<compile_context>
chip_gen: v6e
topology: v6e:2x2x1
jax: 0.10.0
libtpu: 0.0.40
codegen_flags: <defaults>
</compile_context>

<pallas_src>
import numpy as np

import jax
import jax.numpy as jnp
from jax.experimental import pallas as pl
from jax.experimental.pallas import tpu as pltpu


# ---------------------------------------------------------------------------
# Geometry constants (input 84x84 is pinned by fc1 = Linear(7*7*64, 256)).
# The 88x88 zero-padded input is split into 8x8 blocks -> 11x11 block grid.
# Activations are kept flattened with row index (row_block * PW + col_block),
# so a conv at stride s becomes a sum of matmuls over row-offset slabs.
# Slab lengths are padded to sublane multiples; valid rows are a prefix-
# structured subset and padded rows never feed valid downstream rows.
# ---------------------------------------------------------------------------
PW = 11                   # padded plane width (88 // 8)
N_IN = PW * PW            # 121 rows of the space-to-depth'd input
NIN_P = 136               # padded input rows  (>= 12 + L1P, multiple of 8)
L1P = 120                 # conv1 slab rows    (>= 12 + L2P); valid rows 0..108
L2P = 104                 # conv2 slab rows    (>= 24 + L3P); valid oh*11+ow, oh,ow<=8
L3P = 80                  # conv3 slab rows;                  valid oh*11+ow, oh,ow<=6


# ---------------------------------------------------------------------------
# Fused kernel: conv1+conv2+conv3 (+bias+ReLU) per image, then fc1(+ReLU)+fc2
# for the whole batch tile.  All intermediates live in VMEM scratch.
# ---------------------------------------------------------------------------
def _critic_kernel(x_ref, w1_ref, b1_ref, w2_ref, b2_ref, w3_ref, b3_ref,
                   wf1_ref, bf1_ref, wf2_ref, bf2_ref, o_ref,
                   out1_s, out2_s, fc_s):
    bt = x_ref.shape[0]

    # ---- Phase A: conv stack, one image at a time (bounded vreg pressure).
    for i in range(bt):
        # conv1 (8x8 stride 4): 4 matmuls (L1P,256)@(256,128);
        # output lanes = (phase p*2+q)*32 + oc.
        acc1 = jnp.zeros((L1P, 128), jnp.float32)
        for qi in range(2):
            for qj in range(2):
                off = qi * PW + qj
                acc1 = acc1 + jnp.dot(x_ref[i, off:off + L1P, :],
                                      w1_ref[qi, qj],
                                      preferred_element_type=jnp.float32)
        out1_s[...] = jnp.maximum(acc1 + b1_ref[...], 0.0)          # (120,128)

        # conv2 (4x4 stride 2): 4 matmuls (L2P,128)@(128,64)
        acc2 = jnp.zeros((L2P, 64), jnp.float32)
        for qi in range(2):
            for qj in range(2):
                off = qi * PW + qj
                acc2 = acc2 + jnp.dot(out1_s[off:off + L2P, :],
                                      w2_ref[qi, qj],
                                      preferred_element_type=jnp.float32)
        out2_s[...] = jnp.maximum(acc2 + b2_ref[...], 0.0)          # (104, 64)

        # conv3 (3x3 stride 1): 9 matmuls (L3P,64)@(64,64)
        acc3 = jnp.zeros((L3P, 64), jnp.float32)
        for ki in range(3):
            for kj in range(3):
                off = ki * PW + kj
                acc3 = acc3 + jnp.dot(out2_s[off:off + L3P, :],
                                      w3_ref[ki, kj],
                                      preferred_element_type=jnp.float32)
        fc_s[i] = jnp.maximum(acc3 + b3_ref[...], 0.0)              # (80, 64)

    # ---- Phase B: fc1 (+ReLU) and fc2 for all bt images at once.
    # Valid conv3 outputs sit at rows oh*11+ow (oh,ow < 7) of each fc_s slab.
    acc = jnp.zeros((bt, 256), jnp.float32)
    for oh in range(7):
        for ow in range(7):
            r = oh * PW + ow
            acc = acc + jnp.dot(fc_s[:, r, :], wf1_ref[oh * 7 + ow],
                                preferred_element_type=jnp.float32)
    hid = jnp.maximum(acc + bf1_ref[...], 0.0)                      # (bt, 256)
    # fc2 (256 -> 1) as multiply + lane reduction (avoids an N=1 matmul).
    val = jnp.sum(hid * wf2_ref[...], axis=1, keepdims=True) + bf2_ref[...]
    # Lane-dense output store: value broadcast across 128 lanes, column 0 used.
    o_ref[...] = jnp.broadcast_to(val, (bt, 128))


# ---------------------------------------------------------------------------
# XLA-side input prep (fused into the same jit as the kernel call):
# zero-pad 84->88 and space-to-depth by 8.
# Result lane order: (Pi*8 + Pj)*4 + c ; row order: A*11 + B.
# ---------------------------------------------------------------------------
def _space_to_depth8(x):
    B = x.shape[0]
    xp = jnp.pad(x, ((0, 0), (0, 0), (0, 4), (0, 4)))               # (B,4,88,88)
    xr = xp.reshape(B, 4, PW, 8, PW, 8)                             # b,c,A,Pi,B,Pj
    xt = xr.transpose(0, 2, 4, 3, 5, 1)                             # b,A,B,Pi,Pj,c
    return xt.reshape(B, N_IN, 256)


def _batch_tile(B):
    """Images per grid step and padded batch size (keeps blocks 8-aligned)."""
    if B <= 8:
        return B, B                       # single step, block == full batch
    bt = 8
    return bt, ((B + bt - 1) // bt) * bt  # >= 2 steps -> both v7x cores busy


# ---------------------------------------------------------------------------
# Forward
# ---------------------------------------------------------------------------
def critic_forward(prep, x):
    """x: (B, 4, 84, 84) f32 NCHW -> value (B, 1) f32."""
    B = x.shape[0]
    bt, Bp = _batch_tile(B)

    xblk = _space_to_depth8(x)                                      # (B,121,256)
    xblk = jnp.pad(xblk, ((0, Bp - B), (0, NIN_P - N_IN), (0, 0)))  # (Bp,136,256)

    out = pl.pallas_call(
        _critic_kernel,
        out_shape=jax.ShapeDtypeStruct((Bp, 128), jnp.float32),
        grid=(Bp // bt,),
        in_specs=[
            pl.BlockSpec((bt, NIN_P, 256), lambda s: (s, 0, 0)),
            pl.BlockSpec((2, 2, 256, 128), lambda s: (0, 0, 0, 0)),
            pl.BlockSpec((1, 128), lambda s: (0, 0)),
            pl.BlockSpec((2, 2, 128, 64), lambda s: (0, 0, 0, 0)),
            pl.BlockSpec((1, 64), lambda s: (0, 0)),
            pl.BlockSpec((3, 3, 64, 64), lambda s: (0, 0, 0, 0)),
            pl.BlockSpec((1, 64), lambda s: (0, 0)),
            pl.BlockSpec((49, 64, 256), lambda s: (0, 0, 0)),
            pl.BlockSpec((1, 256), lambda s: (0, 0)),
            pl.BlockSpec((1, 256), lambda s: (0, 0)),
            pl.BlockSpec((1, 1), lambda s: (0, 0)),
        ],
        out_specs=pl.BlockSpec((bt, 128), lambda s: (s, 0)),
        scratch_shapes=[pltpu.VMEM((L1P, 128), jnp.float32),
                        pltpu.VMEM((L2P, 64), jnp.float32),
                        pltpu.VMEM((bt, L3P, 64), jnp.float32)],
        compiler_params=pltpu.CompilerParams(
            dimension_semantics=("parallel",)),
    )(xblk, prep["w1p"], prep["b1p"], prep["w2p"], prep["b2p"],
      prep["w3p"], prep["b3p"], prep["wf1p"], prep["bf1p"],
      prep["wf2p"], prep["bf2p"])

    return out[:B, :1]


# ---------------------------------------------------------------------------
# One-time parameter re-layout (PyTorch shapes -> kernel layouts).
# ---------------------------------------------------------------------------
def prepare_params(params):
    w1 = np.asarray(params["w1"], np.float32)   # (32, 4, 8, 8)
    b1 = np.asarray(params["b1"], np.float32)
    w2 = np.asarray(params["w2"], np.float32)   # (64, 32, 4, 4)
    b2 = np.asarray(params["b2"], np.float32)
    w3 = np.asarray(params["w3"], np.float32)   # (64, 64, 3, 3)
    b3 = np.asarray(params["b3"], np.float32)
    wf1 = np.asarray(params["wf1"], np.float32)  # (256, 3136)
    bf1 = np.asarray(params["bf1"], np.float32)
    wf2 = np.asarray(params["wf2"], np.float32)  # (1, 256)
    bf2 = np.asarray(params["bf2"], np.float32)

    # conv1: W1P[Qi, Qj, (Pi*8+Pj)*4 + c, (p*2+q)*32 + oc] = w1[oc, c, ki, kj]
    # with ki = 8*Qi + Pi - 4*p, kj = 8*Qj + Pj - 4*q (zero if out of range).
    w1p = np.zeros((2, 2, 256, 128), np.float32)
    for Qi in range(2):
        for Qj in range(2):
            for p in range(2):
                for q in range(2):
                    for Pi in range(8):
                        ki = 8 * Qi + Pi - 4 * p
                        if not 0 <= ki < 8:
                            continue
                        for Pj in range(8):
                            kj = 8 * Qj + Pj - 4 * q
                            if not 0 <= kj < 8:
                                continue
                            row = (Pi * 8 + Pj) * 4
                            col = (p * 2 + q) * 32
                            w1p[Qi, Qj, row:row + 4, col:col + 32] = \
                                w1[:, :, ki, kj].T
    b1p = np.tile(b1, 4).reshape(1, 128)

    # conv2: W2P[qi, qj, (pi*2+pj)*32 + c, oc] = w2[oc, c, 2qi+pi, 2qj+pj]
    w2p = np.zeros((2, 2, 128, 64), np.float32)
    for qi in range(2):
        for qj in range(2):
            for pi in range(2):
                for pj in range(2):
                    row = (pi * 2 + pj) * 32
                    w2p[qi, qj, row:row + 32, :] = \
                        w2[:, :, 2 * qi + pi, 2 * qj + pj].T
    b2p = b2.reshape(1, 64)

    # conv3: W3P[ki, kj, c, oc] = w3[oc, c, ki, kj]
    w3p = np.transpose(w3, (2, 3, 1, 0)).copy()
    b3p = b3.reshape(1, 64)

    # fc1: W1FP[oh*7+ow, c, n] = wf1[n, c*49 + oh*7 + ow]  (PyTorch CHW flatten)
    wf1p = wf1.reshape(256, 64, 7, 7).transpose(2, 3, 1, 0).reshape(49, 64, 256)
    bf1p = bf1.reshape(1, 256)
    wf2p = wf2.reshape(1, 256)
    bf2p = bf2.reshape(1, 1)

    out = dict(w1p=w1p, b1p=b1p, w2p=w2p, b2p=b2p, w3p=w3p, b3p=b3p,
               wf1p=wf1p, bf1p=bf1p, wf2p=wf2p, bf2p=bf2p)
    return {k: jnp.asarray(np.ascontiguousarray(v), jnp.float32)
            for k, v in out.items()}


def init_params(key):
    """Deterministic synthetic parameters with PyTorch weight shapes."""
    ks = jax.random.split(key, 10)
    s = 0.05
    return {
        "w1": s * jax.random.normal(ks[0], (32, 4, 8, 8), jnp.float32),
        "b1": s * jax.random.normal(ks[1], (32,), jnp.float32),
        "w2": s * jax.random.normal(ks[2], (64, 32, 4, 4), jnp.float32),
        "b2": s * jax.random.normal(ks[3], (64,), jnp.float32),
        "w3": s * jax.random.normal(ks[4], (64, 64, 3, 3), jnp.float32),
        "b3": s * jax.random.normal(ks[5], (64,), jnp.float32),
        "wf1": s * jax.random.normal(ks[6], (256, 7 * 7 * 64), jnp.float32),
        "bf1": s * jax.random.normal(ks[7], (256,), jnp.float32),
        "wf2": s * jax.random.normal(ks[8], (1, 256), jnp.float32),
        "bf2": s * jax.random.normal(ks[9], (1,), jnp.float32),
    }


# ---------------------------------------------------------------------------
# Pure-JAX reference (run at HIGHEST precision so the check can be tight).
# ---------------------------------------------------------------------------
def critic_forward_ref(params, x):
    dn = ("NCHW", "OIHW", "NCHW")
    hp = jax.lax.Precision.HIGHEST

    def conv(x, w, b, s):
        y = jax.lax.conv_general_dilated(x, w, (s, s), "VALID",
                                         dimension_numbers=dn, precision=hp)
        return jnp.maximum(y + b[None, :, None, None], 0.0)

    out = conv(x, params["w1"], params["b1"], 4)
    out = conv(out, params["w2"], params["b2"], 2)
    out = conv(out, params["w3"], params["b3"], 1)
    flat = out.reshape(out.shape[0], -1)
    hid = jnp.maximum(jnp.dot(flat, params["wf1"].T, precision=hp)
                      + params["bf1"], 0.0)
    return jnp.dot(hid, params["wf2"].T, precision=hp) + params["bf2"]


if __name__ == "__main__":
    key = jax.random.PRNGKey(0)
    pkey, xkey = jax.random.split(key)
    params = init_params(pkey)
    prep = prepare_params(params)

    # fc1 (7*7*64 inputs) pins the spatial size to 84x84; batch=2.
    x = jax.random.normal(xkey, (2, 4, 84, 84), jnp.float32)

    fwd = jax.jit(critic_forward)
    value = jax.block_until_ready(fwd(prep, x))
    assert value.shape == (2, 1) and value.dtype == jnp.float32

    ref = jax.block_until_ready(critic_forward_ref(params, x))
    # 10x tighter than before (all-f32 path); bounded by MXU f32-pass rounding.
    assert jnp.allclose(value, ref, rtol=2e-3, atol=2e-3), (value, ref)

    print("KERNEL_OK")
</pallas_src>

<mosaic_0001>
module attributes {stable_mosaic.version = 11 : i64} {
  func.func @_critic_kernel(%arg0: i32, %arg1: memref<2x136x256xf32, #tpu.memory_space<vmem>>, %arg2: memref<2x2x256x128xf32, #tpu.memory_space<vmem>>, %arg3: memref<1x128xf32, #tpu.memory_space<vmem>>, %arg4: memref<2x2x128x64xf32, #tpu.memory_space<vmem>>, %arg5: memref<1x64xf32, #tpu.memory_space<vmem>>, %arg6: memref<3x3x64x64xf32, #tpu.memory_space<vmem>>, %arg7: memref<1x64xf32, #tpu.memory_space<vmem>>, %arg8: memref<49x64x256xf32, #tpu.memory_space<vmem>>, %arg9: memref<1x256xf32, #tpu.memory_space<vmem>>, %arg10: memref<1x256xf32, #tpu.memory_space<vmem>>, %arg11: memref<1x1xf32, #tpu.memory_space<vmem>>, %arg12: memref<2x128xf32, #tpu.memory_space<vmem>>, %arg13: memref<120x128xf32, #tpu.memory_space<vmem>>, %arg14: memref<104x64xf32, #tpu.memory_space<vmem>>, %arg15: memref<2x80x64xf32, #tpu.memory_space<vmem>>) attributes {dimension_semantics = [#tpu.dimension_semantics<parallel>], iteration_bounds = array<i64: 1>, scalar_prefetch = 0 : i64, scratch_operands = 3 : i64, tpu.core_type = #tpu.core_type<tc>, window_params = [{transform_indices = @transform_0, window_bounds = array<i64: 2, 136, 256>}, {pipeline_mode = #tpu.pipeline_mode<synchronous>, transform_indices = @transform_1, window_bounds = array<i64: 2, 2, 256, 128>}, {pipeline_mode = #tpu.pipeline_mode<synchronous>, transform_indices = @transform_2, window_bounds = array<i64: 1, 128>}, {pipeline_mode = #tpu.pipeline_mode<synchronous>, transform_indices = @transform_3, window_bounds = array<i64: 2, 2, 128, 64>}, {pipeline_mode = #tpu.pipeline_mode<synchronous>, transform_indices = @transform_4, window_bounds = array<i64: 1, 64>}, {pipeline_mode = #tpu.pipeline_mode<synchronous>, transform_indices = @transform_5, window_bounds = array<i64: 3, 3, 64, 64>}, {pipeline_mode = #tpu.pipeline_mode<synchronous>, transform_indices = @transform_6, window_bounds = array<i64: 1, 64>}, {pipeline_mode = #tpu.pipeline_mode<synchronous>, transform_indices = @transform_7, window_bounds = array<i64: 49, 64, 256>}, {pipeline_mode = #tpu.pipeline_mode<synchronous>, transform_indices = @transform_8, window_bounds = array<i64: 1, 256>}, {pipeline_mode = #tpu.pipeline_mode<synchronous>, transform_indices = @transform_9, window_bounds = array<i64: 1, 256>}, {pipeline_mode = #tpu.pipeline_mode<synchronous>, transform_indices = @transform_10, window_bounds = array<i64: 1, 1>}, {transform_indices = @transform_11, window_bounds = array<i64: 2, 128>}]} {
    %cst = arith.constant 0.000000e+00 : f32
    %0 = vector.broadcast %cst : f32 to vector<120x128xf32>
    %c0 = arith.constant 0 : index
    %c0_0 = arith.constant 0 : index
    %c0_1 = arith.constant 0 : index
    %1 = vector.load %arg1[%c0, %c0_0, %c0_1] : memref<2x136x256xf32, #tpu.memory_space<vmem>>, vector<1x120x256xf32>
    %2 = vector.shape_cast %1 : vector<1x120x256xf32> to vector<120x256xf32>
    %c0_2 = arith.constant 0 : index
    %c0_3 = arith.constant 0 : index
    %c0_4 = arith.constant 0 : index
    %c0_5 = arith.constant 0 : index
    %3 = vector.load %arg2[%c0_2, %c0_3, %c0_4, %c0_5] : memref<2x2x256x128xf32, #tpu.memory_space<vmem>>, vector<1x1x256x128xf32>
    %4 = vector.shape_cast %3 : vector<1x1x256x128xf32> to vector<256x128xf32>
    %cst_6 = arith.constant dense<0.000000e+00> : vector<120x128xf32>
    %5 = tpu.matmul %2, %4, %cst_6 {dimension_numbers = #tpu.dot_dimension_numbers<[1], [0], [0], [1], [0, 0, 1, 1], [], []>} : vector<120x256xf32>, vector<256x128xf32>, vector<120x128xf32> -> vector<120x128xf32>
    %6 = arith.addf %0, %5 : vector<120x128xf32>
    %c0_7 = arith.constant 0 : index
    %c1 = arith.constant 1 : index
    %c0_8 = arith.constant 0 : index
    %7 = vector.load %arg1[%c0_7, %c1, %c0_8] : memref<2x136x256xf32, #tpu.memory_space<vmem>>, vector<1x120x256xf32>
    %8 = vector.shape_cast %7 : vector<1x120x256xf32> to vector<120x256xf32>
    %c0_9 = arith.constant 0 : index
    %c1_10 = arith.constant 1 : index
    %c0_11 = arith.constant 0 : index
    %c0_12 = arith.constant 0 : index
    %9 = vector.load %arg2[%c0_9, %c1_10, %c0_11, %c0_12] : memref<2x2x256x128xf32, #tpu.memory_space<vmem>>, vector<1x1x256x128xf32>
    %10 = vector.shape_cast %9 : vector<1x1x256x128xf32> to vector<256x128xf32>
    %cst_13 = arith.constant dense<0.000000e+00> : vector<120x128xf32>
    %11 = tpu.matmul %8, %10, %cst_13 {dimension_numbers = #tpu.dot_dimension_numbers<[1], [0], [0], [1], [0, 0, 1, 1], [], []>} : vector<120x256xf32>, vector<256x128xf32>, vector<120x128xf32> -> vector<120x128xf32>
    %12 = arith.addf %6, %11 : vector<120x128xf32>
    %c0_14 = arith.constant 0 : index
    %c11 = arith.constant 11 : index
    %c0_15 = arith.constant 0 : index
    %13 = vector.load %arg1[%c0_14, %c11, %c0_15] : memref<2x136x256xf32, #tpu.memory_space<vmem>>, vector<1x120x256xf32>
    %14 = vector.shape_cast %13 : vector<1x120x256xf32> to vector<120x256xf32>
    %c1_16 = arith.constant 1 : index
    %c0_17 = arith.constant 0 : index
    %c0_18 = arith.constant 0 : index
    %c0_19 = arith.constant 0 : index
    %15 = vector.load %arg2[%c1_16, %c0_17, %c0_18, %c0_19] : memref<2x2x256x128xf32, #tpu.memory_space<vmem>>, vector<1x1x256x128xf32>
    %16 = vector.shape_cast %15 : vector<1x1x256x128xf32> to vector<256x128xf32>
    %cst_20 = arith.constant dense<0.000000e+00> : vector<120x128xf32>
    %17 = tpu.matmul %14, %16, %cst_20 {dimension_numbers = #tpu.dot_dimension_numbers<[1], [0], [0], [1], [0, 0, 1, 1], [], []>} : vector<120x256xf32>, vector<256x128xf32>, vector<120x128xf32> -> vector<120x128xf32>
    %18 = arith.addf %12, %17 : vector<120x128xf32>
    %c0_21 = arith.constant 0 : index
    %c12 = arith.constant 12 : index
    %c0_22 = arith.constant 0 : index
    %19 = vector.load %arg1[%c0_21, %c12, %c0_22] : memref<2x136x256xf32, #tpu.memory_space<vmem>>, vector<1x120x256xf32>
    %20 = vector.shape_cast %19 : vector<1x120x256xf32> to vector<120x256xf32>
    %c1_23 = arith.constant 1 : index
    %c1_24 = arith.constant 1 : index
    %c0_25 = arith.constant 0 : index
    %c0_26 = arith.constant 0 : index
    %21 = vector.load %arg2[%c1_23, %c1_24, %c0_25, %c0_26] : memref<2x2x256x128xf32, #tpu.memory_space<vmem>>, vector<1x1x256x128xf32>
    %22 = vector.shape_cast %21 : vector<1x1x256x128xf32> to vector<256x128xf32>
    %cst_27 = arith.constant dense<0.000000e+00> : vector<120x128xf32>
    %23 = tpu.matmul %20, %22, %cst_27 {dimension_numbers = #tpu.dot_dimension_numbers<[1], [0], [0], [1], [0, 0, 1, 1], [], []>} : vector<120x256xf32>, vector<256x128xf32>, vector<120x128xf32> -> vector<120x128xf32>
    %24 = arith.addf %18, %23 : vector<120x128xf32>
    %c0_28 = arith.constant 0 : index
    %c0_29 = arith.constant 0 : index
    %25 = vector.load %arg3[%c0_28, %c0_29] : memref<1x128xf32, #tpu.memory_space<vmem>>, vector<1x128xf32>
    %26 = vector.broadcast %25 : vector<1x128xf32> to vector<120x128xf32>
    %27 = arith.addf %24, %26 : vector<120x128xf32>
    %cst_30 = arith.constant 0.000000e+00 : f32
    %28 = vector.broadcast %cst_30 : f32 to vector<120x128xf32>
    %29 = arith.maximumf %27, %28 : vector<120x128xf32>
    %c0_31 = arith.constant 0 : index
    %c0_32 = arith.constant 0 : index
    %30 = vector.load %arg13[%c0_31, %c0_32] : memref<120x128xf32, #tpu.memory_space<vmem>>, vector<120x128xf32>
    tpu.vector_store %arg13[%c0_31, %c0_32], %29 {strides = array<i32>} : memref<120x128xf32, #tpu.memory_space<vmem>>, vector<120x128xf32>,
    %cst_33 = arith.constant 0.000000e+00 : f32
    %31 = vector.broadcast %cst_33 : f32 to vector<104x64xf32>
    %c0_34 = arith.constant 0 : index
    %c0_35 = arith.constant 0 : index
    %32 = vector.load %arg13[%c0_34, %c0_35] : memref<120x128xf32, #tpu.memory_space<vmem>>, vector<104x128xf32>
    %c0_36 = arith.constant 0 : index
    %c0_37 = arith.constant 0 : index
    %c0_38 = arith.constant 0 : index
    %c0_39 = arith.constant 0 : index
    %33 = vector.load %arg4[%c0_36, %c0_37, %c0_38, %c0_39] : memref<2x2x128x64xf32, #tpu.memory_space<vmem>>, vector<1x1x128x64xf32>
    %34 = vector.shape_cast %33 : vector<1x1x128x64xf32> to vector<128x64xf32>
    %cst_40 = arith.constant dense<0.000000e+00> : vector<104x64xf32>
    %35 = tpu.matmul %32, %34, %cst_40 {dimension_numbers = #tpu.dot_dimension_numbers<[1], [0], [0], [1], [0, 0, 1, 1], [], []>} : vector<104x128xf32>, vector<128x64xf32>, vector<104x64xf32> -> vector<104x64xf32>
    %36 = arith.addf %31, %35 : vector<104x64xf32>
    %c1_41 = arith.constant 1 : index
    %c0_42 = arith.constant 0 : index
    %37 = vector.load %arg13[%c1_41, %c0_42] : memref<120x128xf32, #tpu.memory_space<vmem>>, vector<104x128xf32>
    %c0_43 = arith.constant 0 : index
    %c1_44 = arith.constant 1 : index
    %c0_45 = arith.constant 0 : index
    %c0_46 = arith.constant 0 : index
    %38 = vector.load %arg4[%c0_43, %c1_44, %c0_45, %c0_46] : memref<2x2x128x64xf32, #tpu.memory_space<vmem>>, vector<1x1x128x64xf32>
    %39 = vector.shape_cast %38 : vector<1x1x128x64xf32> to vector<128x64xf32>
    %cst_47 = arith.constant dense<0.000000e+00> : vector<104x64xf32>
    %40 = tpu.matmul %37, %39, %cst_47 {dimension_numbers = #tpu.dot_dimension_numbers<[1], [0], [0], [1], [0, 0, 1, 1], [], []>} : vector<104x128xf32>, vector<128x64xf32>, vector<104x64xf32> -> vector<104x64xf32>
    %41 = arith.addf %36, %40 : vector<104x64xf32>
    %c11_48 = arith.constant 11 : index
    %c0_49 = arith.constant 0 : index
    %42 = vector.load %arg13[%c11_48, %c0_49] : memref<120x128xf32, #tpu.memory_space<vmem>>, vector<104x128xf32>
    %c1_50 = arith.constant 1 : index
    %c0_51 = arith.constant 0 : index
    %c0_52 = arith.constant 0 : index
    %c0_53 = arith.constant 0 : index
    %43 = vector.load %arg4[%c1_50, %c0_51, %c0_52, %c0_53] : memref<2x2x128x64xf32, #tpu.memory_space<vmem>>, vector<1x1x128x64xf32>
    %44 = vector.shape_cast %43 : vector<1x1x128x64xf32> to vector<128x64xf32>
    %cst_54 = arith.constant dense<0.000000e+00> : vector<104x64xf32>
    %45 = tpu.matmul %42, %44, %cst_54 {dimension_numbers = #tpu.dot_dimension_numbers<[1], [0], [0], [1], [0, 0, 1, 1], [], []>} : vector<104x128xf32>, vector<128x64xf32>, vector<104x64xf32> -> vector<104x64xf32>
    %46 = arith.addf %41, %45 : vector<104x64xf32>
    %c12_55 = arith.constant 12 : index
    %c0_56 = arith.constant 0 : index
    %47 = vector.load %arg13[%c12_55, %c0_56] : memref<120x128xf32, #tpu.memory_space<vmem>>, vector<104x128xf32>
    %c1_57 = arith.constant 1 : index
    %c1_58 = arith.constant 1 : index
    %c0_59 = arith.constant 0 : index
    %c0_60 = arith.constant 0 : index
    %48 = vector.load %arg4[%c1_57, %c1_58, %c0_59, %c0_60] : memref<2x2x128x64xf32, #tpu.memory_space<vmem>>, vector<1x1x128x64xf32>
    %49 = vector.shape_cast %48 : vector<1x1x128x64xf32> to vector<128x64xf32>
    %cst_61 = arith.constant dense<0.000000e+00> : vector<104x64xf32>
    %50 = tpu.matmul %47, %49, %cst_61 {dimension_numbers = #tpu.dot_dimension_numbers<[1], [0], [0], [1], [0, 0, 1, 1], [], []>} : vector<104x128xf32>, vector<128x64xf32>, vector<104x64xf32> -> vector<104x64xf32>
    %51 = arith.addf %46, %50 : vector<104x64xf32>
    %c0_62 = arith.constant 0 : index
    %c0_63 = arith.constant 0 : index
    %52 = vector.load %arg5[%c0_62, %c0_63] : memref<1x64xf32, #tpu.memory_space<vmem>>, vector<1x64xf32>
    %53 = vector.broadcast %52 : vector<1x64xf32> to vector<104x64xf32>
    %54 = arith.addf %51, %53 : vector<104x64xf32>
    %cst_64 = arith.constant 0.000000e+00 : f32
    %55 = vector.broadcast %cst_64 : f32 to vector<104x64xf32>
    %56 = arith.maximumf %54, %55 : vector<104x64xf32>
    %c0_65 = arith.constant 0 : index
    %c0_66 = arith.constant 0 : index
    %57 = vector.load %arg14[%c0_65, %c0_66] : memref<104x64xf32, #tpu.memory_space<vmem>>, vector<104x64xf32>
    tpu.vector_store %arg14[%c0_65, %c0_66], %56 {strides = array<i32>} : memref<104x64xf32, #tpu.memory_space<vmem>>, vector<104x64xf32>,
    %cst_67 = arith.constant 0.000000e+00 : f32
    %58 = vector.broadcast %cst_67 : f32 to vector<80x64xf32>
    %c0_68 = arith.constant 0 : index
    %c0_69 = arith.constant 0 : index
    %59 = vector.load %arg14[%c0_68, %c0_69] : memref<104x64xf32, #tpu.memory_space<vmem>>, vector<80x64xf32>
    %c0_70 = arith.constant 0 : index
    %c0_71 = arith.constant 0 : index
    %c0_72 = arith.constant 0 : index
    %c0_73 = arith.constant 0 : index
    %60 = vector.load %arg6[%c0_70, %c0_71, %c0_72, %c0_73] : memref<3x3x64x64xf32, #tpu.memory_space<vmem>>, vector<1x1x64x64xf32>
    %61 = vector.shape_cast %60 : vector<1x1x64x64xf32> to vector<64x64xf32>
    %cst_74 = arith.constant dense<0.000000e+00> : vector<80x64xf32>
    %62 = tpu.matmul %59, %61, %cst_74 {dimension_numbers = #tpu.dot_dimension_numbers<[1], [0], [0], [1], [0, 0, 1, 1], [], []>} : vector<80x64xf32>, vector<64x64xf32>, vector<80x64xf32> -> vector<80x64xf32>
    %63 = arith.addf %58, %62 : vector<80x64xf32>
    %c1_75 = arith.constant 1 : index
    %c0_76 = arith.constant 0 : index
    %64 = vector.load %arg14[%c1_75, %c0_76] : memref<104x64xf32, #tpu.memory_space<vmem>>, vector<80x64xf32>
    %c0_77 = arith.constant 0 : index
    %c1_78 = arith.constant 1 : index
    %c0_79 = arith.constant 0 : index
    %c0_80 = arith.constant 0 : index
    %65 = vector.load %arg6[%c0_77, %c1_78, %c0_79, %c0_80] : memref<3x3x64x64xf32, #tpu.memory_space<vmem>>, vector<1x1x64x64xf32>
    %66 = vector.shape_cast %65 : vector<1x1x64x64xf32> to vector<64x64xf32>
    %cst_81 = arith.constant dense<0.000000e+00> : vector<80x64xf32>
    %67 = tpu.matmul %64, %66, %cst_81 {dimension_numbers = #tpu.dot_dimension_numbers<[1], [0], [0], [1], [0, 0, 1, 1], [], []>} : vector<80x64xf32>, vector<64x64xf32>, vector<80x64xf32> -> vector<80x64xf32>
    %68 = arith.addf %63, %67 : vector<80x64xf32>
    %c2 = arith.constant 2 : index
    %c0_82 = arith.constant 0 : index
    %69 = vector.load %arg14[%c2, %c0_82] : memref<104x64xf32, #tpu.memory_space<vmem>>, vector<80x64xf32>
    %c0_83 = arith.constant 0 : index
    %c2_84 = arith.constant 2 : index
    %c0_85 = arith.constant 0 : index
    %c0_86 = arith.constant 0 : index
    %70 = vector.load %arg6[%c0_83, %c2_84, %c0_85, %c0_86] : memref<3x3x64x64xf32, #tpu.memory_space<vmem>>, vector<1x1x64x64xf32>
    %71 = vector.shape_cast %70 : vector<1x1x64x64xf32> to vector<64x64xf32>
    %cst_87 = arith.constant dense<0.000000e+00> : vector<80x64xf32>
    %72 = tpu.matmul %69, %71, %cst_87 {dimension_numbers = #tpu.dot_dimension_numbers<[1], [0], [0], [1], [0, 0, 1, 1], [], []>} : vector<80x64xf32>, vector<64x64xf32>, vector<80x64xf32> -> vector<80x64xf32>
    %73 = arith.addf %68, %72 : vector<80x64xf32>
    %c11_88 = arith.constant 11 : index
    %c0_89 = arith.constant 0 : index
    %74 = vector.load %arg14[%c11_88, %c0_89] : memref<104x64xf32, #tpu.memory_space<vmem>>, vector<80x64xf32>
    %c1_90 = arith.constant 1 : index
    %c0_91 = arith.constant 0 : index
    %c0_92 = arith.constant 0 : index
    %c0_93 = arith.constant 0 : index
    %75 = vector.load %arg6[%c1_90, %c0_91, %c0_92, %c0_93] : memref<3x3x64x64xf32, #tpu.memory_space<vmem>>, vector<1x1x64x64xf32>
    %76 = vector.shape_cast %75 : vector<1x1x64x64xf32> to vector<64x64xf32>
    %cst_94 = arith.constant dense<0.000000e+00> : vector<80x64xf32>
    %77 = tpu.matmul %74, %76, %cst_94 {dimension_numbers = #tpu.dot_dimension_numbers<[1], [0], [0], [1], [0, 0, 1, 1], [], []>} : vector<80x64xf32>, vector<64x64xf32>, vector<80x64xf32> -> vector<80x64xf32>
    %78 = arith.addf %73, %77 : vector<80x64xf32>
    %c12_95 = arith.constant 12 : index
    %c0_96 = arith.constant 0 : index
    %79 = vector.load %arg14[%c12_95, %c0_96] : memref<104x64xf32, #tpu.memory_space<vmem>>, vector<80x64xf32>
    %c1_97 = arith.constant 1 : index
    %c1_98 = arith.constant 1 : index
    %c0_99 = arith.constant 0 : index
    %c0_100 = arith.constant 0 : index
    %80 = vector.load %arg6[%c1_97, %c1_98, %c0_99, %c0_100] : memref<3x3x64x64xf32, #tpu.memory_space<vmem>>, vector<1x1x64x64xf32>
    %81 = vector.shape_cast %80 : vector<1x1x64x64xf32> to vector<64x64xf32>
    %cst_101 = arith.constant dense<0.000000e+00> : vector<80x64xf32>
    %82 = tpu.matmul %79, %81, %cst_101 {dimension_numbers = #tpu.dot_dimension_numbers<[1], [0], [0], [1], [0, 0, 1, 1], [], []>} : vector<80x64xf32>, vector<64x64xf32>, vector<80x64xf32> -> vector<80x64xf32>
    %83 = arith.addf %78, %82 : vector<80x64xf32>
    %c13 = arith.constant 13 : index
    %c0_102 = arith.constant 0 : index
    %84 = vector.load %arg14[%c13, %c0_102] : memref<104x64xf32, #tpu.memory_space<vmem>>, vector<80x64xf32>
    %c1_103 = arith.constant 1 : index
    %c2_104 = arith.constant 2 : index
    %c0_105 = arith.constant 0 : index
    %c0_106 = arith.constant 0 : index
    %85 = vector.load %arg6[%c1_103, %c2_104, %c0_105, %c0_106] : memref<3x3x64x64xf32, #tpu.memory_space<vmem>>, vector<1x1x64x64xf32>
    %86 = vector.shape_cast %85 : vector<1x1x64x64xf32> to vector<64x64xf32>
    %cst_107 = arith.constant dense<0.000000e+00> : vector<80x64xf32>
    %87 = tpu.matmul %84, %86, %cst_107 {dimension_numbers = #tpu.dot_dimension_numbers<[1], [0], [0], [1], [0, 0, 1, 1], [], []>} : vector<80x64xf32>, vector<64x64xf32>, vector<80x64xf32> -> vector<80x64xf32>
    %88 = arith.addf %83, %87 : vector<80x64xf32>
    %c22 = arith.constant 22 : index
    %c0_108 = arith.constant 0 : index
    %89 = vector.load %arg14[%c22, %c0_108] : memref<104x64xf32, #tpu.memory_space<vmem>>, vector<80x64xf32>
    %c2_109 = arith.constant 2 : index
    %c0_110 = arith.constant 0 : index
    %c0_111 = arith.constant 0 : index
    %c0_112 = arith.constant 0 : index
    %90 = vector.load %arg6[%c2_109, %c0_110, %c0_111, %c0_112] : memref<3x3x64x64xf32, #tpu.memory_space<vmem>>, vector<1x1x64x64xf32>
    %91 = vector.shape_cast %90 : vector<1x1x64x64xf32> to vector<64x64xf32>
    %cst_113 = arith.constant dense<0.000000e+00> : vector<80x64xf32>
    %92 = tpu.matmul %89, %91, %cst_113 {dimension_numbers = #tpu.dot_dimension_numbers<[1], [0], [0], [1], [0, 0, 1, 1], [], []>} : vector<80x64xf32>, vector<64x64xf32>, vector<80x64xf32> -> vector<80x64xf32>
    %93 = arith.addf %88, %92 : vector<80x64xf32>
    %c23 = arith.constant 23 : index
    %c0_114 = arith.constant 0 : index
    %94 = vector.load %arg14[%c23, %c0_114] : memref<104x64xf32, #tpu.memory_space<vmem>>, vector<80x64xf32>
    %c2_115 = arith.constant 2 : index
    %c1_116 = arith.constant 1 : index
    %c0_117 = arith.constant 0 : index
    %c0_118 = arith.constant 0 : index
    %95 = vector.load %arg6[%c2_115, %c1_116, %c0_117, %c0_118] : memref<3x3x64x64xf32, #tpu.memory_space<vmem>>, vector<1x1x64x64xf32>
    %96 = vector.shape_cast %95 : vector<1x1x64x64xf32> to vector<64x64xf32>
    %cst_119 = arith.constant dense<0.000000e+00> : vector<80x64xf32>
    %97 = tpu.matmul %94, %96, %cst_119 {dimension_numbers = #tpu.dot_dimension_numbers<[1], [0], [0], [1], [0, 0, 1, 1], [], []>} : vector<80x64xf32>, vector<64x64xf32>, vector<80x64xf32> -> vector<80x64xf32>
    %98 = arith.addf %93, %97 : vector<80x64xf32>
    %c24 = arith.constant 24 : index
    %c0_120 = arith.constant 0 : index
    %99 = vector.load %arg14[%c24, %c0_120] : memref<104x64xf32, #tpu.memory_space<vmem>>, vector<80x64xf32>
    %c2_121 = arith.constant 2 : index
    %c2_122 = arith.constant 2 : index
    %c0_123 = arith.constant 0 : index
    %c0_124 = arith.constant 0 : index
    %100 = vector.load %arg6[%c2_121, %c2_122, %c0_123, %c0_124] : memref<3x3x64x64xf32, #tpu.memory_space<vmem>>, vector<1x1x64x64xf32>
    %101 = vector.shape_cast %100 : vector<1x1x64x64xf32> to vector<64x64xf32>
    %cst_125 = arith.constant dense<0.000000e+00> : vector<80x64xf32>
    %102 = tpu.matmul %99, %101, %cst_125 {dimension_numbers = #tpu.dot_dimension_numbers<[1], [0], [0], [1], [0, 0, 1, 1], [], []>} : vector<80x64xf32>, vector<64x64xf32>, vector<80x64xf32> -> vector<80x64xf32>
    %103 = arith.addf %98, %102 : vector<80x64xf32>
    %c0_126 = arith.constant 0 : index
    %c0_127 = arith.constant 0 : index
    %104 = vector.load %arg7[%c0_126, %c0_127] : memref<1x64xf32, #tpu.memory_space<vmem>>, vector<1x64xf32>
    %105 = vector.broadcast %104 : vector<1x64xf32> to vector<80x64xf32>
    %106 = arith.addf %103, %105 : vector<80x64xf32>
    %cst_128 = arith.constant 0.000000e+00 : f32
    %107 = vector.broadcast %cst_128 : f32 to vector<80x64xf32>
    %108 = arith.maximumf %106, %107 : vector<80x64xf32>
    %c0_129 = arith.constant 0 : index
    %c0_130 = arith.constant 0 : index
    %c0_131 = arith.constant 0 : index
    %109 = vector.load %arg15[%c0_129, %c0_130, %c0_131] : memref<2x80x64xf32, #tpu.memory_space<vmem>>, vector<1x80x64xf32>
    %110 = vector.shape_cast %109 : vector<1x80x64xf32> to vector<80x64xf32>
    %111 = vector.shape_cast %108 : vector<80x64xf32> to vector<1x80x64xf32>
    tpu.vector_store %arg15[%c0_129, %c0_130, %c0_131], %111 {strides = array<i32>} : memref<2x80x64xf32, #tpu.memory_space<vmem>>, vector<1x80x64xf32>,
    %cst_132 = arith.constant 0.000000e+00 : f32
    %112 = vector.broadcast %cst_132 : f32 to vector<120x128xf32>
    %c1_133 = arith.constant 1 : index
    %c0_134 = arith.constant 0 : index
    %c0_135 = arith.constant 0 : index
    %113 = vector.load %arg1[%c1_133, %c0_134, %c0_135] : memref<2x136x256xf32, #tpu.memory_space<vmem>>, vector<1x120x256xf32>
    %114 = vector.shape_cast %113 : vector<1x120x256xf32> to vector<120x256xf32>
    %c0_136 = arith.constant 0 : index
    %c0_137 = arith.constant 0 : index
    %c0_138 = arith.constant 0 : index
    %c0_139 = arith.constant 0 : index
    %115 = vector.load %arg2[%c0_136, %c0_137, %c0_138, %c0_139] : memref<2x2x256x128xf32, #tpu.memory_space<vmem>>, vector<1x1x256x128xf32>
    %116 = vector.shape_cast %115 : vector<1x1x256x128xf32> to vector<256x128xf32>
    %cst_140 = arith.constant dense<0.000000e+00> : vector<120x128xf32>
    %117 = tpu.matmul %114, %116, %cst_140 {dimension_numbers = #tpu.dot_dimension_numbers<[1], [0], [0], [1], [0, 0, 1, 1], [], []>} : vector<120x256xf32>, vector<256x128xf32>, vector<120x128xf32> -> vector<120x128xf32>
    %118 = arith.addf %112, %117 : vector<120x128xf32>
    %c1_141 = arith.constant 1 : index
    %c1_142 = arith.constant 1 : index
    %c0_143 = arith.constant 0 : index
    %119 = vector.load %arg1[%c1_141, %c1_142, %c0_143] : memref<2x136x256xf32, #tpu.memory_space<vmem>>, vector<1x120x256xf32>
    %120 = vector.shape_cast %119 : vector<1x120x256xf32> to vector<120x256xf32>
    %c0_144 = arith.constant 0 : index
    %c1_145 = arith.constant 1 : index
    %c0_146 = arith.constant 0 : index
    %c0_147 = arith.constant 0 : index
    %121 = vector.load %arg2[%c0_144, %c1_145, %c0_146, %c0_147] : memref<2x2x256x128xf32, #tpu.memory_space<vmem>>, vector<1x1x256x128xf32>
    %122 = vector.shape_cast %121 : vector<1x1x256x128xf32> to vector<256x128xf32>
    %cst_148 = arith.constant dense<0.000000e+00> : vector<120x128xf32>
    %123 = tpu.matmul %120, %122, %cst_148 {dimension_numbers = #tpu.dot_dimension_numbers<[1], [0], [0], [1], [0, 0, 1, 1], [], []>} : vector<120x256xf32>, vector<256x128xf32>, vector<120x128xf32> -> vector<120x128xf32>
    %124 = arith.addf %118, %123 : vector<120x128xf32>
    %c1_149 = arith.constant 1 : index
    %c11_150 = arith.constant 11 : index
    %c0_151 = arith.constant 0 : index
    %125 = vector.load %arg1[%c1_149, %c11_150, %c0_151] : memref<2x136x256xf32, #tpu.memory_space<vmem>>, vector<1x120x256xf32>
    %126 = vector.shape_cast %125 : vector<1x120x256xf32> to vector<120x256xf32>
    %c1_152 = arith.constant 1 : index
    %c0_153 = arith.constant 0 : index
    %c0_154 = arith.constant 0 : index
    %c0_155 = arith.constant 0 : index
    %127 = vector.load %arg2[%c1_152, %c0_153, %c0_154, %c0_155] : memref<2x2x256x128xf32, #tpu.memory_space<vmem>>, vector<1x1x256x128xf32>
    %128 = vector.shape_cast %127 : vector<1x1x256x128xf32> to vector<256x128xf32>
    %cst_156 = arith.constant dense<0.000000e+00> : vector<120x128xf32>
    %129 = tpu.matmul %126, %128, %cst_156 {dimension_numbers = #tpu.dot_dimension_numbers<[1], [0], [0], [1], [0, 0, 1, 1], [], []>} : vector<120x256xf32>, vector<256x128xf32>, vector<120x128xf32> -> vector<120x128xf32>
    %130 = arith.addf %124, %129 : vector<120x128xf32>
    %c1_157 = arith.constant 1 : index
    %c12_158 = arith.constant 12 : index
    %c0_159 = arith.constant 0 : index
    %131 = vector.load %arg1[%c1_157, %c12_158, %c0_159] : memref<2x136x256xf32, #tpu.memory_space<vmem>>, vector<1x120x256xf32>
    %132 = vector.shape_cast %131 : vector<1x120x256xf32> to vector<120x256xf32>
    %c1_160 = arith.constant 1 : index
    %c1_161 = arith.constant 1 : index
    %c0_162 = arith.constant 0 : index
    %c0_163 = arith.constant 0 : index
    %133 = vector.load %arg2[%c1_160, %c1_161, %c0_162, %c0_163] : memref<2x2x256x128xf32, #tpu.memory_space<vmem>>, vector<1x1x256x128xf32>
    %134 = vector.shape_cast %133 : vector<1x1x256x128xf32> to vector<256x128xf32>
    %cst_164 = arith.constant dense<0.000000e+00> : vector<120x128xf32>
    %135 = tpu.matmul %132, %134, %cst_164 {dimension_numbers = #tpu.dot_dimension_numbers<[1], [0], [0], [1], [0, 0, 1, 1], [], []>} : vector<120x256xf32>, vector<256x128xf32>, vector<120x128xf32> -> vector<120x128xf32>
    %136 = arith.addf %130, %135 : vector<120x128xf32>
    %c0_165 = arith.constant 0 : index
    %c0_166 = arith.constant 0 : index
    %137 = vector.load %arg3[%c0_165, %c0_166] : memref<1x128xf32, #tpu.memory_space<vmem>>, vector<1x128xf32>
    %138 = vector.broadcast %137 : vector<1x128xf32> to vector<120x128xf32>
    %139 = arith.addf %136, %138 : vector<120x128xf32>
    %cst_167 = arith.constant 0.000000e+00 : f32
    %140 = vector.broadcast %cst_167 : f32 to vector<120x128xf32>
    %141 = arith.maximumf %139, %140 : vector<120x128xf32>
    %c0_168 = arith.constant 0 : index
    %c0_169 = arith.constant 0 : index
    %142 = vector.load %arg13[%c0_168, %c0_169] : memref<120x128xf32, #tpu.memory_space<vmem>>, vector<120x128xf32>
    tpu.vector_store %arg13[%c0_168, %c0_169], %141 {strides = array<i32>} : memref<120x128xf32, #tpu.memory_space<vmem>>, vector<120x128xf32>,
    %cst_170 = arith.constant 0.000000e+00 : f32
    %143 = vector.broadcast %cst_170 : f32 to vector<104x64xf32>
    %c0_171 = arith.constant 0 : index
    %c0_172 = arith.constant 0 : index
    %144 = vector.load %arg13[%c0_171, %c0_172] : memref<120x128xf32, #tpu.memory_space<vmem>>, vector<104x128xf32>
    %c0_173 = arith.constant 0 : index
    %c0_174 = arith.constant 0 : index
    %c0_175 = arith.constant 0 : index
    %c0_176 = arith.constant 0 : index
    %145 = vector.load %arg4[%c0_173, %c0_174, %c0_175, %c0_176] : memref<2x2x128x64xf32, #tpu.memory_space<vmem>>, vector<1x1x128x64xf32>
    %146 = vector.shape_cast %145 : vector<1x1x128x64xf32> to vector<128x64xf32>
    %cst_177 = arith.constant dense<0.000000e+00> : vector<104x64xf32>
    %147 = tpu.matmul %144, %146, %cst_177 {dimension_numbers = #tpu.dot_dimension_numbers<[1], [0], [0], [1], [0, 0, 1, 1], [], []>} : vector<104x128xf32>, vector<128x64xf32>, vector<104x64xf32> -> vector<104x64xf32>
    %148 = arith.addf %143, %147 : vector<104x64xf32>
    %c1_178 = arith.constant 1 : index
    %c0_179 = arith.constant 0 : index
    %149 = vector.load %arg13[%c1_178, %c0_179] : memref<120x128xf32, #tpu.memory_space<vmem>>, vector<104x128xf32>
    %c0_180 = arith.constant 0 : index
    %c1_181 = arith.constant 1 : index
    %c0_182 = arith.constant 0 : index
    %c0_183 = arith.constant 0 : index
    %150 = vector.load %arg4[%c0_180, %c1_181, %c0_182, %c0_183] : memref<2x2x128x64xf32, #tpu.memory_space<vmem>>, vector<1x1x128x64xf32>
    %151 = vector.shape_cast %150 : vector<1x1x128x64xf32> to vector<128x64xf32>
    %cst_184 = arith.constant dense<0.000000e+00> : vector<104x64xf32>
    %152 = tpu.matmul %149, %151, %cst_184 {dimension_numbers = #tpu.dot_dimension_numbers<[1], [0], [0], [1], [0, 0, 1, 1], [], []>} : vector<104x128xf32>, vector<128x64xf32>, vector<104x64xf32> -> vector<104x64xf32>
    %153 = arith.addf %148, %152 : vector<104x64xf32>
    %c11_185 = arith.constant 11 : index
    %c0_186 = arith.constant 0 : index
    %154 = vector.load %arg13[%c11_185, %c0_186] : memref<120x128xf32, #tpu.memory_space<vmem>>, vector<104x128xf32>
    %c1_187 = arith.constant 1 : index
    %c0_188 = arith.constant 0 : index
    %c0_189 = arith.constant 0 : index
    %c0_190 = arith.constant 0 : index
    %155 = vector.load %arg4[%c1_187, %c0_188, %c0_189, %c0_190] : memref<2x2x128x64xf32, #tpu.memory_space<vmem>>, vector<1x1x128x64xf32>
    %156 = vector.shape_cast %155 : vector<1x1x128x64xf32> to vector<128x64xf32>
    %cst_191 = arith.constant dense<0.000000e+00> : vector<104x64xf32>
    %157 = tpu.matmul %154, %156, %cst_191 {dimension_numbers = #tpu.dot_dimension_numbers<[1], [0], [0], [1], [0, 0, 1, 1], [], []>} : vector<104x128xf32>, vector<128x64xf32>, vector<104x64xf32> -> vector<104x64xf32>
    %158 = arith.addf %153, %157 : vector<104x64xf32>
    %c12_192 = arith.constant 12 : index
    %c0_193 = arith.constant 0 : index
    %159 = vector.load %arg13[%c12_192, %c0_193] : memref<120x128xf32, #tpu.memory_space<vmem>>, vector<104x128xf32>
    %c1_194 = arith.constant 1 : index
    %c1_195 = arith.constant 1 : index
    %c0_196 = arith.constant 0 : index
    %c0_197 = arith.constant 0 : index
    %160 = vector.load %arg4[%c1_194, %c1_195, %c0_196, %c0_197] : memref<2x2x128x64xf32, #tpu.memory_space<vmem>>, vector<1x1x128x64xf32>
    %161 = vector.shape_cast %160 : vector<1x1x128x64xf32> to vector<128x64xf32>
    %cst_198 = arith.constant dense<0.000000e+00> : vector<104x64xf32>
    %162 = tpu.matmul %159, %161, %cst_198 {dimension_numbers = #tpu.dot_dimension_numbers<[1], [0], [0], [1], [0, 0, 1, 1], [], []>} : vector<104x128xf32>, vector<128x64xf32>, vector<104x64xf32> -> vector<104x64xf32>
    %163 = arith.addf %158, %162 : vector<104x64xf32>
    %c0_199 = arith.constant 0 : index
    %c0_200 = arith.constant 0 : index
    %164 = vector.load %arg5[%c0_199, %c0_200] : memref<1x64xf32, #tpu.memory_space<vmem>>, vector<1x64xf32>
    %165 = vector.broadcast %164 : vector<1x64xf32> to vector<104x64xf32>
    %166 = arith.addf %163, %165 : vector<104x64xf32>
    %cst_201 = arith.constant 0.000000e+00 : f32
    %167 = vector.broadcast %cst_201 : f32 to vector<104x64xf32>
    %168 = arith.maximumf %166, %167 : vector<104x64xf32>
    %c0_202 = arith.constant 0 : index
    %c0_203 = arith.constant 0 : index
    %169 = vector.load %arg14[%c0_202, %c0_203] : memref<104x64xf32, #tpu.memory_space<vmem>>, vector<104x64xf32>
    tpu.vector_store %arg14[%c0_202, %c0_203], %168 {strides = array<i32>} : memref<104x64xf32, #tpu.memory_space<vmem>>, vector<104x64xf32>,
    %cst_204 = arith.constant 0.000000e+00 : f32
    %170 = vector.broadcast %cst_204 : f32 to vector<80x64xf32>
    %c0_205 = arith.constant 0 : index
    %c0_206 = arith.constant 0 : index
    %171 = vector.load %arg14[%c0_205, %c0_206] : memref<104x64xf32, #tpu.memory_space<vmem>>, vector<80x64xf32>
    %c0_207 = arith.constant 0 : index
    %c0_208 = arith.constant 0 : index
    %c0_209 = arith.constant 0 : index
    %c0_210 = arith.constant 0 : index
    %172 = vector.load %arg6[%c0_207, %c0_208, %c0_209, %c0_210] : memref<3x3x64x64xf32, #tpu.memory_space<vmem>>, vector<1x1x64x64xf32>
    %173 = vector.shape_cast %172 : vector<1x1x64x64xf32> to vector<64x64xf32>
    %cst_211 = arith.constant dense<0.000000e+00> : vector<80x64xf32>
    %174 = tpu.matmul %171, %173, %cst_211 {dimension_numbers = #tpu.dot_dimension_numbers<[1], [0], [0], [1], [0, 0, 1, 1], [], []>} : vector<80x64xf32>, vector<64x64xf32>, vector<80x64xf32> -> vector<80x64xf32>
    %175 = arith.addf %170, %174 : vector<80x64xf32>
    %c1_212 = arith.constant 1 : index
    %c0_213 = arith.constant 0 : index
    %176 = vector.load %arg14[%c1_212, %c0_213] : memref<104x64xf32, #tpu.memory_space<vmem>>, vector<80x64xf32>
    %c0_214 = arith.constant 0 : index
    %c1_215 = arith.constant 1 : index
    %c0_216 = arith.constant 0 : index
    %c0_217 = arith.constant 0 : index
    %177 = vector.load %arg6[%c0_214, %c1_215, %c0_216, %c0_217] : memref<3x3x64x64xf32, #tpu.memory_space<vmem>>, vector<1x1x64x64xf32>
    %178 = vector.shape_cast %177 : vector<1x1x64x64xf32> to vector<64x64xf32>
    %cst_218 = arith.constant dense<0.000000e+00> : vector<80x64xf32>
    %179 = tpu.matmul %176, %178, %cst_218 {dimension_numbers = #tpu.dot_dimension_numbers<[1], [0], [0], [1], [0, 0, 1, 1], [], []>} : vector<80x64xf32>, vector<64x64xf32>, vector<80x64xf32> -> vector<80x64xf32>
    %180 = arith.addf %175, %179 : vector<80x64xf32>
    %c2_219 = arith.constant 2 : index
    %c0_220 = arith.constant 0 : index
    %181 = vector.load %arg14[%c2_219, %c0_220] : memref<104x64xf32, #tpu.memory_space<vmem>>, vector<80x64xf32>
    %c0_221 = arith.constant 0 : index
    %c2_222 = arith.constant 2 : index
    %c0_223 = arith.constant 0 : index
    %c0_224 = arith.constant 0 : index
    %182 = vector.load %arg6[%c0_221, %c2_222, %c0_223, %c0_224] : memref<3x3x64x64xf32, #tpu.memory_space<vmem>>, vector<1x1x64x64xf32>
    %183 = vector.shape_cast %182 : vector<1x1x64x64xf32> to vector<64x64xf32>
    %cst_225 = arith.constant dense<0.000000e+00> : vector<80x64xf32>
    %184 = tpu.matmul %181, %183, %cst_225 {dimension_numbers = #tpu.dot_dimension_numbers<[1], [0], [0], [1], [0, 0, 1, 1], [], []>} : vector<80x64xf32>, vector<64x64xf32>, vector<80x64xf32> -> vector<80x64xf32>
    %185 = arith.addf %180, %184 : vector<80x64xf32>
    %c11_226 = arith.constant 11 : index
    %c0_227 = arith.constant 0 : index
    %186 = vector.load %arg14[%c11_226, %c0_227] : memref<104x64xf32, #tpu.memory_space<vmem>>, vector<80x64xf32>
    %c1_228 = arith.constant 1 : index
    %c0_229 = arith.constant 0 : index
    %c0_230 = arith.constant 0 : index
    %c0_231 = arith.constant 0 : index
    %187 = vector.load %arg6[%c1_228, %c0_229, %c0_230, %c0_231] : memref<3x3x64x64xf32, #tpu.memory_space<vmem>>, vector<1x1x64x64xf32>
    %188 = vector.shape_cast %187 : vector<1x1x64x64xf32> to vector<64x64xf32>
    %cst_232 = arith.constant dense<0.000000e+00> : vector<80x64xf32>
    %189 = tpu.matmul %186, %188, %cst_232 {dimension_numbers = #tpu.dot_dimension_numbers<[1], [0], [0], [1], [0, 0, 1, 1], [], []>} : vector<80x64xf32>, vector<64x64xf32>, vector<80x64xf32> -> vector<80x64xf32>
    %190 = arith.addf %185, %189 : vector<80x64xf32>
    %c12_233 = arith.constant 12 : index
    %c0_234 = arith.constant 0 : index
    %191 = vector.load %arg14[%c12_233, %c0_234] : memref<104x64xf32, #tpu.memory_space<vmem>>, vector<80x64xf32>
    %c1_235 = arith.constant 1 : index
    %c1_236 = arith.constant 1 : index
    %c0_237 = arith.constant 0 : index
    %c0_238 = arith.constant 0 : index
    %192 = vector.load %arg6[%c1_235, %c1_236, %c0_237, %c0_238] : memref<3x3x64x64xf32, #tpu.memory_space<vmem>>, vector<1x1x64x64xf32>
    %193 = vector.shape_cast %192 : vector<1x1x64x64xf32> to vector<64x64xf32>
    %cst_239 = arith.constant dense<0.000000e+00> : vector<80x64xf32>
    %194 = tpu.matmul %191, %193, %cst_239 {dimension_numbers = #tpu.dot_dimension_numbers<[1], [0], [0], [1], [0, 0, 1, 1], [], []>} : vector<80x64xf32>, vector<64x64xf32>, vector<80x64xf32> -> vector<80x64xf32>
    %195 = arith.addf %190, %194 : vector<80x64xf32>
    %c13_240 = arith.constant 13 : index
    %c0_241 = arith.constant 0 : index
    %196 = vector.load %arg14[%c13_240, %c0_241] : memref<104x64xf32, #tpu.memory_space<vmem>>, vector<80x64xf32>
    %c1_242 = arith.constant 1 : index
    %c2_243 = arith.constant 2 : index
    %c0_244 = arith.constant 0 : index
    %c0_245 = arith.constant 0 : index
    %197 = vector.load %arg6[%c1_242, %c2_243, %c0_244, %c0_245] : memref<3x3x64x64xf32, #tpu.memory_space<vmem>>, vector<1x1x64x64xf32>
    %198 = vector.shape_cast %197 : vector<1x1x64x64xf32> to vector<64x64xf32>
    %cst_246 = arith.constant dense<0.000000e+00> : vector<80x64xf32>
    %199 = tpu.matmul %196, %198, %cst_246 {dimension_numbers = #tpu.dot_dimension_numbers<[1], [0], [0], [1], [0, 0, 1, 1], [], []>} : vector<80x64xf32>, vector<64x64xf32>, vector<80x64xf32> -> vector<80x64xf32>
    %200 = arith.addf %195, %199 : vector<80x64xf32>
    %c22_247 = arith.constant 22 : index
    %c0_248 = arith.constant 0 : index
    %201 = vector.load %arg14[%c22_247, %c0_248] : memref<104x64xf32, #tpu.memory_space<vmem>>, vector<80x64xf32>
    %c2_249 = arith.constant 2 : index
    %c0_250 = arith.constant 0 : index
    %c0_251 = arith.constant 0 : index
    %c0_252 = arith.constant 0 : index
    %202 = vector.load %arg6[%c2_249, %c0_250, %c0_251, %c0_252] : memref<3x3x64x64xf32, #tpu.memory_space<vmem>>, vector<1x1x64x64xf32>
    %203 = vector.shape_cast %202 : vector<1x1x64x64xf32> to vector<64x64xf32>
    %cst_253 = arith.constant dense<0.000000e+00> : vector<80x64xf32>
    %204 = tpu.matmul %201, %203, %cst_253 {dimension_numbers = #tpu.dot_dimension_numbers<[1], [0], [0], [1], [0, 0, 1, 1], [], []>} : vector<80x64xf32>, vector<64x64xf32>, vector<80x64xf32> -> vector<80x64xf32>
    %205 = arith.addf %200, %204 : vector<80x64xf32>
    %c23_254 = arith.constant 23 : index
    %c0_255 = arith.constant 0 : index
    %206 = vector.load %arg14[%c23_254, %c0_255] : memref<104x64xf32, #tpu.memory_space<vmem>>, vector<80x64xf32>
    %c2_256 = arith.constant 2 : index
    %c1_257 = arith.constant 1 : index
    %c0_258 = arith.constant 0 : index
    %c0_259 = arith.constant 0 : index
    %207 = vector.load %arg6[%c2_256, %c1_257, %c0_258, %c0_259] : memref<3x3x64x64xf32, #tpu.memory_space<vmem>>, vector<1x1x64x64xf32>
    %208 = vector.shape_cast %207 : vector<1x1x64x64xf32> to vector<64x64xf32>
    %cst_260 = arith.constant dense<0.000000e+00> : vector<80x64xf32>
    %209 = tpu.matmul %206, %208, %cst_260 {dimension_numbers = #tpu.dot_dimension_numbers<[1], [0], [0], [1], [0, 0, 1, 1], [], []>} : vector<80x64xf32>, vector<64x64xf32>, vector<80x64xf32> -> vector<80x64xf32>
    %210 = arith.addf %205, %209 : vector<80x64xf32>
    %c24_261 = arith.constant 24 : index
    %c0_262 = arith.constant 0 : index
    %211 = vector.load %arg14[%c24_261, %c0_262] : memref<104x64xf32, #tpu.memory_space<vmem>>, vector<80x64xf32>
    %c2_263 = arith.constant 2 : index
    %c2_264 = arith.constant 2 : index
    %c0_265 = arith.constant 0 : index
    %c0_266 = arith.constant 0 : index
    %212 = vector.load %arg6[%c2_263, %c2_264, %c0_265, %c0_266] : memref<3x3x64x64xf32, #tpu.memory_space<vmem>>, vector<1x1x64x64xf32>
    %213 = vector.shape_cast %212 : vector<1x1x64x64xf32> to vector<64x64xf32>
    %cst_267 = arith.constant dense<0.000000e+00> : vector<80x64xf32>
    %214 = tpu.matmul %211, %213, %cst_267 {dimension_numbers = #tpu.dot_dimension_numbers<[1], [0], [0], [1], [0, 0, 1, 1], [], []>} : vector<80x64xf32>, vector<64x64xf32>, vector<80x64xf32> -> vector<80x64xf32>
    %215 = arith.addf %210, %214 : vector<80x64xf32>
    %c0_268 = arith.constant 0 : index
    %c0_269 = arith.constant 0 : index
    %216 = vector.load %arg7[%c0_268, %c0_269] : memref<1x64xf32, #tpu.memory_space<vmem>>, vector<1x64xf32>
    %217 = vector.broadcast %216 : vector<1x64xf32> to vector<80x64xf32>
    %218 = arith.addf %215, %217 : vector<80x64xf32>
    %cst_270 = arith.constant 0.000000e+00 : f32
    %219 = vector.broadcast %cst_270 : f32 to vector<80x64xf32>
    %220 = arith.maximumf %218, %219 : vector<80x64xf32>
    %c1_271 = arith.constant 1 : index
    %c0_272 = arith.constant 0 : index
    %c0_273 = arith.constant 0 : index
    %221 = vector.load %arg15[%c1_271, %c0_272, %c0_273] : memref<2x80x64xf32, #tpu.memory_space<vmem>>, vector<1x80x64xf32>
    %222 = vector.shape_cast %221 : vector<1x80x64xf32> to vector<80x64xf32>
    %223 = vector.shape_cast %220 : vector<80x64xf32> to vector<1x80x64xf32>
    tpu.vector_store %arg15[%c1_271, %c0_272, %c0_273], %223 {strides = array<i32>} : memref<2x80x64xf32, #tpu.memory_space<vmem>>, vector<1x80x64xf32>,
    %cst_274 = arith.constant 0.000000e+00 : f32
    %224 = vector.broadcast %cst_274 : f32 to vector<2x256xf32>
    %c0_275 = arith.constant 0 : index
    %c0_276 = arith.constant 0 : index
    %c0_277 = arith.constant 0 : index
    %225 = vector.load %arg15[%c0_275, %c0_276, %c0_277] : memref<2x80x64xf32, #tpu.memory_space<vmem>>, vector<2x1x64xf32>
    %226 = vector.shape_cast %225 : vector<2x1x64xf32> to vector<2x64xf32>
    %c0_278 = arith.constant 0 : index
    %c0_279 = arith.constant 0 : index
    %c0_280 = arith.constant 0 : index
    %227 = vector.load %arg8[%c0_278, %c0_279, %c0_280] : memref<49x64x256xf32, #tpu.memory_space<vmem>>, vector<1x64x256xf32>
    %228 = vector.shape_cast %227 : vector<1x64x256xf32> to vector<64x256xf32>
    %cst_281 = arith.constant dense<0.000000e+00> : vector<2x256xf32>
    %229 = tpu.matmul %226, %228, %cst_281 {dimension_numbers = #tpu.dot_dimension_numbers<[1], [0], [0], [1], [0, 0, 1, 1], [], []>} : vector<2x64xf32>, vector<64x256xf32>, vector<2x256xf32> -> vector<2x256xf32>
    %230 = arith.addf %224, %229 : vector<2x256xf32>
    %c0_282 = arith.constant 0 : index
    %c1_283 = arith.constant 1 : index
    %c0_284 = arith.constant 0 : index
    %231 = vector.load %arg15[%c0_282, %c1_283, %c0_284] : memref<2x80x64xf32, #tpu.memory_space<vmem>>, vector<2x1x64xf32>
    %232 = vector.shape_cast %231 : vector<2x1x64xf32> to vector<2x64xf32>
    %c1_285 = arith.constant 1 : index
    %c0_286 = arith.constant 0 : index
    %c0_287 = arith.constant 0 : index
    %233 = vector.load %arg8[%c1_285, %c0_286, %c0_287] : memref<49x64x256xf32, #tpu.memory_space<vmem>>, vector<1x64x256xf32>
    %234 = vector.shape_cast %233 : vector<1x64x256xf32> to vector<64x256xf32>
    %cst_288 = arith.constant dense<0.000000e+00> : vector<2x256xf32>
    %235 = tpu.matmul %232, %234, %cst_288 {dimension_numbers = #tpu.dot_dimension_numbers<[1], [0], [0], [1], [0, 0, 1, 1], [], []>} : vector<2x64xf32>, vector<64x256xf32>, vector<2x256xf32> -> vector<2x256xf32>
    %236 = arith.addf %230, %235 : vector<2x256xf32>
    %c0_289 = arith.constant 0 : index
    %c2_290 = arith.constant 2 : index
    %c0_291 = arith.constant 0 : index
    %237 = vector.load %arg15[%c0_289, %c2_290, %c0_291] : memref<2x80x64xf32, #tpu.memory_space<vmem>>, vector<2x1x64xf32>
    %238 = vector.shape_cast %237 : vector<2x1x64xf32> to vector<2x64xf32>
    %c2_292 = arith.constant 2 : index
    %c0_293 = arith.constant 0 : index
    %c0_294 = arith.constant 0 : index
    %239 = vector.load %arg8[%c2_292, %c0_293, %c0_294] : memref<49x64x256xf32, #tpu.memory_space<vmem>>, vector<1x64x256xf32>
    %240 = vector.shape_cast %239 : vector<1x64x256xf32> to vector<64x256xf32>
    %cst_295 = arith.constant dense<0.000000e+00> : vector<2x256xf32>
    %241 = tpu.matmul %238, %240, %cst_295 {dimension_numbers = #tpu.dot_dimension_numbers<[1], [0], [0], [1], [0, 0, 1, 1], [], []>} : vector<2x64xf32>, vector<64x256xf32>, vector<2x256xf32> -> vector<2x256xf32>
    %242 = arith.addf %236, %241 : vector<2x256xf32>
    %c0_296 = arith.constant 0 : index
    %c3 = arith.constant 3 : index
    %c0_297 = arith.constant 0 : index
    %243 = vector.load %arg15[%c0_296, %c3, %c0_297] : memref<2x80x64xf32, #tpu.memory_space<vmem>>, vector<2x1x64xf32>
    %244 = vector.shape_cast %243 : vector<2x1x64xf32> to vector<2x64xf32>
    %c3_298 = arith.constant 3 : index
    %c0_299 = arith.constant 0 : index
    %c0_300 = arith.constant 0 : index
    %245 = vector.load %arg8[%c3_298, %c0_299, %c0_300] : memref<49x64x256xf32, #tpu.memory_space<vmem>>, vector<1x64x256xf32>
    %246 = vector.shape_cast %245 : vector<1x64x256xf32> to vector<64x256xf32>
    %cst_301 = arith.constant dense<0.000000e+00> : vector<2x256xf32>
    %247 = tpu.matmul %244, %246, %cst_301 {dimension_numbers = #tpu.dot_dimension_numbers<[1], [0], [0], [1], [0, 0, 1, 1], [], []>} : vector<2x64xf32>, vector<64x256xf32>, vector<2x256xf32> -> vector<2x256xf32>
    %248 = arith.addf %242, %247 : vector<2x256xf32>
    %c0_302 = arith.constant 0 : index
    %c4 = arith.constant 4 : index
    %c0_303 = arith.constant 0 : index
    %249 = vector.load %arg15[%c0_302, %c4, %c0_303] : memref<2x80x64xf32, #tpu.memory_space<vmem>>, vector<2x1x64xf32>
    %250 = vector.shape_cast %249 : vector<2x1x64xf32> to vector<2x64xf32>
    %c4_304 = arith.constant 4 : index
    %c0_305 = arith.constant 0 : index
    %c0_306 = arith.constant 0 : index
    %251 = vector.load %arg8[%c4_304, %c0_305, %c0_306] : memref<49x64x256xf32, #tpu.memory_space<vmem>>, vector<1x64x256xf32>
    %252 = vector.shape_cast %251 : vector<1x64x256xf32> to vector<64x256xf32>
    %cst_307 = arith.constant dense<0.000000e+00> : vector<2x256xf32>
    %253 = tpu.matmul %250, %252, %cst_307 {dimension_numbers = #tpu.dot_dimension_numbers<[1], [0], [0], [1], [0, 0, 1, 1], [], []>} : vector<2x64xf32>, vector<64x256xf32>, vector<2x256xf32> -> vector<2x256xf32>
    %254 = arith.addf %248, %253 : vector<2x256xf32>
    %c0_308 = arith.constant 0 : index
    %c5 = arith.constant 5 : index
    %c0_309 = arith.constant 0 : index
    %255 = vector.load %arg15[%c0_308, %c5, %c0_309] : memref<2x80x64xf32, #tpu.memory_space<vmem>>, vector<2x1x64xf32>
    %256 = vector.shape_cast %255 : vector<2x1x64xf32> to vector<2x64xf32>
    %c5_310 = arith.constant 5 : index
    %c0_311 = arith.constant 0 : index
    %c0_312 = arith.constant 0 : index
    %257 = vector.load %arg8[%c5_310, %c0_311, %c0_312] : memref<49x64x256xf32, #tpu.memory_space<vmem>>, vector<1x64x256xf32>
    %258 = vector.shape_cast %257 : vector<1x64x256xf32> to vector<64x256xf32>
    %cst_313 = arith.constant dense<0.000000e+00> : vector<2x256xf32>
    %259 = tpu.matmul %256, %258, %cst_313 {dimension_numbers = #tpu.dot_dimension_numbers<[1], [0], [0], [1], [0, 0, 1, 1], [], []>} : vector<2x64xf32>, vector<64x256xf32>, vector<2x256xf32> -> vector<2x256xf32>
    %260 = arith.addf %254, %259 : vector<2x256xf32>
    %c0_314 = arith.constant 0 : index
    %c6 = arith.constant 6 : index
    %c0_315 = arith.constant 0 : index
    %261 = vector.load %arg15[%c0_314, %c6, %c0_315] : memref<2x80x64xf32, #tpu.memory_space<vmem>>, vector<2x1x64xf32>
    %262 = vector.shape_cast %261 : vector<2x1x64xf32> to vector<2x64xf32>
    %c6_316 = arith.constant 6 : index
    %c0_317 = arith.constant 0 : index
    %c0_318 = arith.constant 0 : index
    %263 = vector.load %arg8[%c6_316, %c0_317, %c0_318] : memref<49x64x256xf32, #tpu.memory_space<vmem>>, vector<1x64x256xf32>
    %264 = vector.shape_cast %263 : vector<1x64x256xf32> to vector<64x256xf32>
    %cst_319 = arith.constant dense<0.000000e+00> : vector<2x256xf32>
    %265 = tpu.matmul %262, %264, %cst_319 {dimension_numbers = #tpu.dot_dimension_numbers<[1], [0], [0], [1], [0, 0, 1, 1], [], []>} : vector<2x64xf32>, vector<64x256xf32>, vector<2x256xf32> -> vector<2x256xf32>
    %266 = arith.addf %260, %265 : vector<2x256xf32>
    %c0_320 = arith.constant 0 : index
    %c11_321 = arith.constant 11 : index
    %c0_322 = arith.constant 0 : index
    %267 = vector.load %arg15[%c0_320, %c11_321, %c0_322] : memref<2x80x64xf32, #tpu.memory_space<vmem>>, vector<2x1x64xf32>
    %268 = vector.shape_cast %267 : vector<2x1x64xf32> to vector<2x64xf32>
    %c7 = arith.constant 7 : index
    %c0_323 = arith.constant 0 : index
    %c0_324 = arith.constant 0 : index
    %269 = vector.load %arg8[%c7, %c0_323, %c0_324] : memref<49x64x256xf32, #tpu.memory_space<vmem>>, vector<1x64x256xf32>
    %270 = vector.shape_cast %269 : vector<1x64x256xf32> to vector<64x256xf32>
    %cst_325 = arith.constant dense<0.000000e+00> : vector<2x256xf32>
    %271 = tpu.matmul %268, %270, %cst_325 {dimension_numbers = #tpu.dot_dimension_numbers<[1], [0], [0], [1], [0, 0, 1, 1], [], []>} : vector<2x64xf32>, vector<64x256xf32>, vector<2x256xf32> -> vector<2x256xf32>
    %272 = arith.addf %266, %271 : vector<2x256xf32>
    %c0_326 = arith.constant 0 : index
    %c12_327 = arith.constant 12 : index
    %c0_328 = arith.constant 0 : index
    %273 = vector.load %arg15[%c0_326, %c12_327, %c0_328] : memref<2x80x64xf32, #tpu.memory_space<vmem>>, vector<2x1x64xf32>
    %274 = vector.shape_cast %273 : vector<2x1x64xf32> to vector<2x64xf32>
    %c8 = arith.constant 8 : index
    %c0_329 = arith.constant 0 : index
    %c0_330 = arith.constant 0 : index
    %275 = vector.load %arg8[%c8, %c0_329, %c0_330] : memref<49x64x256xf32, #tpu.memory_space<vmem>>, vector<1x64x256xf32>
    %276 = vector.shape_cast %275 : vector<1x64x256xf32> to vector<64x256xf32>
    %cst_331 = arith.constant dense<0.000000e+00> : vector<2x256xf32>
    %277 = tpu.matmul %274, %276, %cst_331 {dimension_numbers = #tpu.dot_dimension_numbers<[1], [0], [0], [1], [0, 0, 1, 1], [], []>} : vector<2x64xf32>, vector<64x256xf32>, vector<2x256xf32> -> vector<2x256xf32>
    %278 = arith.addf %272, %277 : vector<2x256xf32>
    %c0_332 = arith.constant 0 : index
    %c13_333 = arith.constant 13 : index
    %c0_334 = arith.constant 0 : index
    %279 = vector.load %arg15[%c0_332, %c13_333, %c0_334] : memref<2x80x64xf32, #tpu.memory_space<vmem>>, vector<2x1x64xf32>
    %280 = vector.shape_cast %279 : vector<2x1x64xf32> to vector<2x64xf32>
    %c9 = arith.constant 9 : index
    %c0_335 = arith.constant 0 : index
    %c0_336 = arith.constant 0 : index
    %281 = vector.load %arg8[%c9, %c0_335, %c0_336] : memref<49x64x256xf32, #tpu.memory_space<vmem>>, vector<1x64x256xf32>
    %282 = vector.shape_cast %281 : vector<1x64x256xf32> to vector<64x256xf32>
    %cst_337 = arith.constant dense<0.000000e+00> : vector<2x256xf32>
    %283 = tpu.matmul %280, %282, %cst_337 {dimension_numbers = #tpu.dot_dimension_numbers<[1], [0], [0], [1], [0, 0, 1, 1], [], []>} : vector<2x64xf32>, vector<64x256xf32>, vector<2x256xf32> -> vector<2x256xf32>
    %284 = arith.addf %278, %283 : vector<2x256xf32>
    %c0_338 = arith.constant 0 : index
    %c14 = arith.constant 14 : index
    %c0_339 = arith.constant 0 : index
    %285 = vector.load %arg15[%c0_338, %c14, %c0_339] : memref<2x80x64xf32, #tpu.memory_space<vmem>>, vector<2x1x64xf32>
    %286 = vector.shape_cast %285 : vector<2x1x64xf32> to vector<2x64xf32>
    %c10 = arith.constant 10 : index
    %c0_340 = arith.constant 0 : index
    %c0_341 = arith.constant 0 : index
    %287 = vector.load %arg8[%c10, %c0_340, %c0_341] : memref<49x64x256xf32, #tpu.memory_space<vmem>>, vector<1x64x256xf32>
    %288 = vector.shape_cast %287 : vector<1x64x256xf32> to vector<64x256xf32>
    %cst_342 = arith.constant dense<0.000000e+00> : vector<2x256xf32>
    %289 = tpu.matmul %286, %288, %cst_342 {dimension_numbers = #tpu.dot_dimension_numbers<[1], [0], [0], [1], [0, 0, 1, 1], [], []>} : vector<2x64xf32>, vector<64x256xf32>, vector<2x256xf32> -> vector<2x256xf32>
    %290 = arith.addf %284, %289 : vector<2x256xf32>
    %c0_343 = arith.constant 0 : index
    %c15 = arith.constant 15 : index
    %c0_344 = arith.constant 0 : index
    %291 = vector.load %arg15[%c0_343, %c15, %c0_344] : memref<2x80x64xf32, #tpu.memory_space<vmem>>, vector<2x1x64xf32>
    %292 = vector.shape_cast %291 : vector<2x1x64xf32> to vector<2x64xf32>
    %c11_345 = arith.constant 11 : index
    %c0_346 = arith.constant 0 : index
    %c0_347 = arith.constant 0 : index
    %293 = vector.load %arg8[%c11_345, %c0_346, %c0_347] : memref<49x64x256xf32, #tpu.memory_space<vmem>>, vector<1x64x256xf32>
    %294 = vector.shape_cast %293 : vector<1x64x256xf32> to vector<64x256xf32>
    %cst_348 = arith.constant dense<0.000000e+00> : vector<2x256xf32>
    %295 = tpu.matmul %292, %294, %cst_348 {dimension_numbers = #tpu.dot_dimension_numbers<[1], [0], [0], [1], [0, 0, 1, 1], [], []>} : vector<2x64xf32>, vector<64x256xf32>, vector<2x256xf32> -> vector<2x256xf32>
    %296 = arith.addf %290, %295 : vector<2x256xf32>
    %c0_349 = arith.constant 0 : index
    %c16 = arith.constant 16 : index
    %c0_350 = arith.constant 0 : index
    %297 = vector.load %arg15[%c0_349, %c16, %c0_350] : memref<2x80x64xf32, #tpu.memory_space<vmem>>, vector<2x1x64xf32>
    %298 = vector.shape_cast %297 : vector<2x1x64xf32> to vector<2x64xf32>
    %c12_351 = arith.constant 12 : index
    %c0_352 = arith.constant 0 : index
    %c0_353 = arith.constant 0 : index
    %299 = vector.load %arg8[%c12_351, %c0_352, %c0_353] : memref<49x64x256xf32, #tpu.memory_space<vmem>>, vector<1x64x256xf32>
    %300 = vector.shape_cast %299 : vector<1x64x256xf32> to vector<64x256xf32>
    %cst_354 = arith.constant dense<0.000000e+00> : vector<2x256xf32>
    %301 = tpu.matmul %298, %300, %cst_354 {dimension_numbers = #tpu.dot_dimension_numbers<[1], [0], [0], [1], [0, 0, 1, 1], [], []>} : vector<2x64xf32>, vector<64x256xf32>, vector<2x256xf32> -> vector<2x256xf32>
    %302 = arith.addf %296, %301 : vector<2x256xf32>
    %c0_355 = arith.constant 0 : index
    %c17 = arith.constant 17 : index
    %c0_356 = arith.constant 0 : index
    %303 = vector.load %arg15[%c0_355, %c17, %c0_356] : memref<2x80x64xf32, #tpu.memory_space<vmem>>, vector<2x1x64xf32>
    %304 = vector.shape_cast %303 : vector<2x1x64xf32> to vector<2x64xf32>
    %c13_357 = arith.constant 13 : index
    %c0_358 = arith.constant 0 : index
    %c0_359 = arith.constant 0 : index
    %305 = vector.load %arg8[%c13_357, %c0_358, %c0_359] : memref<49x64x256xf32, #tpu.memory_space<vmem>>, vector<1x64x256xf32>
    %306 = vector.shape_cast %305 : vector<1x64x256xf32> to vector<64x256xf32>
    %cst_360 = arith.constant dense<0.000000e+00> : vector<2x256xf32>
    %307 = tpu.matmul %304, %306, %cst_360 {dimension_numbers = #tpu.dot_dimension_numbers<[1], [0], [0], [1], [0, 0, 1, 1], [], []>} : vector<2x64xf32>, vector<64x256xf32>, vector<2x256xf32> -> vector<2x256xf32>
    %308 = arith.addf %302, %307 : vector<2x256xf32>
    %c0_361 = arith.constant 0 : index
    %c22_362 = arith.constant 22 : index
    %c0_363 = arith.constant 0 : index
    %309 = vector.load %arg15[%c0_361, %c22_362, %c0_363] : memref<2x80x64xf32, #tpu.memory_space<vmem>>, vector<2x1x64xf32>
    %310 = vector.shape_cast %309 : vector<2x1x64xf32> to vector<2x64xf32>
    %c14_364 = arith.constant 14 : index
    %c0_365 = arith.constant 0 : index
    %c0_366 = arith.constant 0 : index
    %311 = vector.load %arg8[%c14_364, %c0_365, %c0_366] : memref<49x64x256xf32, #tpu.memory_space<vmem>>, vector<1x64x256xf32>
    %312 = vector.shape_cast %311 : vector<1x64x256xf32> to vector<64x256xf32>
    %cst_367 = arith.constant dense<0.000000e+00> : vector<2x256xf32>
    %313 = tpu.matmul %310, %312, %cst_367 {dimension_numbers = #tpu.dot_dimension_numbers<[1], [0], [0], [1], [0, 0, 1, 1], [], []>} : vector<2x64xf32>, vector<64x256xf32>, vector<2x256xf32> -> vector<2x256xf32>
    %314 = arith.addf %308, %313 : vector<2x256xf32>
    %c0_368 = arith.constant 0 : index
    %c23_369 = arith.constant 23 : index
    %c0_370 = arith.constant 0 : index
    %315 = vector.load %arg15[%c0_368, %c23_369, %c0_370] : memref<2x80x64xf32, #tpu.memory_space<vmem>>, vector<2x1x64xf32>
    %316 = vector.shape_cast %315 : vector<2x1x64xf32> to vector<2x64xf32>
    %c15_371 = arith.constant 15 : index
    %c0_372 = arith.constant 0 : index
    %c0_373 = arith.constant 0 : index
    %317 = vector.load %arg8[%c15_371, %c0_372, %c0_373] : memref<49x64x256xf32, #tpu.memory_space<vmem>>, vector<1x64x256xf32>
    %318 = vector.shape_cast %317 : vector<1x64x256xf32> to vector<64x256xf32>
    %cst_374 = arith.constant dense<0.000000e+00> : vector<2x256xf32>
    %319 = tpu.matmul %316, %318, %cst_374 {dimension_numbers = #tpu.dot_dimension_numbers<[1], [0], [0], [1], [0, 0, 1, 1], [], []>} : vector<2x64xf32>, vector<64x256xf32>, vector<2x256xf32> -> vector<2x256xf32>
    %320 = arith.addf %314, %319 : vector<2x256xf32>
    %c0_375 = arith.constant 0 : index
    %c24_376 = arith.constant 24 : index
    %c0_377 = arith.constant 0 : index
    %321 = vector.load %arg15[%c0_375, %c24_376, %c0_377] : memref<2x80x64xf32, #tpu.memory_space<vmem>>, vector<2x1x64xf32>
    %322 = vector.shape_cast %321 : vector<2x1x64xf32> to vector<2x64xf32>
    %c16_378 = arith.constant 16 : index
    %c0_379 = arith.constant 0 : index
    %c0_380 = arith.constant 0 : index
    %323 = vector.load %arg8[%c16_378, %c0_379, %c0_380] : memref<49x64x256xf32, #tpu.memory_space<vmem>>, vector<1x64x256xf32>
    %324 = vector.shape_cast %323 : vector<1x64x256xf32> to vector<64x256xf32>
    %cst_381 = arith.constant dense<0.000000e+00> : vector<2x256xf32>
    %325 = tpu.matmul %322, %324, %cst_381 {dimension_numbers = #tpu.dot_dimension_numbers<[1], [0], [0], [1], [0, 0, 1, 1], [], []>} : vector<2x64xf32>, vector<64x256xf32>, vector<2x256xf32> -> vector<2x256xf32>
    %326 = arith.addf %320, %325 : vector<2x256xf32>
    %c0_382 = arith.constant 0 : index
    %c25 = arith.constant 25 : index
    %c0_383 = arith.constant 0 : index
    %327 = vector.load %arg15[%c0_382, %c25, %c0_383] : memref<2x80x64xf32, #tpu.memory_space<vmem>>, vector<2x1x64xf32>
    %328 = vector.shape_cast %327 : vector<2x1x64xf32> to vector<2x64xf32>
    %c17_384 = arith.constant 17 : index
    %c0_385 = arith.constant 0 : index
    %c0_386 = arith.constant 0 : index
    %329 = vector.load %arg8[%c17_384, %c0_385, %c0_386] : memref<49x64x256xf32, #tpu.memory_space<vmem>>, vector<1x64x256xf32>
    %330 = vector.shape_cast %329 : vector<1x64x256xf32> to vector<64x256xf32>
    %cst_387 = arith.constant dense<0.000000e+00> : vector<2x256xf32>
    %331 = tpu.matmul %328, %330, %cst_387 {dimension_numbers = #tpu.dot_dimension_numbers<[1], [0], [0], [1], [0, 0, 1, 1], [], []>} : vector<2x64xf32>, vector<64x256xf32>, vector<2x256xf32> -> vector<2x256xf32>
    %332 = arith.addf %326, %331 : vector<2x256xf32>
    %c0_388 = arith.constant 0 : index
    %c26 = arith.constant 26 : index
    %c0_389 = arith.constant 0 : index
    %333 = vector.load %arg15[%c0_388, %c26, %c0_389] : memref<2x80x64xf32, #tpu.memory_space<vmem>>, vector<2x1x64xf32>
    %334 = vector.shape_cast %333 : vector<2x1x64xf32> to vector<2x64xf32>
    %c18 = arith.constant 18 : index
    %c0_390 = arith.constant 0 : index
    %c0_391 = arith.constant 0 : index
    %335 = vector.load %arg8[%c18, %c0_390, %c0_391] : memref<49x64x256xf32, #tpu.memory_space<vmem>>, vector<1x64x256xf32>
    %336 = vector.shape_cast %335 : vector<1x64x256xf32> to vector<64x256xf32>
    %cst_392 = arith.constant dense<0.000000e+00> : vector<2x256xf32>
    %337 = tpu.matmul %334, %336, %cst_392 {dimension_numbers = #tpu.dot_dimension_numbers<[1], [0], [0], [1], [0, 0, 1, 1], [], []>} : vector<2x64xf32>, vector<64x256xf32>, vector<2x256xf32> -> vector<2x256xf32>
    %338 = arith.addf %332, %337 : vector<2x256xf32>
    %c0_393 = arith.constant 0 : index
    %c27 = arith.constant 27 : index
    %c0_394 = arith.constant 0 : index
    %339 = vector.load %arg15[%c0_393, %c27, %c0_394] : memref<2x80x64xf32, #tpu.memory_space<vmem>>, vector<2x1x64xf32>
    %340 = vector.shape_cast %339 : vector<2x1x64xf32> to vector<2x64xf32>
    %c19 = arith.constant 19 : index
    %c0_395 = arith.constant 0 : index
    %c0_396 = arith.constant 0 : index
    %341 = vector.load %arg8[%c19, %c0_395, %c0_396] : memref<49x64x256xf32, #tpu.memory_space<vmem>>, vector<1x64x256xf32>
    %342 = vector.shape_cast %341 : vector<1x64x256xf32> to vector<64x256xf32>
    %cst_397 = arith.constant dense<0.000000e+00> : vector<2x256xf32>
    %343 = tpu.matmul %340, %342, %cst_397 {dimension_numbers = #tpu.dot_dimension_numbers<[1], [0], [0], [1], [0, 0, 1, 1], [], []>} : vector<2x64xf32>, vector<64x256xf32>, vector<2x256xf32> -> vector<2x256xf32>
    %344 = arith.addf %338, %343 : vector<2x256xf32>
    %c0_398 = arith.constant 0 : index
    %c28 = arith.constant 28 : index
    %c0_399 = arith.constant 0 : index
    %345 = vector.load %arg15[%c0_398, %c28, %c0_399] : memref<2x80x64xf32, #tpu.memory_space<vmem>>, vector<2x1x64xf32>
    %346 = vector.shape_cast %345 : vector<2x1x64xf32> to vector<2x64xf32>
    %c20 = arith.constant 20 : index
    %c0_400 = arith.constant 0 : index
    %c0_401 = arith.constant 0 : index
    %347 = vector.load %arg8[%c20, %c0_400, %c0_401] : memref<49x64x256xf32, #tpu.memory_space<vmem>>, vector<1x64x256xf32>
    %348 = vector.shape_cast %347 : vector<1x64x256xf32> to vector<64x256xf32>
    %cst_402 = arith.constant dense<0.000000e+00> : vector<2x256xf32>
    %349 = tpu.matmul %346, %348, %cst_402 {dimension_numbers = #tpu.dot_dimension_numbers<[1], [0], [0], [1], [0, 0, 1, 1], [], []>} : vector<2x64xf32>, vector<64x256xf32>, vector<2x256xf32> -> vector<2x256xf32>
    %350 = arith.addf %344, %349 : vector<2x256xf32>
    %c0_403 = arith.constant 0 : index
    %c33 = arith.constant 33 : index
    %c0_404 = arith.constant 0 : index
    %351 = vector.load %arg15[%c0_403, %c33, %c0_404] : memref<2x80x64xf32, #tpu.memory_space<vmem>>, vector<2x1x64xf32>
    %352 = vector.shape_cast %351 : vector<2x1x64xf32> to vector<2x64xf32>
    %c21 = arith.constant 21 : index
    %c0_405 = arith.constant 0 : index
    %c0_406 = arith.constant 0 : index
    %353 = vector.load %arg8[%c21, %c0_405, %c0_406] : memref<49x64x256xf32, #tpu.memory_space<vmem>>, vector<1x64x256xf32>
    %354 = vector.shape_cast %353 : vector<1x64x256xf32> to vector<64x256xf32>
    %cst_407 = arith.constant dense<0.000000e+00> : vector<2x256xf32>
    %355 = tpu.matmul %352, %354, %cst_407 {dimension_numbers = #tpu.dot_dimension_numbers<[1], [0], [0], [1], [0, 0, 1, 1], [], []>} : vector<2x64xf32>, vector<64x256xf32>, vector<2x256xf32> -> vector<2x256xf32>
    %356 = arith.addf %350, %355 : vector<2x256xf32>
    %c0_408 = arith.constant 0 : index
    %c34 = arith.constant 34 : index
    %c0_409 = arith.constant 0 : index
    %357 = vector.load %arg15[%c0_408, %c34, %c0_409] : memref<2x80x64xf32, #tpu.memory_space<vmem>>, vector<2x1x64xf32>
    %358 = vector.shape_cast %357 : vector<2x1x64xf32> to vector<2x64xf32>
    %c22_410 = arith.constant 22 : index
    %c0_411 = arith.constant 0 : index
    %c0_412 = arith.constant 0 : index
    %359 = vector.load %arg8[%c22_410, %c0_411, %c0_412] : memref<49x64x256xf32, #tpu.memory_space<vmem>>, vector<1x64x256xf32>
    %360 = vector.shape_cast %359 : vector<1x64x256xf32> to vector<64x256xf32>
    %cst_413 = arith.constant dense<0.000000e+00> : vector<2x256xf32>
    %361 = tpu.matmul %358, %360, %cst_413 {dimension_numbers = #tpu.dot_dimension_numbers<[1], [0], [0], [1], [0, 0, 1, 1], [], []>} : vector<2x64xf32>, vector<64x256xf32>, vector<2x256xf32> -> vector<2x256xf32>
    %362 = arith.addf %356, %361 : vector<2x256xf32>
    %c0_414 = arith.constant 0 : index
    %c35 = arith.constant 35 : index
    %c0_415 = arith.constant 0 : index
    %363 = vector.load %arg15[%c0_414, %c35, %c0_415] : memref<2x80x64xf32, #tpu.memory_space<vmem>>, vector<2x1x64xf32>
    %364 = vector.shape_cast %363 : vector<2x1x64xf32> to vector<2x64xf32>
    %c23_416 = arith.constant 23 : index
    %c0_417 = arith.constant 0 : index
    %c0_418 = arith.constant 0 : index
    %365 = vector.load %arg8[%c23_416, %c0_417, %c0_418] : memref<49x64x256xf32, #tpu.memory_space<vmem>>, vector<1x64x256xf32>
    %366 = vector.shape_cast %365 : vector<1x64x256xf32> to vector<64x256xf32>
    %cst_419 = arith.constant dense<0.000000e+00> : vector<2x256xf32>
    %367 = tpu.matmul %364, %366, %cst_419 {dimension_numbers = #tpu.dot_dimension_numbers<[1], [0], [0], [1], [0, 0, 1, 1], [], []>} : vector<2x64xf32>, vector<64x256xf32>, vector<2x256xf32> -> vector<2x256xf32>
    %368 = arith.addf %362, %367 : vector<2x256xf32>
    %c0_420 = arith.constant 0 : index
    %c36 = arith.constant 36 : index
    %c0_421 = arith.constant 0 : index
    %369 = vector.load %arg15[%c0_420, %c36, %c0_421] : memref<2x80x64xf32, #tpu.memory_space<vmem>>, vector<2x1x64xf32>
    %370 = vector.shape_cast %369 : vector<2x1x64xf32> to vector<2x64xf32>
    %c24_422 = arith.constant 24 : index
    %c0_423 = arith.constant 0 : index
    %c0_424 = arith.constant 0 : index
    %371 = vector.load %arg8[%c24_422, %c0_423, %c0_424] : memref<49x64x256xf32, #tpu.memory_space<vmem>>, vector<1x64x256xf32>
    %372 = vector.shape_cast %371 : vector<1x64x256xf32> to vector<64x256xf32>
    %cst_425 = arith.constant dense<0.000000e+00> : vector<2x256xf32>
    %373 = tpu.matmul %370, %372, %cst_425 {dimension_numbers = #tpu.dot_dimension_numbers<[1], [0], [0], [1], [0, 0, 1, 1], [], []>} : vector<2x64xf32>, vector<64x256xf32>, vector<2x256xf32> -> vector<2x256xf32>
    %374 = arith.addf %368, %373 : vector<2x256xf32>
    %c0_426 = arith.constant 0 : index
    %c37 = arith.constant 37 : index
    %c0_427 = arith.constant 0 : index
    %375 = vector.load %arg15[%c0_426, %c37, %c0_427] : memref<2x80x64xf32, #tpu.memory_space<vmem>>, vector<2x1x64xf32>
    %376 = vector.shape_cast %375 : vector<2x1x64xf32> to vector<2x64xf32>
    %c25_428 = arith.constant 25 : index
    %c0_429 = arith.constant 0 : index
    %c0_430 = arith.constant 0 : index
    %377 = vector.load %arg8[%c25_428, %c0_429, %c0_430] : memref<49x64x256xf32, #tpu.memory_space<vmem>>, vector<1x64x256xf32>
    %378 = vector.shape_cast %377 : vector<1x64x256xf32> to vector<64x256xf32>
    %cst_431 = arith.constant dense<0.000000e+00> : vector<2x256xf32>
    %379 = tpu.matmul %376, %378, %cst_431 {dimension_numbers = #tpu.dot_dimension_numbers<[1], [0], [0], [1], [0, 0, 1, 1], [], []>} : vector<2x64xf32>, vector<64x256xf32>, vector<2x256xf32> -> vector<2x256xf32>
    %380 = arith.addf %374, %379 : vector<2x256xf32>
    %c0_432 = arith.constant 0 : index
    %c38 = arith.constant 38 : index
    %c0_433 = arith.constant 0 : index
    %381 = vector.load %arg15[%c0_432, %c38, %c0_433] : memref<2x80x64xf32, #tpu.memory_space<vmem>>, vector<2x1x64xf32>
    %382 = vector.shape_cast %381 : vector<2x1x64xf32> to vector<2x64xf32>
    %c26_434 = arith.constant 26 : index
    %c0_435 = arith.constant 0 : index
    %c0_436 = arith.constant 0 : index
    %383 = vector.load %arg8[%c26_434, %c0_435, %c0_436] : memref<49x64x256xf32, #tpu.memory_space<vmem>>, vector<1x64x256xf32>
    %384 = vector.shape_cast %383 : vector<1x64x256xf32> to vector<64x256xf32>
    %cst_437 = arith.constant dense<0.000000e+00> : vector<2x256xf32>
    %385 = tpu.matmul %382, %384, %cst_437 {dimension_numbers = #tpu.dot_dimension_numbers<[1], [0], [0], [1], [0, 0, 1, 1], [], []>} : vector<2x64xf32>, vector<64x256xf32>, vector<2x256xf32> -> vector<2x256xf32>
    %386 = arith.addf %380, %385 : vector<2x256xf32>
    %c0_438 = arith.constant 0 : index
    %c39 = arith.constant 39 : index
    %c0_439 = arith.constant 0 : index
    %387 = vector.load %arg15[%c0_438, %c39, %c0_439] : memref<2x80x64xf32, #tpu.memory_space<vmem>>, vector<2x1x64xf32>
    %388 = vector.shape_cast %387 : vector<2x1x64xf32> to vector<2x64xf32>
    %c27_440 = arith.constant 27 : index
    %c0_441 = arith.constant 0 : index
    %c0_442 = arith.constant 0 : index
    %389 = vector.load %arg8[%c27_440, %c0_441, %c0_442] : memref<49x64x256xf32, #tpu.memory_space<vmem>>, vector<1x64x256xf32>
    %390 = vector.shape_cast %389 : vector<1x64x256xf32> to vector<64x256xf32>
    %cst_443 = arith.constant dense<0.000000e+00> : vector<2x256xf32>
    %391 = tpu.matmul %388, %390, %cst_443 {dimension_numbers = #tpu.dot_dimension_numbers<[1], [0], [0], [1], [0, 0, 1, 1], [], []>} : vector<2x64xf32>, vector<64x256xf32>, vector<2x256xf32> -> vector<2x256xf32>
    %392 = arith.addf %386, %391 : vector<2x256xf32>
    %c0_444 = arith.constant 0 : index
    %c44 = arith.constant 44 : index
    %c0_445 = arith.constant 0 : index
    %393 = vector.load %arg15[%c0_444, %c44, %c0_445] : memref<2x80x64xf32, #tpu.memory_space<vmem>>, vector<2x1x64xf32>
    %394 = vector.shape_cast %393 : vector<2x1x64xf32> to vector<2x64xf32>
    %c28_446 = arith.constant 28 : index
    %c0_447 = arith.constant 0 : index
    %c0_448 = arith.constant 0 : index
    %395 = vector.load %arg8[%c28_446, %c0_447, %c0_448] : memref<49x64x256xf32, #tpu.memory_space<vmem>>, vector<1x64x256xf32>
    %396 = vector.shape_cast %395 : vector<1x64x256xf32> to vector<64x256xf32>
    %cst_449 = arith.constant dense<0.000000e+00> : vector<2x256xf32>
    %397 = tpu.matmul %394, %396, %cst_449 {dimension_numbers = #tpu.dot_dimension_numbers<[1], [0], [0], [1], [0, 0, 1, 1], [], []>} : vector<2x64xf32>, vector<64x256xf32>, vector<2x256xf32> -> vector<2x256xf32>
    %398 = arith.addf %392, %397 : vector<2x256xf32>
    %c0_450 = arith.constant 0 : index
    %c45 = arith.constant 45 : index
    %c0_451 = arith.constant 0 : index
    %399 = vector.load %arg15[%c0_450, %c45, %c0_451] : memref<2x80x64xf32, #tpu.memory_space<vmem>>, vector<2x1x64xf32>
    %400 = vector.shape_cast %399 : vector<2x1x64xf32> to vector<2x64xf32>
    %c29 = arith.constant 29 : index
    %c0_452 = arith.constant 0 : index
    %c0_453 = arith.constant 0 : index
    %401 = vector.load %arg8[%c29, %c0_452, %c0_453] : memref<49x64x256xf32, #tpu.memory_space<vmem>>, vector<1x64x256xf32>
    %402 = vector.shape_cast %401 : vector<1x64x256xf32> to vector<64x256xf32>
    %cst_454 = arith.constant dense<0.000000e+00> : vector<2x256xf32>
    %403 = tpu.matmul %400, %402, %cst_454 {dimension_numbers = #tpu.dot_dimension_numbers<[1], [0], [0], [1], [0, 0, 1, 1], [], []>} : vector<2x64xf32>, vector<64x256xf32>, vector<2x256xf32> -> vector<2x256xf32>
    %404 = arith.addf %398, %403 : vector<2x256xf32>
    %c0_455 = arith.constant 0 : index
    %c46 = arith.constant 46 : index
    %c0_456 = arith.constant 0 : index
    %405 = vector.load %arg15[%c0_455, %c46, %c0_456] : memref<2x80x64xf32, #tpu.memory_space<vmem>>, vector<2x1x64xf32>
    %406 = vector.shape_cast %405 : vector<2x1x64xf32> to vector<2x64xf32>
    %c30 = arith.constant 30 : index
    %c0_457 = arith.constant 0 : index
    %c0_458 = arith.constant 0 : index
    %407 = vector.load %arg8[%c30, %c0_457, %c0_458] : memref<49x64x256xf32, #tpu.memory_space<vmem>>, vector<1x64x256xf32>
    %408 = vector.shape_cast %407 : vector<1x64x256xf32> to vector<64x256xf32>
    %cst_459 = arith.constant dense<0.000000e+00> : vector<2x256xf32>
    %409 = tpu.matmul %406, %408, %cst_459 {dimension_numbers = #tpu.dot_dimension_numbers<[1], [0], [0], [1], [0, 0, 1, 1], [], []>} : vector<2x64xf32>, vector<64x256xf32>, vector<2x256xf32> -> vector<2x256xf32>
    %410 = arith.addf %404, %409 : vector<2x256xf32>
    %c0_460 = arith.constant 0 : index
    %c47 = arith.constant 47 : index
    %c0_461 = arith.constant 0 : index
    %411 = vector.load %arg15[%c0_460, %c47, %c0_461] : memref<2x80x64xf32, #tpu.memory_space<vmem>>, vector<2x1x64xf32>
    %412 = vector.shape_cast %411 : vector<2x1x64xf32> to vector<2x64xf32>
    %c31 = arith.constant 31 : index
    %c0_462 = arith.constant 0 : index
    %c0_463 = arith.constant 0 : index
    %413 = vector.load %arg8[%c31, %c0_462, %c0_463] : memref<49x64x256xf32, #tpu.memory_space<vmem>>, vector<1x64x256xf32>
    %414 = vector.shape_cast %413 : vector<1x64x256xf32> to vector<64x256xf32>
    %cst_464 = arith.constant dense<0.000000e+00> : vector<2x256xf32>
    %415 = tpu.matmul %412, %414, %cst_464 {dimension_numbers = #tpu.dot_dimension_numbers<[1], [0], [0], [1], [0, 0, 1, 1], [], []>} : vector<2x64xf32>, vector<64x256xf32>, vector<2x256xf32> -> vector<2x256xf32>
    %416 = arith.addf %410, %415 : vector<2x256xf32>
    %c0_465 = arith.constant 0 : index
    %c48 = arith.constant 48 : index
    %c0_466 = arith.constant 0 : index
    %417 = vector.load %arg15[%c0_465, %c48, %c0_466] : memref<2x80x64xf32, #tpu.memory_space<vmem>>, vector<2x1x64xf32>
    %418 = vector.shape_cast %417 : vector<2x1x64xf32> to vector<2x64xf32>
    %c32 = arith.constant 32 : index
    %c0_467 = arith.constant 0 : index
    %c0_468 = arith.constant 0 : index
    %419 = vector.load %arg8[%c32, %c0_467, %c0_468] : memref<49x64x256xf32, #tpu.memory_space<vmem>>, vector<1x64x256xf32>
    %420 = vector.shape_cast %419 : vector<1x64x256xf32> to vector<64x256xf32>
    %cst_469 = arith.constant dense<0.000000e+00> : vector<2x256xf32>
    %421 = tpu.matmul %418, %420, %cst_469 {dimension_numbers = #tpu.dot_dimension_numbers<[1], [0], [0], [1], [0, 0, 1, 1], [], []>} : vector<2x64xf32>, vector<64x256xf32>, vector<2x256xf32> -> vector<2x256xf32>
    %422 = arith.addf %416, %421 : vector<2x256xf32>
    %c0_470 = arith.constant 0 : index
    %c49 = arith.constant 49 : index
    %c0_471 = arith.constant 0 : index
    %423 = vector.load %arg15[%c0_470, %c49, %c0_471] : memref<2x80x64xf32, #tpu.memory_space<vmem>>, vector<2x1x64xf32>
    %424 = vector.shape_cast %423 : vector<2x1x64xf32> to vector<2x64xf32>
    %c33_472 = arith.constant 33 : index
    %c0_473 = arith.constant 0 : index
    %c0_474 = arith.constant 0 : index
    %425 = vector.load %arg8[%c33_472, %c0_473, %c0_474] : memref<49x64x256xf32, #tpu.memory_space<vmem>>, vector<1x64x256xf32>
    %426 = vector.shape_cast %425 : vector<1x64x256xf32> to vector<64x256xf32>
    %cst_475 = arith.constant dense<0.000000e+00> : vector<2x256xf32>
    %427 = tpu.matmul %424, %426, %cst_475 {dimension_numbers = #tpu.dot_dimension_numbers<[1], [0], [0], [1], [0, 0, 1, 1], [], []>} : vector<2x64xf32>, vector<64x256xf32>, vector<2x256xf32> -> vector<2x256xf32>
    %428 = arith.addf %422, %427 : vector<2x256xf32>
    %c0_476 = arith.constant 0 : index
    %c50 = arith.constant 50 : index
    %c0_477 = arith.constant 0 : index
    %429 = vector.load %arg15[%c0_476, %c50, %c0_477] : memref<2x80x64xf32, #tpu.memory_space<vmem>>, vector<2x1x64xf32>
    %430 = vector.shape_cast %429 : vector<2x1x64xf32> to vector<2x64xf32>
    %c34_478 = arith.constant 34 : index
    %c0_479 = arith.constant 0 : index
    %c0_480 = arith.constant 0 : index
    %431 = vector.load %arg8[%c34_478, %c0_479, %c0_480] : memref<49x64x256xf32, #tpu.memory_space<vmem>>, vector<1x64x256xf32>
    %432 = vector.shape_cast %431 : vector<1x64x256xf32> to vector<64x256xf32>
    %cst_481 = arith.constant dense<0.000000e+00> : vector<2x256xf32>
    %433 = tpu.matmul %430, %432, %cst_481 {dimension_numbers = #tpu.dot_dimension_numbers<[1], [0], [0], [1], [0, 0, 1, 1], [], []>} : vector<2x64xf32>, vector<64x256xf32>, vector<2x256xf32> -> vector<2x256xf32>
    %434 = arith.addf %428, %433 : vector<2x256xf32>
    %c0_482 = arith.constant 0 : index
    %c55 = arith.constant 55 : index
    %c0_483 = arith.constant 0 : index
    %435 = vector.load %arg15[%c0_482, %c55, %c0_483] : memref<2x80x64xf32, #tpu.memory_space<vmem>>, vector<2x1x64xf32>
    %436 = vector.shape_cast %435 : vector<2x1x64xf32> to vector<2x64xf32>
    %c35_484 = arith.constant 35 : index
    %c0_485 = arith.constant 0 : index
    %c0_486 = arith.constant 0 : index
    %437 = vector.load %arg8[%c35_484, %c0_485, %c0_486] : memref<49x64x256xf32, #tpu.memory_space<vmem>>, vector<1x64x256xf32>
    %438 = vector.shape_cast %437 : vector<1x64x256xf32> to vector<64x256xf32>
    %cst_487 = arith.constant dense<0.000000e+00> : vector<2x256xf32>
    %439 = tpu.matmul %436, %438, %cst_487 {dimension_numbers = #tpu.dot_dimension_numbers<[1], [0], [0], [1], [0, 0, 1, 1], [], []>} : vector<2x64xf32>, vector<64x256xf32>, vector<2x256xf32> -> vector<2x256xf32>
    %440 = arith.addf %434, %439 : vector<2x256xf32>
    %c0_488 = arith.constant 0 : index
    %c56 = arith.constant 56 : index
    %c0_489 = arith.constant 0 : index
    %441 = vector.load %arg15[%c0_488, %c56, %c0_489] : memref<2x80x64xf32, #tpu.memory_space<vmem>>, vector<2x1x64xf32>
    %442 = vector.shape_cast %441 : vector<2x1x64xf32> to vector<2x64xf32>
    %c36_490 = arith.constant 36 : index
    %c0_491 = arith.constant 0 : index
    %c0_492 = arith.constant 0 : index
    %443 = vector.load %arg8[%c36_490, %c0_491, %c0_492] : memref<49x64x256xf32, #tpu.memory_space<vmem>>, vector<1x64x256xf32>
    %444 = vector.shape_cast %443 : vector<1x64x256xf32> to vector<64x256xf32>
    %cst_493 = arith.constant dense<0.000000e+00> : vector<2x256xf32>
    %445 = tpu.matmul %442, %444, %cst_493 {dimension_numbers = #tpu.dot_dimension_numbers<[1], [0], [0], [1], [0, 0, 1, 1], [], []>} : vector<2x64xf32>, vector<64x256xf32>, vector<2x256xf32> -> vector<2x256xf32>
    %446 = arith.addf %440, %445 : vector<2x256xf32>
    %c0_494 = arith.constant 0 : index
    %c57 = arith.constant 57 : index
    %c0_495 = arith.constant 0 : index
    %447 = vector.load %arg15[%c0_494, %c57, %c0_495] : memref<2x80x64xf32, #tpu.memory_space<vmem>>, vector<2x1x64xf32>
    %448 = vector.shape_cast %447 : vector<2x1x64xf32> to vector<2x64xf32>
    %c37_496 = arith.constant 37 : index
    %c0_497 = arith.constant 0 : index
    %c0_498 = arith.constant 0 : index
    %449 = vector.load %arg8[%c37_496, %c0_497, %c0_498] : memref<49x64x256xf32, #tpu.memory_space<vmem>>, vector<1x64x256xf32>
    %450 = vector.shape_cast %449 : vector<1x64x256xf32> to vector<64x256xf32>
    %cst_499 = arith.constant dense<0.000000e+00> : vector<2x256xf32>
    %451 = tpu.matmul %448, %450, %cst_499 {dimension_numbers = #tpu.dot_dimension_numbers<[1], [0], [0], [1], [0, 0, 1, 1], [], []>} : vector<2x64xf32>, vector<64x256xf32>, vector<2x256xf32> -> vector<2x256xf32>
    %452 = arith.addf %446, %451 : vector<2x256xf32>
    %c0_500 = arith.constant 0 : index
    %c58 = arith.constant 58 : index
    %c0_501 = arith.constant 0 : index
    %453 = vector.load %arg15[%c0_500, %c58, %c0_501] : memref<2x80x64xf32, #tpu.memory_space<vmem>>, vector<2x1x64xf32>
    %454 = vector.shape_cast %453 : vector<2x1x64xf32> to vector<2x64xf32>
    %c38_502 = arith.constant 38 : index
    %c0_503 = arith.constant 0 : index
    %c0_504 = arith.constant 0 : index
    %455 = vector.load %arg8[%c38_502, %c0_503, %c0_504] : memref<49x64x256xf32, #tpu.memory_space<vmem>>, vector<1x64x256xf32>
    %456 = vector.shape_cast %455 : vector<1x64x256xf32> to vector<64x256xf32>
    %cst_505 = arith.constant dense<0.000000e+00> : vector<2x256xf32>
    %457 = tpu.matmul %454, %456, %cst_505 {dimension_numbers = #tpu.dot_dimension_numbers<[1], [0], [0], [1], [0, 0, 1, 1], [], []>} : vector<2x64xf32>, vector<64x256xf32>, vector<2x256xf32> -> vector<2x256xf32>
    %458 = arith.addf %452, %457 : vector<2x256xf32>
    %c0_506 = arith.constant 0 : index
    %c59 = arith.constant 59 : index
    %c0_507 = arith.constant 0 : index
    %459 = vector.load %arg15[%c0_506, %c59, %c0_507] : memref<2x80x64xf32, #tpu.memory_space<vmem>>, vector<2x1x64xf32>
    %460 = vector.shape_cast %459 : vector<2x1x64xf32> to vector<2x64xf32>
    %c39_508 = arith.constant 39 : index
    %c0_509 = arith.constant 0 : index
    %c0_510 = arith.constant 0 : index
    %461 = vector.load %arg8[%c39_508, %c0_509, %c0_510] : memref<49x64x256xf32, #tpu.memory_space<vmem>>, vector<1x64x256xf32>
    %462 = vector.shape_cast %461 : vector<1x64x256xf32> to vector<64x256xf32>
    %cst_511 = arith.constant dense<0.000000e+00> : vector<2x256xf32>
    %463 = tpu.matmul %460, %462, %cst_511 {dimension_numbers = #tpu.dot_dimension_numbers<[1], [0], [0], [1], [0, 0, 1, 1], [], []>} : vector<2x64xf32>, vector<64x256xf32>, vector<2x256xf32> -> vector<2x256xf32>
    %464 = arith.addf %458, %463 : vector<2x256xf32>
    %c0_512 = arith.constant 0 : index
    %c60 = arith.constant 60 : index
    %c0_513 = arith.constant 0 : index
    %465 = vector.load %arg15[%c0_512, %c60, %c0_513] : memref<2x80x64xf32, #tpu.memory_space<vmem>>, vector<2x1x64xf32>
    %466 = vector.shape_cast %465 : vector<2x1x64xf32> to vector<2x64xf32>
    %c40 = arith.constant 40 : index
    %c0_514 = arith.constant 0 : index
    %c0_515 = arith.constant 0 : index
    %467 = vector.load %arg8[%c40, %c0_514, %c0_515] : memref<49x64x256xf32, #tpu.memory_space<vmem>>, vector<1x64x256xf32>
    %468 = vector.shape_cast %467 : vector<1x64x256xf32> to vector<64x256xf32>
    %cst_516 = arith.constant dense<0.000000e+00> : vector<2x256xf32>
    %469 = tpu.matmul %466, %468, %cst_516 {dimension_numbers = #tpu.dot_dimension_numbers<[1], [0], [0], [1], [0, 0, 1, 1], [], []>} : vector<2x64xf32>, vector<64x256xf32>, vector<2x256xf32> -> vector<2x256xf32>
    %470 = arith.addf %464, %469 : vector<2x256xf32>
    %c0_517 = arith.constant 0 : index
    %c61 = arith.constant 61 : index
    %c0_518 = arith.constant 0 : index
    %471 = vector.load %arg15[%c0_517, %c61, %c0_518] : memref<2x80x64xf32, #tpu.memory_space<vmem>>, vector<2x1x64xf32>
    %472 = vector.shape_cast %471 : vector<2x1x64xf32> to vector<2x64xf32>
    %c41 = arith.constant 41 : index
    %c0_519 = arith.constant 0 : index
    %c0_520 = arith.constant 0 : index
    %473 = vector.load %arg8[%c41, %c0_519, %c0_520] : memref<49x64x256xf32, #tpu.memory_space<vmem>>, vector<1x64x256xf32>
    %474 = vector.shape_cast %473 : vector<1x64x256xf32> to vector<64x256xf32>
    %cst_521 = arith.constant dense<0.000000e+00> : vector<2x256xf32>
    %475 = tpu.matmul %472, %474, %cst_521 {dimension_numbers = #tpu.dot_dimension_numbers<[1], [0], [0], [1], [0, 0, 1, 1], [], []>} : vector<2x64xf32>, vector<64x256xf32>, vector<2x256xf32> -> vector<2x256xf32>
    %476 = arith.addf %470, %475 : vector<2x256xf32>
    %c0_522 = arith.constant 0 : index
    %c66 = arith.constant 66 : index
    %c0_523 = arith.constant 0 : index
    %477 = vector.load %arg15[%c0_522, %c66, %c0_523] : memref<2x80x64xf32, #tpu.memory_space<vmem>>, vector<2x1x64xf32>
    %478 = vector.shape_cast %477 : vector<2x1x64xf32> to vector<2x64xf32>
    %c42 = arith.constant 42 : index
    %c0_524 = arith.constant 0 : index
    %c0_525 = arith.constant 0 : index
    %479 = vector.load %arg8[%c42, %c0_524, %c0_525] : memref<49x64x256xf32, #tpu.memory_space<vmem>>, vector<1x64x256xf32>
    %480 = vector.shape_cast %479 : vector<1x64x256xf32> to vector<64x256xf32>
    %cst_526 = arith.constant dense<0.000000e+00> : vector<2x256xf32>
    %481 = tpu.matmul %478, %480, %cst_526 {dimension_numbers = #tpu.dot_dimension_numbers<[1], [0], [0], [1], [0, 0, 1, 1], [], []>} : vector<2x64xf32>, vector<64x256xf32>, vector<2x256xf32> -> vector<2x256xf32>
    %482 = arith.addf %476, %481 : vector<2x256xf32>
    %c0_527 = arith.constant 0 : index
    %c67 = arith.constant 67 : index
    %c0_528 = arith.constant 0 : index
    %483 = vector.load %arg15[%c0_527, %c67, %c0_528] : memref<2x80x64xf32, #tpu.memory_space<vmem>>, vector<2x1x64xf32>
    %484 = vector.shape_cast %483 : vector<2x1x64xf32> to vector<2x64xf32>
    %c43 = arith.constant 43 : index
    %c0_529 = arith.constant 0 : index
    %c0_530 = arith.constant 0 : index
    %485 = vector.load %arg8[%c43, %c0_529, %c0_530] : memref<49x64x256xf32, #tpu.memory_space<vmem>>, vector<1x64x256xf32>
    %486 = vector.shape_cast %485 : vector<1x64x256xf32> to vector<64x256xf32>
    %cst_531 = arith.constant dense<0.000000e+00> : vector<2x256xf32>
    %487 = tpu.matmul %484, %486, %cst_531 {dimension_numbers = #tpu.dot_dimension_numbers<[1], [0], [0], [1], [0, 0, 1, 1], [], []>} : vector<2x64xf32>, vector<64x256xf32>, vector<2x256xf32> -> vector<2x256xf32>
    %488 = arith.addf %482, %487 : vector<2x256xf32>
    %c0_532 = arith.constant 0 : index
    %c68 = arith.constant 68 : index
    %c0_533 = arith.constant 0 : index
    %489 = vector.load %arg15[%c0_532, %c68, %c0_533] : memref<2x80x64xf32, #tpu.memory_space<vmem>>, vector<2x1x64xf32>
    %490 = vector.shape_cast %489 : vector<2x1x64xf32> to vector<2x64xf32>
    %c44_534 = arith.constant 44 : index
    %c0_535 = arith.constant 0 : index
    %c0_536 = arith.constant 0 : index
    %491 = vector.load %arg8[%c44_534, %c0_535, %c0_536] : memref<49x64x256xf32, #tpu.memory_space<vmem>>, vector<1x64x256xf32>
    %492 = vector.shape_cast %491 : vector<1x64x256xf32> to vector<64x256xf32>
    %cst_537 = arith.constant dense<0.000000e+00> : vector<2x256xf32>
    %493 = tpu.matmul %490, %492, %cst_537 {dimension_numbers = #tpu.dot_dimension_numbers<[1], [0], [0], [1], [0, 0, 1, 1], [], []>} : vector<2x64xf32>, vector<64x256xf32>, vector<2x256xf32> -> vector<2x256xf32>
    %494 = arith.addf %488, %493 : vector<2x256xf32>
    %c0_538 = arith.constant 0 : index
    %c69 = arith.constant 69 : index
    %c0_539 = arith.constant 0 : index
    %495 = vector.load %arg15[%c0_538, %c69, %c0_539] : memref<2x80x64xf32, #tpu.memory_space<vmem>>, vector<2x1x64xf32>
    %496 = vector.shape_cast %495 : vector<2x1x64xf32> to vector<2x64xf32>
    %c45_540 = arith.constant 45 : index
    %c0_541 = arith.constant 0 : index
    %c0_542 = arith.constant 0 : index
    %497 = vector.load %arg8[%c45_540, %c0_541, %c0_542] : memref<49x64x256xf32, #tpu.memory_space<vmem>>, vector<1x64x256xf32>
    %498 = vector.shape_cast %497 : vector<1x64x256xf32> to vector<64x256xf32>
    %cst_543 = arith.constant dense<0.000000e+00> : vector<2x256xf32>
    %499 = tpu.matmul %496, %498, %cst_543 {dimension_numbers = #tpu.dot_dimension_numbers<[1], [0], [0], [1], [0, 0, 1, 1], [], []>} : vector<2x64xf32>, vector<64x256xf32>, vector<2x256xf32> -> vector<2x256xf32>
    %500 = arith.addf %494, %499 : vector<2x256xf32>
    %c0_544 = arith.constant 0 : index
    %c70 = arith.constant 70 : index
    %c0_545 = arith.constant 0 : index
    %501 = vector.load %arg15[%c0_544, %c70, %c0_545] : memref<2x80x64xf32, #tpu.memory_space<vmem>>, vector<2x1x64xf32>
    %502 = vector.shape_cast %501 : vector<2x1x64xf32> to vector<2x64xf32>
    %c46_546 = arith.constant 46 : index
    %c0_547 = arith.constant 0 : index
    %c0_548 = arith.constant 0 : index
    %503 = vector.load %arg8[%c46_546, %c0_547, %c0_548] : memref<49x64x256xf32, #tpu.memory_space<vmem>>, vector<1x64x256xf32>
    %504 = vector.shape_cast %503 : vector<1x64x256xf32> to vector<64x256xf32>
    %cst_549 = arith.constant dense<0.000000e+00> : vector<2x256xf32>
    %505 = tpu.matmul %502, %504, %cst_549 {dimension_numbers = #tpu.dot_dimension_numbers<[1], [0], [0], [1], [0, 0, 1, 1], [], []>} : vector<2x64xf32>, vector<64x256xf32>, vector<2x256xf32> -> vector<2x256xf32>
    %506 = arith.addf %500, %505 : vector<2x256xf32>
    %c0_550 = arith.constant 0 : index
    %c71 = arith.constant 71 : index
    %c0_551 = arith.constant 0 : index
    %507 = vector.load %arg15[%c0_550, %c71, %c0_551] : memref<2x80x64xf32, #tpu.memory_space<vmem>>, vector<2x1x64xf32>
    %508 = vector.shape_cast %507 : vector<2x1x64xf32> to vector<2x64xf32>
    %c47_552 = arith.constant 47 : index
    %c0_553 = arith.constant 0 : index
    %c0_554 = arith.constant 0 : index
    %509 = vector.load %arg8[%c47_552, %c0_553, %c0_554] : memref<49x64x256xf32, #tpu.memory_space<vmem>>, vector<1x64x256xf32>
    %510 = vector.shape_cast %509 : vector<1x64x256xf32> to vector<64x256xf32>
    %cst_555 = arith.constant dense<0.000000e+00> : vector<2x256xf32>
    %511 = tpu.matmul %508, %510, %cst_555 {dimension_numbers = #tpu.dot_dimension_numbers<[1], [0], [0], [1], [0, 0, 1, 1], [], []>} : vector<2x64xf32>, vector<64x256xf32>, vector<2x256xf32> -> vector<2x256xf32>
    %512 = arith.addf %506, %511 : vector<2x256xf32>
    %c0_556 = arith.constant 0 : index
    %c72 = arith.constant 72 : index
    %c0_557 = arith.constant 0 : index
    %513 = vector.load %arg15[%c0_556, %c72, %c0_557] : memref<2x80x64xf32, #tpu.memory_space<vmem>>, vector<2x1x64xf32>
    %514 = vector.shape_cast %513 : vector<2x1x64xf32> to vector<2x64xf32>
    %c48_558 = arith.constant 48 : index
    %c0_559 = arith.constant 0 : index
    %c0_560 = arith.constant 0 : index
    %515 = vector.load %arg8[%c48_558, %c0_559, %c0_560] : memref<49x64x256xf32, #tpu.memory_space<vmem>>, vector<1x64x256xf32>
    %516 = vector.shape_cast %515 : vector<1x64x256xf32> to vector<64x256xf32>
    %cst_561 = arith.constant dense<0.000000e+00> : vector<2x256xf32>
    %517 = tpu.matmul %514, %516, %cst_561 {dimension_numbers = #tpu.dot_dimension_numbers<[1], [0], [0], [1], [0, 0, 1, 1], [], []>} : vector<2x64xf32>, vector<64x256xf32>, vector<2x256xf32> -> vector<2x256xf32>
    %518 = arith.addf %512, %517 : vector<2x256xf32>
    %c0_562 = arith.constant 0 : index
    %c0_563 = arith.constant 0 : index
    %519 = vector.load %arg9[%c0_562, %c0_563] : memref<1x256xf32, #tpu.memory_space<vmem>>, vector<1x256xf32>
    %520 = vector.broadcast %519 : vector<1x256xf32> to vector<2x256xf32>
    %521 = arith.addf %518, %520 : vector<2x256xf32>
    %cst_564 = arith.constant 0.000000e+00 : f32
    %522 = vector.broadcast %cst_564 : f32 to vector<2x256xf32>
    %523 = arith.maximumf %521, %522 : vector<2x256xf32>
    %c0_565 = arith.constant 0 : index
    %c0_566 = arith.constant 0 : index
    %524 = vector.load %arg10[%c0_565, %c0_566] : memref<1x256xf32, #tpu.memory_space<vmem>>, vector<1x256xf32>
    %525 = vector.broadcast %524 : vector<1x256xf32> to vector<2x256xf32>
    %526 = arith.mulf %523, %525 : vector<2x256xf32>
    %cst_567 = arith.constant dense<0.000000e+00> : vector<2xf32>
    %527 = vector.multi_reduction <add>, %526, %cst_567 [1] : vector<2x256xf32> to vector<2xf32>
    %528 = vector.shape_cast %527 : vector<2xf32> to vector<2x1xf32>
    %c0_568 = arith.constant 0 : index
    %c0_569 = arith.constant 0 : index
    %529 = vector.load %arg11[%c0_568, %c0_569] : memref<1x1xf32, #tpu.memory_space<vmem>>, vector<1x1xf32>
    %530 = vector.broadcast %529 : vector<1x1xf32> to vector<2x1xf32>
    %531 = arith.addf %528, %530 : vector<2x1xf32>
    %532 = vector.shape_cast %531 : vector<2x1xf32> to vector<2x1xf32>
    %533 = vector.broadcast %532 : vector<2x1xf32> to vector<2x128xf32>
    %c0_570 = arith.constant 0 : index
    %c0_571 = arith.constant 0 : index
    %534 = vector.load %arg12[%c0_570, %c0_571] : memref<2x128xf32, #tpu.memory_space<vmem>>, vector<2x128xf32>
    tpu.vector_store %arg12[%c0_570, %c0_571], %533 {strides = array<i32>} : memref<2x128xf32, #tpu.memory_space<vmem>>, vector<2x128xf32>,
    return
  }
  func.func @transform_0(%arg0: i32) -> (i32, i32, i32) {
    %c0_i32 = arith.constant 0 : i32
    %c0_i32_0 = arith.constant 0 : i32
    %c0_i32_1 = arith.constant 0 : i32
    return %arg0, %c0_i32, %c0_i32_0 : i32, i32, i32
  }
  func.func @transform_1(%arg0: i32) -> (i32, i32, i32, i32) {
    %c0_i32 = arith.constant 0 : i32
    %c0_i32_0 = arith.constant 0 : i32
    %c0_i32_1 = arith.constant 0 : i32
    %c0_i32_2 = arith.constant 0 : i32
    %c0_i32_3 = arith.constant 0 : i32
    return %c0_i32, %c0_i32_0, %c0_i32_1, %c0_i32_2 : i32, i32, i32, i32
  }
  func.func @transform_2(%arg0: i32) -> (i32, i32) {
    %c0_i32 = arith.constant 0 : i32
    %c0_i32_0 = arith.constant 0 : i32
    %c0_i32_1 = arith.constant 0 : i32
    return %c0_i32, %c0_i32_0 : i32, i32
  }
  func.func @transform_3(%arg0: i32) -> (i32, i32, i32, i32) {
    %c0_i32 = arith.constant 0 : i32
    %c0_i32_0 = arith.constant 0 : i32
    %c0_i32_1 = arith.constant 0 : i32
    %c0_i32_2 = arith.constant 0 : i32
    %c0_i32_3 = arith.constant 0 : i32
    return %c0_i32, %c0_i32_0, %c0_i32_1, %c0_i32_2 : i32, i32, i32, i32
  }
  func.func @transform_4(%arg0: i32) -> (i32, i32) {
    %c0_i32 = arith.constant 0 : i32
    %c0_i32_0 = arith.constant 0 : i32
    %c0_i32_1 = arith.constant 0 : i32
    return %c0_i32, %c0_i32_0 : i32, i32
  }
  func.func @transform_5(%arg0: i32) -> (i32, i32, i32, i32) {
    %c0_i32 = arith.constant 0 : i32
    %c0_i32_0 = arith.constant 0 : i32
    %c0_i32_1 = arith.constant 0 : i32
    %c0_i32_2 = arith.constant 0 : i32
    %c0_i32_3 = arith.constant 0 : i32
    return %c0_i32, %c0_i32_0, %c0_i32_1, %c0_i32_2 : i32, i32, i32, i32
  }
  func.func @transform_6(%arg0: i32) -> (i32, i32) {
    %c0_i32 = arith.constant 0 : i32
    %c0_i32_0 = arith.constant 0 : i32
    %c0_i32_1 = arith.constant 0 : i32
    return %c0_i32, %c0_i32_0 : i32, i32
  }
  func.func @transform_7(%arg0: i32) -> (i32, i32, i32) {
    %c0_i32 = arith.constant 0 : i32
    %c0_i32_0 = arith.constant 0 : i32
    %c0_i32_1 = arith.constant 0 : i32
    %c0_i32_2 = arith.constant 0 : i32
    return %c0_i32, %c0_i32_0, %c0_i32_1 : i32, i32, i32
  }
  func.func @transform_8(%arg0: i32) -> (i32, i32) {
    %c0_i32 = arith.constant 0 : i32
    %c0_i32_0 = arith.constant 0 : i32
    %c0_i32_1 = arith.constant 0 : i32
    return %c0_i32, %c0_i32_0 : i32, i32
  }
  func.func @transform_9(%arg0: i32) -> (i32, i32) {
    %c0_i32 = arith.constant 0 : i32
    %c0_i32_0 = arith.constant 0 : i32
    %c0_i32_1 = arith.constant 0 : i32
    return %c0_i32, %c0_i32_0 : i32, i32
  }
  func.func @transform_10(%arg0: i32) -> (i32, i32) {
    %c0_i32 = arith.constant 0 : i32
    %c0_i32_0 = arith.constant 0 : i32
    %c0_i32_1 = arith.constant 0 : i32
    return %c0_i32, %c0_i32_0 : i32, i32
  }
  func.func @transform_11(%arg0: i32) -> (i32, i32) {
    %c0_i32 = arith.constant 0 : i32
    %c0_i32_0 = arith.constant 0 : i32
    return %arg0, %c0_i32 : i32, i32
  }
}

</mosaic_0001>

<bundles_post_ra>
// kernel: critic_forward.1
= control target key start
LH: loop header
LB: loop body
LE: loop exit
PB: predicated region body
PF: predicated region fallthrough
CT: control target
= control target key end

     0   :  { %vm171_vm0 = vcmask 1046528   ;;  %vm641_vm1 = vcmask 1044480   ;;  %vm930_vm2 = vcmask 1043456   ;;  %vm15637_vm3 = vmmov 0   ;;  %s22174_s1 = inlined_call_operand.vmem [shape: f32[2,2,256,128], index: 1, kind: input, shape index: {}]   ;;  %s22175_s0 = inlined_call_operand.vmem [shape: f32[2,136,256], index: 0, kind: input, shape index: {}]   ;;  %s22176_s3 = inlined_call_operand.vmem [shape: f32[2,2,128,64], index: 3, kind: input, shape index: {}]   ;;  %s22177_s2 = inlined_call_operand.vmem [shape: f32[1,128], index: 2, kind: input, shape index: {}]   ;;  %s22178_s5 = inlined_call_operand.vmem [shape: f32[3,3,64,64], index: 5, kind: input, shape index: {}]   ;;  %s22179_s4 = inlined_call_operand.vmem [shape: f32[1,64], index: 4, kind: input, shape index: {}]   ;;  %s22180_s6 = inlined_call_operand.vmem [shape: f32[1,64], index: 6, kind: input, shape index: {}]   ;;  %s22181_s7 = inlined_call_operand.vmem [shape: f32[49,64,256], index: 7, kind: input, shape index: {}]   ;;  %s22182_s10 = inlined_call_operand.<no memory space> [shape: f32[1,1], index: 10, kind: input, shape index: {}]   ;;  %s22183_s8 = inlined_call_operand.vmem [shape: f32[1,256], index: 8, kind: input, shape index: {}]   ;;  %s22184_s9 = inlined_call_operand.vmem [shape: f32[1,256], index: 9, kind: input, shape index: {}]   ;;  %s22185_s11 = inlined_call_operand.vmem [shape: f32[2,128], index: 11, kind: output, shape index: {}]  }
   0x1   :  { %v11875_v0 = vld [vmem:[%s22174_s1 + $0x1f8] sm:$0xff]  ;;  %v11874_v4 = vld [vmem:[%s22174_s1 + $0x1f0] sm:$0xff]  ;;  %v11873_v8 = vld [vmem:[%s22174_s1 + $0x1e8] sm:$0xff]  ;;  %vm1928_vm4 = vcmask 523264   ;;  %vm7032_vm5 = vcmask 1041409   ;;  %vm11820_vm6 = vcmask 1041408  }
   0x2   :  { %v101_v1 = vld [vmem:[%s22174_s1 + $0xf8] sm:$0xff]  ;;  %13334 = vmatprep.subr.mxu0 %v11875_v0  ;;  %v100_v5 = vld [vmem:[%s22174_s1 + $0xf0] sm:$0xff]  ;;  %v99_v9 = vld [vmem:[%s22174_s1 + $0xe8] sm:$0xff] }
   0x3   :  { %v11859_v2 = vld [vmem:[%s22174_s1 + $0x178] sm:$0xff]  ;;  %13411 = vmatprep.subr.mxu1 %v101_v1  ;;  %v11858_v6 = vld [vmem:[%s22174_s1 + $0x170] sm:$0xff]  ;;  %v11857_v10 = vld [vmem:[%s22174_s1 + $0x168] sm:$0xff] }
   0x4   :  { %v85_v3 = vld [vmem:[%s22174_s1 + $0x78] sm:$0xff]  ;;  %13335 = vmatpush3.msra.mxu0 %v11859_v2  ;;  %v84_v7 = vld [vmem:[%s22174_s1 + $0x70] sm:$0xff]  ;;  %v83_v11 = vld [vmem:[%s22174_s1 + $0x68] sm:$0xff] }
   0x5   :  { %13412 = vmatpush3.msra.mxu1 %v85_v3  ;;  %13336 = vmatprep.subr.mxu0 %v11874_v4  ;;  %v11872_v12 = vld [vmem:[%s22174_s1 + $0x1e0] sm:$0xff]  ;;  %v11871_v16 = vld [vmem:[%s22174_s1 + $0x1d8] sm:$0xff]  ;;  %v11870_v20 = vld [vmem:[%s22174_s1 + $0x1d0] sm:$0xff] }
   0x6   :  { %13413 = vmatprep.subr.mxu1 %v100_v5  ;;  %13337 = vmatpush3.msra.mxu0 %v11858_v6  ;;  %v98_v13 = vld [vmem:[%s22174_s1 + $0xe0] sm:$0xff]  ;;  %v97_v17 = vld [vmem:[%s22174_s1 + $0xd8] sm:$0xff]  ;;  %v96_v21 = vld [vmem:[%s22174_s1 + $0xd0] sm:$0xff] }
   0x7   :  { %13414 = vmatpush3.msra.mxu1 %v84_v7  ;;  %13338 = vmatprep.subr.mxu0 %v11873_v8  ;;  %v11856_v14 = vld [vmem:[%s22174_s1 + $0x160] sm:$0xff]  ;;  %v11855_v18 = vld [vmem:[%s22174_s1 + $0x158] sm:$0xff]  ;;  %v11854_v22 = vld [vmem:[%s22174_s1 + $0x150] sm:$0xff] }
   0x8   :  { %13415 = vmatprep.subr.mxu1 %v99_v9  ;;  %v82_v15 = vld [vmem:[%s22174_s1 + $0x60] sm:$0xff]  ;;  %13339 = vmatpush3.msra.mxu0 %v11857_v10  ;;  %v81_v19 = vld [vmem:[%s22174_s1 + $0x58] sm:$0xff]  ;;  %v80_v23 = vld [vmem:[%s22174_s1 + $0x50] sm:$0xff] }
   0x9   :  { %13416 = vmatpush3.msra.mxu1 %v83_v11  ;;  %13340 = vmatprep.subr.mxu0 %v11872_v12  ;;  %v11869_v24 = vld [vmem:[%s22174_s1 + $0x1c8] sm:$0xff]  ;;  %v11868_v28 = vld [vmem:[%s22174_s1 + $0x1c0] sm:$0xff]  ;;  %v11867_v32 = vld [vmem:[%s22174_s1 + $0x1b8] sm:$0xff] }
   0xa   :  { %13417 = vmatprep.subr.mxu1 %v98_v13  ;;  %13341 = vmatpush3.msra.mxu0 %v11856_v14  ;;  %v95_v25 = vld [vmem:[%s22174_s1 + $0xc8] sm:$0xff]  ;;  %v94_v29 = vld [vmem:[%s22174_s1 + $0xc0] sm:$0xff]  ;;  %v93_v33 = vld [vmem:[%s22174_s1 + $0xb8] sm:$0xff] }
   0xb   :  { %13418 = vmatpush3.msra.mxu1 %v82_v15  ;;  %13342 = vmatprep.subr.mxu0 %v11871_v16  ;;  %v11853_v26 = vld [vmem:[%s22174_s1 + $0x148] sm:$0xff]  ;;  %v11852_v30 = vld [vmem:[%s22174_s1 + $0x140] sm:$0xff]  ;;  %v11851_v34 = vld [vmem:[%s22174_s1 + $0x138] sm:$0xff] }
   0xc   :  { %13419 = vmatprep.subr.mxu1 %v97_v17  ;;  %13343 = vmatpush3.msra.mxu0 %v11855_v18  ;;  %v79_v27 = vld [vmem:[%s22174_s1 + $0x48] sm:$0xff]  ;;  %v78_v31 = vld [vmem:[%s22174_s1 + $0x40] sm:$0xff]  ;;  %v77_v35 = vld [vmem:[%s22174_s1 + $0x38] sm:$0xff] }
   0xd   :  { %13420 = vmatpush3.msra.mxu1 %v81_v19  ;;  %13344 = vmatprep.subr.mxu0 %v11870_v20  ;;  %v11866_v36 = vld [vmem:[%s22174_s1 + $0x1b0] sm:$0xff]  ;;  %v11865_v40 = vld [vmem:[%s22174_s1 + $0x1a8] sm:$0xff]  ;;  %v11864_v44 = vld [vmem:[%s22174_s1 + $0x1a0] sm:$0xff] }
   0xe   :  { %13421 = vmatprep.subr.mxu1 %v96_v21  ;;  %13345 = vmatpush3.msra.mxu0 %v11854_v22  ;;  %v92_v37 = vld [vmem:[%s22174_s1 + $0xb0] sm:$0xff]  ;;  %v91_v41 = vld [vmem:[%s22174_s1 + $0xa8] sm:$0xff]  ;;  %v90_v45 = vld [vmem:[%s22174_s1 + $0xa0] sm:$0xff] }
   0xf   :  { %13422 = vmatpush3.msra.mxu1 %v80_v23  ;;  %13346 = vmatprep.subr.mxu0 %v11869_v24  ;;  %v11850_v38 = vld [vmem:[%s22174_s1 + $0x130] sm:$0xff]  ;;  %v11849_v42 = vld [vmem:[%s22174_s1 + $0x128] sm:$0xff]  ;;  %v11848_v46 = vld [vmem:[%s22174_s1 + $0x120] sm:$0xff] }
  0x10   :  { %13423 = vmatprep.subr.mxu1 %v95_v25  ;;  %13347 = vmatpush3.msra.mxu0 %v11853_v26  ;;  %v76_v39 = vld [vmem:[%s22174_s1 + $0x30] sm:$0xff]  ;;  %v75_v43 = vld [vmem:[%s22174_s1 + $0x28] sm:$0xff]  ;;  %v74_v47 = vld [vmem:[%s22174_s1 + $0x20] sm:$0xff] }
  0x11   :  { %13424 = vmatpush3.msra.mxu1 %v79_v27  ;;  %13348 = vmatprep.subr.mxu0 %v11868_v28  ;;  %v11863_v48 = vld [vmem:[%s22174_s1 + $0x198] sm:$0xff]  ;;  %v103_v51 = vld [vmem:[%s22175_s0 + $0x8] sm:$0xfe]  ;;  %v11862_v54 = vld [vmem:[%s22174_s1 + $0x190] sm:$0xff] }
  0x12   :  { %13425 = vmatprep.subr.mxu1 %v94_v29  ;;  %13349 = vmatpush3.msra.mxu0 %v11852_v30  ;;  %v89_v49 = vld [vmem:[%s22174_s1 + $0x98] sm:$0xff]  ;;  %v88_v55 = vld [vmem:[%s22174_s1 + $0x90] sm:$0xff]  ;;  %v102_v57 = vld [vmem:[%s22175_s0] sm:$0xfe]  ;;  %v175_v60 = vrot.slane %v103_v51, 1 }
  0x13   :  { %13426 = vmatpush3.msra.mxu1 %v78_v31  ;;  %13350 = vmatprep.subr.mxu0 %v11867_v32  ;;  %v15852_v50 = vld [vmem:[%s22175_s0 + $0x18] sm:$0xff]  ;;  %v15872_v56 = vld [vmem:[%s22175_s0 + $0x10] sm:$0xff]  ;;  %v11861_v62 = vld [vmem:[%s22174_s1 + $0x188] sm:$0xff]  ;;  %v172_v3 = vrot.slane %v102_v57, 1 }
  0x14   :  { %13427 = vmatprep.subr.mxu1 %v93_v33  ;;  %13351 = vmatpush3.msra.mxu0 %v11851_v34  ;;  %v11847_v52 = vld [vmem:[%s22174_s1 + $0x118] sm:$0xff]  ;;  %v11846_v58 = vld [vmem:[%s22174_s1 + $0x110] sm:$0xff]  ;;  %v176_v61 = vrot.slane %v15852_v50, 1  ;;  %v87_v63 = vld [vmem:[%s22174_s1 + $0x88] sm:$0xff]  ;;  %v173_v4 = vrot.slane %v15872_v56, 1 }
  0x15   :  { %13428 = vmatpush3.msra.mxu1 %v77_v35  ;;  %13352 = vmatprep.subr.mxu0 %v11866_v36  ;;  %v73_v53 = vld [vmem:[%s22174_s1 + $0x18] sm:$0xff]  ;;  %v72_v59 = vld [vmem:[%s22174_s1 + $0x10] sm:$0xff]  ;;  %v15893_v0 = vld [vmem:[%s22175_s0 + $0x28] sm:$0xff] }
  0x16   :  { %13429 = vmatprep.subr.mxu1 %v92_v37  ;;  %13353 = vmatpush3.msra.mxu0 %v11850_v38  ;;  %v11845_v1 = vld [vmem:[%s22174_s1 + $0x108] sm:$0xff]  ;;  %v11860_v5 = vld [vmem:[%s22174_s1 + $0x180] sm:$0xff]  ;;  %v177_v9 = vsel %vm171_vm0, %v175_v60, %v176_v61  ;;  %v180_v10 = vrot.slane %v15893_v0, 1  ;;  %v15927_v13 = vld [vmem:[%s22175_s0 + $0x38] sm:$0xff]  ;;  %v174_v14 = vsel %vm171_vm0, %v172_v3, %v173_v4 }
  0x17   :  { %13430 = vmatpush3.msra.mxu1 %v76_v39  ;;  %13354 = vmatprep.subr.mxu0 %v11865_v40  ;;  %v71_v2 = vld [vmem:[%s22174_s1 + $0x8] sm:$0xff]  ;;  %v86_v6 = vld [vmem:[%s22174_s1 + $0x80] sm:$0xff]  ;;  %v11907_v17 = vld [vmem:[%s22174_s1 + $0x2f8] sm:$0xff]  ;;  %v184_v22 = vrot.slane %v15927_v13, 1 }
  0x18   :  { %13431 = vmatprep.subr.mxu1 %v91_v41  ;;  %13355 = vmatpush3.msra.mxu0 %v11849_v42  ;;  %v15911_v7 = vld [vmem:[%s22175_s0 + $0x20] sm:$0xff]  ;;  %v41_v12 = vld [vmem:[%s22175_s0 + $0x8] sm:$0xff]  ;;  %v11939_v18 = vld [vmem:[%s22174_s1 + $0x3f8] sm:$0xff]  ;;  %v181_v21 = vsel %vm171_vm0, %v176_v61, %v180_v10 }
  0x19   :  { %13432 = vmatpush3.msra.mxu1 %v75_v43  ;;  %13356 = vmatprep.subr.mxu0 %v11864_v44  ;;  %v11844_v8 = vld [vmem:[%s22174_s1 + $0x100] sm:$0xff]  ;;  %v178_v16 = vrot.slane %v15911_v7, 1  ;;  %v15943_v19 = vld [vmem:[%s22175_s0 + $0x30] sm:$0xff]  ;;  %v11891_v20 = vld [vmem:[%s22174_s1 + $0x278] sm:$0xff]  ;;  %v185_v31 = vsel %vm171_vm0, %v180_v10, %v184_v22 }
  0x1a   :  { %13433 = vmatprep.subr.mxu1 %v90_v45  ;;  %13357 = vmatpush3.msra.mxu0 %v11848_v46  ;;  %v70_v11 = vld [vmem:[%s22174_s1] sm:$0xff]  ;;  %v11923_v23 = vld [vmem:[%s22174_s1 + $0x378] sm:$0xff]  ;;  %v15956_v24 = vld [vmem:[%s22175_s0 + $0x48] sm:$0xff]  ;;  %v182_v26 = vrot.slane %v15943_v19, 1 }
  0x1b   :  { %13434 = vmatpush3.msra.mxu1 %v74_v47  ;;  %13358 = vmatprep.subr.mxu0 %v11863_v48  ;;  %v40_v15 = vld [vmem:[%s22175_s0] sm:$0xff]  ;;  %v179_v25 = vsel %vm171_vm0, %v173_v4, %v178_v16  ;;  %v11906_v27 = vld [vmem:[%s22174_s1 + $0x2f0] sm:$0xff]  ;;  %v188_v32 = vrot.slane %v15956_v24, 1  ;;  %v15984_v34 = vld [vmem:[%s22175_s0 + $0x58] sm:$0xff] }
  0x1c   :  { %13435 = vmatprep.subr.mxu1 %v89_v49  ;;  %13359 = vmatpush3.msra.mxu0 %v11847_v52  ;;  %v11938_v28 = vld [vmem:[%s22174_s1 + $0x3f0] sm:$0xff]  ;;  %v15969_v29 = vld [vmem:[%s22175_s0 + $0x40] sm:$0xff]  ;;  %v183_v35 = vsel %vm171_vm0, %v178_v16, %v182_v26  ;;  %v11905_v37 = vld [vmem:[%s22174_s1 + $0x2e8] sm:$0xff]  ;;  %v192_v42 = vrot.slane %v15984_v34, 1 }
  0x1d   :  { %13436 = vmatpush3.msra.mxu1 %v73_v53  ;;  %13360 = vmatprep.subr.mxu0 %v11862_v54  ;;  %v11890_v30 = vld [vmem:[%s22174_s1 + $0x270] sm:$0xff]  ;;  %v186_v36 = vrot.slane %v15969_v29, 1  ;;  %v11937_v38 = vld [vmem:[%s22174_s1 + $0x3e8] sm:$0xff]  ;;  %v189_v41 = vsel %vm171_vm0, %v184_v22, %v188_v32  ;;  %v11904_v47 = vld [vmem:[%s22174_s1 + $0x2e0] sm:$0xff] }
  0x1e   :  { %13437 = vmatprep.subr.mxu1 %v88_v55  ;;  %13361 = vmatpush3.msra.mxu0 %v11846_v58  ;;  %v11922_v33 = vld [vmem:[%s22174_s1 + $0x370] sm:$0xff]  ;;  %v11889_v40 = vld [vmem:[%s22174_s1 + $0x268] sm:$0xff]  ;;  %v11936_v48 = vld [vmem:[%s22174_s1 + $0x3e0] sm:$0xff]  ;;  %v193_v51 = vsel %vm171_vm0, %v188_v32, %v192_v42 }
  0x1f   :  { %13438 = vmatpush3.msra.mxu1 %v72_v59  ;;  %13362 = vmatprep.subr.mxu0 %v11861_v62  ;;  %v15997_v39 = vld [vmem:[%s22175_s0 + $0x50] sm:$0xff]  ;;  %v11921_v43 = vld [vmem:[%s22174_s1 + $0x368] sm:$0xff]  ;;  %v187_v45 = vsel %vm171_vm0, %v182_v26, %v186_v36  ;;  %v16025_v49 = vld [vmem:[%s22175_s0 + $0x60] sm:$0xff] }
  0x20   :  { %13439 = vmatprep.subr.mxu1 %v87_v63  ;;  %13363 = vmatpush3.msra.mxu0 %v11845_v1  ;;  %v16012_v44 = vld [vmem:[%s22175_s0 + $0x68] sm:$0xff]  ;;  %v190_v46 = vrot.slane %v15997_v39, 1  ;;  %v11903_v53 = vld [vmem:[%s22174_s1 + $0x2d8] sm:$0xff]  ;;  %v11920_v55 = vld [vmem:[%s22174_s1 + $0x360] sm:$0xff]  ;;  %v194_v57 = vrot.slane %v16025_v49, 1 }
  0x21   :  { %13440 = vmatpush3.msra.mxu1 %v71_v2  ;;  %13364 = vmatprep.subr.mxu0 %v11860_v5  ;;  %v196_v52 = vrot.slane %v16012_v44, 1  ;;  %v16040_v54 = vld [vmem:[%s22175_s0 + $0x78] sm:$0xff]  ;;  %v16053_v59 = vld [vmem:[%s22175_s0 + $0x70] sm:$0xff]  ;;  %v16067_v1 = vld [vmem:[%s22175_s0 + $0x88] sm:$0xff] }
  0x22   :  { %13441 = vmatprep.subr.mxu1 %v86_v6  ;;  %13365 = vmatpush3.msra.mxu0 %v11844_v8  ;;  %v11887_v58 = vld [vmem:[%s22174_s1 + $0x258] sm:$0xff]  ;;  %v200_v62 = vrot.slane %v16040_v54, 1  ;;  %v11902_v2 = vld [vmem:[%s22174_s1 + $0x2d0] sm:$0xff]  ;;  %v195_v3 = vsel %vm171_vm0, %v190_v46, %v194_v57  ;;  %v198_v4 = vrot.slane %v16053_v59, 1  ;;  %v16081_v6 = vld [vmem:[%s22175_s0 + $0x80] sm:$0xff]  ;;  %v204_v10 = vrot.slane %v16067_v1, 1 }
  0x23   :  { %328 = vmatprep.mubr.f32.mxu0 %v177_v9  ;;  %13442 = vmatpush3.msra.mxu1 %v70_v11  ;;  %v11935_v60 = vld [vmem:[%s22174_s1 + $0x3d8] sm:$0xff]  ;;  %v197_v61 = vsel %vm171_vm0, %v192_v42, %v196_v52  ;;  %v11886_v5 = vld [vmem:[%s22174_s1 + $0x250] sm:$0xff]  ;;  %v11917_v22 = vld [vmem:[%s22174_s1 + $0x348] sm:$0xff] }
  0x24   :  { %468 = vmatprep.mubr.f32.mxu1 %v41_v12  ;;  %329 = vmatmul.mubr.f32.vlgmr.msra.gmra.mxu0 %v174_v14  ;;  %v11919_v63 = vld [vmem:[%s22174_s1 + $0x358] sm:$0xff]  ;;  %v11934_v8 = vld [vmem:[%s22174_s1 + $0x3d0] sm:$0xff]  ;;  %v201_v9 = vsel %vm171_vm0, %v196_v52, %v200_v62  ;;  %v11901_v12 = vld [vmem:[%s22174_s1 + $0x2c8] sm:$0xff]  ;;  %v199_v14 = vsel %vm171_vm0, %v194_v57, %v198_v4 }
  0x25   :  { %469 = vmatmul.mubr.f32.vlgmr.msra.gmra.mxu1 %v40_v15  ;;  %13488 = vmatprep.subr.mxu0 %v11907_v17  ;;  %v11918_v11 = vld [vmem:[%s22174_s1 + $0x350] sm:$0xff]  ;;  %v202_v15 = vrot.slane %v16081_v6, 1  ;;  %v16101_v16 = vld [vmem:[%s22175_s0 + $0x98] sm:$0xff]  ;;  %v11885_v17 = vld [vmem:[%s22174_s1 + $0x248] sm:$0xff] }
  0x26   :  { %13565 = vmatprep.subr.mxu1 %v11939_v18  ;;  %13489 = vmatpush3.msra.mxu0 %v11891_v20  ;;  %v11933_v18 = vld [vmem:[%s22174_s1 + $0x3c8] sm:$0xff]  ;;  %v205_v20 = vsel %vm171_vm0, %v200_v62, %v204_v10  ;;  %v11899_v32 = vld [vmem:[%s22174_s1 + $0x2b8] sm:$0xff] }
  0x27   :  { %333 = vmatprep.mubr.f32.mxu0 %v181_v21  ;;  %473 = vmatprep.mubr.f32.mxu1 %v15852_v50  ;;  %v11888_v50 = vld [vmem:[%s22174_s1 + $0x260] sm:$0xff]  ;;  %v16114_v21 = vld [vmem:[%s22175_s0 + $0x90] sm:$0xff]  ;;  %v203_v26 = vsel %vm171_vm0, %v198_v4, %v202_v15  ;;  %v16186_v52 = vld [vmem:[%s22175_s0 + $0xc8] sm:$0xff] }
  0x28   :  { %13566 = vmatpush3.msra.mxu1 %v11923_v23  ;;  %334 = vmatmul.mubr.f32.gmra.mxu0 %v179_v25  ;;  %v208_v23 = vrot.slane %v16101_v16, 1  ;;  %v11900_v25 = vld [vmem:[%s22174_s1 + $0x2c0] sm:$0xff]  ;;  %v11897_v57 = vld [vmem:[%s22174_s1 + $0x2a8] sm:$0xff]  ;;  %v220_v62 = vrot.slane %v16186_v52, 1  ;;  %v16216_v4 = vld [vmem:[%s22175_s0 + $0xd8] sm:$0xff] }
  0x29   :  { %474 = vmatmul.mubr.f32.gmra.mxu1 %v15872_v56  ;;  %13490 = vmatprep.subr.mxu0 %v11906_v27  ;;  %v191_v56 = vsel %vm171_vm0, %v186_v36, %v190_v46  ;;  %v16128_v27 = vld [vmem:[%s22175_s0 + $0xa8] sm:$0xff]  ;;  %v16171_v46 = vld [vmem:[%s22175_s0 + $0xb0] sm:$0xff] }
  0x2a   :  { %13567 = vmatprep.subr.mxu1 %v11938_v28  ;;  %13491 = vmatpush3.msra.mxu0 %v11890_v30  ;;  %v11884_v28 = vld [vmem:[%s22174_s1 + $0x240] sm:$0xff]  ;;  %v206_v30 = vrot.slane %v16114_v21, 1  ;;  %v209_v36 = vsel %vm171_vm0, %v204_v10, %v208_v23  ;;  %v11913_v10 = vld [vmem:[%s22174_s1 + $0x328] sm:$0xff] }
  0x2b   :  { %338 = vmatprep.mubr.f32.mxu0 %v185_v31  ;;  %478 = vmatprep.mubr.f32.mxu1 %v15893_v0  ;;  %v11932_v31 = vld [vmem:[%s22174_s1 + $0x3c0] sm:$0xff] }
  0x2c   :  { %13568 = vmatpush3.msra.mxu1 %v11922_v33  ;;  %339 = vmatmul.mubr.f32.gmra.mxu0 %v183_v35  ;;  %v16144_v33 = vld [vmem:[%s22175_s0 + $0xa0] sm:$0xff] }
  0x2d   :  { %479 = vmatmul.mubr.f32.gmra.mxu1 %v15911_v7  ;;  %13492 = vmatprep.subr.mxu0 %v11905_v37  ;;  %v11916_v35 = vld [vmem:[%s22174_s1 + $0x340] sm:$0xff]  ;;  %v212_v37 = vrot.slane %v16128_v27, 1  ;;  %v210_v42 = vrot.slane %v16144_v33, 1 }
  0x2e   :  { %13569 = vmatprep.subr.mxu1 %v11937_v38  ;;  %13493 = vmatpush3.msra.mxu0 %v11889_v40  ;;  %v11883_v38 = vld [vmem:[%s22174_s1 + $0x238] sm:$0xff] }
  0x2f   :  { %343 = vmatprep.mubr.f32.mxu0 %v189_v41  ;;  %483 = vmatprep.mubr.f32.mxu1 %v15927_v13  ;;  %v16158_v40 = vld [vmem:[%s22175_s0 + $0xb8] sm:$0xff]  ;;  %v207_v41 = vsel %vm171_vm0, %v202_v15, %v206_v30 }
  0x30   :  { %13570 = vmatpush3.msra.mxu1 %v11921_v43  ;;  %344 = vmatmul.mubr.f32.gmra.mxu0 %v187_v45  ;;  %v11931_v43 = vld [vmem:[%s22174_s1 + $0x3b8] sm:$0xff]  ;;  %v11898_v45 = vld [vmem:[%s22174_s1 + $0x2b0] sm:$0xff] }
  0x31   :  { %484 = vmatmul.mubr.f32.gmra.mxu1 %v15943_v19  ;;  %13494 = vmatprep.subr.mxu0 %v11904_v47  ;;  %v11915_v47 = vld [vmem:[%s22174_s1 + $0x338] sm:$0xff] }
  0x32   :  { %13571 = vmatprep.subr.mxu1 %v11936_v48  ;;  %13495 = vmatpush3.msra.mxu0 %v11888_v50  ;;  %v213_v48 = vsel %vm171_vm0, %v208_v23, %v212_v37  ;;  %v216_v50 = vrot.slane %v16158_v40, 1  ;;  %v16255_v23 = vld [vmem:[%s22175_s0 + $0xe0] sm:$0xff] }
  0x33   :  { %348 = vmatprep.mubr.f32.mxu0 %v193_v51  ;;  %488 = vmatprep.mubr.f32.mxu1 %v15956_v24  ;;  %v11882_v51 = vld [vmem:[%s22174_s1 + $0x230] sm:$0xff] }
  0x34   :  { %13496 = vmatprep.subr.mxu0 %v11903_v53  ;;  %13572 = vmatpush3.msra.mxu1 %v11920_v55  ;;  %v211_v53 = vsel %vm171_vm0, %v206_v30, %v210_v42  ;;  %v214_v55 = vrot.slane %v16171_v46, 1 }
  0x35   :  { %349 = vmatmul.mubr.f32.gmra.mxu0 %v191_v56  ;;  %489 = vmatmul.mubr.f32.gmra.mxu1 %v15969_v29  ;;  %v11930_v56 = vld [vmem:[%s22174_s1 + $0x3b0] sm:$0xff] }
  0x36   :  { %13497 = vmatpush3.msra.mxu0 %v11887_v58  ;;  %13573 = vmatprep.subr.mxu1 %v11935_v60  ;;  %v16199_v58 = vld [vmem:[%s22175_s0 + $0xc0] sm:$0xff]  ;;  %v11914_v60 = vld [vmem:[%s22174_s1 + $0x330] sm:$0xff] }
  0x37   :  { %353 = vmatprep.mubr.f32.mxu0 %v197_v61  ;;  %13574 = vmatpush3.msra.mxu1 %v11919_v63  ;;  %v217_v61 = vsel %vm171_vm0, %v212_v37, %v216_v50  ;;  %v11881_v63 = vld [vmem:[%s22174_s1 + $0x228] sm:$0xff]  ;;  %v11894_v37 = vld [vmem:[%s22174_s1 + $0x290] sm:$0xff] }
  0x38   :  { %493 = vmatprep.mubr.f32.mxu1 %v15984_v34  ;;  %13498 = vmatprep.subr.mxu0 %v11902_v2  ;;  %v215_v2 = vsel %vm171_vm0, %v210_v42, %v214_v55  ;;  %v11878_v42 = vld [vmem:[%s22174_s1 + $0x210] sm:$0xff] }
  0x39   :  { %354 = vmatmul.mubr.f32.gmra.mxu0 %v195_v3  ;;  %494 = vmatmul.mubr.f32.gmra.mxu1 %v15997_v39  ;;  %v218_v3 = vrot.slane %v16199_v58, 1 }
  0x3a   :  { %13499 = vmatpush3.msra.mxu0 %v11886_v5  ;;  %13575 = vmatprep.subr.mxu1 %v11934_v8  ;;  %v11929_v5 = vld [vmem:[%s22174_s1 + $0x3a8] sm:$0xff]  ;;  %v11896_v8 = vld [vmem:[%s22174_s1 + $0x2a0] sm:$0xff] }
  0x3b   :  { %358 = vmatprep.mubr.f32.mxu0 %v201_v9  ;;  %13576 = vmatpush3.msra.mxu1 %v11918_v11  ;;  %v16227_v9 = vld [vmem:[%s22175_s0 + $0xd0] sm:$0xff]  ;;  %v221_v11 = vsel %vm171_vm0, %v216_v50, %v220_v62  ;;  %v219_v15 = vsel %vm171_vm0, %v214_v55, %v218_v3  ;;  %v11893_v55 = vld [vmem:[%s22174_s1 + $0x288] sm:$0xff] }
  0x3c   :  { %498 = vmatprep.mubr.f32.mxu1 %v16012_v44  ;;  %13500 = vmatprep.subr.mxu0 %v11901_v12  ;;  %v11880_v12 = vld [vmem:[%s22174_s1 + $0x220] sm:$0xff] }
  0x3d   :  { %359 = vmatmul.mubr.f32.gmra.mxu0 %v199_v14  ;;  %499 = vmatmul.mubr.f32.gmra.mxu1 %v16025_v49  ;;  %v224_v14 = vrot.slane %v16216_v4, 1 }
  0x3e   :  { %13501 = vmatpush3.msra.mxu0 %v11885_v17  ;;  %13577 = vmatprep.subr.mxu1 %v11933_v18  ;;  %v222_v17 = vrot.slane %v16227_v9, 1  ;;  %v16244_v18 = vld [vmem:[%s22175_s0 + $0xe8] sm:$0xff] }
  0x3f   :  { %363 = vmatprep.mubr.f32.mxu0 %v205_v20  ;;  %13578 = vmatpush3.msra.mxu1 %v11917_v22  ;;  %v11928_v20 = vld [vmem:[%s22174_s1 + $0x3a0] sm:$0xff]  ;;  %v11895_v22 = vld [vmem:[%s22174_s1 + $0x298] sm:$0xff]  ;;  %v228_v30 = vrot.slane %v16244_v18, 1 }
  0x40   :  { %503 = vmatprep.mubr.f32.mxu1 %v16040_v54  ;;  %13502 = vmatprep.subr.mxu0 %v11900_v25  ;;  %v11912_v25 = vld [vmem:[%s22174_s1 + $0x320] sm:$0xff] }
  0x41   :  { %364 = vmatmul.mubr.f32.gmra.mxu0 %v203_v26  ;;  %504 = vmatmul.mubr.f32.gmra.mxu1 %v16053_v59  ;;  %v11879_v26 = vld [vmem:[%s22174_s1 + $0x218] sm:$0xff] }
  0x42   :  { %13503 = vmatpush3.msra.mxu0 %v11884_v28  ;;  %13579 = vmatprep.subr.mxu1 %v11932_v31  ;;  %v225_v28 = vsel %vm171_vm0, %v220_v62, %v224_v14  ;;  %v11927_v31 = vld [vmem:[%s22174_s1 + $0x398] sm:$0xff] }
  0x43   :  { %13504 = vmatprep.subr.mxu0 %v11899_v32  ;;  %13580 = vmatpush3.msra.mxu1 %v11916_v35  ;;  %v223_v32 = vsel %vm171_vm0, %v218_v3, %v222_v17  ;;  %v226_v35 = vrot.slane %v16255_v23, 1  ;;  %v11925_v3 = vld [vmem:[%s22174_s1 + $0x388] sm:$0xff] }
  0x44   :  { %368 = vmatprep.mubr.f32.mxu0 %v209_v36  ;;  %508 = vmatprep.mubr.f32.mxu1 %v16067_v1  ;;  %v105_v36 = vld [vmem:[%s22175_s0 + $0xf8] sm:$0x1] }
  0x45   :  { %13505 = vmatpush3.msra.mxu0 %v11883_v38  ;;  %509 = vmatmul.mubr.f32.gmra.mxu1 %v16081_v6  ;;  %v104_v38 = vld [vmem:[%s22175_s0 + $0xf0] sm:$0x1] }
  0x46   :  { %369 = vmatmul.mubr.f32.gmra.mxu0 %v207_v41  ;;  %13581 = vmatprep.subr.mxu1 %v11931_v43  ;;  %v11911_v41 = vld [vmem:[%s22174_s1 + $0x318] sm:$0xff]  ;;  %v229_v43 = vsel %vm171_vm0, %v224_v14, %v228_v30  ;;  %v230_v50 = vrot.slane %v104_v38, 1  ;;  %v643_v14 = vrot.slane %v15911_v7, 3  ;;  %v654_v38 = vrot.slane %v15956_v24, 3 }
  0x47   :  { %13506 = vmatprep.subr.mxu0 %v11898_v45  ;;  %13582 = vmatpush3.msra.mxu1 %v11915_v47  ;;  %v232_v45 = vrot.slane %v105_v36, 1  ;;  %v11926_v47 = vld [vmem:[%s22174_s1 + $0x390] sm:$0xff] }
  0x48   :  { %373 = vmatprep.mubr.f32.mxu0 %v213_v48  ;;  %513 = vmatprep.mubr.f32.mxu1 %v16101_v16  ;;  %v227_v48 = vsel %vm171_vm0, %v222_v17, %v226_v35  ;;  %v932_v17 = vrot.slane %v15911_v7, 4  ;;  %v11924_v7 = vld [vmem:[%s22174_s1 + $0x380] sm:$0xff] }
  0x49   :  { %13507 = vmatpush3.msra.mxu0 %v11882_v51  ;;  %514 = vmatmul.mubr.f32.gmra.mxu1 %v16114_v21  ;;  %v545_v51 = vld [vmem:[%s22175_s0 + $0x18] sm:$0xf8]  ;;  %v233_v62 = vsel %vm171_vm0, %v228_v30, %v232_v45  ;;  %v941_v45 = vrot.slane %v15969_v29, 4 }
  0x4a   :  { %374 = vmatmul.mubr.f32.gmra.mxu0 %v211_v53  ;;  %13583 = vmatprep.subr.mxu1 %v11930_v56  ;;  %v11910_v53 = vld [vmem:[%s22174_s1 + $0x310] sm:$0xff]  ;;  %v890_v56 = vld [vmem:[%s22175_s0 + $0x18] sm:$0xf0] }
  0x4b   :  { %13508 = vmatprep.subr.mxu0 %v11897_v57  ;;  %13584 = vmatpush3.msra.mxu1 %v11914_v60  ;;  %v11877_v57 = vld [vmem:[%s22174_s1 + $0x208] sm:$0xff]  ;;  %v544_v60 = vld [vmem:[%s22175_s0 + $0x10] sm:$0xf8] }
  0x4c   :  { %378 = vmatprep.mubr.f32.mxu0 %v217_v61  ;;  %518 = vmatprep.mubr.f32.mxu1 %v16128_v27  ;;  %v889_v61 = vld [vmem:[%s22175_s0 + $0x10] sm:$0xf0] }
  0x4d   :  { %13509 = vmatpush3.msra.mxu0 %v11881_v63  ;;  %519 = vmatmul.mubr.f32.gmra.mxu1 %v16144_v33  ;;  %v645_v63 = vrot.slane %v545_v51, 3 }
  0x4e   :  { %379 = vmatmul.mubr.f32.gmra.mxu0 %v215_v2  ;;  %13585 = vmatprep.subr.mxu1 %v11929_v5  ;;  %v646_v2 = vrot.slane %v15893_v0, 3  ;;  %v231_v5 = vsel %vm171_vm0, %v226_v35, %v230_v50  ;;  %v937_v35 = vrot.slane %v15943_v19, 4  ;;  %v947_v50 = vrot.slane %v15984_v34, 4 }
  0x4f   :  { %13510 = vmatprep.subr.mxu0 %v11896_v8  ;;  %13586 = vmatpush3.msra.mxu1 %v11913_v10  ;;  %v934_v8 = vrot.slane %v890_v56, 4  ;;  %v935_v10 = vrot.slane %v15893_v0, 4  ;;  %v11876_v0 = vld [vmem:[%s22174_s1 + $0x200] sm:$0xff] }
  0x50   :  { %383 = vmatprep.mubr.f32.mxu0 %v221_v11  ;;  %523 = vmatprep.mubr.f32.mxu1 %v16158_v40  ;;  %v11892_v11 = vld [vmem:[%s22174_s1 + $0x280] sm:$0xff] }
  0x51   :  { %13511 = vmatpush3.msra.mxu0 %v11880_v12  ;;  %524 = vmatmul.mubr.f32.gmra.mxu1 %v16171_v46  ;;  %v642_v12 = vrot.slane %v544_v60, 3  ;;  %v936_v30 = vsel %vm930_vm2, %v934_v8, %v935_v10  ;;  %v662_v60 = vrot.slane %v16012_v44, 3 }
  0x52   :  { %384 = vmatmul.mubr.f32.gmra.mxu0 %v219_v15  ;;  %13587 = vmatprep.subr.mxu1 %v11928_v20  ;;  %v931_v15 = vrot.slane %v889_v61, 4  ;;  %v11909_v20 = vld [vmem:[%s22174_s1 + $0x308] sm:$0xff] }
  0x53   :  { %13512 = vmatprep.subr.mxu0 %v11895_v22  ;;  %13588 = vmatpush3.msra.mxu1 %v11912_v25  ;;  %v650_v22 = vrot.slane %v15927_v13, 3  ;;  %v939_v25 = vrot.slane %v15927_v13, 4  ;;  %v644_v13 = vsel %vm641_vm1, %v642_v12, %v643_v14 }
  0x54   :  { %13513 = vmatpush3.msra.mxu0 %v11879_v26  ;;  %388 = vmatprep.mubr.f32.mxu0 %v225_v28  ;;  %v647_v26 = vsel %vm641_vm1, %v645_v63, %v646_v2  ;;  %v11908_v28 = vld [vmem:[%s22174_s1 + $0x300] sm:$0xff]  ;;  %v660_v63 = vrot.slane %v16025_v49, 3 }
  0x55   :  { %528 = vmatprep.mubr.f32.mxu1 %v16186_v52  ;;  %13589 = vmatprep.subr.mxu1 %v11927_v31  ;;  %v933_v31 = vsel %vm930_vm2, %v931_v15, %v932_v17  ;;  %v651_v36 = vsel %vm641_vm1, %v646_v2, %v650_v22  ;;  %v670_v15 = vrot.slane %v16067_v1, 3 }
  0x56   :  { %389 = vmatmul.mubr.f32.gmra.mxu0 %v223_v32  ;;  %529 = vmatmul.mubr.f32.gmra.mxu1 %v16199_v58  ;;  %v648_v32 = vrot.slane %v15943_v19, 3  ;;  %v938_v19 = vsel %vm930_vm2, %v932_v17, %v937_v35 }
  0x57   :  { %13514 = vmatprep.subr.mxu0 %v11894_v37  ;;  %13590 = vmatpush3.msra.mxu1 %v11911_v41  ;;  %v940_v37 = vsel %vm930_vm2, %v935_v10, %v939_v25  ;;  %v943_v41 = vrot.slane %v15956_v24, 4  ;;  %v658_v24 = vrot.slane %v15984_v34, 3  ;;  %v951_v34 = vrot.slane %v16012_v44, 4 }
  0x58   :  { %13515 = vmatpush3.msra.mxu0 %v11878_v42  ;;  %393 = vmatprep.mubr.f32.mxu0 %v229_v43  ;;  %v649_v42 = vsel %vm641_vm1, %v643_v14, %v648_v32  ;;  %v652_v43 = vrot.slane %v15969_v29, 3  ;;  %v945_v29 = vrot.slane %v15997_v39, 4  ;;  %v955_v44 = vrot.slane %v16040_v54, 4 }
  0x59   :  { %533 = vmatprep.mubr.f32.mxu1 %v16216_v4  ;;  %13591 = vmatprep.subr.mxu1 %v11926_v47  ;;  %v655_v47 = vsel %vm641_vm1, %v650_v22, %v654_v38  ;;  %v659_v56 = vsel %vm641_vm1, %v654_v38, %v658_v24  ;;  %v663_v2 = vsel %vm641_vm1, %v658_v24, %v662_v60  ;;  %v686_v24 = vrot.slane %v16186_v52, 3 }
  0x5a   :  { %394 = vmatmul.mubr.f32.gmra.mxu0 %v227_v48  ;;  %534 = vmatmul.mubr.f32.gmra.mxu1 %v16227_v9  ;;  %v944_v48 = vsel %vm930_vm2, %v939_v25, %v943_v41  ;;  %v653_v51 = vsel %vm641_vm1, %v648_v32, %v652_v43  ;;  %v956_v14 = vsel %vm930_vm2, %v951_v34, %v955_v44  ;;  %v678_v32 = vrot.slane %v16128_v27, 3 }
  0x5b   :  { %13516 = vmatprep.subr.mxu0 %v11893_v55  ;;  %13592 = vmatpush3.msra.mxu1 %v11910_v53  ;;  %v942_v53 = vsel %vm930_vm2, %v937_v35, %v941_v45  ;;  %v656_v55 = vrot.slane %v15997_v39, 3  ;;  %v949_v39 = vrot.slane %v16025_v49, 4  ;;  %v953_v49 = vrot.slane %v16053_v59, 4 }
  0x5c   :  { %13517 = vmatpush3.msra.mxu0 %v11877_v57  ;;  %398 = vmatprep.mubr.f32.mxu0 %v233_v62  ;;  %v948_v57 = vsel %vm930_vm2, %v943_v41, %v947_v50  ;;  %v946_v62 = vsel %vm930_vm2, %v941_v45, %v945_v29  ;;  %v680_v45 = vrot.slane %v16171_v46, 3 }
  0x5d   :  { %538 = vmatprep.mubr.f32.mxu1 %v16244_v18  ;;  %13593 = vmatprep.subr.mxu1 %v11925_v3  ;;  %v657_v61 = vsel %vm641_vm1, %v652_v43, %v656_v55  ;;  %v952_v3 = vsel %vm930_vm2, %v947_v50, %v951_v34  ;;  %v661_v8 = vsel %vm641_vm1, %v656_v55, %v660_v63  ;;  %v22186_v50 = vmov 0.0  }
  0x5e   :  { %399 = vmatmul.mubr.f32.gmra.mxu0 %v231_v5  ;;  %539 = vmatmul.mubr.f32.gmra.mxu1 %v16255_v23  ;;  %v666_v5 = vrot.slane %v16040_v54, 3  ;;  %v950_v10 = vsel %vm930_vm2, %v945_v29, %v949_v39  ;;  %v959_v54 = vrot.slane %v16067_v1, 4  ;;  %v963_v1 = vrot.slane %v16101_v16, 4  ;;  %v1258_v29 = vld [vmem:[%s22176_s3 + $0x78] sm:$0xff] }
  0x5f   :  { %13518 = vmatprep.subr.mxu0 %v11892_v11  ;;  %13594 = vmatpush3.msra.mxu1 %v11909_v20  ;;  %v664_v11 = vrot.slane %v16053_v59, 3  ;;  %v954_v20 = vsel %vm930_vm2, %v949_v39, %v953_v49  ;;  %v957_v59 = vrot.slane %v16081_v6, 4  ;;  %v973_v55 = vrot.slane %v16199_v58, 4 }
  0x60   :  { %13519 = vmatpush3.msra.mxu0 %v11876_v0  ;;  %13595 = vmatprep.subr.mxu1 %v11924_v7  ;;  %v667_v12 = vsel %vm641_vm1, %v662_v60, %v666_v5  ;;  %v668_v0 = vrot.slane %v16081_v6, 3  ;;  %v671_v22 = vsel %vm641_vm1, %v666_v5, %v670_v15  ;;  %v960_v25 = vsel %vm930_vm2, %v955_v44, %v959_v54 }
  0x61   :  { %798 = vmatprep.mubr.f32.mxu0 %v647_v26  ;;  %13596 = vmatpush3.msra.mxu1 %v11908_v28  ;;  %v665_v17 = vsel %vm641_vm1, %v660_v63, %v664_v11  ;;  %v674_v7 = vrot.slane %v16101_v16, 3  ;;  %v958_v28 = vsel %vm930_vm2, %v953_v49, %v957_v59  ;;  %v961_v6 = vrot.slane %v16114_v21, 4 }
  0x62   :  { %1087 = vmatprep.mubr.f32.mxu1 %v936_v30  ;;  %799 = vmatmul.mubr.f32.vlgmr.msra.gmra.mxu0 %v644_v13  ;;  %v669_v26 = vsel %vm641_vm1, %v664_v11, %v668_v0  ;;  %v672_v30 = vrot.slane %v16114_v21, 3  ;;  %v967_v16 = vrot.slane %v16128_v27, 4  ;;  %v965_v21 = vrot.slane %v16144_v33, 4 }
  0x63   :  { %1088 = vmatmul.mubr.f32.vlgmr.msra.gmra.mxu1 %v933_v31  ;;  %803 = vmatprep.mubr.f32.mxu0 %v651_v36  ;;  %v675_v13 = vsel %vm641_vm1, %v670_v15, %v674_v7  ;;  %v964_v31 = vsel %vm930_vm2, %v959_v54, %v963_v1  ;;  %v962_v36 = vsel %vm930_vm2, %v957_v59, %v961_v6  ;;  %v971_v27 = vrot.slane %v16158_v40, 4  ;;  %v11953_v59 = vld [vmem:[%s22176_s3 + $0xe0] sm:$0xff] }
  0x64   :  { %1092 = vmatprep.mubr.f32.mxu1 %v940_v37  ;;  %v673_v35 = vsel %vm641_vm1, %v668_v0, %v672_v30  ;;  %v676_v37 = vrot.slane %v16144_v33, 3  ;;  %v679_v38 = vsel %vm641_vm1, %v674_v7, %v678_v32  ;;  %v968_v41 = vsel %vm930_vm2, %v963_v1, %v967_v16  ;;  %14506 = vmatprep.subr.mxu0 %v22186_v50  ;;  %v575_v0 = vld [vmem:[%s22175_s0 + $0x108] sm:$0x7] }
  0x65   :  { %v966_v43 = vsel %vm930_vm2, %v961_v6, %v965_v21  ;;  %v969_v33 = vrot.slane %v16171_v46, 4  ;;  %14577 = vmatprep.subr.mxu1 %v22186_v50  ;;  %v690_v60 = vrot.slane %v16216_v4, 3  ;;  %v979_v34 = vrot.slane %v16216_v4, 4 }
  0x66   :  { %804 = vmatmul.mubr.f32.gmra.mxu0 %v649_v42  ;;  %v682_v42 = vrot.slane %v16158_v40, 3  ;;  %v975_v40 = vrot.slane %v16186_v52, 4  ;;  %v11956_v52 = vld [vmem:[%s22176_s3 + $0xf8] sm:$0xff]  ;;  %14578 = vmatpush3.msra.mxu1 %v1258_v29  ;;  %v688_v63 = vrot.slane %v16227_v9, 3  ;;  %v977_v39 = vrot.slane %v16227_v9, 4  ;;  %v11954_v9 = vld [vmem:[%s22176_s3 + $0xe8] sm:$0xff] }
  0x67   :  { %1093 = vmatmul.mubr.f32.gmra.mxu1 %v938_v19  ;;  %808 = vmatprep.mubr.f32.mxu0 %v655_v47  ;;  %v677_v19 = vsel %vm641_vm1, %v672_v30, %v676_v37  ;;  %v970_v46 = vsel %vm930_vm2, %v965_v21, %v969_v33  ;;  %v694_v5 = vrot.slane %v16244_v18, 3  ;;  %v983_v44 = vrot.slane %v16244_v18, 4  ;;  %v1256_v18 = vld [vmem:[%s22176_s3 + $0x68] sm:$0xff]  ;;  %v1246_v29 = vld [vmem:[%s22176_s3 + $0x18] sm:$0xff] }
  0x68   :  { %1097 = vmatprep.mubr.f32.mxu1 %v944_v48  ;;  %v683_v47 = vsel %vm641_vm1, %v678_v32, %v682_v42  ;;  %v972_v48 = vsel %vm930_vm2, %v967_v16, %v971_v27  ;;  %14507 = vmatpush3.msra.mxu0 %v11956_v52  ;;  %v978_v11 = vsel %vm930_vm2, %v973_v55, %v977_v39  ;;  %v692_v49 = vrot.slane %v16255_v23, 3  ;;  %v891_v32 = vld [vmem:[%s22175_s0 + $0x100] sm:$0xf]  ;;  %v11952_v16 = vld [vmem:[%s22176_s3 + $0xd8] sm:$0xff] }
  0x69   :  { %14508 = vmatprep.subr.mxu0 %v22186_v50  ;;  %14579 = vmatprep.subr.mxu1 %v22186_v50  ;;  %v984_v15 = vsel %vm930_vm2, %v979_v34, %v983_v44  ;;  %v702_v6 = vrot.slane %v575_v0, 3  ;;  %v1247_v52 = vld [vmem:[%s22176_s3 + $0x20] sm:$0xff] }
  0x6a   :  { %809 = vmatmul.mubr.f32.gmra.mxu0 %v653_v51  ;;  %v681_v51 = vsel %vm641_vm1, %v676_v37, %v680_v45 }
  0x6b   :  { %1098 = vmatmul.mubr.f32.gmra.mxu1 %v942_v53  ;;  %813 = vmatprep.mubr.f32.mxu0 %v659_v56  ;;  %v684_v53 = vrot.slane %v16199_v58, 3  ;;  %v687_v56 = vsel %vm641_vm1, %v682_v42, %v686_v24  ;;  %v11955_v58 = vld [vmem:[%s22176_s3 + $0xf0] sm:$0xff] }
  0x6c   :  { %1102 = vmatprep.mubr.f32.mxu1 %v948_v57  ;;  %v976_v57 = vsel %vm930_vm2, %v971_v27, %v975_v40  ;;  %14509 = vmatpush3.msra.mxu0 %v11955_v58  ;;  %v11951_v27 = vld [vmem:[%s22176_s3 + $0xd0] sm:$0xff]  ;;  %v11945_v58 = vld [vmem:[%s22176_s3 + $0xa0] sm:$0xff] }
  0x6d   :  { %v685_v4 = vsel %vm641_vm1, %v680_v45, %v684_v53  ;;  %14510 = vmatprep.subr.mxu0 %v22186_v50 }
  0x6e   :  { %814 = vmatmul.mubr.f32.gmra.mxu0 %v657_v61  ;;  %v1257_v61 = vld [vmem:[%s22176_s3 + $0x70] sm:$0xff] }
  0x6f   :  { %1103 = vmatmul.mubr.f32.gmra.mxu1 %v946_v62  ;;  %818 = vmatprep.mubr.f32.mxu0 %v663_v2  ;;  %v974_v62 = vsel %vm930_vm2, %v969_v33, %v973_v55  ;;  %v691_v2 = vsel %vm641_vm1, %v686_v24, %v690_v60  ;;  %v11950_v33 = vld [vmem:[%s22176_s3 + $0xc8] sm:$0xff]  ;;  %v1251_v24 = vld [vmem:[%s22176_s3 + $0x40] sm:$0xff] }
  0x70   :  { %1107 = vmatprep.mubr.f32.mxu1 %v952_v3  ;;  %v980_v3 = vsel %vm930_vm2, %v975_v40, %v979_v34  ;;  %14580 = vmatpush3.msra.mxu1 %v1257_v61  ;;  %v11948_v40 = vld [vmem:[%s22176_s3 + $0xb8] sm:$0xff]  ;;  %v1248_v55 = vld [vmem:[%s22176_s3 + $0x28] sm:$0xff] }
  0x71   :  { %14581 = vmatprep.subr.mxu1 %v22186_v50  ;;  %14511 = vmatpush3.msra.mxu0 %v11954_v9  ;;  %v11946_v34 = vld [vmem:[%s22176_s3 + $0xa8] sm:$0xff]  ;;  %v11944_v61 = vld [vmem:[%s22176_s3 + $0x98] sm:$0xff] }
  0x72   :  { %819 = vmatmul.mubr.f32.gmra.mxu0 %v661_v8  ;;  %v573_v8 = vld [vmem:[%s22175_s0 + $0xf8] sm:$0xff]  ;;  %14582 = vmatpush3.msra.mxu1 %v1256_v18 }
  0x73   :  { %1108 = vmatmul.mubr.f32.gmra.mxu1 %v950_v10  ;;  %823 = vmatprep.mubr.f32.mxu0 %v667_v12  ;;  %v689_v10 = vsel %vm641_vm1, %v684_v53, %v688_v63  ;;  %v981_v12 = vrot.slane %v16255_v23, 4  ;;  %v698_v54 = vrot.slane %v573_v8, 3  ;;  %v892_v23 = vld [vmem:[%s22175_s0 + $0x108] sm:$0xf]  ;;  %v11947_v53 = vld [vmem:[%s22176_s3 + $0xb0] sm:$0xff] }
  0x74   :  { %1112 = vmatprep.mubr.f32.mxu1 %v956_v14  ;;  %v695_v14 = vsel %vm641_vm1, %v690_v60, %v694_v5  ;;  %14512 = vmatprep.subr.mxu0 %v22186_v50  ;;  %v1243_v60 = vld [vmem:[%s22176_s3] sm:$0xff] }
  0x75   :  { %14583 = vmatprep.subr.mxu1 %v22186_v50  ;;  %v982_v7 = vsel %vm930_vm2, %v977_v39, %v981_v12  ;;  %14513 = vmatpush3.msra.mxu0 %v11953_v59 }
  0x76   :  { %824 = vmatmul.mubr.f32.gmra.mxu0 %v665_v17  ;;  %v987_v17 = vrot.slane %v573_v8, 4  ;;  %14514 = vmatprep.subr.mxu0 %v22186_v50 }
  0x77   :  { %1113 = vmatmul.mubr.f32.gmra.mxu1 %v954_v20  ;;  %828 = vmatprep.mubr.f32.mxu0 %v671_v22  ;;  %v572_v20 = vld [vmem:[%s22175_s0 + $0xf0] sm:$0xff]  ;;  %v1255_v22 = vld [vmem:[%s22176_s3 + $0x60] sm:$0xff] }
  0x78   :  { %1117 = vmatprep.mubr.f32.mxu1 %v960_v25  ;;  %v693_v25 = vsel %vm641_vm1, %v688_v63, %v692_v49  ;;  %v696_v1 = vrot.slane %v572_v20, 3  ;;  %v988_v30 = vsel %vm930_vm2, %v983_v44, %v987_v17  ;;  %14584 = vmatpush3.msra.mxu1 %v1255_v22  ;;  %v11941_v63 = vld [vmem:[%s22176_s3 + $0x80] sm:$0xff] }
  0x79   :  { %14585 = vmatprep.subr.mxu1 %v22186_v50  ;;  %14515 = vmatpush3.msra.mxu0 %v11952_v16 }
  0x7a   :  { %829 = vmatmul.mubr.f32.gmra.mxu0 %v669_v26  ;;  %v985_v26 = vrot.slane %v572_v20, 4  ;;  %14516 = vmatprep.subr.mxu0 %v22186_v50 }
  0x7b   :  { %1118 = vmatmul.mubr.f32.gmra.mxu1 %v958_v28  ;;  %833 = vmatprep.mubr.f32.mxu0 %v675_v13  ;;  %v699_v28 = vsel %vm641_vm1, %v694_v5, %v698_v54  ;;  %v574_v13 = vld [vmem:[%s22175_s0 + $0x100] sm:$0x7] }
  0x7c   :  { %1122 = vmatprep.mubr.f32.mxu1 %v964_v31  ;;  %v991_v31 = vrot.slane %v892_v23, 4  ;;  %v986_v37 = vsel %vm930_vm2, %v981_v12, %v985_v26  ;;  %v700_v21 = vrot.slane %v574_v13, 3  ;;  %14517 = vmatpush3.msra.mxu0 %v11951_v27 }
  0x7d   :  { %14518 = vmatprep.subr.mxu0 %v22186_v50 }
  0x7e   :  { %834 = vmatmul.mubr.f32.gmra.mxu0 %v673_v35  ;;  %v1254_v35 = vld [vmem:[%s22176_s3 + $0x58] sm:$0xff]  ;;  %v992_v42 = vsel %vm930_vm2, %v987_v17, %v991_v31 }
  0x7f   :  { %1123 = vmatmul.mubr.f32.gmra.mxu1 %v962_v36  ;;  %838 = vmatprep.mubr.f32.mxu0 %v679_v38  ;;  %v697_v36 = vsel %vm641_vm1, %v692_v49, %v696_v1  ;;  %v989_v38 = vrot.slane %v891_v32, 4 }
  0x80   :  { %1127 = vmatprep.mubr.f32.mxu1 %v968_v41  ;;  %v703_v41 = vsel %vm641_vm1, %v698_v54, %v702_v6  ;;  %14586 = vmatpush3.msra.mxu1 %v1254_v35 }
  0x81   :  { %14587 = vmatprep.subr.mxu1 %v22186_v50  ;;  %v990_v45 = vsel %vm930_vm2, %v985_v26, %v989_v38  ;;  %14519 = vmatpush3.msra.mxu0 %v11950_v33 }
  0x82   :  { %839 = vmatmul.mubr.f32.gmra.mxu0 %v677_v19  ;;  %v1253_v19 = vld [vmem:[%s22176_s3 + $0x50] sm:$0xff]  ;;  %14520 = vmatprep.subr.mxu0 %v22186_v50 }
  0x83   :  { %1128 = vmatmul.mubr.f32.gmra.mxu1 %v966_v43  ;;  %843 = vmatprep.mubr.f32.mxu0 %v683_v47  ;;  %v701_v43 = vsel %vm641_vm1, %v696_v1, %v700_v21  ;;  %v1252_v47 = vld [vmem:[%s22176_s3 + $0x48] sm:$0xff] }
  0x84   :  { %1132 = vmatprep.mubr.f32.mxu1 %v972_v48  ;;  %14588 = vmatpush3.msra.mxu1 %v1253_v19  ;;  %v11949_v48 = vld [vmem:[%s22176_s3 + $0xc0] sm:$0xff] }
  0x85   :  { %14589 = vmatprep.subr.mxu1 %v22186_v50  ;;  %14521 = vmatpush3.msra.mxu0 %v11949_v48 }
  0x86   :  { %844 = vmatmul.mubr.f32.gmra.mxu0 %v681_v51  ;;  %14590 = vmatpush3.msra.mxu1 %v1252_v47  ;;  %v1250_v51 = vld [vmem:[%s22176_s3 + $0x38] sm:$0xff] }
  0x87   :  { %1133 = vmatmul.mubr.f32.gmra.mxu1 %v970_v46  ;;  %848 = vmatprep.mubr.f32.mxu0 %v687_v56  ;;  %v1249_v46 = vld [vmem:[%s22176_s3 + $0x30] sm:$0xff] }
  0x88   :  { %1137 = vmatprep.mubr.f32.mxu1 %v976_v57  ;;  %14591 = vmatprep.subr.mxu1 %v22186_v50  ;;  %v1245_v56 = vld [vmem:[%s22176_s3 + $0x10] sm:$0xff]  ;;  %v1244_v57 = vld [vmem:[%s22176_s3 + $0x8] sm:$0xff] }
  0x89   :  { %14522 = vmatprep.subr.mxu0 %v22186_v50  ;;  %14592 = vmatpush3.msra.mxu1 %v1251_v24 }
  0x8a   :  { %849 = vmatmul.mubr.f32.gmra.mxu0 %v685_v4  ;;  %14593 = vmatprep.subr.mxu1 %v22186_v50  ;;  %v11943_v4 = vld [vmem:[%s22176_s3 + $0x90] sm:$0xff] }
  0x8b   :  { %1138 = vmatmul.mubr.f32.gmra.mxu1 %v974_v62  ;;  %853 = vmatprep.mubr.f32.mxu0 %v691_v2  ;;  %v11942_v62 = vld [vmem:[%s22176_s3 + $0x88] sm:$0xff] }
  0x8c   :  { %1142 = vmatprep.mubr.f32.mxu1 %v980_v3  ;;  %14523 = vmatpush3.msra.mxu0 %v11948_v40 }
  0x8d   :  { %14594 = vmatpush3.msra.mxu1 %v1250_v51  ;;  %14524 = vmatprep.subr.mxu0 %v22186_v50 }
  0x8e   :  { %854 = vmatmul.mubr.f32.gmra.mxu0 %v689_v10  ;;  %14595 = vmatprep.subr.mxu1 %v22186_v50 }
  0x8f   :  { %1143 = vmatmul.mubr.f32.gmra.mxu1 %v978_v11  ;;  %858 = vmatprep.mubr.f32.mxu0 %v695_v14 }
  0x90   :  { %1147 = vmatprep.mubr.f32.mxu1 %v984_v15  ;;  %14596 = vmatpush3.msra.mxu1 %v1249_v46 }
  0x91   :  { %14597 = vmatprep.subr.mxu1 %v22186_v50  ;;  %14525 = vmatpush3.msra.mxu0 %v11947_v53 }
  0x92   :  { %859 = vmatmul.mubr.f32.gmra.mxu0 %v693_v25  ;;  %14598 = vmatpush3.msra.mxu1 %v1248_v55 }
  0x93   :  { %1148 = vmatmul.mubr.f32.gmra.mxu1 %v982_v7  ;;  %863 = vmatprep.mubr.f32.mxu0 %v699_v28 }
  0x94   :  { %1152 = vmatprep.mubr.f32.mxu1 %v988_v30  ;;  %14526 = vmatprep.subr.mxu0 %v22186_v50 }
  0x95   :  { %14599 = vmatprep.subr.mxu1 %v22186_v50  ;;  %14527 = vmatpush3.msra.mxu0 %v11946_v34 }
  0x96   :  { %864 = vmatmul.mubr.f32.gmra.mxu0 %v697_v36  ;;  %14600 = vmatpush3.msra.mxu1 %v1247_v52 }
  0x97   :  { %1153 = vmatmul.mubr.f32.gmra.mxu1 %v986_v37  ;;  %868 = vmatprep.mubr.f32.mxu0 %v703_v41 }
  0x98   :  { %1157 = vmatprep.mubr.f32.mxu1 %v992_v42  ;;  %14601 = vmatprep.subr.mxu1 %v22186_v50 }
  0x99   :  { %14602 = vmatpush3.msra.mxu1 %v1246_v29  ;;  %14528 = vmatprep.subr.mxu0 %v22186_v50 }
  0x9a   :  { %869 = vmatmul.mubr.f32.gmra.mxu0 %v701_v43  ;;  %14603 = vmatprep.subr.mxu1 %v22186_v50 }
  0x9b   :  { %1158 = vmatmul.mubr.f32.gmra.mxu1 %v990_v45  ;;  %14538 = vmatprep.mubr.msk.f32.mxu0 %vm15637_vm3, %v22186_v50 }
  0x9c   :  { %14604 = vmatpush3.msra.mxu1 %v1245_v56  ;;  %14609 = vmatprep.mubr.msk.f32.mxu1 %vm15637_vm3, %v22186_v50 }
  0x9d   :  { %14605 = vmatprep.subr.mxu1 %v22186_v50  ;;  %14529 = vmatpush3.msra.mxu0 %v11945_v58 }
  0x9e   :  { %14606 = vmatpush3.msra.mxu1 %v1244_v57  ;;  %14530 = vmatprep.subr.mxu0 %v22186_v50 }
  0x9f   :  { %14607 = vmatprep.subr.mxu1 %v22186_v50  ;;  %14531 = vmatpush3.msra.mxu0 %v11944_v61 }
  0xa0   :  { %14608 = vmatpush3.msra.mxu1 %v1243_v60  ;;  %14532 = vmatprep.subr.mxu0 %v22186_v50 }
  0xa1   :  { %14719 = vmatprep.subr.mxu1 %v22186_v50  ;;  %14533 = vmatpush3.msra.mxu0 %v11943_v4 }
  0xa2   :  { %14534 = vmatprep.subr.mxu0 %v22186_v50 }
  0xa3   :  { %14535 = vmatpush3.msra.mxu0 %v11942_v62 }
  0xa4   :  { %14536 = vmatprep.subr.mxu0 %v22186_v50 }
  0xa5   :  { %14537 = vmatpush3.msra.mxu0 %v11941_v63 }
  0xa6   :  { %14648 = vmatprep.subr.mxu0 %v22186_v50 }
  0xe4   :  { %v13366_v39 = vpop.f32.mrf.mxu0 }
  0xe5   :  { %v13443_v2 = vpop.f32.mrf.mxu1 }
  0xe6   :  { %v13367_v3 = vpop.f32.mrf.mxu0 }
  0xe7   :  { %v13444_v5 = vpop.f32.mrf.mxu1  ;;  %v13368_v4 = vadd.f32 %v13367_v3, %v13366_v39 }
  0xe8   :  { %v16603_v44 = vpop.f32.mrf.mxu0  ;;  %v13445_v62 = vadd.f32 %v13444_v5, %v13443_v2  ;;  %v16720_v2 = vld [vmem:[%s22177_s2] ss:$0 sm:$0xff] }
  0xe9   :  { %v16605_v8 = vpop.f32.mrf.mxu1 }
  0xea   :  { %v13370_v9 = vpop.f32.mrf.mxu0 }
  0xeb   :  { %v13447_v18 = vpop.f32.mrf.mxu1 }
  0xec   :  { %v16607_v10 = vpop.f32.mrf.mxu0 }
  0xed   :  { %v16609_v11 = vpop.f32.mrf.mxu1 }
  0xee   :  { %v16611_v49 = vpop.f32.mrf.mxu0 }
  0xef   :  { %v16613_v12 = vpop.f32.mrf.mxu1 }
  0xf0   :  { %v16615_v14 = vpop.f32.mrf.mxu0  ;;  %v13451_v39 = vadd.f32 %v16613_v12, %v16609_v11 }
  0xf1   :  { %v16617_v15 = vpop.f32.mrf.mxu1 }
  0xf2   :  { %v16619_v54 = vpop.f32.mrf.mxu0 }
  0xf3   :  { %v16621_v17 = vpop.f32.mrf.mxu1  ;;  %v13377_v11 = vadd.f32 %v16619_v54, %v16615_v14  ;;  %v11987_v14 = vld [vmem:[%s22176_s3 + $0x1f0] sm:$0xff] }
  0xf5   :  { %v16623_v20 = vpop.f32.mrf.mxu0  ;;  %v16625_v0 = vpop.f32.mrf.mxu1 }
  0xf7   :  { %v16627_v23 = vpop.f32.mrf.mxu0  ;;  %v16629_v59 = vpop.f32.mrf.mxu1 }
  0xf8   :  { %v13457_v54 = vadd.f32 %v16629_v59, %v16625_v0 }
  0xf9   :  { %v16631_v22 = vpop.f32.mrf.mxu0  ;;  %v16633_v25 = vpop.f32.mrf.mxu1 }
  0xfb   :  { %v16635_v7 = vpop.f32.mrf.mxu0  ;;  %v16637_v1 = vpop.f32.mrf.mxu1 }
  0xfd   :  { %v16639_v26 = vpop.f32.mrf.mxu0  ;;  %v16641_v28 = vpop.f32.mrf.mxu1 }
  0xff   :  { %v16643_v30 = vpop.f32.mrf.mxu0  ;;  %v16645_v6 = vpop.f32.mrf.mxu1 }
 0x101   :  { %v16647_v13 = vpop.f32.mrf.mxu0  ;;  %v16649_v31 = vpop.f32.mrf.mxu1 }
 0x103   :  { %v16651_v32 = vpop.f32.mrf.mxu0  ;;  %v16653_v16 = vpop.f32.mrf.mxu1 }
 0x105   :  { %v16657_v36 = vpop.f32.mrf.mxu1 }
 0x106   :  { %v16655_v35 = vpop.f32.mrf.mxu0 }
 0x107   :  { %v16661_v21 = vpop.f32.mrf.mxu1 }
 0x108   :  { %v16659_v37 = vpop.f32.mrf.mxu0 }
 0x109   :  { %v16665_v41 = vpop.f32.mrf.mxu1 }
 0x10a   :  { %v16663_v38 = vpop.f32.mrf.mxu0 }
 0x10b   :  { %v16669_v27 = vpop.f32.mrf.mxu1 }
 0x10c   :  { %v16667_v42 = vpop.f32.mrf.mxu0 }
 0x10d   :  { %v16673_v43 = vpop.f32.mrf.mxu1 }
 0x10e   :  { %v16671_v19 = vpop.f32.mrf.mxu0 }
 0x10f   :  { %v16677_v33 = vpop.f32.mrf.mxu1 }
 0x110   :  { %v16675_v45 = vpop.f32.mrf.mxu0 }
 0x111   :  { %v16681_v48 = vpop.f32.mrf.mxu1 }
 0x112   :  { %v16679_v47 = vpop.f32.mrf.mxu0 }
 0x113   :  { %v16685_v40 = vpop.f32.mrf.mxu1 }
 0x114   :  { %v16683_v24 = vpop.f32.mrf.mxu0 }
 0x116   :  { %v16687_v51 = vpop.f32.mrf.mxu0  ;;  %v16689_v46 = vpop.f32.mrf.mxu1 }
 0x117   :  { %22189 = vst [vmem:[#allocation6_spill] sm:$0xff] %v16687_v51  ;;  %22190 = vst [vmem:[#allocation7_spill] sm:$0xff] %v16689_v46  ;;  %v471_v46 = vadd.f32 %v13445_v62, %v13368_v4 }
 0x118   :  { %v16691_v53 = vpop.f32.mrf.mxu0  ;;  %v16693_v55 = vpop.f32.mrf.mxu1 }
 0x119   :  { %22191 = vst [vmem:[#allocation8_spill] sm:$0xff] %v16691_v53  ;;  %22192 = vst [vmem:[#allocation9_spill] sm:$0xff] %v16693_v55 }
 0x11a   :  { %v16695_v52 = vpop.f32.mrf.mxu0  ;;  %v16697_v29 = vpop.f32.mrf.mxu1 }
 0x11b   :  { %22193 = vst [vmem:[#allocation10_spill] sm:$0xff] %v16695_v52  ;;  %22194 = vst [vmem:[#allocation11_spill] sm:$0xff] %v16697_v29  ;;  %v13371_v29 = vadd.f32 %v13370_v9, %v16603_v44 }
 0x11c   :  { %v16699_v56 = vpop.f32.mrf.mxu0  ;;  %v16701_v57 = vpop.f32.mrf.mxu1 }
 0x11d   :  { %22195 = vst [vmem:[#allocation12_spill] sm:$0xff] %v16699_v56  ;;  %22196 = vst [vmem:[#allocation13_spill] sm:$0xff] %v16701_v57  ;;  %v13448_v56 = vadd.f32 %v13447_v18, %v16605_v8 }
 0x11e   :  { %v16703_v60 = vpop.f32.mrf.mxu0  ;;  %v16705_v34 = vpop.f32.mrf.mxu1 }
 0x11f   :  { %22197 = vst [vmem:[#allocation14_spill] sm:$0xff] %v16703_v60  ;;  %22198 = vst [vmem:[#allocation15_spill] sm:$0xff] %v16705_v34  ;;  %v476_v44 = vadd.f32 %v13448_v56, %v13371_v29 }
 0x120   :  { %v16707_v58 = vpop.f32.mrf.mxu0  ;;  %v16709_v61 = vpop.f32.mrf.mxu1 }
 0x121   :  { %22199 = vst [vmem:[#allocation16_spill] sm:$0xff] %v16707_v58  ;;  %v13374_v58 = vadd.f32 %v16611_v49, %v16607_v10 }
 0x122   :  { %v13520_v63 = vpop.f32.mrf.mxu0 }
 0x123   :  { %v13597_v50 = vpop.f32.mrf.mxu1  ;;  %v481_v10 = vadd.f32 %v13451_v39, %v13374_v58  ;;  %v22200_v39 = vmov 0.0  }
 0x124   :  { %v13521_v55 = vpop.f32.mrf.mxu0 }
 0x125   :  { %v13598_v52 = vpop.f32.mrf.mxu1  ;;  %v13522_v57 = vadd.f32 %v13521_v55, %v13520_v63 }
 0x126   :  { %v13523_v53 = vpop.f32.mrf.mxu0  ;;  %v13599_v34 = vadd.f32 %v13598_v52, %v13597_v50 }
 0x127   :  { %v13600_v60 = vpop.f32.mrf.mxu1  ;;  %v874_v51 = vadd.f32 %v13522_v57, %v471_v46  ;;  %v13454_v57 = vadd.f32 %v16621_v17, %v16617_v15  ;;  %v13380_v15 = vadd.f32 %v16627_v23, %v16623_v20 }
 0x128   :  { %v13524_v3 = vpop.f32.mrf.mxu0 }
 0x129   :  { %v13601_v5 = vpop.f32.mrf.mxu1  ;;  %v1163_v8 = vadd.f32 %v13599_v34, %v874_v51  ;;  %v13525_v9 = vadd.f32 %v13524_v3, %v13523_v53  ;;  %v11988_v51 = vld [vmem:[%s22176_s3 + $0x1f8] sm:$0xff]  ;;  %v486_v3 = vadd.f32 %v13454_v57, %v13377_v11  ;;  %v13460_v11 = vadd.f32 %v16637_v1, %v16633_v25  ;;  %v11983_v25 = vld [vmem:[%s22176_s3 + $0x1d0] sm:$0xff] }
 0x12a   :  { %v13526_v18 = vpop.f32.mrf.mxu0  ;;  %v13602_v52 = vadd.f32 %v13601_v5, %v13600_v60  ;;  %v13386_v1 = vadd.f32 %v16643_v30, %v16639_v26 }
 0x12b   :  { %v13603_v55 = vpop.f32.mrf.mxu1  ;;  %v1185_v50 = vadd.f32 %v16720_v2, %v1163_v8  ;;  %v875_v46 = vadd.f32 %v13525_v9, %v476_v44  ;;  %v11986_v9 = vld [vmem:[%s22176_s3 + $0x1e8] sm:$0xff] }
 0x12c   :  { %v13527_v49 = vpop.f32.mrf.mxu0 }
 0x12d   :  { %v13604_v12 = vpop.f32.mrf.mxu1  ;;  %v1200_v4 = vmax.f32 %v1185_v50, 0.0  ;;  %v1164_v62 = vadd.f32 %v13602_v52, %v875_v46  ;;  %v13528_v29 = vadd.f32 %v13527_v49, %v13526_v18  ;;  %v491_v50 = vadd.f32 %v13457_v54, %v13380_v15  ;;  %v11972_v54 = vld [vmem:[%s22176_s3 + $0x178] sm:$0xff] }
 0x12e   :  { %v13529_v53 = vpop.f32.mrf.mxu0  ;;  %v13605_v58 = vadd.f32 %v13604_v12, %v13603_v55  ;;  %v11985_v55 = vld [vmem:[%s22176_s3 + $0x1e0] sm:$0xff]  ;;  %v13383_v46 = vadd.f32 %v16635_v7, %v16631_v22 }
 0x12f   :  { %v13606_v56 = vpop.f32.mrf.mxu1  ;;  %1215 = vst [vmem:[#allocation2] sm:$0xff] %v1200_v4  ;;  %v1186_v60 = vadd.f32 %v16720_v2, %v1164_v62  ;;  %v876_v34 = vadd.f32 %v13528_v29, %v481_v10  ;;  %14610 = vmatmul.mubr.f32.vlgmr.msra.gmra.mxu1 %v1200_v4  ;;  %v11984_v4 = vld [vmem:[%s22176_s3 + $0x1d8] sm:$0xff] }
 0x130   :  { %v13530_v17 = vpop.f32.mrf.mxu0  ;;  %14612 = vmatprep.mubr.msk.f32.mxu1 %vm15637_vm3, %v22200_v39  ;;  %14720 = vmatpush3.msra.mxu1 %v11988_v51 }
 0x131   :  { %v13607_v63 = vpop.f32.mrf.mxu1  ;;  %v1201_v5 = vmax.f32 %v1186_v60, 0.0  ;;  %v1165_v44 = vadd.f32 %v13605_v58, %v876_v34  ;;  %v13531_v8 = vadd.f32 %v13530_v17, %v13529_v53  ;;  %14721 = vmatprep.subr.mxu1 %v22200_v39  ;;  %v13463_v53 = vadd.f32 %v16645_v6, %v16641_v28 }
 0x132   :  { %v13532_v20 = vpop.f32.mrf.mxu0  ;;  %14722 = vmatpush3.msra.mxu1 %v11987_v14  ;;  %v13608_v18 = vadd.f32 %v13607_v63, %v13606_v56  ;;  %v496_v34 = vadd.f32 %v13460_v11, %v13383_v46  ;;  %v11969_v46 = vld [vmem:[%s22176_s3 + $0x160] sm:$0xff] }
 0x133   :  { %v13609_v23 = vpop.f32.mrf.mxu1  ;;  %1216 = vst [vmem:[#allocation2 + $0x8] sm:$0xff] %v1201_v5  ;;  %v1187_v0 = vadd.f32 %v16720_v2, %v1165_v44  ;;  %v877_v59 = vadd.f32 %v13531_v8, %v486_v3  ;;  %14613 = vmatmul.mubr.f32.gmra.mxu1 %v1201_v5  ;;  %14723 = vmatprep.subr.mxu1 %v22200_v39  ;;  %v11971_v3 = vld [vmem:[%s22176_s3 + $0x170] sm:$0xff] }
 0x134   :  { %v13533_v52 = vpop.f32.mrf.mxu0  ;;  %14615 = vmatprep.mubr.msk.f32.mxu1 %vm15637_vm3, %v22200_v39  ;;  %14724 = vmatpush3.msra.mxu1 %v11986_v9  ;;  %v501_v5 = vadd.f32 %v13463_v53, %v13386_v1  ;;  %v13389_v44 = vadd.f32 %v16651_v32, %v16647_v13  ;;  %v13395_v1 = vadd.f32 %v16667_v42, %v16663_v38 }
 0x135   :  { %v13610_v10 = vpop.f32.mrf.mxu1  ;;  %v1202_v49 = vmax.f32 %v1187_v0, 0.0  ;;  %v1166_v12 = vadd.f32 %v13608_v18, %v877_v59  ;;  %v13534_v57 = vadd.f32 %v13533_v52, %v13532_v20  ;;  %14725 = vmatprep.subr.mxu1 %v22200_v39  ;;  %v13466_v20 = vadd.f32 %v16653_v16, %v16649_v31  ;;  %v11970_v18 = vld [vmem:[%s22176_s3 + $0x168] sm:$0xff] }
 0x136   :  { %v13535_v62 = vpop.f32.mrf.mxu0  ;;  %14726 = vmatpush3.msra.mxu1 %v11985_v55  ;;  %v13611_v51 = vadd.f32 %v13610_v10, %v13609_v23  ;;  %v13392_v52 = vadd.f32 %v16659_v37, %v16655_v35  ;;  %v13469_v10 = vadd.f32 %v16661_v21, %v16657_v36  ;;  %v11968_v35 = vld [vmem:[%s22176_s3 + $0x158] sm:$0xff] }
 0x137   :  { %v13612_v22 = vpop.f32.mrf.mxu1  ;;  %1217 = vst [vmem:[#allocation2 + $0x10] sm:$0xff] %v1202_v49  ;;  %v1188_v7 = vadd.f32 %v16720_v2, %v1166_v12  ;;  %v878_v29 = vadd.f32 %v13534_v57, %v491_v50  ;;  %14616 = vmatmul.mubr.f32.gmra.mxu1 %v1202_v49  ;;  %14727 = vmatprep.subr.mxu1 %v22200_v39 }
 0x138   :  { %v13536_v56 = vpop.f32.mrf.mxu0  ;;  %14618 = vmatprep.mubr.msk.f32.mxu1 %vm15637_vm3, %v22200_v39  ;;  %14728 = vmatpush3.msra.mxu1 %v11984_v4  ;;  %v506_v12 = vadd.f32 %v13466_v20, %v13389_v44 }
 0x139   :  { %v13613_v60 = vpop.f32.mrf.mxu1  ;;  %v1203_v58 = vmax.f32 %v1188_v7, 0.0  ;;  %v1167_v14 = vadd.f32 %v13611_v51, %v878_v29  ;;  %v13537_v15 = vadd.f32 %v13536_v56, %v13535_v62  ;;  %14729 = vmatprep.subr.mxu1 %v22200_v39  ;;  %v11967_v51 = vld [vmem:[%s22176_s3 + $0x150] sm:$0xff] }
 0x13a   :  { %v13538_v26 = vpop.f32.mrf.mxu0  ;;  %v1259_v17 = vld [vmem:[#allocation2 + $0x1] sm:$0xff]  ;;  %14730 = vmatpush3.msra.mxu1 %v11983_v25  ;;  %v13614_v63 = vadd.f32 %v13613_v60, %v13612_v22  ;;  %v511_v25 = vadd.f32 %v13469_v10, %v13392_v52  ;;  %v13472_v60 = vadd.f32 %v16669_v27, %v16665_v41 }
 0x13b   :  { %v13615_v30 = vpop.f32.mrf.mxu1  ;;  %1218 = vst [vmem:[#allocation2 + $0x18] sm:$0xff] %v1203_v58  ;;  %v1189_v28 = vadd.f32 %v16720_v2, %v1167_v14  ;;  %v879_v6 = vadd.f32 %v13537_v15, %v496_v34  ;;  %14539 = vmatmul.mubr.f32.vlgmr.msra.gmra.mxu0 %v1259_v17  ;;  %14619 = vmatmul.mubr.f32.gmra.mxu1 %v1203_v58  ;;  %v11966_v15 = vld [vmem:[%s22176_s3 + $0x148] sm:$0xff] }
 0x13c   :  { %v13539_v8 = vpop.f32.mrf.mxu0  ;;  %14649 = vmatpush3.msra.mxu0 %v11972_v54  ;;  %14541 = vmatprep.mubr.msk.f32.mxu0 %vm15637_vm3, %v22200_v39  ;;  %v13398_v17 = vadd.f32 %v16675_v45, %v16671_v19  ;;  %v11965_v19 = vld [vmem:[%s22176_s3 + $0x140] sm:$0xff] }
 0x13d   :  { %v13616_v9 = vpop.f32.mrf.mxu1  ;;  %v1204_v23 = vmax.f32 %v1189_v28, 0.0  ;;  %v1168_v0 = vadd.f32 %v13614_v63, %v879_v6  ;;  %v13540_v59 = vadd.f32 %v13539_v8, %v13538_v26  ;;  %14650 = vmatprep.subr.mxu0 %v22200_v39  ;;  %14621 = vmatprep.mubr.msk.f32.mxu1 %vm15637_vm3, %v22200_v39  ;;  %v13475_v28 = vadd.f32 %v16677_v33, %v16673_v43 }
 0x13e   :  { %v13541_v13 = vpop.f32.mrf.mxu0  ;;  %v1260_v55 = vld [vmem:[#allocation2 + $0x9] sm:$0xff]  ;;  %14651 = vmatpush3.msra.mxu0 %v11971_v3  ;;  %14731 = vmatprep.subr.mxu1 %v22200_v39  ;;  %v13617_v50 = vadd.f32 %v13616_v9, %v13615_v30  ;;  %v516_v3 = vadd.f32 %v13472_v60, %v13395_v1 }
 0x13f   :  { %v13618_v32 = vpop.f32.mrf.mxu1  ;;  %1219 = vst [vmem:[#allocation2 + $0x20] sm:$0xff] %v1204_v23  ;;  %v1190_v31 = vadd.f32 %v16720_v2, %v1168_v0  ;;  %v880_v16 = vadd.f32 %v13540_v59, %v501_v5  ;;  %14542 = vmatmul.mubr.f32.gmra.mxu0 %v1260_v55  ;;  %14652 = vmatprep.subr.mxu0 %v22200_v39  ;;  %v11982_v30 = vld [vmem:[%s22176_s3 + $0x1c8] sm:$0xff]  ;;  %v11981_v0 = vld [vmem:[%s22176_s3 + $0x1c0] sm:$0xff] }
 0x140   :  { %v13542_v11 = vpop.f32.mrf.mxu0  ;;  %14544 = vmatprep.mubr.msk.f32.mxu0 %vm15637_vm3, %v22200_v39  ;;  %14653 = vmatpush3.msra.mxu0 %v11970_v18  ;;  %v521_v59 = vadd.f32 %v13475_v28, %v13398_v17  ;;  %v13401_v18 = vadd.f32 %v16683_v24, %v16679_v47  ;;  %v13478_v55 = vadd.f32 %v16685_v40, %v16681_v48 }
 0x141   :  { %v13619_v49 = vpop.f32.mrf.mxu1  ;;  %v1205_v57 = vmax.f32 %v1190_v31, 0.0  ;;  %v1169_v4 = vadd.f32 %v13617_v50, %v880_v16  ;;  %v13543_v62 = vadd.f32 %v13542_v11, %v13541_v13  ;;  %14654 = vmatprep.subr.mxu0 %v22200_v39  ;;  %14622 = vmatmul.mubr.f32.gmra.mxu1 %v1204_v23  ;;  %v11980_v11 = vld [vmem:[%s22176_s3 + $0x1b8] sm:$0xff] }
 0x142   :  { %v13544_v37 = vpop.f32.mrf.mxu0  ;;  %v1261_v36 = vld [vmem:[#allocation2 + $0x11] sm:$0xff]  ;;  %14655 = vmatpush3.msra.mxu0 %v11969_v46  ;;  %14624 = vmatprep.mubr.msk.f32.mxu1 %vm15637_vm3, %v22200_v39  ;;  %v13620_v29 = vadd.f32 %v13619_v49, %v13618_v32  ;;  %v22201_v49 = vld [vmem:[#allocation6_spill] sm:$0xff] }
 0x143   :  { %v13621_v22 = vpop.f32.mrf.mxu1  ;;  %1220 = vst [vmem:[#allocation2 + $0x28] sm:$0xff] %v1205_v57  ;;  %v1191_v21 = vadd.f32 %v16720_v2, %v1169_v4  ;;  %v881_v7 = vadd.f32 %v13543_v62, %v506_v12  ;;  %14545 = vmatmul.mubr.f32.gmra.mxu0 %v1261_v36  ;;  %14656 = vmatprep.subr.mxu0 %v22200_v39  ;;  %v11964_v46 = vld [vmem:[%s22176_s3 + $0x138] sm:$0xff]  ;;  %v22203_v4 = vld [vmem:[#allocation7_spill] sm:$0xff] }
 0x144   :  { %v13545_v53 = vpop.f32.mrf.mxu0  ;;  %14547 = vmatprep.mubr.msk.f32.mxu0 %vm15637_vm3, %v22200_v39  ;;  %14657 = vmatpush3.msra.mxu0 %v11968_v35  ;;  %v22202_v12 = vld [vmem:[#allocation8_spill] sm:$0xff]  ;;  %v22204_v62 = vld [vmem:[#allocation9_spill] sm:$0xff]  ;;  %v526_v36 = vadd.f32 %v13478_v55, %v13401_v18 }
 0x145   :  { %v13622_v56 = vpop.f32.mrf.mxu1  ;;  %v1206_v34 = vmax.f32 %v1191_v21, 0.0  ;;  %v1170_v58 = vadd.f32 %v13620_v29, %v881_v7  ;;  %v13546_v14 = vadd.f32 %v13545_v53, %v13544_v37  ;;  %14625 = vmatmul.mubr.f32.gmra.mxu1 %v1205_v57  ;;  %14658 = vmatprep.subr.mxu0 %v22200_v39  ;;  %v13404_v57 = vadd.f32 %v22202_v12, %v22201_v49 }
 0x146   :  { %v13547_v38 = vpop.f32.mrf.mxu0  ;;  %v1262_v54 = vld [vmem:[#allocation2 + $0x19] sm:$0xff]  ;;  %14659 = vmatpush3.msra.mxu0 %v11967_v51  ;;  %14627 = vmatprep.mubr.msk.f32.mxu1 %vm15637_vm3, %v22200_v39  ;;  %v13623_v26 = vadd.f32 %v13622_v56, %v13621_v22  ;;  %v13481_v35 = vadd.f32 %v22204_v62, %v22203_v4  ;;  %v11963_v51 = vld [vmem:[%s22176_s3 + $0x130] sm:$0xff] }
 0x147   :  { %v13624_v42 = vpop.f32.mrf.mxu1  ;;  %1221 = vst [vmem:[#allocation2 + $0x30] sm:$0xff] %v1206_v34  ;;  %v1192_v41 = vadd.f32 %v16720_v2, %v1170_v58  ;;  %v882_v27 = vadd.f32 %v13546_v14, %v511_v25  ;;  %14548 = vmatmul.mubr.f32.gmra.mxu0 %v1262_v54  ;;  %14660 = vmatprep.subr.mxu0 %v22200_v39  ;;  %v11979_v58 = vld [vmem:[%s22176_s3 + $0x1b0] sm:$0xff]  ;;  %v11962_v14 = vld [vmem:[%s22176_s3 + $0x128] sm:$0xff] }
 0x148   :  { %v13548_v6 = vpop.f32.mrf.mxu0  ;;  %14550 = vmatprep.mubr.msk.f32.mxu0 %vm15637_vm3, %v22200_v39  ;;  %14661 = vmatpush3.msra.mxu0 %v11966_v15  ;;  %v531_v15 = vadd.f32 %v13481_v35, %v13404_v57  ;;  %v11976_v35 = vld [vmem:[%s22176_s3 + $0x198] sm:$0xff] }
 0x149   :  { %v13625_v63 = vpop.f32.mrf.mxu1  ;;  %v1207_v5 = vmax.f32 %v1192_v41, 0.0  ;;  %v1171_v44 = vadd.f32 %v13623_v26, %v882_v27  ;;  %v13549_v8 = vadd.f32 %v13548_v6, %v13547_v38  ;;  %14628 = vmatmul.mubr.f32.gmra.mxu1 %v1206_v34  ;;  %14662 = vmatprep.subr.mxu0 %v22200_v39  ;;  %v22205_v38 = vld [vmem:[#allocation10_spill] sm:$0xff]  ;;  %v22207_v26 = vld [vmem:[#allocation11_spill] sm:$0xff] }
 0x14a   :  { %v13550_v45 = vpop.f32.mrf.mxu0  ;;  %v1263_v43 = vld [vmem:[#allocation2 + $0x21] sm:$0xff]  ;;  %14630 = vmatprep.mubr.msk.f32.mxu1 %vm15637_vm3, %v22200_v39  ;;  %14732 = vmatpush3.msra.mxu1 %v11982_v30  ;;  %v13626_v23 = vadd.f32 %v13625_v63, %v13624_v42  ;;  %v22206_v42 = vld [vmem:[#allocation12_spill] sm:$0xff]  ;;  %v22208_v30 = vld [vmem:[#allocation13_spill] sm:$0xff] }
 0x14b   :  { %v13627_v9 = vpop.f32.mrf.mxu1  ;;  %1222 = vst [vmem:[#allocation2 + $0x38] sm:$0xff] %v1207_v5  ;;  %v1193_v33 = vadd.f32 %v16720_v2, %v1171_v44  ;;  %v883_v20 = vadd.f32 %v13549_v8, %v516_v3  ;;  %14551 = vmatmul.mubr.f32.gmra.mxu0 %v1263_v43  ;;  %14733 = vmatprep.subr.mxu1 %v22200_v39  ;;  %v11961_v43 = vld [vmem:[%s22176_s3 + $0x120] sm:$0xff] }
 0x14c   :  { %v13551_v13 = vpop.f32.mrf.mxu0  ;;  %14553 = vmatprep.mubr.msk.f32.mxu0 %vm15637_vm3, %v22200_v39  ;;  %14663 = vmatpush3.msra.mxu0 %v11965_v19  ;;  %v13407_v54 = vadd.f32 %v22206_v42, %v22205_v38  ;;  %v13484_v17 = vadd.f32 %v22208_v30, %v22207_v26  ;;  %v1723_v38 = vld [vmem:[#allocation2 + $0x14] sm:$0xff]  ;;  %v1549_v42 = vld [vmem:[#allocation2 + $0xb] sm:$0xff] }
 0x14d   :  { %v13628_v32 = vpop.f32.mrf.mxu1  ;;  %v1208_v31 = vmax.f32 %v1193_v33, 0.0  ;;  %v1172_v16 = vadd.f32 %v13626_v23, %v883_v20  ;;  %v13552_v50 = vadd.f32 %v13551_v13, %v13550_v45  ;;  %14631 = vmatmul.mubr.f32.gmra.mxu1 %v1207_v5  ;;  %14664 = vmatprep.subr.mxu0 %v22200_v39  ;;  %v22209_v33 = vld [vmem:[#allocation14_spill] sm:$0xff]  ;;  %v22210_v20 = vld [vmem:[#allocation16_spill] sm:$0xff] }
 0x14e   :  { %v13553_v47 = vpop.f32.mrf.mxu0  ;;  %v1264_v52 = vld [vmem:[#allocation2 + $0x29] sm:$0xff]  ;;  %14734 = vmatpush3.msra.mxu1 %v11981_v0  ;;  %14633 = vmatprep.mubr.msk.f32.mxu1 %vm15637_vm3, %v22200_v39  ;;  %v13629_v10 = vadd.f32 %v13628_v32, %v13627_v9  ;;  %v13410_v23 = vadd.f32 %v22210_v20, %v22209_v33  ;;  %v536_v32 = vadd.f32 %v13484_v17, %v13407_v54  ;;  %v1724_v54 = vld [vmem:[#allocation2 + $0x1c] sm:$0xff] }
 0x14f   :  { %v13630_v24 = vpop.f32.mrf.mxu1  ;;  %1223 = vst [vmem:[#allocation2 + $0x40] sm:$0xff] %v1208_v31  ;;  %v1194_v48 = vadd.f32 %v16720_v2, %v1172_v16  ;;  %v884_v40 = vadd.f32 %v13552_v50, %v521_v59  ;;  %14554 = vmatmul.mubr.f32.gmra.mxu0 %v1264_v52  ;;  %14735 = vmatprep.subr.mxu1 %v22200_v39  ;;  %v11978_v9 = vld [vmem:[%s22176_s3 + $0x1a8] sm:$0xff]  ;;  %v1551_v26 = vld [vmem:[#allocation2 + $0x1b] sm:$0xff] }
 0x150   :  { %v13554_v37 = vpop.f32.mrf.mxu0  ;;  %14556 = vmatprep.mubr.msk.f32.mxu0 %vm15637_vm3, %v22200_v39  ;;  %14665 = vmatpush3.msra.mxu0 %v11964_v46  ;;  %v22211_v0 = vld [vmem:[#allocation15_spill] sm:$0xff] }
 0x151   :  { %v13631_v22 = vpop.f32.mrf.mxu1  ;;  %v1209_v21 = vmax.f32 %v1194_v48, 0.0  ;;  %v1173_v7 = vadd.f32 %v13629_v10, %v884_v40  ;;  %v13555_v29 = vadd.f32 %v13554_v37, %v13553_v47  ;;  %14634 = vmatmul.mubr.f32.gmra.mxu1 %v1208_v31  ;;  %14666 = vmatprep.subr.mxu0 %v22200_v39  ;;  %v13487_v59 = vadd.f32 %v16709_v61, %v22211_v0  ;;  %v11977_v61 = vld [vmem:[%s22176_s3 + $0x1a0] sm:$0xff]  ;;  %v11960_v40 = vld [vmem:[%s22176_s3 + $0x118] sm:$0xff]  ;;  %v1726_v30 = vld [vmem:[#allocation2 + $0x2c] sm:$0xff] }
 0x152   :  { %v13556_v25 = vpop.f32.mrf.mxu0  ;;  %v1265_v53 = vld [vmem:[#allocation2 + $0x31] sm:$0xff]  ;;  %14736 = vmatpush3.msra.mxu1 %v11980_v11  ;;  %14636 = vmatprep.mubr.msk.f32.mxu1 %vm15637_vm3, %v22200_v39  ;;  %v13632_v34 = vadd.f32 %v13631_v22, %v13630_v24  ;;  %v1552_v17 = vld [vmem:[#allocation2 + $0x23] sm:$0xff] }
 0x153   :  { %v13633_v1 = vpop.f32.mrf.mxu1  ;;  %1224 = vst [vmem:[#allocation2 + $0x48] sm:$0xff] %v1209_v21  ;;  %v1195_v56 = vadd.f32 %v16720_v2, %v1173_v7  ;;  %v885_v60 = vadd.f32 %v13555_v29, %v526_v36  ;;  %14557 = vmatmul.mubr.f32.gmra.mxu0 %v1265_v53  ;;  %14737 = vmatprep.subr.mxu1 %v22200_v39  ;;  %v11974_v53 = vld [vmem:[%s22176_s3 + $0x188] sm:$0xff] }
 0x154   :  { %v13557_v41 = vpop.f32.mrf.mxu0  ;;  %14559 = vmatprep.mubr.msk.f32.mxu0 %vm15637_vm3, %v22200_v39  ;;  %14667 = vmatpush3.msra.mxu0 %v11963_v51  ;;  %v541_v10 = vadd.f32 %v13487_v59, %v13410_v23  ;;  %v11959_v51 = vld [vmem:[%s22176_s3 + $0x110] sm:$0xff] }
 0x155   :  { %v13634_v27 = vpop.f32.mrf.mxu1  ;;  %v1210_v28 = vmax.f32 %v1195_v56, 0.0  ;;  %v1174_v6 = vadd.f32 %v13632_v34, %v885_v60  ;;  %v13558_v63 = vadd.f32 %v13557_v41, %v13556_v25  ;;  %14637 = vmatmul.mubr.f32.gmra.mxu1 %v1209_v21  ;;  %14668 = vmatprep.subr.mxu0 %v22200_v39  ;;  %v11975_v21 = vld [vmem:[%s22176_s3 + $0x190] sm:$0xff]  ;;  %v11958_v56 = vld [vmem:[%s22176_s3 + $0x108] sm:$0xff] }
 0x156   :  { %v13559_v3 = vpop.f32.mrf.mxu0  ;;  %v1266_v44 = vld [vmem:[#allocation2 + $0x39] sm:$0xff]  ;;  %14738 = vmatpush3.msra.mxu1 %v11979_v58  ;;  %14669 = vmatpush3.msra.mxu0 %v11962_v14  ;;  %v13635_v45 = vadd.f32 %v13634_v27, %v13633_v1  ;;  %v1722_v14 = vld [vmem:[#allocation2 + $0xc] sm:$0xff]  ;;  %v1725_v27 = vld [vmem:[#allocation2 + $0x24] sm:$0xff] }
 0x157   :  { %v13636_v5 = vpop.f32.mrf.mxu1  ;;  %1225 = vst [vmem:[#allocation2 + $0x50] sm:$0xff] %v1210_v28  ;;  %v1196_v8 = vadd.f32 %v16720_v2, %v1174_v6  ;;  %v886_v19 = vadd.f32 %v13558_v63, %v531_v15  ;;  %14560 = vmatmul.mubr.f32.gmra.mxu0 %v1266_v44  ;;  %14639 = vmatprep.mubr.msk.f32.mxu1 %vm15637_vm3, %v22200_v39  ;;  %v11957_v58 = vld [vmem:[%s22176_s3 + $0x100] sm:$0xff]  ;;  %v1550_v41 = vld [vmem:[#allocation2 + $0x13] sm:$0xff]  ;;  %v1553_v6 = vld [vmem:[#allocation2 + $0x2b] sm:$0xff] }
 0x158   :  { %v13560_v18 = vpop.f32.mrf.mxu0  ;;  %14562 = vmatprep.mubr.msk.f32.mxu0 %vm15637_vm3, %v22200_v39  ;;  %14739 = vmatprep.subr.mxu1 %v22200_v39  ;;  %v1728_v63 = vld [vmem:[#allocation2 + $0x3c] sm:$0xff] }
 0x159   :  { %v13637_v13 = vpop.f32.mrf.mxu1  ;;  %v1211_v55 = vmax.f32 %v1196_v8, 0.0  ;;  %v1175_v31 = vadd.f32 %v13635_v45, %v886_v19  ;;  %v13561_v16 = vadd.f32 %v13560_v18, %v13559_v3  ;;  %14640 = vmatmul.mubr.f32.gmra.mxu1 %v1210_v28  ;;  %14670 = vmatprep.subr.mxu0 %v22200_v39  ;;  %v1727_v28 = vld [vmem:[#allocation2 + $0x34] sm:$0xff] }
 0x15a   :  { %v13562_v50 = vpop.f32.mrf.mxu0  ;;  %v1267_v46 = vld [vmem:[#allocation2 + $0x41] sm:$0xff]  ;;  %14740 = vmatpush3.msra.mxu1 %v11978_v9  ;;  %14671 = vmatpush3.msra.mxu0 %v11961_v43  ;;  %v13638_v48 = vadd.f32 %v13637_v13, %v13636_v5  ;;  %v1554_v3 = vld [vmem:[#allocation2 + $0x33] sm:$0xff] }
 0x15b   :  { %v13639_v47 = vpop.f32.mrf.mxu1  ;;  %1226 = vst [vmem:[#allocation2 + $0x58] sm:$0xff] %v1211_v55  ;;  %v1197_v24 = vadd.f32 %v16720_v2, %v1175_v31  ;;  %v887_v52 = vadd.f32 %v13561_v16, %v536_v32  ;;  %14563 = vmatmul.mubr.f32.gmra.mxu0 %v1267_v46  ;;  %14741 = vmatprep.subr.mxu1 %v22200_v39  ;;  %v1729_v5 = vld [vmem:[#allocation2 + $0x44] sm:$0xff]  ;;  %v1555_v44 = vld [vmem:[#allocation2 + $0x3b] sm:$0xff]  ;;  %v11996_v32 = vld [vmem:[%s22178_s5 + $0x70] sm:$0xff] }
 0x15c   :  { %v13563_v11 = vpop.f32.mrf.mxu0  ;;  %14565 = vmatprep.mubr.msk.f32.mxu0 %vm15637_vm3, %v22200_v39  ;;  %14642 = vmatprep.mubr.msk.f32.mxu1 %vm15637_vm3, %v22200_v39  ;;  %v1556_v19 = vld [vmem:[#allocation2 + $0x43] sm:$0xff]  ;;  %v11997_v13 = vld [vmem:[%s22178_s5 + $0x78] sm:$0xff]  ;;  %v1958_v16 = vld [vmem:[%s22178_s5 + $0x30] sm:$0xff] }
 0x15d   :  { %v13640_v49 = vpop.f32.mrf.mxu1  ;;  %v1212_v12 = vmax.f32 %v1197_v24, 0.0  ;;  %v1176_v57 = vadd.f32 %v13638_v48, %v887_v52  ;;  %v13564_v4 = vadd.f32 %v13563_v11, %v13562_v50  ;;  %14672 = vmatprep.subr.mxu0 %v22200_v39  ;;  %14742 = vmatpush3.msra.mxu1 %v11977_v61  ;;  %v1959_v31 = vld [vmem:[%s22178_s5 + $0x38] sm:$0xff]  ;;  %v1957_v50 = vld [vmem:[%s22178_s5 + $0x28] sm:$0xff]  ;;  %v11994_v46 = vld [vmem:[%s22178_s5 + $0x60] sm:$0xff] }
 0x15e   :  { %v13641_v62 = vadd.f32 %v13640_v49, %v13639_v47  ;;  %v1268_v37 = vld [vmem:[#allocation2 + $0x49] sm:$0xff]  ;;  %14643 = vmatmul.mubr.f32.gmra.mxu1 %v1211_v55  ;;  %14673 = vmatpush3.msra.mxu0 %v11960_v40  ;;  %v1956_v47 = vld [vmem:[%s22178_s5 + $0x20] sm:$0xff]  ;;  %v1955_v61 = vld [vmem:[%s22178_s5 + $0x18] sm:$0xff] }
 0x15f   :  { %1227 = vst [vmem:[#allocation2 + $0x60] sm:$0xff] %v1212_v12  ;;  %v1198_v22 = vadd.f32 %v16720_v2, %v1176_v57  ;;  %v888_v36 = vadd.f32 %v13564_v4, %v541_v10  ;;  %14566 = vmatmul.mubr.f32.gmra.mxu0 %v1268_v37  ;;  %14743 = vmatprep.subr.mxu1 %v22200_v39  ;;  %v1730_v8 = vld [vmem:[#allocation2 + $0x4c] sm:$0xff]  ;;  %v11993_v24 = vld [vmem:[%s22178_s5 + $0x58] sm:$0xff]  ;;  %v1952_v10 = vld [vmem:[%s22178_s5] sm:$0xff] }
 0x160   :  { %14568 = vmatprep.mubr.msk.f32.mxu0 %vm15637_vm3, %v22200_v39  ;;  %14744 = vmatpush3.msra.mxu1 %v11976_v35  ;;  %v1557_v9 = vld [vmem:[#allocation2 + $0x4b] sm:$0xff]  ;;  %v11990_v49 = vld [vmem:[%s22178_s5 + $0x40] sm:$0xff]  ;;  %v17068_v57 = vld [vmem:[%s22178_s5 + $0xb8] sm:$0xff] }
 0x161   :  { %v1213_v7 = vmax.f32 %v1198_v22, 0.0  ;;  %v1177_v29 = vadd.f32 %v13641_v62, %v888_v36  ;;  %14745 = vmatprep.subr.mxu1 %v22200_v39  ;;  %14645 = vmatprep.mubr.msk.f32.mxu1 %vm15637_vm3, %v22200_v39  ;;  %v11995_v55 = vld [vmem:[%s22178_s5 + $0x68] sm:$0xff]  ;;  %v1954_v52 = vld [vmem:[%s22178_s5 + $0x10] sm:$0xff] }
 0x162   :  { %v1269_v25 = vld [vmem:[#allocation2 + $0x51] sm:$0xff]  ;;  %14674 = vmatprep.subr.mxu0 %v22200_v39  ;;  %14746 = vmatpush3.msra.mxu1 %v11975_v21  ;;  %v1953_v48 = vld [vmem:[%s22178_s5 + $0x8] sm:$0xff] }
 0x163   :  { %1228 = vst [vmem:[#allocation2 + $0x68] sm:$0xff] %v1213_v7  ;;  %v1199_v1 = vadd.f32 %v16720_v2, %v1177_v29  ;;  %14569 = vmatmul.mubr.f32.gmra.mxu0 %v1269_v25  ;;  %14646 = vmatmul.mubr.f32.gmra.mxu1 %v1212_v12  ;;  %v11973_v2 = vld [vmem:[%s22176_s3 + $0x180] sm:$0xff]  ;;  %v1731_v45 = vld [vmem:[#allocation2 + $0x54] sm:$0xff]  ;;  %v11991_v11 = vld [vmem:[%s22178_s5 + $0x48] sm:$0xff] }
 0x164   :  { %14571 = vmatprep.mubr.msk.f32.mxu0 %vm15637_vm3, %v22200_v39  ;;  %14675 = vmatpush3.msra.mxu0 %v11959_v51  ;;  %v1558_v33 = vld [vmem:[#allocation2 + $0x53] sm:$0xff] }
 0x165   :  { %v1214_v60 = vmax.f32 %v1199_v1, 0.0  ;;  %14747 = vmatprep.subr.mxu1 %v22200_v39  ;;  %14676 = vmatprep.subr.mxu0 %v22200_v39  ;;  %v11992_v40 = vld [vmem:[%s22178_s5 + $0x50] sm:$0xff]  ;;  %v17062_v12 = vld [vmem:[%s22178_s5 + $0xf8] sm:$0xff] }
 0x166   :  { %v1270_v34 = vld [vmem:[#allocation2 + $0x59] sm:$0xff]  ;;  %14748 = vmatpush3.msra.mxu1 %v11974_v53  ;;  %14677 = vmatpush3.msra.mxu0 %v11958_v56 }
 0x167   :  { %1229 = vst [vmem:[#allocation2 + $0x70] sm:$0xff] %v1214_v60  ;;  %14572 = vmatmul.mubr.f32.gmra.mxu0 %v1270_v34  ;;  %14749 = vmatprep.subr.mxu1 %v22200_v39  ;;  %v1732_v43 = vld [vmem:[#allocation2 + $0x5c] sm:$0xff] }
 0x168   :  { %14574 = vmatprep.mubr.msk.f32.mxu0 %vm15637_vm3, %v22200_v39  ;;  %14750 = vmatpush3.msra.mxu1 %v11973_v2  ;;  %v1559_v23 = vld [vmem:[#allocation2 + $0x5b] sm:$0xff] }
 0x169   :  { %14751 = vmatprep.mubr.msk.f32.mxu1 %vm15637_vm3, %v22200_v39  ;;  %14678 = vmatprep.subr.mxu0 %v22200_v39 }
 0x16a   :  { %v1271_v15 = vld [vmem:[#allocation2 + $0x61] sm:$0xff]  ;;  %14752 = vmatmul.mubr.f32.vlgmr.msra.gmra.mxu1 %v1722_v14  ;;  %14679 = vmatpush3.msra.mxu0 %v11957_v58 }
 0x16b   :  { %14575 = vmatmul.mubr.f32.gmra.mxu0 %v1271_v15  ;;  %14754 = vmatprep.mubr.msk.f32.mxu1 %vm15637_vm3, %v22200_v39  ;;  %v1733_v20 = vld [vmem:[#allocation2 + $0x64] sm:$0xff] }
 0x16c   :  { %14680 = vmatprep.mubr.msk.f32.mxu0 %vm15637_vm3, %v22200_v39  ;;  %v1560_v59 = vld [vmem:[#allocation2 + $0x63] sm:$0xff]  ;;  %14790 = vmatprep.subr.mxu0 %v11997_v13 }
 0x16d   :  { %14821 = vmatprep.subr.mxu1 %v1959_v31 }
 0x16e   :  { %14755 = vmatmul.mubr.f32.gmra.mxu1 %v1723_v38  ;;  %v1734_v0 = vld [vmem:[#allocation2 + $0x6c] sm:$0xff] }
 0x16f   :  { %14681 = vmatmul.mubr.f32.vlgmr.msra.gmra.mxu0 %v1549_v42  ;;  %14757 = vmatprep.mubr.msk.f32.mxu1 %vm15637_vm3, %v22200_v39  ;;  %v1561_v18 = vld [vmem:[#allocation2 + $0x6b] sm:$0xff] }
 0x170   :  { %14683 = vmatprep.mubr.msk.f32.mxu0 %vm15637_vm3, %v22200_v39  ;;  %14791 = vmatpush3.msra.mxu0 %v11997_v13 }
 0x171   :  { %14792 = vmatprep.subr.mxu0 %v11996_v32  ;;  %14822 = vmatpush3.msra.mxu1 %v1959_v31 }
 0x172   :  { %14758 = vmatmul.mubr.f32.gmra.mxu1 %v1724_v54  ;;  %14793 = vmatpush3.msra.mxu0 %v11996_v32 }
 0x173   :  { %14684 = vmatmul.mubr.f32.gmra.mxu0 %v1550_v41  ;;  %14760 = vmatprep.mubr.msk.f32.mxu1 %vm15637_vm3, %v22200_v39 }
 0x174   :  { %14686 = vmatprep.mubr.msk.f32.mxu0 %vm15637_vm3, %v22200_v39  ;;  %14794 = vmatprep.subr.mxu0 %v11995_v55 }
 0x175   :  { %14795 = vmatpush3.msra.mxu0 %v11995_v55  ;;  %14823 = vmatprep.subr.mxu1 %v1958_v16 }
 0x176   :  { %14761 = vmatmul.mubr.f32.gmra.mxu1 %v1725_v27  ;;  %14796 = vmatprep.subr.mxu0 %v11994_v46 }
 0x177   :  { %14687 = vmatmul.mubr.f32.gmra.mxu0 %v1551_v26  ;;  %14763 = vmatprep.mubr.msk.f32.mxu1 %vm15637_vm3, %v22200_v39 }
 0x178   :  { %14689 = vmatprep.mubr.msk.f32.mxu0 %vm15637_vm3, %v22200_v39  ;;  %14824 = vmatpush3.msra.mxu1 %v1958_v16 }
 0x179   :  { %14825 = vmatprep.subr.mxu1 %v1957_v50  ;;  %14797 = vmatpush3.msra.mxu0 %v11994_v46 }
 0x17a   :  { %14764 = vmatmul.mubr.f32.gmra.mxu1 %v1726_v30  ;;  %14798 = vmatprep.subr.mxu0 %v11993_v24 }
 0x17b   :  { %14690 = vmatmul.mubr.f32.gmra.mxu0 %v1552_v17  ;;  %14766 = vmatprep.mubr.msk.f32.mxu1 %vm15637_vm3, %v22200_v39 }
 0x17c   :  { %14692 = vmatprep.mubr.msk.f32.mxu0 %vm15637_vm3, %v22200_v39  ;;  %14826 = vmatpush3.msra.mxu1 %v1957_v50 }
 0x17d   :  { %14827 = vmatprep.subr.mxu1 %v1956_v47  ;;  %14799 = vmatpush3.msra.mxu0 %v11993_v24 }
 0x17e   :  { %14767 = vmatmul.mubr.f32.gmra.mxu1 %v1727_v28  ;;  %14800 = vmatprep.subr.mxu0 %v11992_v40 }
 0x17f   :  { %14693 = vmatmul.mubr.f32.gmra.mxu0 %v1553_v6  ;;  %14769 = vmatprep.mubr.msk.f32.mxu1 %vm15637_vm3, %v22200_v39 }
 0x180   :  { %14695 = vmatprep.mubr.msk.f32.mxu0 %vm15637_vm3, %v22200_v39  ;;  %14828 = vmatpush3.msra.mxu1 %v1956_v47 }
 0x181   :  { %14829 = vmatprep.subr.mxu1 %v1955_v61  ;;  %14801 = vmatpush3.msra.mxu0 %v11992_v40 }
 0x182   :  { %14770 = vmatmul.mubr.f32.gmra.mxu1 %v1728_v63  ;;  %14802 = vmatprep.subr.mxu0 %v11991_v11 }
 0x183   :  { %14696 = vmatmul.mubr.f32.gmra.mxu0 %v1554_v3  ;;  %14772 = vmatprep.mubr.msk.f32.mxu1 %vm15637_vm3, %v22200_v39 }
 0x184   :  { %14698 = vmatprep.mubr.msk.f32.mxu0 %vm15637_vm3, %v22200_v39  ;;  %14830 = vmatpush3.msra.mxu1 %v1955_v61 }
 0x185   :  { %14831 = vmatprep.subr.mxu1 %v1954_v52  ;;  %14803 = vmatpush3.msra.mxu0 %v11991_v11  ;;  %v17116_v11 = vld [vmem:[%s22179_s4] ss:$0 sm:$0xff] }
 0x186   :  { %14773 = vmatmul.mubr.f32.gmra.mxu1 %v1729_v5  ;;  %14804 = vmatprep.subr.mxu0 %v11990_v49 }
 0x187   :  { %14699 = vmatmul.mubr.f32.gmra.mxu0 %v1555_v44  ;;  %14775 = vmatprep.mubr.msk.f32.mxu1 %vm15637_vm3, %v22200_v39 }
 0x188   :  { %14701 = vmatprep.mubr.msk.f32.mxu0 %vm15637_vm3, %v22200_v39  ;;  %14832 = vmatpush3.msra.mxu1 %v1954_v52 }
 0x189   :  { %14833 = vmatprep.subr.mxu1 %v1953_v48  ;;  %14805 = vmatpush3.msra.mxu0 %v11990_v49 }
 0x18a   :  { %14776 = vmatmul.mubr.f32.gmra.mxu1 %v1730_v8  ;;  %14852 = vmatprep.subr.mxu0 %v17068_v57 }
 0x18b   :  { %14702 = vmatmul.mubr.f32.gmra.mxu0 %v1556_v19  ;;  %14778 = vmatprep.mubr.msk.f32.mxu1 %vm15637_vm3, %v22200_v39 }
 0x18c   :  { %14704 = vmatprep.mubr.msk.f32.mxu0 %vm15637_vm3, %v22200_v39  ;;  %14834 = vmatpush3.msra.mxu1 %v1953_v48 }
 0x18d   :  { %14835 = vmatprep.subr.mxu1 %v1952_v10 }
 0x18e   :  { %14779 = vmatmul.mubr.f32.gmra.mxu1 %v1731_v45 }
 0x18f   :  { %14705 = vmatmul.mubr.f32.gmra.mxu0 %v1557_v9  ;;  %14781 = vmatprep.mubr.msk.f32.mxu1 %vm15637_vm3, %v22200_v39 }
 0x190   :  { %14707 = vmatprep.mubr.msk.f32.mxu0 %vm15637_vm3, %v22200_v39  ;;  %14836 = vmatpush3.msra.mxu1 %v1952_v10 }
 0x191   :  { %14883 = vmatprep.subr.mxu1 %v17062_v12 }
 0x192   :  { %14782 = vmatmul.mubr.f32.gmra.mxu1 %v1732_v43 }
 0x193   :  { %14708 = vmatmul.mubr.f32.gmra.mxu0 %v1558_v33  ;;  %14784 = vmatprep.mubr.msk.f32.mxu1 %vm15637_vm3, %v22200_v39 }
 0x194   :  { %14710 = vmatprep.mubr.msk.f32.mxu0 %vm15637_vm3, %v22200_v39 }
 0x196   :  { %14785 = vmatmul.mubr.f32.gmra.mxu1 %v1733_v20 }
 0x197   :  { %14711 = vmatmul.mubr.f32.gmra.mxu0 %v1559_v23  ;;  %14787 = vmatprep.mubr.msk.f32.mxu1 %vm15637_vm3, %v22200_v39 }
 0x198   :  { %14713 = vmatprep.mubr.msk.f32.mxu0 %vm15637_vm3, %v22200_v39 }
 0x19a   :  { %14788 = vmatmul.mubr.f32.gmra.mxu1 %v1734_v0 }
 0x19b   :  { %14714 = vmatmul.mubr.f32.gmra.mxu0 %v1560_v59 }
 0x19c   :  { %14716 = vmatprep.mubr.msk.f32.mxu0 %vm15637_vm3, %v22200_v39 }
 0x19f   :  { %14717 = vmatmul.mubr.f32.gmra.mxu0 %v1561_v18 }
 0x1ef   :  { %v1485_v4 = vpop.f32.mrf.mxu1 }
 0x1f1   :  { %v14611_v62 = vpop.f32.mrf.mxu1 }
 0x1f3   :  { %v1490_v35 = vpop.f32.mrf.mxu1 }
 0x1f5   :  { %v14614_v37 = vpop.f32.mrf.mxu1 }
 0x1f7   :  { %v17071_v22 = vpop.f32.mrf.mxu1 }
 0x1f9   :  { %v14617_v36 = vpop.f32.mrf.mxu1 }
 0x1fb   :  { %v1355_v21 = vpop.f32.mrf.mxu0  ;;  %v17073_v7 = vpop.f32.mrf.mxu1 }
 0x1fc   :  { %v1486_v24 = vadd.f32 %v1485_v4, %v1355_v21 }
 0x1fd   :  { %v14540_v29 = vpop.f32.mrf.mxu0  ;;  %v14620_v51 = vpop.f32.mrf.mxu1 }
 0x1ff   :  { %v1360_v25 = vpop.f32.mrf.mxu0 }
 0x200   :  { %v1491_v62 = vadd.f32 %v1490_v35, %v1360_v25 }
 0x201   :  { %v14543_v1 = vpop.f32.mrf.mxu0  ;;  %v17075_v53 = vpop.f32.mrf.mxu1 }
 0x203   :  { %v1365_v56 = vpop.f32.mrf.mxu0  ;;  %v14623_v60 = vpop.f32.mrf.mxu1 }
 0x204   :  { %v1496_v21 = vadd.f32 %v17071_v22, %v1365_v56 }
 0x205   :  { %v14546_v2 = vpop.f32.mrf.mxu0  ;;  %v17077_v34 = vpop.f32.mrf.mxu1 }
 0x207   :  { %v17079_v58 = vpop.f32.mrf.mxu0  ;;  %v14626_v14 = vpop.f32.mrf.mxu1 }
 0x209   :  { %v14549_v15 = vpop.f32.mrf.mxu0  ;;  %v17081_v38 = vpop.f32.mrf.mxu1 }
 0x20b   :  { %v17083_v42 = vpop.f32.mrf.mxu0  ;;  %v14629_v54 = vpop.f32.mrf.mxu1 }
 0x20d   :  { %v14552_v41 = vpop.f32.mrf.mxu0  ;;  %v17085_v27 = vpop.f32.mrf.mxu1 }
 0x20f   :  { %v17087_v26 = vpop.f32.mrf.mxu0  ;;  %v14632_v30 = vpop.f32.mrf.mxu1 }
 0x211   :  { %v14555_v17 = vpop.f32.mrf.mxu0  ;;  %v17089_v28 = vpop.f32.mrf.mxu1 }
 0x212   :  { %v1501_v17 = vadd.f32 %v17073_v7, %v17079_v58 }
 0x213   :  { %v17091_v6 = vpop.f32.mrf.mxu0  ;;  %v14635_v63 = vpop.f32.mrf.mxu1 }
 0x215   :  { %v14558_v3 = vpop.f32.mrf.mxu0  ;;  %v17093_v5 = vpop.f32.mrf.mxu1 }
 0x217   :  { %v17095_v44 = vpop.f32.mrf.mxu0  ;;  %v14638_v8 = vpop.f32.mrf.mxu1 }
 0x219   :  { %v14561_v19 = vpop.f32.mrf.mxu0  ;;  %v17097_v45 = vpop.f32.mrf.mxu1 }
 0x21b   :  { %v17099_v9 = vpop.f32.mrf.mxu0  ;;  %v14641_v43 = vpop.f32.mrf.mxu1 }
 0x21d   :  { %v14564_v33 = vpop.f32.mrf.mxu0 }
 0x21e   :  { %v17101_v20 = vpop.f32.mrf.mxu1 }
 0x21f   :  { %v17103_v23 = vpop.f32.mrf.mxu0 }
 0x220   :  { %v14644_v0 = vpop.f32.mrf.mxu1 }
 0x221   :  { %v14567_v59 = vpop.f32.mrf.mxu0  ;;  %v1506_v0 = vadd.f32 %v17075_v53, %v17083_v42 }
 0x223   :  { %v17105_v18 = vpop.f32.mrf.mxu0  ;;  %v17107_v13 = vpop.f32.mrf.mxu1 }
 0x225   :  { %v14570_v32 = vpop.f32.mrf.mxu0  ;;  %v14647_v55 = vpop.f32.mrf.mxu1 }
 0x227   :  { %v17109_v31 = vpop.f32.mrf.mxu0 }
 0x229   :  { %v14573_v16 = vpop.f32.mrf.mxu0 }
 0x22a   :  { %v1818_v50 = vpop.f32.mrf.mxu1 }
 0x22b   :  { %v17111_v46 = vpop.f32.mrf.mxu0 }
 0x22c   :  { %v14753_v47 = vpop.f32.mrf.mxu1 }
 0x22d   :  { %v14576_v61 = vpop.f32.mrf.mxu0 }
 0x22e   :  { %v1823_v52 = vpop.f32.mrf.mxu1 }
 0x22f   :  { %v1645_v48 = vpop.f32.mrf.mxu0 }
 0x230   :  { %v1709_v40 = vadd.f32 %v1645_v48, %v1486_v24  ;;  %v14756_v10 = vpop.f32.mrf.mxu1  ;;  %v1511_v24 = vadd.f32 %v17077_v34, %v17087_v26 }
 0x231   :  { %v14682_v49 = vpop.f32.mrf.mxu0 }
 0x232   :  { %v1882_v37 = vadd.f32 %v1818_v50, %v1709_v40  ;;  %v1828_v36 = vpop.f32.mrf.mxu1  ;;  %v12042_v49 = vld [vmem:[%s22178_s5 + $0xf0] sm:$0xff] }
 0x233   :  { %v1650_v29 = vpop.f32.mrf.mxu0 }
 0x234   :  { %v1902_v51 = vadd.f32 %v17116_v11, %v1882_v37  ;;  %v1710_v1 = vadd.f32 %v1650_v29, %v1491_v62  ;;  %v14759_v60 = vpop.f32.mrf.mxu1 }
 0x235   :  { %v14685_v4 = vpop.f32.mrf.mxu0  ;;  %v12041_v60 = vld [vmem:[%s22178_s5 + $0xe8] sm:$0xff] }
 0x236   :  { %v1915_v2 = vmax.f32 %v1902_v51, 0.0  ;;  %v1883_v14 = vadd.f32 %v1823_v52, %v1710_v1  ;;  %v1833_v15 = vpop.f32.mrf.mxu1 }
 0x237   :  { %v1655_v54 = vpop.f32.mrf.mxu0 }
 0x238   :  { %1929 = vst.msk [vmem:[#allocation3] sm:$0xff] %vm1928_vm4, %v1915_v2  ;;  %v1903_v41 = vadd.f32 %v17116_v11, %v1883_v14  ;;  %v1711_v35 = vadd.f32 %v1655_v54, %v1496_v21  ;;  %v14762_v25 = vpop.f32.mrf.mxu1  ;;  %v12024_v14 = vld [vmem:[%s22178_s5 + $0xb0] sm:$0xff] }
 0x239   :  { %v14688_v30 = vpop.f32.mrf.mxu0 }
 0x23a   :  { %v1916_v63 = vmax.f32 %v1903_v41, 0.0  ;;  %v1884_v3 = vadd.f32 %v1828_v36, %v1711_v35  ;;  %v1838_v8 = vpop.f32.mrf.mxu1  ;;  %v1516_v36 = vadd.f32 %v17081_v38, %v17091_v6  ;;  %v1521_v41 = vadd.f32 %v17085_v27, %v17095_v44 }
 0x23b   :  { %v1660_v19 = vpop.f32.mrf.mxu0 }
 0x23c   :  { %1930 = vst.msk [vmem:[#allocation3 + $0x8] sm:$0xff] %vm1928_vm4, %v1916_v63  ;;  %v1904_v22 = vadd.f32 %v17116_v11, %v1884_v3  ;;  %v1712_v56 = vadd.f32 %v1660_v19, %v1501_v17  ;;  %v14765_v43 = vpop.f32.mrf.mxu1  ;;  %v12023_v17 = vld [vmem:[%s22178_s5 + $0xa8] sm:$0xff] }
 0x23d   :  { %v14691_v33 = vpop.f32.mrf.mxu0  ;;  %v1526_v43 = vadd.f32 %v17089_v28, %v17099_v9 }
 0x23e   :  { %v1917_v59 = vmax.f32 %v1904_v22, 0.0  ;;  %v1885_v32 = vadd.f32 %v1833_v15, %v1712_v56  ;;  %v1843_v55 = vpop.f32.mrf.mxu1  ;;  %v12040_v15 = vld [vmem:[%s22178_s5 + $0xe0] sm:$0xff] }
 0x23f   :  { %v1665_v16 = vpop.f32.mrf.mxu0  ;;  %v1942_v50 = vld [vmem:[#allocation3] sm:$0xff]  ;;  %v12022_v22 = vld [vmem:[%s22178_s5 + $0xa0] sm:$0xff] }
 0x240   :  { %1931 = vst.msk [vmem:[#allocation3 + $0x10] sm:$0xff] %vm1928_vm4, %v1917_v59  ;;  %v1905_v7 = vadd.f32 %v17116_v11, %v1885_v32  ;;  %v1713_v58 = vadd.f32 %v1665_v16, %v1506_v0  ;;  %14837 = vmatprep.mubr.msk.f32.mxu1 %vm1928_vm4, %v1942_v50  ;;  %v14768_v47 = vpop.f32.mrf.mxu1  ;;  %v12038_v32 = vld [vmem:[%s22178_s5 + $0xd0] sm:$0xff] }
 0x241   :  { %v14694_v61 = vpop.f32.mrf.mxu0  ;;  %v12037_v47 = vld [vmem:[%s22178_s5 + $0xc8] sm:$0xff] }
 0x242   :  { %v1918_v52 = vmax.f32 %v1905_v7, 0.0  ;;  %v1886_v48 = vadd.f32 %v1838_v8, %v1713_v58  ;;  %v1848_v53 = vpop.f32.mrf.mxu1  ;;  %v12021_v7 = vld [vmem:[%s22178_s5 + $0x98] sm:$0xff] }
 0x243   :  { %v1670_v42 = vpop.f32.mrf.mxu0  ;;  %v1960_v40 = vld [vmem:[#allocation3 + $0x1] sm:$0xff] }
 0x244   :  { %v1943_v10 = vld [vmem:[#allocation3 + $0x8] sm:$0xff]  ;;  %1932 = vst.msk [vmem:[#allocation3 + $0x18] sm:$0xff] %vm1928_vm4, %v1918_v52  ;;  %v1906_v62 = vadd.f32 %v17116_v11, %v1886_v48  ;;  %v1714_v37 = vadd.f32 %v1670_v42, %v1511_v24  ;;  %14806 = vmatprep.mubr.msk.f32.mxu0 %vm1928_vm4, %v1960_v40  ;;  %v14771_v34 = vpop.f32.mrf.mxu1  ;;  %v1531_v24 = vadd.f32 %v17093_v5, %v17103_v23  ;;  %v12020_v42 = vld [vmem:[%s22178_s5 + $0x90] sm:$0xff] }
 0x245   :  { %14838 = vmatmul.mubr.msk.f32.vlgmr.msra.gmra.mxu1 %vm1928_vm4, %v1943_v10  ;;  %v14697_v26 = vpop.f32.mrf.mxu0  ;;  %v12019_v34 = vld [vmem:[%s22178_s5 + $0x88] sm:$0xff] }
 0x246   :  { %14884 = vmatpush3.msra.mxu1 %v17062_v12  ;;  %v1919_v29 = vmax.f32 %v1906_v62, 0.0  ;;  %v1887_v51 = vadd.f32 %v1843_v55, %v1714_v37  ;;  %v1853_v1 = vpop.f32.mrf.mxu1  ;;  %v12036_v62 = vld [vmem:[%s22178_s5 + $0xc0] sm:$0xff] }
 0x247   :  { %14885 = vmatprep.subr.mxu1 %v12042_v49  ;;  %v1675_v4 = vpop.f32.mrf.mxu0  ;;  %v1961_v21 = vld [vmem:[#allocation3 + $0x9] sm:$0xff] }
 0x248   :  { %v1944_v2 = vld [vmem:[#allocation3 + $0x10] sm:$0xff]  ;;  %14886 = vmatpush3.msra.mxu1 %v12042_v49  ;;  %1933 = vst.msk [vmem:[#allocation3 + $0x20] sm:$0xff] %vm1928_vm4, %v1919_v29  ;;  %v1907_v12 = vadd.f32 %v17116_v11, %v1887_v51  ;;  %v1715_v38 = vadd.f32 %v1675_v4, %v1516_v36  ;;  %14807 = vmatmul.mubr.msk.f32.vlgmr.msra.gmra.mxu0 %vm1928_vm4, %v1961_v21  ;;  %v14774_v6 = vpop.f32.mrf.mxu1 }
 0x249   :  { %14840 = vmatprep.mubr.msk.f32.mxu1 %vm1928_vm4, %v1944_v2  ;;  %v14700_v54 = vpop.f32.mrf.mxu0  ;;  %14853 = vmatpush3.msra.mxu0 %v17068_v57  ;;  %v12039_v57 = vld [vmem:[%s22178_s5 + $0xd8] sm:$0xff]  ;;  %v1536_v36 = vadd.f32 %v17097_v45, %v17105_v18  ;;  %v12018_v45 = vld [vmem:[%s22178_s5 + $0x80] sm:$0xff]  ;;  %v1541_v6 = vadd.f32 %v17101_v20, %v17109_v31 }
 0x24a   :  { %14887 = vmatprep.subr.mxu1 %v12041_v60  ;;  %v1920_v35 = vmax.f32 %v1907_v12, 0.0  ;;  %v1888_v25 = vadd.f32 %v1848_v53, %v1715_v38  ;;  %v1858_v30 = vpop.f32.mrf.mxu1  ;;  %14854 = vmatprep.subr.mxu0 %v12024_v14 }
 0x24b   :  { %14888 = vmatpush3.msra.mxu1 %v12041_v60  ;;  %v1680_v63 = vpop.f32.mrf.mxu0  ;;  %v1962_v3 = vld [vmem:[#allocation3 + $0x11] sm:$0xff]  ;;  %14855 = vmatpush3.msra.mxu0 %v12024_v14  ;;  %v17216_v60 = vld [vmem:[%s22178_s5 + $0x178] sm:$0xff] }
 0x24c   :  { %v17162_v8 = vld [vmem:[#allocation3 + $0x18] sm:$0xff]  ;;  %14889 = vmatprep.subr.mxu1 %v12040_v15  ;;  %1934 = vst.msk [vmem:[#allocation3 + $0x28] sm:$0xff] %vm1928_vm4, %v1920_v35  ;;  %v1908_v27 = vadd.f32 %v17116_v11, %v1888_v25  ;;  %v1716_v44 = vadd.f32 %v1680_v63, %v1521_v41  ;;  %14809 = vmatprep.mubr.msk.f32.mxu0 %vm1928_vm4, %v1962_v3  ;;  %v14777_v19 = vpop.f32.mrf.mxu1  ;;  %v12061_v35 = vld [vmem:[%s22178_s5 + $0x138] sm:$0xff] }
 0x24d   :  { %14841 = vmatmul.mubr.msk.f32.gmra.mxu1 %vm1928_vm4, %v17162_v8  ;;  %v14703_v56 = vpop.f32.mrf.mxu0  ;;  %14856 = vmatprep.subr.mxu0 %v12023_v17 }
 0x24e   :  { %14890 = vmatpush3.msra.mxu1 %v12040_v15  ;;  %v1921_v33 = vmax.f32 %v1908_v27, 0.0  ;;  %v1889_v0 = vadd.f32 %v1853_v1, %v1716_v44  ;;  %v1863_v59 = vpop.f32.mrf.mxu1  ;;  %14857 = vmatpush3.msra.mxu0 %v12023_v17 }
 0x24f   :  { %14891 = vmatprep.subr.mxu1 %v12039_v57  ;;  %v1685_v55 = vpop.f32.mrf.mxu0  ;;  %v1963_v16 = vld [vmem:[#allocation3 + $0x19] sm:$0xff]  ;;  %14858 = vmatprep.subr.mxu0 %v12022_v22 }
 0x250   :  { %v17180_v50 = vld [vmem:[#allocation3 + $0x20] sm:$0xff]  ;;  %14892 = vmatpush3.msra.mxu1 %v12039_v57  ;;  %1935 = vst.msk [vmem:[#allocation3 + $0x30] sm:$0xff] %vm1928_vm4, %v1921_v33  ;;  %v1909_v28 = vadd.f32 %v17116_v11, %v1889_v0  ;;  %v1717_v9 = vadd.f32 %v1685_v55, %v1526_v43  ;;  %14810 = vmatmul.mubr.msk.f32.gmra.mxu0 %vm1928_vm4, %v1963_v16  ;;  %v14780_v58 = vpop.f32.mrf.mxu1  ;;  %v2443_v16 = vld [vmem:[#allocation3 + $0xb] sm:$0xff] }
 0x251   :  { %14843 = vmatprep.mubr.msk.f32.mxu1 %vm1928_vm4, %v17180_v50  ;;  %v14706_v61 = vpop.f32.mrf.mxu0  ;;  %14859 = vmatpush3.msra.mxu0 %v12022_v22  ;;  %v1546_v57 = vadd.f32 %v17107_v13, %v17111_v46  ;;  %v2269_v58 = vld [vmem:[#allocation3 + $0x2] sm:$0xff] }
 0x252   :  { %14893 = vmatprep.subr.mxu1 %v12038_v32  ;;  %v1922_v52 = vmax.f32 %v1909_v28, 0.0  ;;  %v1890_v48 = vadd.f32 %v1858_v30, %v1717_v9  ;;  %v1868_v53 = vpop.f32.mrf.mxu1  ;;  %14860 = vmatprep.subr.mxu0 %v12021_v7  ;;  %v2444_v9 = vld [vmem:[#allocation3 + $0x13] sm:$0xff]  ;;  %v2270_v61 = vld [vmem:[#allocation3 + $0xa] sm:$0xff] }
 0x253   :  { %14894 = vmatpush3.msra.mxu1 %v12038_v32  ;;  %v1690_v40 = vpop.f32.mrf.mxu0  ;;  %v1964_v10 = vld [vmem:[#allocation3 + $0x21] sm:$0xff]  ;;  %14861 = vmatpush3.msra.mxu0 %v12021_v7 }
 0x254   :  { %v17198_v49 = vld [vmem:[#allocation3 + $0x28] sm:$0xff]  ;;  %14895 = vmatprep.subr.mxu1 %v12037_v47  ;;  %1936 = vst.msk [vmem:[#allocation3 + $0x38] sm:$0xff] %vm1928_vm4, %v1922_v52  ;;  %v1910_v5 = vadd.f32 %v17116_v11, %v1890_v48  ;;  %v1718_v23 = vadd.f32 %v1690_v40, %v1531_v24  ;;  %14812 = vmatprep.mubr.msk.f32.mxu0 %vm1928_vm4, %v1964_v10  ;;  %v14783_v37 = vpop.f32.mrf.mxu1  ;;  %v12060_v52 = vld [vmem:[%s22178_s5 + $0x130] sm:$0xff] }
 0x255   :  { %14844 = vmatmul.mubr.msk.f32.gmra.mxu1 %vm1928_vm4, %v17198_v49  ;;  %v14709_v26 = vpop.f32.mrf.mxu0  ;;  %14862 = vmatprep.subr.mxu0 %v12020_v42  ;;  %v2446_v24 = vld [vmem:[#allocation3 + $0x23] sm:$0xff]  ;;  %v2271_v48 = vld [vmem:[#allocation3 + $0x12] sm:$0xff]  ;;  %v2272_v40 = vld [vmem:[#allocation3 + $0x1a] sm:$0xff] }
 0x256   :  { %14896 = vmatpush3.msra.mxu1 %v12037_v47  ;;  %v1923_v29 = vmax.f32 %v1910_v5, 0.0  ;;  %v1891_v51 = vadd.f32 %v1863_v59, %v1718_v23  ;;  %v1873_v1 = vpop.f32.mrf.mxu1  ;;  %14863 = vmatpush3.msra.mxu0 %v12020_v42  ;;  %v2445_v47 = vld [vmem:[#allocation3 + $0x1b] sm:$0xff]  ;;  %v12077_v42 = vld [vmem:[%s22178_s5 + $0x168] sm:$0xff]  ;;  %v12076_v37 = vld [vmem:[%s22178_s5 + $0x160] sm:$0xff] }
 0x257   :  { %14897 = vmatprep.subr.mxu1 %v12036_v62  ;;  %v1695_v4 = vpop.f32.mrf.mxu0  ;;  %v1965_v21 = vld [vmem:[#allocation3 + $0x29] sm:$0xff]  ;;  %14864 = vmatprep.subr.mxu0 %v12019_v34 }
 0x258   :  { %v17218_v2 = vld [vmem:[#allocation3 + $0x30] sm:$0xff]  ;;  %14898 = vmatpush3.msra.mxu1 %v12036_v62  ;;  %1937 = vst.msk [vmem:[#allocation3 + $0x40] sm:$0xff] %vm1928_vm4, %v1923_v29  ;;  %v1911_v18 = vadd.f32 %v17116_v11, %v1891_v51  ;;  %v1719_v14 = vadd.f32 %v1695_v4, %v1536_v36  ;;  %14813 = vmatmul.mubr.msk.f32.gmra.mxu0 %vm1928_vm4, %v1965_v21  ;;  %v14786_v12 = vpop.f32.mrf.mxu1  ;;  %v2273_v5 = vld [vmem:[#allocation3 + $0x22] sm:$0xff]  ;;  %v12074_v4 = vld [vmem:[%s22178_s5 + $0x150] sm:$0xff] }
 0x259   :  { %14846 = vmatprep.mubr.msk.f32.mxu1 %vm1928_vm4, %v17218_v2  ;;  %v14712_v38 = vpop.f32.mrf.mxu0  ;;  %14865 = vmatpush3.msra.mxu0 %v12019_v34  ;;  %v12059_v62 = vld [vmem:[%s22178_s5 + $0x128] sm:$0xff]  ;;  %v12058_v34 = vld [vmem:[%s22178_s5 + $0x120] sm:$0xff]  ;;  %v12075_v36 = vld [vmem:[%s22178_s5 + $0x158] sm:$0xff] }
 0x25a   :  { %14945 = vmatprep.subr.mxu1 %v17216_v60  ;;  %v1924_v15 = vmax.f32 %v1911_v18, 0.0  ;;  %v1892_v54 = vadd.f32 %v1868_v53, %v1719_v14  ;;  %v1878_v41 = vpop.f32.mrf.mxu1  ;;  %14866 = vmatprep.subr.mxu0 %v12018_v45  ;;  %v2447_v53 = vld [vmem:[#allocation3 + $0x2b] sm:$0xff]  ;;  %v12057_v51 = vld [vmem:[%s22178_s5 + $0x118] sm:$0xff]  ;;  %v12056_v14 = vld [vmem:[%s22178_s5 + $0x110] sm:$0xff] }
 0x25b   :  { %v1700_v25 = vpop.f32.mrf.mxu0  ;;  %v1966_v30 = vld [vmem:[#allocation3 + $0x31] sm:$0xff]  ;;  %14867 = vmatpush3.msra.mxu0 %v12018_v45  ;;  %v12072_v38 = vld [vmem:[%s22178_s5 + $0x140] sm:$0xff] }
 0x25c   :  { %v17234_v17 = vld [vmem:[#allocation3 + $0x38] sm:$0xff]  ;;  %1938 = vst.msk [vmem:[#allocation3 + $0x48] sm:$0xff] %vm1928_vm4, %v1924_v15  ;;  %v1912_v63 = vadd.f32 %v17116_v11, %v1892_v54  ;;  %v1720_v3 = vadd.f32 %v1700_v25, %v1541_v6  ;;  %14815 = vmatprep.mubr.msk.f32.mxu0 %vm1928_vm4, %v1966_v30  ;;  %v14789_v20 = vpop.f32.mrf.mxu1  ;;  %14914 = vmatprep.subr.mxu0 %v12061_v35  ;;  %v2274_v26 = vld [vmem:[#allocation3 + $0x2a] sm:$0xff]  ;;  %v12115_v25 = vld [vmem:[%s22178_s5 + $0x1f8] sm:$0xff] }
 0x25d   :  { %14847 = vmatmul.mubr.msk.f32.gmra.mxu1 %vm1928_vm4, %v17234_v17  ;;  %v14715_v31 = vpop.f32.mrf.mxu0  ;;  %v2448_v10 = vld [vmem:[#allocation3 + $0x33] sm:$0xff] }
 0x25e   :  { %v1925_v27 = vmax.f32 %v1912_v63, 0.0  ;;  %v1893_v44 = vadd.f32 %v1873_v1, %v1720_v3  ;;  %v2275_v1 = vld [vmem:[#allocation3 + $0x32] sm:$0xff]  ;;  %v2793_v63 = vld [vmem:[#allocation3 + $0x1d] sm:$0xff]  ;;  %v2794_v31 = vld [vmem:[#allocation3 + $0x25] sm:$0xff] }
 0x25f   :  { %v1705_v19 = vpop.f32.mrf.mxu0  ;;  %v1967_v22 = vld [vmem:[#allocation3 + $0x39] sm:$0xff]  ;;  %v12073_v21 = vld [vmem:[%s22178_s5 + $0x148] sm:$0xff] }
 0x260   :  { %v17243_v56 = vld [vmem:[#allocation3 + $0x40] sm:$0xff]  ;;  %1939 = vst.msk [vmem:[#allocation3 + $0x50] sm:$0xff] %vm1928_vm4, %v1925_v27  ;;  %v1913_v43 = vadd.f32 %v17116_v11, %v1893_v44  ;;  %v1721_v33 = vadd.f32 %v1705_v19, %v1546_v57  ;;  %14816 = vmatmul.mubr.msk.f32.gmra.mxu0 %vm1928_vm4, %v1967_v22  ;;  %v12055_v6 = vld [vmem:[%s22178_s5 + $0x108] sm:$0xff]  ;;  %v12114_v27 = vld [vmem:[%s22178_s5 + $0x1f0] sm:$0xff] }
 0x261   :  { %14849 = vmatprep.mubr.msk.f32.mxu1 %vm1928_vm4, %v17243_v56  ;;  %v14718_v0 = vpop.f32.mrf.mxu0  ;;  %v2449_v23 = vld [vmem:[#allocation3 + $0x3b] sm:$0xff]  ;;  %v2791_v15 = vld [vmem:[#allocation3 + $0xd] sm:$0xff] }
 0x262   :  { %v1926_v59 = vmax.f32 %v1913_v43, 0.0  ;;  %v1894_v32 = vadd.f32 %v1878_v41, %v1721_v33  ;;  %v2276_v45 = vld [vmem:[#allocation3 + $0x3a] sm:$0xff]  ;;  %v2617_v30 = vld [vmem:[#allocation3 + $0xc] sm:$0xff]  ;;  %v2620_v43 = vld [vmem:[#allocation3 + $0x24] sm:$0xff] }
 0x263   :  { %v1968_v13 = vld [vmem:[#allocation3 + $0x41] sm:$0xff]  ;;  %v2792_v41 = vld [vmem:[#allocation3 + $0x15] sm:$0xff]  ;;  %v2795_v19 = vld [vmem:[#allocation3 + $0x2d] sm:$0xff] }
 0x264   :  { %v17250_v46 = vld [vmem:[#allocation3 + $0x48] sm:$0xff]  ;;  %1940 = vst.msk [vmem:[#allocation3 + $0x58] sm:$0xff] %vm1928_vm4, %v1926_v59  ;;  %v1914_v55 = vadd.f32 %v17116_v11, %v1894_v32  ;;  %14818 = vmatprep.mubr.msk.f32.mxu0 %vm1928_vm4, %v1968_v13  ;;  %v12078_v11 = vld [vmem:[%s22178_s5 + $0x170] sm:$0xff]  ;;  %v12097_v3 = vld [vmem:[%s22178_s5 + $0x1b8] sm:$0xff] }
 0x265   :  { %14850 = vmatmul.mubr.msk.f32.gmra.mxu1 %vm1928_vm4, %v17250_v46  ;;  %v2450_v29 = vld [vmem:[#allocation3 + $0x43] sm:$0xff]  ;;  %v2618_v20 = vld [vmem:[#allocation3 + $0x14] sm:$0xff]  ;;  %v2621_v32 = vld [vmem:[#allocation3 + $0x2c] sm:$0xff] }
 0x266   :  { %14899 = vmatprep.mubr.msk.f32.mxu1 %vm1928_vm4, %v2443_v16  ;;  %v1927_v7 = vmax.f32 %v1914_v55, 0.0  ;;  %v2277_v12 = vld [vmem:[#allocation3 + $0x42] sm:$0xff]  ;;  %v12096_v44 = vld [vmem:[%s22178_s5 + $0x1b0] sm:$0xff]  ;;  %v12113_v22 = vld [vmem:[%s22178_s5 + $0x1e8] sm:$0xff] }
 0x267   :  { %v1969_v28 = vld [vmem:[#allocation3 + $0x49] sm:$0xff]  ;;  %v2619_v57 = vld [vmem:[#allocation3 + $0x1c] sm:$0xff] }
 0x268   :  { %1941 = vst.msk [vmem:[#allocation3 + $0x60] sm:$0xff] %vm1928_vm4, %v1927_v7  ;;  %14819 = vmatmul.mubr.msk.f32.gmra.mxu0 %vm1928_vm4, %v1969_v28  ;;  %v2278_v54 = vld [vmem:[#allocation3 + $0x4a] sm:$0xff]  ;;  %v2796_v33 = vld [vmem:[#allocation3 + $0x35] sm:$0xff]  ;;  %v2797_v13 = vld [vmem:[#allocation3 + $0x3d] sm:$0xff] }
 0x269   :  { %14900 = vmatmul.mubr.msk.f32.vlgmr.msra.gmra.mxu1 %vm1928_vm4, %v2444_v9  ;;  %14868 = vmatprep.mubr.msk.f32.mxu0 %vm1928_vm4, %v2269_v58  ;;  %v12095_v0 = vld [vmem:[%s22178_s5 + $0x1a8] sm:$0xff]  ;;  %v12112_v59 = vld [vmem:[%s22178_s5 + $0x1e0] sm:$0xff]  ;;  %v12111_v55 = vld [vmem:[%s22178_s5 + $0x1d8] sm:$0xff] }
 0x26a   :  { %14902 = vmatprep.mubr.msk.f32.mxu1 %vm1928_vm4, %v2445_v47  ;;  %14946 = vmatpush3.msra.mxu1 %v17216_v60  ;;  %v2451_v60 = vld [vmem:[#allocation3 + $0x4b] sm:$0xff]  ;;  %v2622_v7 = vld [vmem:[#allocation3 + $0x34] sm:$0xff]  ;;  %v2623_v9 = vld [vmem:[#allocation3 + $0x3c] sm:$0xff] }
 0x26b   :  { %14947 = vmatprep.subr.mxu1 %v12078_v11  ;;  %v2452_v18 = vld [vmem:[#allocation3 + $0x53] sm:$0xff]  ;;  %v12094_v16 = vld [vmem:[%s22178_s5 + $0x1a0] sm:$0xff]  ;;  %v12093_v47 = vld [vmem:[%s22178_s5 + $0x198] sm:$0xff] }
 0x26c   :  { %14869 = vmatmul.mubr.msk.f32.vlgmr.msra.gmra.mxu0 %vm1928_vm4, %v2270_v61  ;;  %14948 = vmatpush3.msra.mxu1 %v12078_v11  ;;  %v2798_v28 = vld [vmem:[#allocation3 + $0x45] sm:$0xff]  ;;  %v12110_v58 = vld [vmem:[%s22178_s5 + $0x1d0] sm:$0xff]  ;;  %v2799_v11 = vld [vmem:[#allocation3 + $0x4d] sm:$0xff] }
 0x26d   :  { %14903 = vmatmul.mubr.msk.f32.gmra.mxu1 %vm1928_vm4, %v2446_v24  ;;  %14871 = vmatprep.mubr.msk.f32.mxu0 %vm1928_vm4, %v2271_v48  ;;  %v12109_v61 = vld [vmem:[%s22178_s5 + $0x1c8] sm:$0xff]  ;;  %v2624_v24 = vld [vmem:[#allocation3 + $0x44] sm:$0xff] }
 0x26e   :  { %14905 = vmatprep.mubr.msk.f32.mxu1 %vm1928_vm4, %v2447_v53  ;;  %14915 = vmatpush3.msra.mxu0 %v12061_v35  ;;  %v12054_v35 = vld [vmem:[%s22178_s5 + $0x100] sm:$0xff]  ;;  %v2800_v48 = vld [vmem:[#allocation3 + $0x55] sm:$0xff] }
 0x26f   :  { %14916 = vmatprep.subr.mxu0 %v12060_v52  ;;  %14949 = vmatprep.subr.mxu1 %v12077_v42  ;;  %v2625_v53 = vld [vmem:[#allocation3 + $0x4c] sm:$0xff] }
 0x270   :  { %14872 = vmatmul.mubr.msk.f32.gmra.mxu0 %vm1928_vm4, %v2272_v40  ;;  %14950 = vmatpush3.msra.mxu1 %v12077_v42  ;;  %v12108_v42 = vld [vmem:[%s22178_s5 + $0x1c0] sm:$0xff]  ;;  %v3139_v40 = vld [vmem:[#allocation3 + $0x17] sm:$0xff] }
 0x271   :  { %14906 = vmatmul.mubr.msk.f32.gmra.mxu1 %vm1928_vm4, %v2448_v10  ;;  %14917 = vmatpush3.msra.mxu0 %v12060_v52  ;;  %v12092_v52 = vld [vmem:[%s22178_s5 + $0x190] sm:$0xff]  ;;  %v12091_v10 = vld [vmem:[%s22178_s5 + $0x188] sm:$0xff] }
 0x272   :  { %14874 = vmatprep.mubr.msk.f32.mxu0 %vm1928_vm4, %v2273_v5  ;;  %14908 = vmatprep.mubr.msk.f32.mxu1 %vm1928_vm4, %v2449_v23  ;;  %v12194_v5 = vld [vmem:[%s22174_s1 + $0x178] sm:$0xff]  ;;  %v2626_v23 = vld [vmem:[#allocation3 + $0x54] sm:$0xff] }
 0x273   :  { %14918 = vmatprep.subr.mxu0 %v12059_v62  ;;  %14951 = vmatprep.subr.mxu1 %v12076_v37 }
 0x274   :  { %14919 = vmatpush3.msra.mxu0 %v12059_v62  ;;  %14952 = vmatpush3.msra.mxu1 %v12076_v37  ;;  %v12210_v62 = vld [vmem:[%s22174_s1 + $0x1f8] sm:$0xff] }
 0x275   :  { %14875 = vmatmul.mubr.msk.f32.gmra.mxu0 %vm1928_vm4, %v2274_v26  ;;  %14920 = vmatprep.subr.mxu0 %v12058_v34  ;;  %v3140_v37 = vld [vmem:[#allocation3 + $0x1f] sm:$0xff]  ;;  %v12090_v26 = vld [vmem:[%s22178_s5 + $0x180] sm:$0xff] }
 0x276   :  { %14909 = vmatmul.mubr.msk.f32.gmra.mxu1 %vm1928_vm4, %v2450_v29  ;;  %14953 = vmatprep.subr.mxu1 %v12075_v36  ;;  %v3141_v29 = vld [vmem:[#allocation3 + $0x27] sm:$0xff] }
 0x277   :  { %14877 = vmatprep.mubr.msk.f32.mxu0 %vm1928_vm4, %v2275_v1  ;;  %14911 = vmatprep.mubr.msk.f32.mxu1 %vm1928_vm4, %v2451_v60  ;;  %v12208_v1 = vld [vmem:[%s22174_s1 + $0x1e8] sm:$0xff]  ;;  %v12133_v60 = vld [vmem:[%s22178_s5 + $0x238] sm:$0xff] }
 0x278   :  { %14921 = vmatpush3.msra.mxu0 %v12058_v34  ;;  %14954 = vmatpush3.msra.mxu1 %v12075_v36  ;;  %v12209_v34 = vld [vmem:[%s22174_s1 + $0x1f0] sm:$0xff] }
 0x279   :  { %14922 = vmatprep.subr.mxu0 %v12057_v51  ;;  %14955 = vmatprep.subr.mxu1 %v12074_v4  ;;  %v2965_v36 = vld [vmem:[#allocation3 + $0x16] sm:$0xff] }
 0x27a   :  { %14923 = vmatpush3.msra.mxu0 %v12057_v51  ;;  %14956 = vmatpush3.msra.mxu1 %v12074_v4  ;;  %v12193_v51 = vld [vmem:[%s22174_s1 + $0x170] sm:$0xff] }
 0x27b   :  { %14878 = vmatmul.mubr.msk.f32.gmra.mxu0 %vm1928_vm4, %v2276_v45  ;;  %14912 = vmatmul.mubr.msk.f32.gmra.mxu1 %vm1928_vm4, %v2452_v18  ;;  %v2966_v4 = vld [vmem:[#allocation3 + $0x1e] sm:$0xff]  ;;  %v3142_v45 = vld [vmem:[#allocation3 + $0x2f] sm:$0xff]  ;;  %v2967_v18 = vld [vmem:[#allocation3 + $0x26] sm:$0xff] }
 0x27c   :  { %14957 = vmatprep.subr.mxu1 %v12073_v21  ;;  %14880 = vmatprep.mubr.msk.f32.mxu0 %vm1928_vm4, %v2277_v12  ;;  %v12132_v12 = vld [vmem:[%s22178_s5 + $0x230] sm:$0xff] }
 0x27d   :  { %14924 = vmatprep.subr.mxu0 %v12056_v14  ;;  %14958 = vmatpush3.msra.mxu1 %v12073_v21  ;;  %v12192_v21 = vld [vmem:[%s22174_s1 + $0x168] sm:$0xff] }
 0x27e   :  { %14961 = vmatprep.mubr.msk.f32.mxu1 %vm1928_vm4, %v2791_v15  ;;  %14925 = vmatpush3.msra.mxu0 %v12056_v14  ;;  %v12207_v14 = vld [vmem:[%s22174_s1 + $0x1e0] sm:$0xff]  ;;  %v12206_v15 = vld [vmem:[%s22174_s1 + $0x1d8] sm:$0xff] }
 0x27f   :  { %14959 = vmatprep.subr.mxu1 %v12072_v38  ;;  %14926 = vmatprep.subr.mxu0 %v12055_v6 }
 0x280   :  { %14960 = vmatpush3.msra.mxu1 %v12072_v38  ;;  %14881 = vmatmul.mubr.msk.f32.gmra.mxu0 %vm1928_vm4, %v2278_v54  ;;  %v3143_v38 = vld [vmem:[#allocation3 + $0x37] sm:$0xff]  ;;  %v2968_v54 = vld [vmem:[#allocation3 + $0x2e] sm:$0xff] }
 0x281   :  { %14927 = vmatpush3.msra.mxu0 %v12055_v6  ;;  %14962 = vmatmul.mubr.msk.f32.vlgmr.msra.gmra.mxu1 %vm1928_vm4, %v2792_v41  ;;  %v12191_v6 = vld [vmem:[%s22174_s1 + $0x160] sm:$0xff]  ;;  %v12190_v41 = vld [vmem:[%s22174_s1 + $0x158] sm:$0xff] }
 0x282   :  { %14930 = vmatprep.mubr.msk.f32.mxu0 %vm1928_vm4, %v2617_v30  ;;  %14964 = vmatprep.mubr.msk.f32.mxu1 %vm1928_vm4, %v2793_v63  ;;  %v12205_v30 = vld [vmem:[%s22174_s1 + $0x1d0] sm:$0xff] }
 0x283   :  { %14928 = vmatprep.subr.mxu0 %v12054_v35  ;;  %15007 = vmatprep.subr.mxu1 %v12115_v25  ;;  %v2969_v63 = vld [vmem:[#allocation3 + $0x36] sm:$0xff] }
 0x284   :  { %14929 = vmatpush3.msra.mxu0 %v12054_v35  ;;  %15008 = vmatpush3.msra.mxu1 %v12115_v25  ;;  %v3144_v35 = vld [vmem:[#allocation3 + $0x3f] sm:$0xff]  ;;  %v12131_v25 = vld [vmem:[%s22178_s5 + $0x228] sm:$0xff] }
 0x285   :  { %14931 = vmatmul.mubr.msk.f32.vlgmr.msra.gmra.mxu0 %vm1928_vm4, %v2618_v20  ;;  %14965 = vmatmul.mubr.msk.f32.gmra.mxu1 %vm1928_vm4, %v2794_v31  ;;  %v12189_v20 = vld [vmem:[%s22174_s1 + $0x150] sm:$0xff]  ;;  %v12204_v31 = vld [vmem:[%s22174_s1 + $0x1c8] sm:$0xff] }
 0x286   :  { %14976 = vmatprep.subr.mxu0 %v12097_v3  ;;  %14933 = vmatprep.mubr.msk.f32.mxu0 %vm1928_vm4, %v2619_v57  ;;  %v12130_v57 = vld [vmem:[%s22178_s5 + $0x220] sm:$0xff] }
 0x287   :  { %14967 = vmatprep.mubr.msk.f32.mxu1 %vm1928_vm4, %v2795_v19  ;;  %14977 = vmatpush3.msra.mxu0 %v12097_v3  ;;  %v3145_v3 = vld [vmem:[#allocation3 + $0x47] sm:$0xff]  ;;  %v3146_v19 = vld [vmem:[#allocation3 + $0x4f] sm:$0xff] }
 0x288   :  { %15009 = vmatprep.subr.mxu1 %v12114_v27  ;;  %14978 = vmatprep.subr.mxu0 %v12096_v44 }
 0x289   :  { %15010 = vmatpush3.msra.mxu1 %v12114_v27  ;;  %14934 = vmatmul.mubr.msk.f32.gmra.mxu0 %vm1928_vm4, %v2620_v43  ;;  %v2970_v27 = vld [vmem:[#allocation3 + $0x3e] sm:$0xff]  ;;  %v12203_v43 = vld [vmem:[%s22174_s1 + $0x1c0] sm:$0xff] }
 0x28a   :  { %15011 = vmatprep.subr.mxu1 %v12113_v22  ;;  %14968 = vmatmul.mubr.msk.f32.gmra.mxu1 %vm1928_vm4, %v2796_v33  ;;  %v12129_v33 = vld [vmem:[%s22178_s5 + $0x218] sm:$0xff] }
 0x28b   :  { %14979 = vmatpush3.msra.mxu0 %v12096_v44  ;;  %15012 = vmatpush3.msra.mxu1 %v12113_v22  ;;  %v12188_v44 = vld [vmem:[%s22174_s1 + $0x148] sm:$0xff]  ;;  %v2971_v22 = vld [vmem:[#allocation3 + $0x46] sm:$0xff] }
 0x28c   :  { %14936 = vmatprep.mubr.msk.f32.mxu0 %vm1928_vm4, %v2621_v32  ;;  %14970 = vmatprep.mubr.msk.f32.mxu1 %vm1928_vm4, %v2797_v13  ;;  %v12202_v32 = vld [vmem:[%s22174_s1 + $0x1b8] sm:$0xff]  ;;  %v2972_v13 = vld [vmem:[#allocation3 + $0x4e] sm:$0xff] }
 0x28d   :  { %14980 = vmatprep.subr.mxu0 %v12095_v0  ;;  %15013 = vmatprep.subr.mxu1 %v12112_v59 }
 0x28e   :  { %14981 = vmatpush3.msra.mxu0 %v12095_v0  ;;  %15014 = vmatpush3.msra.mxu1 %v12112_v59  ;;  %v3147_v0 = vld [vmem:[#allocation3 + $0x57] sm:$0xff]  ;;  %v12187_v59 = vld [vmem:[%s22174_s1 + $0x140] sm:$0xff] }
 0x28f   :  { %15015 = vmatprep.subr.mxu1 %v12111_v55  ;;  %14937 = vmatmul.mubr.msk.f32.gmra.mxu0 %vm1928_vm4, %v2622_v7  ;;  %v3148_v7 = vld [vmem:[#allocation3 + $0x5f] sm:$0xff] }
 0x290   :  { %14971 = vmatmul.mubr.msk.f32.gmra.mxu1 %vm1928_vm4, %v2798_v28  ;;  %14982 = vmatprep.subr.mxu0 %v12094_v16  ;;  %v2973_v28 = vld [vmem:[#allocation3 + $0x56] sm:$0xff] }
 0x291   :  { %15016 = vmatpush3.msra.mxu1 %v12111_v55  ;;  %14939 = vmatprep.mubr.msk.f32.mxu0 %vm1928_vm4, %v2623_v9  ;;  %v12186_v55 = vld [vmem:[%s22174_s1 + $0x138] sm:$0xff]  ;;  %v12201_v9 = vld [vmem:[%s22174_s1 + $0x1b0] sm:$0xff] }
 0x292   :  { %14973 = vmatprep.mubr.msk.f32.mxu1 %vm1928_vm4, %v2799_v11  ;;  %14983 = vmatpush3.msra.mxu0 %v12094_v16  ;;  %v12128_v16 = vld [vmem:[%s22178_s5 + $0x210] sm:$0xff]  ;;  %v12200_v11 = vld [vmem:[%s22174_s1 + $0x1a8] sm:$0xff] }
 0x293   :  { %15017 = vmatprep.subr.mxu1 %v12110_v58  ;;  %14984 = vmatprep.subr.mxu0 %v12093_v47 }
 0x294   :  { %15018 = vmatpush3.msra.mxu1 %v12110_v58  ;;  %14985 = vmatpush3.msra.mxu0 %v12093_v47  ;;  %v12185_v58 = vld [vmem:[%s22174_s1 + $0x130] sm:$0xff]  ;;  %v12127_v47 = vld [vmem:[%s22178_s5 + $0x208] sm:$0xff] }
 0x295   :  { %15019 = vmatprep.subr.mxu1 %v12109_v61  ;;  %14940 = vmatmul.mubr.msk.f32.gmra.mxu0 %vm1928_vm4, %v2624_v24  ;;  %v2974_v24 = vld [vmem:[#allocation3 + $0x5e] sm:$0xff] }
 0x296   :  { %14974 = vmatmul.mubr.msk.f32.gmra.mxu1 %vm1928_vm4, %v2800_v48  ;;  %14942 = vmatprep.mubr.msk.f32.mxu0 %vm1928_vm4, %v2625_v53  ;;  %v12199_v48 = vld [vmem:[%s22174_s1 + $0x1a0] sm:$0xff] }
 0x297   :  { %15020 = vmatpush3.msra.mxu1 %v12109_v61  ;;  %14986 = vmatprep.subr.mxu0 %v12092_v52  ;;  %v12184_v61 = vld [vmem:[%s22174_s1 + $0x128] sm:$0xff]  ;;  %v12183_v53 = vld [vmem:[%s22174_s1 + $0x120] sm:$0xff] }
 0x298   :  { %15021 = vmatprep.subr.mxu1 %v12108_v42  ;;  %15023 = vmatprep.mubr.msk.f32.mxu1 %vm1928_vm4, %v3139_v40  ;;  %v12198_v40 = vld [vmem:[%s22174_s1 + $0x198] sm:$0xff] }
 0x299   :  { %14987 = vmatpush3.msra.mxu0 %v12092_v52  ;;  %15022 = vmatpush3.msra.mxu1 %v12108_v42  ;;  %v12126_v52 = vld [vmem:[%s22178_s5 + $0x200] sm:$0xff]  ;;  %v3586_v42 = vld [vmem:[%s22174_s1 + $0xf8] sm:$0xff] }
 0x29a   :  { %14988 = vmatprep.subr.mxu0 %v12091_v10  ;;  %13920 = vmatprep.subr.mxu1 %v12210_v62  ;;  %v3570_v62 = vld [vmem:[%s22174_s1 + $0x78] sm:$0xff] }
 0x29b   :  { %14943 = vmatmul.mubr.msk.f32.gmra.mxu0 %vm1928_vm4, %v2626_v23  ;;  %15024 = vmatmul.mubr.msk.f32.vlgmr.msra.gmra.mxu1 %vm1928_vm4, %v3140_v37  ;;  %v17529_v23 = vld [vmem:[%s22175_s0 + $0x128] sm:$0xff]  ;;  %v12176_v37 = vld [vmem:[%s22175_s0 + $0x118] sm:$0xfe] }
 0x29c   :  { %14989 = vmatpush3.msra.mxu0 %v12091_v10  ;;  %13921 = vmatpush3.msra.mxu1 %v12194_v5  ;;  %v12182_v10 = vld [vmem:[%s22174_s1 + $0x118] sm:$0xff]  ;;  %v12197_v5 = vld [vmem:[%s22174_s1 + $0x190] sm:$0xff] }
 0x29d   :  { %14992 = vmatprep.mubr.msk.f32.mxu0 %vm1928_vm4, %v2965_v36  ;;  %15026 = vmatprep.mubr.msk.f32.mxu1 %vm1928_vm4, %v3141_v29  ;;  %v12175_v36 = vld [vmem:[%s22175_s0 + $0x110] sm:$0xfe] }
 0x29e   :  { %13922 = vmatprep.subr.mxu1 %v12209_v34  ;;  %14990 = vmatprep.subr.mxu0 %v12090_v26  ;;  %v12181_v34 = vld [vmem:[%s22174_s1 + $0x110] sm:$0xff] }
 0x29f   :  { %13923 = vmatpush3.msra.mxu1 %v12193_v51  ;;  %14991 = vmatpush3.msra.mxu0 %v12090_v26  ;;  %v17542_v26 = vld [vmem:[%s22175_s0 + $0x120] sm:$0xff]  ;;  %v3569_v29 = vld [vmem:[%s22174_s1 + $0x70] sm:$0xff]  ;;  %v17556_v51 = vld [vmem:[%s22175_s0 + $0x138] sm:$0xff] }
 0x2a0   :  { %13924 = vmatprep.subr.mxu1 %v12208_v1  ;;  %14993 = vmatmul.mubr.msk.f32.vlgmr.msra.gmra.mxu0 %vm1928_vm4, %v2966_v4  ;;  %v3584_v1 = vld [vmem:[%s22174_s1 + $0xe8] sm:$0xff]  ;;  %v3659_v4 = vrot.slane %v17529_v23, 1 }
 0x2a1   :  { %15027 = vmatmul.mubr.msk.f32.gmra.mxu1 %vm1928_vm4, %v3142_v45  ;;  %15038 = vmatprep.subr.mxu0 %v12133_v60  ;;  %v3568_v45 = vld [vmem:[%s22174_s1 + $0x68] sm:$0xff] }
 0x2a2   :  { %13925 = vmatpush3.msra.mxu1 %v12192_v21  ;;  %14995 = vmatprep.mubr.msk.f32.mxu0 %vm1928_vm4, %v2967_v18  ;;  %v12180_v21 = vld [vmem:[%s22174_s1 + $0x108] sm:$0xff]  ;;  %v3655_v18 = vrot.slane %v12175_v36, 1 }
 0x2a3   :  { %15029 = vmatprep.mubr.msk.f32.mxu1 %vm1928_vm4, %v3143_v38  ;;  %15039 = vmatpush3.msra.mxu0 %v12133_v60  ;;  %v3658_v60 = vrot.slane %v12176_v37, 1  ;;  %v17578_v38 = vld [vmem:[%s22175_s0 + $0x130] sm:$0xff]  ;;  %v17708_v36 = vld [vmem:[%s22175_s0 + $0x188] sm:$0xff] }
 0x2a4   :  { %13926 = vmatprep.subr.mxu1 %v12207_v14  ;;  %15040 = vmatprep.subr.mxu0 %v12132_v12  ;;  %v12195_v14 = vld [vmem:[%s22174_s1 + $0x180] sm:$0xff]  ;;  %v17700_v37 = vld [vmem:[%s22175_s0 + $0x170] sm:$0xff] }
 0x2a5   :  { %13927 = vmatpush3.msra.mxu1 %v12191_v6  ;;  %14996 = vmatmul.mubr.msk.f32.gmra.mxu0 %vm1928_vm4, %v2968_v54  ;;  %v3583_v6 = vld [vmem:[%s22174_s1 + $0xe0] sm:$0xff]  ;;  %v3660_v54 = vsel %vm171_vm0, %v3658_v60, %v3659_v4 }
 0x2a6   :  { %13928 = vmatprep.subr.mxu1 %v12206_v15  ;;  %15030 = vmatmul.mubr.msk.f32.gmra.mxu1 %vm1928_vm4, %v3144_v35  ;;  %v12179_v15 = vld [vmem:[%s22174_s1 + $0x100] sm:$0xff]  ;;  %v3582_v35 = vld [vmem:[%s22174_s1 + $0xd8] sm:$0xff] }
 0x2a7   :  { %15041 = vmatpush3.msra.mxu0 %v12132_v12  ;;  %13929 = vmatpush3.msra.mxu1 %v12190_v41  ;;  %v3663_v12 = vrot.slane %v17556_v51, 1  ;;  %v3567_v41 = vld [vmem:[%s22174_s1 + $0x60] sm:$0xff] }
 0x2a8   :  { %14998 = vmatprep.mubr.msk.f32.mxu0 %vm1928_vm4, %v2969_v63  ;;  %15032 = vmatprep.mubr.msk.f32.mxu1 %vm1928_vm4, %v3145_v3  ;;  %v3566_v3 = vld [vmem:[%s22174_s1 + $0x58] sm:$0xff]  ;;  %v3559_v60 = vld [vmem:[%s22174_s1 + $0x20] sm:$0xff] }
 0x2a9   :  { %15042 = vmatprep.subr.mxu0 %v12131_v25  ;;  %13930 = vmatprep.subr.mxu1 %v12205_v30  ;;  %v17602_v30 = vld [vmem:[%s22175_s0 + $0x148] sm:$0xff]  ;;  %v3664_v63 = vsel %vm171_vm0, %v3659_v4, %v3663_v12 }
 0x2aa   :  { %15043 = vmatpush3.msra.mxu0 %v12131_v25  ;;  %13931 = vmatpush3.msra.mxu1 %v12189_v20  ;;  %v3661_v25 = vrot.slane %v17578_v38, 1  ;;  %v3581_v20 = vld [vmem:[%s22174_s1 + $0xd0] sm:$0xff] }
 0x2ab   :  { %13932 = vmatprep.subr.mxu1 %v12204_v31  ;;  %14999 = vmatmul.mubr.msk.f32.gmra.mxu0 %vm1928_vm4, %v2970_v27  ;;  %v3667_v31 = vrot.slane %v17602_v30, 1  ;;  %v12274_v27 = vld [vmem:[%s22174_s1 + $0x2f8] sm:$0xff] }
 0x2ac   :  { %15033 = vmatmul.mubr.msk.f32.gmra.mxu1 %vm1928_vm4, %v3146_v19  ;;  %15044 = vmatprep.subr.mxu0 %v12130_v57 }
 0x2ad   :  { %13933 = vmatpush3.msra.mxu1 %v12188_v44  ;;  %15001 = vmatprep.mubr.msk.f32.mxu0 %vm1928_vm4, %v2971_v22  ;;  %v3565_v44 = vld [vmem:[%s22174_s1 + $0x50] sm:$0xff] }
 0x2ae   :  { %15035 = vmatprep.mubr.msk.f32.mxu1 %vm1928_vm4, %v3147_v0  ;;  %15045 = vmatpush3.msra.mxu0 %v12130_v57  ;;  %v17620_v57 = vld [vmem:[%s22175_s0 + $0x158] sm:$0xff] }
 0x2af   :  { %13934 = vmatprep.subr.mxu1 %v12203_v43  ;;  %15046 = vmatprep.subr.mxu0 %v12129_v33  ;;  %v3580_v43 = vld [vmem:[%s22174_s1 + $0xc8] sm:$0xff]  ;;  %v3671_v0 = vrot.slane %v17620_v57, 1 }
 0x2b0   :  { %13935 = vmatpush3.msra.mxu1 %v12187_v59  ;;  %15047 = vmatpush3.msra.mxu0 %v12129_v33  ;;  %v3564_v33 = vld [vmem:[%s22174_s1 + $0x48] sm:$0xff] }
 0x2b1   :  { %13936 = vmatprep.subr.mxu1 %v12202_v32  ;;  %15002 = vmatmul.mubr.msk.f32.gmra.mxu0 %vm1928_vm4, %v2972_v13  ;;  %v3320_v59 = vld [vmem:[#allocation3 + $0x50] sm:$0xff]  ;;  %v3579_v32 = vld [vmem:[%s22174_s1 + $0xc0] sm:$0xff]  ;;  %v3668_v13 = vsel %vm171_vm0, %v3663_v12, %v3667_v31  ;;  %v3558_v12 = vld [vmem:[%s22174_s1 + $0x18] sm:$0xff] }
 0x2b2   :  { %15036 = vmatmul.mubr.msk.f32.gmra.mxu1 %vm1928_vm4, %v3148_v7  ;;  %15004 = vmatprep.mubr.msk.f32.mxu0 %vm1928_vm4, %v2973_v28 }
 0x2b3   :  { %13937 = vmatpush3.msra.mxu1 %v12186_v55  ;;  %15048 = vmatprep.subr.mxu0 %v12128_v16  ;;  %v3321_v55 = vld [vmem:[#allocation3 + $0x58] sm:$0xff] }
 0x2b4   :  { %13938 = vmatprep.subr.mxu1 %v12201_v9  ;;  %15049 = vmatpush3.msra.mxu0 %v12128_v16  ;;  %v3563_v16 = vld [vmem:[%s22174_s1 + $0x40] sm:$0xff]  ;;  %v3578_v9 = vld [vmem:[%s22174_s1 + $0xb8] sm:$0xff] }
 0x2b5   :  { %13939 = vmatpush3.msra.mxu1 %v12185_v58  ;;  %15050 = vmatprep.subr.mxu0 %v12127_v47 }
 0x2b6   :  { %13940 = vmatprep.subr.mxu1 %v12200_v11  ;;  %15005 = vmatmul.mubr.msk.f32.gmra.mxu0 %vm1928_vm4, %v2974_v24  ;;  %v3562_v11 = vld [vmem:[%s22174_s1 + $0x38] sm:$0xff] }
 0x2b7   :  { %15051 = vmatpush3.msra.mxu0 %v12127_v47  ;;  %13941 = vmatpush3.msra.mxu1 %v12184_v61  ;;  %v17669_v47 = vld [vmem:[%s22175_s0 + $0x160] sm:$0xff]  ;;  %v3672_v61 = vsel %vm171_vm0, %v3667_v31, %v3671_v0  ;;  %v17678_v24 = vld [vmem:[%s22175_s0 + $0x178] sm:$0xff]  ;;  %v3556_v31 = vld [vmem:[%s22174_s1 + $0x8] sm:$0xff] }
 0x2b8   :  { %15052 = vmatprep.subr.mxu0 %v12126_v52  ;;  %15054 = vmatprep.mubr.msk.f32.mxu0 %vm1928_vm4, %v17162_v8  ;;  %v3585_v8 = vld [vmem:[%s22174_s1 + $0xf0] sm:$0xff] }
 0x2b9   :  { %13942 = vmatprep.subr.mxu1 %v12199_v48  ;;  %15053 = vmatpush3.msra.mxu0 %v12126_v52  ;;  %v3322_v52 = vld [vmem:[#allocation3 + $0x60] sm:$0xff]  ;;  %v3577_v48 = vld [vmem:[%s22174_s1 + $0xb0] sm:$0xff] }
 0x2ba   :  { %13943 = vmatpush3.msra.mxu1 %v12183_v53  ;;  %13997 = vmatprep.subr.mxu0 %v3586_v42  ;;  %v12146_v53 = vld [vmem:[%s22175_s0 + $0x118] sm:$0xff]  ;;  %v3561_v42 = vld [vmem:[%s22174_s1 + $0x30] sm:$0xff] }
 0x2bb   :  { %13944 = vmatprep.subr.mxu1 %v12198_v40  ;;  %15055 = vmatmul.mubr.msk.f32.vlgmr.msra.gmra.mxu0 %vm1928_vm4, %v17180_v50  ;;  %v12196_v50 = vld [vmem:[%s22174_s1 + $0x188] sm:$0xff] }
 0x2bc   :  { %13945 = vmatpush3.msra.mxu1 %v12182_v10  ;;  %13998 = vmatpush3.msra.mxu0 %v3570_v62  ;;  %v3673_v10 = vrot.slane %v17669_v47, 1  ;;  %v3576_v62 = vld [vmem:[%s22174_s1 + $0xa8] sm:$0xff] }
 0x2bd   :  { %15057 = vmatprep.mubr.msk.f32.mxu0 %vm1928_vm4, %v17198_v49  ;;  %13946 = vmatprep.subr.mxu1 %v12197_v5  ;;  %v3656_v49 = vrot.slane %v17542_v26, 1 }
 0x2be   :  { %13999 = vmatprep.subr.mxu0 %v3585_v8  ;;  %13947 = vmatpush3.msra.mxu1 %v12181_v34  ;;  %v3679_v8 = vrot.slane %v17678_v24, 1  ;;  %v3560_v34 = vld [vmem:[%s22174_s1 + $0x28] sm:$0xff] }
 0x2bf   :  { %14000 = vmatpush3.msra.mxu0 %v3569_v29  ;;  %13948 = vmatprep.subr.mxu1 %v12196_v50  ;;  %v3662_v19 = vsel %vm171_vm0, %v3656_v49, %v3661_v25  ;;  %v12258_v29 = vld [vmem:[%s22174_s1 + $0x278] sm:$0xff]  ;;  %v3575_v50 = vld [vmem:[%s22174_s1 + $0xa0] sm:$0xff] }
 0x2c0   :  { %14001 = vmatprep.subr.mxu0 %v3584_v1  ;;  %15058 = vmatmul.mubr.msk.f32.gmra.mxu0 %vm1928_vm4, %v17218_v2  ;;  %v3657_v2 = vsel %vm171_vm0, %v3655_v18, %v3656_v49  ;;  %v12273_v1 = vld [vmem:[%s22174_s1 + $0x2f0] sm:$0xff]  ;;  %v3683_v49 = vrot.slane %v17708_v36, 1 }
 0x2c1   :  { %13949 = vmatpush3.msra.mxu1 %v12180_v21  ;;  %14002 = vmatpush3.msra.mxu0 %v3568_v45  ;;  %v3677_v21 = vrot.slane %v17700_v37, 1  ;;  %v3574_v45 = vld [vmem:[%s22174_s1 + $0x98] sm:$0xff] }
 0x2c2   :  { %15060 = vmatprep.mubr.msk.f32.mxu0 %vm1928_vm4, %v17234_v17  ;;  %13950 = vmatprep.subr.mxu1 %v12195_v14  ;;  %v17608_v17 = vld [vmem:[%s22175_s0 + $0x140] sm:$0xff] }
 0x2c3   :  { %14003 = vmatprep.subr.mxu0 %v3583_v6  ;;  %13951 = vmatpush3.msra.mxu1 %v12179_v15  ;;  %v3665_v22 = vrot.slane %v17608_v17, 1  ;;  %v17732_v14 = vld [vmem:[%s22175_s0 + $0x180] sm:$0xff]  ;;  %v12257_v6 = vld [vmem:[%s22174_s1 + $0x270] sm:$0xff] }
 0x2c4   :  { %3811 = vmatprep.mubr.f32.mxu1 %v3660_v54  ;;  %14004 = vmatpush3.msra.mxu0 %v3567_v41  ;;  %v3573_v15 = vld [vmem:[%s22174_s1 + $0x90] sm:$0xff]  ;;  %v17746_v54 = vld [vmem:[%s22175_s0 + $0x198] sm:$0xff]  ;;  %v12272_v41 = vld [vmem:[%s22174_s1 + $0x2e8] sm:$0xff] }
 0x2c5   :  { %3812 = vmatmul.mubr.f32.vlgmr.msra.gmra.mxu1 %v3657_v2  ;;  %14005 = vmatprep.subr.mxu0 %v3582_v35  ;;  %v3666_v7 = vsel %vm171_vm0, %v3661_v25, %v3665_v22  ;;  %v3557_v2 = vld [vmem:[%s22174_s1 + $0x10] sm:$0xff]  ;;  %v3678_v35 = vsel %vm171_vm0, %v3673_v10, %v3677_v21  ;;  %v3681_v25 = vrot.slane %v17732_v14, 1 }
 0x2c6   :  { %15061 = vmatmul.mubr.msk.f32.gmra.mxu0 %vm1928_vm4, %v17243_v56  ;;  %3816 = vmatprep.mubr.f32.mxu1 %v3664_v63  ;;  %v17640_v56 = vld [vmem:[%s22175_s0 + $0x150] sm:$0xff]  ;;  %v3572_v63 = vld [vmem:[%s22174_s1 + $0x88] sm:$0xff] }
 0x2c7   :  { %14006 = vmatpush3.msra.mxu0 %v3566_v3  ;;  %15063 = vmatprep.mubr.msk.f32.mxu0 %vm1928_vm4, %v17250_v46  ;;  %v17649_v46 = vld [vmem:[%s22175_s0 + $0x168] sm:$0xff]  ;;  %v3669_v28 = vrot.slane %v17640_v56, 1  ;;  %v3684_v3 = vsel %vm171_vm0, %v3679_v8, %v3683_v49 }
 0x2c8   :  { %14007 = vmatprep.subr.mxu0 %v3581_v20  ;;  %14074 = vmatprep.subr.mxu1 %v12274_v27  ;;  %v3675_v58 = vrot.slane %v17649_v46, 1  ;;  %v17763_v20 = vld [vmem:[%s22175_s0 + $0x190] sm:$0xff]  ;;  %v3687_v27 = vrot.slane %v17746_v54, 1 }
 0x2c9   :  { %14008 = vmatpush3.msra.mxu0 %v3565_v44  ;;  %3817 = vmatmul.mubr.f32.gmra.mxu1 %v3662_v19  ;;  %v3670_v40 = vsel %vm171_vm0, %v3665_v22, %v3669_v28  ;;  %v3674_v4 = vsel %vm171_vm0, %v3669_v28, %v3673_v10  ;;  %v17772_v44 = vld [vmem:[%s22175_s0 + $0x1a8] sm:$0xff]  ;;  %v3571_v22 = vld [vmem:[%s22174_s1 + $0x80] sm:$0xff] }
 0x2ca   :  { %14009 = vmatprep.subr.mxu0 %v3580_v43  ;;  %15064 = vmatmul.mubr.msk.f32.gmra.mxu0 %vm1928_vm4, %v3320_v59  ;;  %v3676_v5 = vsel %vm171_vm0, %v3671_v0, %v3675_v58  ;;  %v3680_v18 = vsel %vm171_vm0, %v3675_v58, %v3679_v8  ;;  %v12256_v19 = vld [vmem:[%s22174_s1 + $0x268] sm:$0xff]  ;;  %v12271_v43 = vld [vmem:[%s22174_s1 + $0x2e0] sm:$0xff]  ;;  %v3682_v0 = vsel %vm171_vm0, %v3677_v21, %v3681_v25  ;;  %v3685_v59 = vrot.slane %v17763_v20, 1  ;;  %v12309_v58 = vld [vmem:[%s22174_s1 + $0x3f0] sm:$0xff] }
 0x2cb   :  { %14010 = vmatpush3.msra.mxu0 %v3564_v33  ;;  %15066 = vmatprep.mubr.msk.f32.mxu0 %vm1928_vm4, %v3321_v55  ;;  %v3555_v33 = vld [vmem:[%s22174_s1] sm:$0xff]  ;;  %v3691_v55 = vrot.slane %v17772_v44, 1  ;;  %v3688_v28 = vsel %vm171_vm0, %v3683_v49, %v3687_v27  ;;  %v17831_v10 = vld [vmem:[%s22175_s0 + $0x1c8] sm:$0xff]  ;;  %v17865_v21 = vld [vmem:[%s22175_s0 + $0x1d8] sm:$0xff] }
 0x2cc   :  { %14011 = vmatprep.subr.mxu0 %v3579_v32  ;;  %3821 = vmatprep.mubr.f32.mxu1 %v3668_v13  ;;  %v12145_v32 = vld [vmem:[%s22175_s0 + $0x110] sm:$0xff]  ;;  %v12310_v13 = vld [vmem:[%s22174_s1 + $0x3f8] sm:$0xff] }
 0x2cd   :  { %14012 = vmatpush3.msra.mxu0 %v3563_v16  ;;  %3822 = vmatmul.mubr.f32.gmra.mxu1 %v3666_v7  ;;  %v17798_v16 = vld [vmem:[%s22175_s0 + $0x1a0] sm:$0xff]  ;;  %v12294_v7 = vld [vmem:[%s22174_s1 + $0x378] sm:$0xff] }
 0x2ce   :  { %14013 = vmatprep.subr.mxu0 %v3578_v9  ;;  %15067 = vmatmul.mubr.msk.f32.gmra.mxu0 %vm1928_vm4, %v3322_v52  ;;  %v17807_v9 = vld [vmem:[%s22175_s0 + $0x1b8] sm:$0xff]  ;;  %v3689_v52 = vrot.slane %v17798_v16, 1 }
 0x2cf   :  { %14014 = vmatpush3.msra.mxu0 %v3562_v11  ;;  %3826 = vmatprep.mubr.f32.mxu1 %v3672_v61  ;;  %v3686_v11 = vsel %vm171_vm0, %v3681_v25, %v3685_v59  ;;  %v12293_v61 = vld [vmem:[%s22174_s1 + $0x370] sm:$0xff] }
 0x2d0   :  { %14015 = vmatprep.subr.mxu0 %v3577_v48  ;;  %3951 = vmatprep.mubr.f32.mxu0 %v12146_v53  ;;  %v3692_v48 = vsel %vm171_vm0, %v3687_v27, %v3691_v55  ;;  %v3695_v53 = vrot.slane %v17807_v9, 1  ;;  %v12252_v27 = vld [vmem:[%s22174_s1 + $0x248] sm:$0xff] }
 0x2d1   :  { %14016 = vmatpush3.msra.mxu0 %v3561_v42  ;;  %3827 = vmatmul.mubr.f32.gmra.mxu1 %v3670_v40  ;;  %v17822_v42 = vld [vmem:[%s22175_s0 + $0x1b0] sm:$0xff]  ;;  %v12308_v40 = vld [vmem:[%s22174_s1 + $0x3e8] sm:$0xff] }
 0x2d2   :  { %14017 = vmatprep.subr.mxu0 %v3576_v62  ;;  %3831 = vmatprep.mubr.f32.mxu1 %v3676_v5  ;;  %v12292_v62 = vld [vmem:[%s22174_s1 + $0x368] sm:$0xff]  ;;  %v3690_v5 = vsel %vm171_vm0, %v3685_v59, %v3689_v52  ;;  %v3693_v8 = vrot.slane %v17822_v42, 1  ;;  %v12305_v59 = vld [vmem:[%s22174_s1 + $0x3d0] sm:$0xff] }
 0x2d3   :  { %14018 = vmatpush3.msra.mxu0 %v3560_v34  ;;  %14075 = vmatpush3.msra.mxu1 %v12258_v29  ;;  %v12270_v34 = vld [vmem:[%s22174_s1 + $0x2d8] sm:$0xff]  ;;  %v3696_v29 = vsel %vm171_vm0, %v3691_v55, %v3695_v53 }
 0x2d4   :  { %14019 = vmatprep.subr.mxu0 %v3575_v50  ;;  %14076 = vmatprep.subr.mxu1 %v12273_v1  ;;  %v3699_v50 = vrot.slane %v17831_v10, 1  ;;  %v12307_v1 = vld [vmem:[%s22174_s1 + $0x3e0] sm:$0xff] }
 0x2d5   :  { %14020 = vmatpush3.msra.mxu0 %v3559_v60  ;;  %3832 = vmatmul.mubr.f32.gmra.mxu1 %v3674_v4  ;;  %v12254_v60 = vld [vmem:[%s22174_s1 + $0x258] sm:$0xff]  ;;  %v12291_v4 = vld [vmem:[%s22174_s1 + $0x360] sm:$0xff] }
 0x2d6   :  { %14021 = vmatprep.subr.mxu0 %v3574_v45  ;;  %3836 = vmatprep.mubr.f32.mxu1 %v3680_v18  ;;  %v3694_v45 = vsel %vm171_vm0, %v3689_v52, %v3693_v8  ;;  %v12269_v18 = vld [vmem:[%s22174_s1 + $0x2d0] sm:$0xff] }
 0x2d7   :  { %14022 = vmatpush3.msra.mxu0 %v3558_v12  ;;  %14077 = vmatpush3.msra.mxu1 %v12257_v6  ;;  %v3700_v12 = vsel %vm171_vm0, %v3695_v53, %v3699_v50  ;;  %v17878_v6 = vld [vmem:[%s22175_s0 + $0x1d0] sm:$0xff] }
 0x2d8   :  { %14023 = vmatprep.subr.mxu0 %v3573_v15  ;;  %14078 = vmatprep.subr.mxu1 %v12272_v41  ;;  %v12253_v15 = vld [vmem:[%s22174_s1 + $0x250] sm:$0xff]  ;;  %v3703_v41 = vrot.slane %v17865_v21, 1 }
 0x2d9   :  { %14024 = vmatpush3.msra.mxu0 %v3557_v2  ;;  %3837 = vmatmul.mubr.f32.gmra.mxu1 %v3678_v35  ;;  %v12306_v2 = vld [vmem:[%s22174_s1 + $0x3d8] sm:$0xff]  ;;  %v12268_v35 = vld [vmem:[%s22174_s1 + $0x2c8] sm:$0xff]  ;;  %v17946_v52 = vld [vmem:[%s22175_s0 + $0x1f0] sm:$0xff] }
 0x2da   :  { %14025 = vmatprep.subr.mxu0 %v3572_v63  ;;  %3841 = vmatprep.mubr.f32.mxu1 %v3684_v3  ;;  %v12290_v63 = vld [vmem:[%s22174_s1 + $0x358] sm:$0xff]  ;;  %v3701_v3 = vrot.slane %v17878_v6, 1 }
 0x2db   :  { %14026 = vmatpush3.msra.mxu0 %v3556_v31  ;;  %14079 = vmatpush3.msra.mxu1 %v12256_v19  ;;  %v17899_v31 = vld [vmem:[%s22175_s0 + $0x1e8] sm:$0xff]  ;;  %v12267_v19 = vld [vmem:[%s22174_s1 + $0x2c0] sm:$0xff] }
 0x2dc   :  { %14027 = vmatprep.subr.mxu0 %v3571_v22  ;;  %14080 = vmatprep.subr.mxu1 %v12271_v43  ;;  %v3704_v22 = vsel %vm171_vm0, %v3699_v50, %v3703_v41  ;;  %v17912_v43 = vld [vmem:[%s22175_s0 + $0x1e0] sm:$0xff] }
 0x2dd   :  { %14028 = vmatpush3.msra.mxu0 %v3555_v33  ;;  %3842 = vmatmul.mubr.f32.gmra.mxu1 %v3682_v0  ;;  %v12251_v33 = vld [vmem:[%s22174_s1 + $0x240] sm:$0xff]  ;;  %v3707_v0 = vrot.slane %v17899_v31, 1  ;;  %v3705_v55 = vrot.slane %v17912_v43, 1 }
 0x2de   :  { %3952 = vmatmul.mubr.f32.vlgmr.msra.gmra.mxu0 %v12145_v32  ;;  %14151 = vmatprep.subr.mxu0 %v12310_v13  ;;  %v12266_v13 = vld [vmem:[%s22174_s1 + $0x2b8] sm:$0xff]  ;;  %v12263_v50 = vld [vmem:[%s22174_s1 + $0x2a0] sm:$0xff] }
 0x2df   :  { %14152 = vmatpush3.msra.mxu0 %v12294_v7  ;;  %3846 = vmatprep.mubr.f32.mxu1 %v3688_v28  ;;  %v17930_v7 = vld [vmem:[%s22175_s0 + $0x1f8] sm:$0xff]  ;;  %v12289_v28 = vld [vmem:[%s22174_s1 + $0x350] sm:$0xff] }
 0x2e0   :  { %3956 = vmatprep.mubr.f32.mxu0 %v17529_v23  ;;  %14153 = vmatprep.subr.mxu0 %v12309_v58  ;;  %v12255_v23 = vld [vmem:[%s22174_s1 + $0x260] sm:$0xff]  ;;  %v12250_v58 = vld [vmem:[%s22174_s1 + $0x238] sm:$0xff]  ;;  %v3711_v53 = vrot.slane %v17930_v7, 1 }
 0x2e1   :  { %3847 = vmatmul.mubr.f32.gmra.mxu1 %v3686_v11  ;;  %14154 = vmatpush3.msra.mxu0 %v12293_v61  ;;  %v12265_v11 = vld [vmem:[%s22174_s1 + $0x2b0] sm:$0xff]  ;;  %v3708_v61 = vsel %vm171_vm0, %v3703_v41, %v3707_v0  ;;  %v12246_v41 = vld [vmem:[%s22174_s1 + $0x218] sm:$0xff] }
 0x2e2   :  { %3957 = vmatmul.mubr.f32.gmra.mxu0 %v17542_v26  ;;  %3851 = vmatprep.mubr.f32.mxu1 %v3692_v48  ;;  %v17851_v26 = vld [vmem:[%s22175_s0 + $0x1c0] sm:$0xff]  ;;  %v12249_v48 = vld [vmem:[%s22174_s1 + $0x230] sm:$0xff] }
 0x2e3   :  { %3961 = vmatprep.mubr.f32.mxu0 %v17556_v51  ;;  %14155 = vmatprep.subr.mxu0 %v12308_v40  ;;  %v3697_v49 = vrot.slane %v17851_v26, 1  ;;  %v12304_v40 = vld [vmem:[%s22174_s1 + $0x3c8] sm:$0xff] }
 0x2e4   :  { %14156 = vmatpush3.msra.mxu0 %v12292_v62  ;;  %14081 = vmatpush3.msra.mxu1 %v12255_v23  ;;  %v3706_v62 = vsel %vm171_vm0, %v3701_v3, %v3705_v55  ;;  %v12264_v23 = vld [vmem:[%s22174_s1 + $0x2a8] sm:$0xff] }
 0x2e5   :  { %3852 = vmatmul.mubr.f32.gmra.mxu1 %v3690_v5  ;;  %14082 = vmatprep.subr.mxu1 %v12270_v34  ;;  %v3698_v25 = vsel %vm171_vm0, %v3693_v8, %v3697_v49  ;;  %v3702_v32 = vsel %vm171_vm0, %v3697_v49, %v3701_v3  ;;  %v3709_v5 = vrot.slane %v17946_v52, 1  ;;  %v12288_v8 = vld [vmem:[%s22174_s1 + $0x348] sm:$0xff] }
 0x2e6   :  { %3962 = vmatmul.mubr.f32.gmra.mxu0 %v17578_v38  ;;  %3856 = vmatprep.mubr.f32.mxu1 %v3696_v29  ;;  %v12248_v34 = vld [vmem:[%s22174_s1 + $0x228] sm:$0xff] }
 0x2e7   :  { %3966 = vmatprep.mubr.f32.mxu0 %v17602_v30  ;;  %14157 = vmatprep.subr.mxu0 %v12307_v1  ;;  %v12178_v29 = vld [vmem:[%s22175_s0 + $0x208] sm:$0x1]  ;;  %v3712_v1 = vsel %vm171_vm0, %v3707_v0, %v3711_v53  ;;  %v4127_v0 = vrot.slane %v17556_v51, 3 }
 0x2e8   :  { %14083 = vmatpush3.msra.mxu1 %v12254_v60  ;;  %14158 = vmatpush3.msra.mxu0 %v12291_v4  ;;  %v12247_v60 = vld [vmem:[%s22174_s1 + $0x220] sm:$0xff]  ;;  %v3715_v49 = vrot.slane %v12178_v29, 1  ;;  %v12284_v29 = vld [vmem:[%s22174_s1 + $0x328] sm:$0xff] }
 0x2e9   :  { %3857 = vmatmul.mubr.f32.gmra.mxu1 %v3694_v45  ;;  %14084 = vmatprep.subr.mxu1 %v12269_v18  ;;  %v12177_v4 = vld [vmem:[%s22175_s0 + $0x200] sm:$0x1]  ;;  %v3710_v18 = vsel %vm171_vm0, %v3705_v55, %v3709_v5 }
 0x2ea   :  { %3967 = vmatmul.mubr.f32.gmra.mxu0 %v17608_v17  ;;  %3861 = vmatprep.mubr.f32.mxu1 %v3700_v12  ;;  %v12303_v45 = vld [vmem:[%s22174_s1 + $0x3c0] sm:$0xff]  ;;  %v12262_v12 = vld [vmem:[%s22174_s1 + $0x298] sm:$0xff]  ;;  %v3716_v3 = vsel %vm171_vm0, %v3711_v53, %v3715_v49 }
 0x2eb   :  { %3971 = vmatprep.mubr.f32.mxu0 %v17620_v57  ;;  %14085 = vmatpush3.msra.mxu1 %v12253_v15  ;;  %v12287_v15 = vld [vmem:[%s22174_s1 + $0x340] sm:$0xff]  ;;  %v12298_v49 = vld [vmem:[%s22174_s1 + $0x398] sm:$0xff] }
 0x2ec   :  { %14159 = vmatprep.subr.mxu0 %v12306_v2  ;;  %14086 = vmatprep.subr.mxu1 %v12268_v35  ;;  %v3713_v2 = vrot.slane %v12177_v4, 1  ;;  %v12212_v35 = vld [vmem:[%s22175_s0 + $0x128] sm:$0xf8]  ;;  %v12243_v53 = vld [vmem:[%s22174_s1 + $0x200] sm:$0xff] }
 0x2ed   :  { %3862 = vmatmul.mubr.f32.gmra.mxu1 %v3698_v25  ;;  %14160 = vmatpush3.msra.mxu0 %v12290_v63  ;;  %v12261_v25 = vld [vmem:[%s22174_s1 + $0x290] sm:$0xff]  ;;  %v12302_v63 = vld [vmem:[%s22174_s1 + $0x3b8] sm:$0xff] }
 0x2ee   :  { %3972 = vmatmul.mubr.f32.gmra.mxu0 %v17640_v56  ;;  %14087 = vmatpush3.msra.mxu1 %v12252_v27  ;;  %v12211_v27 = vld [vmem:[%s22175_s0 + $0x120] sm:$0xf8] }
 0x2ef   :  { %14088 = vmatprep.subr.mxu1 %v12267_v19  ;;  %3866 = vmatprep.mubr.f32.mxu1 %v3704_v22  ;;  %v12245_v19 = vld [vmem:[%s22174_s1 + $0x210] sm:$0xff]  ;;  %v12286_v22 = vld [vmem:[%s22174_s1 + $0x338] sm:$0xff]  ;;  %v4123_v55 = vrot.slane %v12211_v27, 3 }
 0x2f0   :  { %3976 = vmatprep.mubr.f32.mxu0 %v17649_v46  ;;  %14089 = vmatpush3.msra.mxu1 %v12251_v33  ;;  %v4126_v33 = vrot.slane %v12212_v35, 3 }
 0x2f1   :  { %14161 = vmatprep.subr.mxu0 %v12305_v59  ;;  %3867 = vmatmul.mubr.f32.gmra.mxu1 %v3702_v32  ;;  %v3714_v59 = vsel %vm171_vm0, %v3709_v5, %v3713_v2  ;;  %v12260_v32 = vld [vmem:[%s22174_s1 + $0x288] sm:$0xff]  ;;  %v4143_v2 = vrot.slane %v17678_v24, 3 }
 0x2f2   :  { %3977 = vmatmul.mubr.f32.gmra.mxu0 %v17669_v47  ;;  %14090 = vmatprep.subr.mxu1 %v12266_v13  ;;  %v12301_v13 = vld [vmem:[%s22174_s1 + $0x3b0] sm:$0xff]  ;;  %v12300_v5 = vld [vmem:[%s22174_s1 + $0x3a8] sm:$0xff] }
 0x2f3   :  { %14162 = vmatpush3.msra.mxu0 %v12289_v28  ;;  %14091 = vmatpush3.msra.mxu1 %v12250_v58  ;;  %v4124_v28 = vrot.slane %v17578_v38, 3  ;;  %v12244_v58 = vld [vmem:[%s22174_s1 + $0x208] sm:$0xff] }
 0x2f4   :  { %14092 = vmatprep.subr.mxu1 %v12265_v11  ;;  %3871 = vmatprep.mubr.f32.mxu1 %v3708_v61  ;;  %v12259_v11 = vld [vmem:[%s22174_s1 + $0x280] sm:$0xff]  ;;  %v4128_v61 = vsel %vm641_vm1, %v4126_v33, %v4127_v0  ;;  %v4147_v33 = vrot.slane %v17708_v36, 3 }
 0x2f5   :  { %3981 = vmatprep.mubr.f32.mxu0 %v17678_v24  ;;  %14093 = vmatpush3.msra.mxu1 %v12249_v48  ;;  %v4131_v48 = vrot.slane %v17602_v30, 3 }
 0x2f6   :  { %14163 = vmatprep.subr.mxu0 %v12304_v40  ;;  %3872 = vmatmul.mubr.f32.gmra.mxu1 %v3706_v62  ;;  %v12285_v40 = vld [vmem:[%s22174_s1 + $0x330] sm:$0xff]  ;;  %v4125_v62 = vsel %vm641_vm1, %v4123_v55, %v4124_v28  ;;  %v12280_v55 = vld [vmem:[%s22174_s1 + $0x308] sm:$0xff] }
 0x2f7   :  { %3982 = vmatmul.mubr.f32.gmra.mxu0 %v17700_v37  ;;  %14094 = vmatprep.subr.mxu1 %v12264_v23  ;;  %v4129_v23 = vrot.slane %v17608_v17, 3 }
 0x2f8   :  { %14164 = vmatpush3.msra.mxu0 %v12288_v8  ;;  %14095 = vmatpush3.msra.mxu1 %v12248_v34  ;;  %v4135_v8 = vrot.slane %v17620_v57, 3  ;;  %v4132_v34 = vsel %vm641_vm1, %v4127_v0, %v4131_v48 }
 0x2f9   :  { %14096 = vmatprep.subr.mxu1 %v12263_v50  ;;  %3876 = vmatprep.mubr.f32.mxu1 %v3712_v1  ;;  %v12299_v50 = vld [vmem:[%s22174_s1 + $0x3a0] sm:$0xff]  ;;  %v4130_v1 = vsel %vm641_vm1, %v4124_v28, %v4129_v23 }
 0x2fa   :  { %3986 = vmatprep.mubr.f32.mxu0 %v17708_v36  ;;  %14097 = vmatpush3.msra.mxu1 %v12247_v60  ;;  %v4133_v60 = vrot.slane %v17640_v56, 3  ;;  %v4136_v4 = vsel %vm641_vm1, %v4131_v48, %v4135_v8  ;;  %v4151_v48 = vrot.slane %v17746_v54, 3 }
 0x2fb   :  { %14165 = vmatprep.subr.mxu0 %v12303_v45  ;;  %3877 = vmatmul.mubr.f32.gmra.mxu1 %v3710_v18  ;;  %v12283_v45 = vld [vmem:[%s22174_s1 + $0x320] sm:$0xff]  ;;  %v4139_v18 = vrot.slane %v17649_v46, 3 }
 0x2fc   :  { %3987 = vmatmul.mubr.f32.gmra.mxu0 %v17732_v14  ;;  %14098 = vmatprep.subr.mxu1 %v12262_v12  ;;  %v4134_v12 = vsel %vm641_vm1, %v4129_v23, %v4133_v60 }
 0x2fd   :  { %14166 = vmatpush3.msra.mxu0 %v12287_v15  ;;  %14099 = vmatpush3.msra.mxu1 %v12246_v41  ;;  %v4137_v15 = vrot.slane %v17669_v47, 3  ;;  %v12282_v41 = vld [vmem:[%s22174_s1 + $0x318] sm:$0xff] }
 0x2fe   :  { %14100 = vmatprep.subr.mxu1 %v12261_v25  ;;  %14167 = vmatprep.subr.mxu0 %v12302_v63  ;;  %v4140_v25 = vsel %vm641_vm1, %v4135_v8, %v4139_v18  ;;  %v12297_v63 = vld [vmem:[%s22174_s1 + $0x390] sm:$0xff]  ;;  %v12279_v8 = vld [vmem:[%s22174_s1 + $0x300] sm:$0xff] }
 0x2ff   :  { %3881 = vmatprep.mubr.f32.mxu1 %v3716_v3  ;;  %3991 = vmatprep.mubr.f32.mxu0 %v17746_v54  ;;  %v12281_v3 = vld [vmem:[%s22174_s1 + $0x310] sm:$0xff]  ;;  %v4138_v27 = vsel %vm641_vm1, %v4133_v60, %v4137_v15  ;;  %v4411_v60 = vrot.slane %v17578_v38, 4 }
 0x300   :  { %14101 = vmatpush3.msra.mxu1 %v12245_v19  ;;  %14168 = vmatpush3.msra.mxu0 %v12286_v22  ;;  %v4141_v19 = vrot.slane %v17700_v37, 3  ;;  %v4144_v22 = vsel %vm641_vm1, %v4139_v18, %v4143_v2  ;;  %v4155_v18 = vrot.slane %v17772_v44, 3 }
 0x301   :  { %3882 = vmatmul.mubr.f32.gmra.mxu1 %v3714_v59  ;;  %3992 = vmatmul.mubr.f32.gmra.mxu0 %v17763_v20 }
 0x302   :  { %14102 = vmatprep.subr.mxu1 %v12260_v32  ;;  %14169 = vmatprep.subr.mxu0 %v12301_v13  ;;  %v12296_v32 = vld [vmem:[%s22174_s1 + $0x388] sm:$0xff] }
 0x303   :  { %14103 = vmatpush3.msra.mxu1 %v12244_v58  ;;  %3996 = vmatprep.mubr.f32.mxu0 %v17772_v44  ;;  %v12276_v13 = vld [vmem:[%s22175_s0 + $0x128] sm:$0xf0]  ;;  %v4142_v58 = vsel %vm641_vm1, %v4137_v15, %v4141_v19 }
 0x304   :  { %14104 = vmatprep.subr.mxu1 %v12259_v11  ;;  %4279 = vmatprep.mubr.f32.mxu1 %v4128_v61  ;;  %v4145_v11 = vrot.slane %v17732_v14, 3  ;;  %v4148_v61 = vsel %vm641_vm1, %v4143_v2, %v4147_v33  ;;  %v4153_v2 = vrot.slane %v17798_v16, 3 }
 0x305   :  { %14105 = vmatpush3.msra.mxu1 %v12243_v53  ;;  %14170 = vmatpush3.msra.mxu0 %v12285_v40  ;;  %v18076_v35 = vpop.f32.mrf.mxu1  ;;  %v4413_v53 = vrot.slane %v12276_v13, 4  ;;  %v4414_v40 = vrot.slane %v17556_v51, 4  ;;  %v4157_v13 = vrot.slane %v17822_v42, 3 }
 0x306   :  { %3997 = vmatmul.mubr.f32.gmra.mxu0 %v17798_v16  ;;  %4280 = vmatmul.mubr.f32.vlgmr.msra.gmra.mxu1 %v4125_v62  ;;  %v12275_v62 = vld [vmem:[%s22175_s0 + $0x120] sm:$0xf0] }
 0x307   :  { %14171 = vmatprep.subr.mxu0 %v12300_v5  ;;  %4001 = vmatprep.mubr.f32.mxu0 %v17807_v9  ;;  %v18091_v0 = vpop.f32.mrf.mxu1  ;;  %v12295_v5 = vld [vmem:[%s22174_s1 + $0x380] sm:$0xff] }
 0x308   :  { %4284 = vmatprep.mubr.f32.mxu1 %v4132_v34  ;;  %14172 = vmatpush3.msra.mxu0 %v12284_v29  ;;  %v18093_v59 = vpop.f32.mrf.mxu0  ;;  %v4146_v29 = vsel %vm641_vm1, %v4141_v19, %v4145_v11 }
 0x309   :  { %14173 = vmatprep.subr.mxu0 %v12299_v50  ;;  %15069 = vmatprep.subr.mxu1 %v22200_v39  ;;  %v4149_v50 = vrot.slane %v17763_v20, 3 }
 0x30a   :  { %4002 = vmatmul.mubr.f32.gmra.mxu0 %v17822_v42  ;;  %4285 = vmatmul.mubr.f32.gmra.mxu1 %v4130_v1  ;;  %v18116_v23 = vpop.f32.mrf.mxu0  ;;  %v4410_v1 = vrot.slane %v12275_v62, 4 }
 0x30b   :  { %4006 = vmatprep.mubr.f32.mxu0 %v17831_v10  ;;  %4289 = vmatprep.mubr.f32.mxu1 %v4136_v4  ;;  %v4152_v4 = vsel %vm641_vm1, %v4147_v33, %v4151_v48  ;;  %v4150_v38 = vsel %vm641_vm1, %v4145_v11, %v4149_v50  ;;  %v4163_v11 = vrot.slane %v17831_v10, 3 }
 0x30c   :  { %14174 = vmatpush3.msra.mxu0 %v12283_v45  ;;  %v4415_v45 = vsel %vm930_vm2, %v4413_v53, %v4414_v40 }
 0x30d   :  { %14175 = vmatprep.subr.mxu0 %v12298_v49  ;;  %v18105_v28 = vpop.f32.mrf.mxu1  ;;  %v4418_v49 = vrot.slane %v17602_v30, 4  ;;  %v4156_v30 = vsel %vm641_vm1, %v4151_v48, %v4155_v18 }
 0x30e   :  { %4007 = vmatmul.mubr.f32.gmra.mxu0 %v17851_v26  ;;  %4290 = vmatmul.mubr.f32.gmra.mxu1 %v4134_v12 }
 0x30f   :  { %14176 = vmatpush3.msra.mxu0 %v12282_v41  ;;  %4011 = vmatprep.mubr.f32.mxu0 %v17865_v21  ;;  %v18125_v34 = vpop.f32.mrf.mxu1  ;;  %v4412_v41 = vsel %vm930_vm2, %v4410_v1, %v4411_v60  ;;  %v4430_v1 = vrot.slane %v17678_v24, 4 }
 0x310   :  { %4294 = vmatprep.mubr.f32.mxu1 %v4140_v25  ;;  %14177 = vmatprep.subr.mxu0 %v12297_v63  ;;  %v18127_v51 = vpop.f32.mrf.mxu0  ;;  %v4416_v25 = vrot.slane %v17608_v17, 4  ;;  %v4419_v63 = vsel %vm930_vm2, %v4414_v40, %v4418_v49  ;;  %v4154_v17 = vsel %vm641_vm1, %v4149_v50, %v4153_v2  ;;  %v4167_v50 = vrot.slane %v17865_v21, 3 }
 0x311   :  { %14178 = vmatpush3.msra.mxu0 %v12281_v3  ;;  %v4159_v3 = vrot.slane %v17807_v9, 3 }
 0x312   :  { %4012 = vmatmul.mubr.f32.gmra.mxu0 %v17878_v6  ;;  %4295 = vmatmul.mubr.f32.gmra.mxu1 %v4138_v27  ;;  %v18140_v15 = vpop.f32.mrf.mxu0  ;;  %v4422_v27 = vrot.slane %v17620_v57, 4  ;;  %v4420_v57 = vrot.slane %v17640_v56, 4  ;;  %v4158_v56 = vsel %vm641_vm1, %v4153_v2, %v4157_v13  ;;  %v4168_v24 = vsel %vm641_vm1, %v4163_v11, %v4167_v50 }
 0x313   :  { %4016 = vmatprep.mubr.f32.mxu0 %v17899_v31  ;;  %4299 = vmatprep.mubr.f32.mxu1 %v4144_v22  ;;  %v4171_v2 = vrot.slane %v17899_v31, 3 }
 0x314   :  { %14179 = vmatprep.subr.mxu0 %v12296_v32  ;;  %v4417_v32 = vsel %vm930_vm2, %v4411_v60, %v4416_v25  ;;  %v4421_v62 = vsel %vm930_vm2, %v4416_v25, %v4420_v57  ;;  %v4434_v25 = vrot.slane %v17708_v36, 4  ;;  %v4432_v36 = vrot.slane %v17732_v14, 4 }
 0x315   :  { %14180 = vmatpush3.msra.mxu0 %v12280_v55  ;;  %v18137_v12 = vpop.f32.mrf.mxu1  ;;  %v4160_v55 = vsel %vm641_vm1, %v4155_v18, %v4159_v3 }
 0x316   :  { %4017 = vmatmul.mubr.f32.gmra.mxu0 %v17912_v43  ;;  %4300 = vmatmul.mubr.f32.gmra.mxu1 %v4142_v58  ;;  %v4423_v58 = vsel %vm930_vm2, %v4418_v49, %v4422_v27  ;;  %v4165_v49 = vrot.slane %v17878_v6, 3 }
 0x317   :  { %4021 = vmatprep.mubr.f32.mxu0 %v17930_v7  ;;  %4304 = vmatprep.mubr.f32.mxu1 %v4148_v61  ;;  %v18150_v19 = vpop.f32.mrf.mxu1  ;;  %v4426_v61 = vrot.slane %v17649_v46, 4  ;;  %v4164_v46 = vsel %vm641_vm1, %v4159_v3, %v4163_v11 }
 0x318   :  { %14181 = vmatprep.subr.mxu0 %v12295_v5  ;;  %v18152_v22 = vpop.f32.mrf.mxu0  ;;  %v4161_v5 = vrot.slane %v17851_v26, 3 }
 0x319   :  { %14182 = vmatpush3.msra.mxu0 %v12279_v8  ;;  %v4424_v8 = vrot.slane %v17669_v47, 4 }
 0x31a   :  { %4022 = vmatmul.mubr.f32.gmra.mxu0 %v17946_v52  ;;  %4305 = vmatmul.mubr.f32.gmra.mxu1 %v4146_v29  ;;  %v18165_v48 = vpop.f32.mrf.mxu0  ;;  %v4427_v29 = vsel %vm930_vm2, %v4422_v27, %v4426_v61  ;;  %v4162_v47 = vsel %vm641_vm1, %v4157_v13, %v4161_v5  ;;  %v4172_v13 = vsel %vm641_vm1, %v4167_v50, %v4171_v2 }
 0x31b   :  { %4309 = vmatprep.mubr.f32.mxu1 %v4152_v4  ;;  %4566 = vmatprep.mubr.f32.mxu0 %v4415_v45  ;;  %v4425_v18 = vsel %vm930_vm2, %v4420_v57, %v4424_v8  ;;  %v4435_v57 = vsel %vm930_vm2, %v4430_v1, %v4434_v25 }
 0x31c   :  { %15140 = vmatprep.subr.mxu0 %v22200_v39 }
 0x31d   :  { %v18155_v33 = vpop.f32.mrf.mxu1 }
 0x31e   :  { %4310 = vmatmul.mubr.f32.gmra.mxu1 %v4150_v38  ;;  %4567 = vmatmul.mubr.f32.vlgmr.msra.gmra.mxu0 %v4412_v41  ;;  %v4428_v38 = vrot.slane %v17700_v37, 4  ;;  %v4431_v41 = vsel %vm930_vm2, %v4426_v61, %v4430_v1  ;;  %v4166_v37 = vsel %vm641_vm1, %v4161_v5, %v4165_v49 }
 0x31f   :  { %4314 = vmatprep.mubr.f32.mxu1 %v4156_v30  ;;  %4571 = vmatprep.mubr.f32.mxu0 %v4419_v63  ;;  %v18167_v53 = vpop.f32.mrf.mxu1 }
 0x320   :  { %v18169_v40 = vpop.f32.mrf.mxu0 }
 0x322   :  { %4315 = vmatmul.mubr.f32.gmra.mxu1 %v4154_v17  ;;  %4572 = vmatmul.mubr.f32.gmra.mxu0 %v4417_v32  ;;  %v18181_v4 = vpop.f32.mrf.mxu0  ;;  %v4429_v17 = vsel %vm930_vm2, %v4424_v8, %v4428_v38  ;;  %v4169_v32 = vrot.slane %v17912_v43, 3  ;;  %v4173_v8 = vrot.slane %v17946_v52, 3 }
 0x323   :  { %4319 = vmatprep.mubr.f32.mxu1 %v4160_v55  ;;  %4576 = vmatprep.mubr.f32.mxu0 %v4423_v58  ;;  %v4175_v55 = vrot.slane %v17930_v7, 3  ;;  %v4438_v58 = vrot.slane %v17746_v54, 4  ;;  %v4433_v54 = vsel %vm930_vm2, %v4428_v38, %v4432_v36 }
 0x324   :  { %v4170_v5 = vsel %vm641_vm1, %v4165_v49, %v4169_v32 }
 0x325   :  { %v18179_v60 = vpop.f32.mrf.mxu1  ;;  %v4439_v50 = vsel %vm930_vm2, %v4434_v25, %v4438_v58 }
 0x326   :  { %4320 = vmatmul.mubr.f32.gmra.mxu1 %v4158_v56  ;;  %4577 = vmatmul.mubr.f32.gmra.mxu0 %v4421_v62  ;;  %v18216_v56 = vld [vmem:[%s22175_s0 + $0x208] sm:$0xff] }
 0x327   :  { %v18183_v45 = vpop.f32.mrf.mxu1  ;;  %4324 = vmatprep.mubr.f32.mxu1 %v4164_v46  ;;  %4581 = vmatprep.mubr.f32.mxu0 %v4427_v29  ;;  %v4436_v46 = vrot.slane %v17763_v20, 4  ;;  %v4176_v29 = vsel %vm641_vm1, %v4171_v2, %v4175_v55  ;;  %v4179_v1 = vrot.slane %v18216_v56, 3  ;;  %v12242_v20 = vld [vmem:[%s22175_s0 + $0x218] sm:$0x7] }
 0x328   :  { %v18193_v30 = vpop.f32.mrf.mxu0 }
 0x329   :  { %v18195_v63 = vpop.f32.mrf.mxu1  ;;  %v4437_v2 = vsel %vm930_vm2, %v4432_v36, %v4436_v46 }
 0x32a   :  { %4325 = vmatmul.mubr.f32.gmra.mxu1 %v4162_v47  ;;  %4582 = vmatmul.mubr.f32.gmra.mxu0 %v4425_v18  ;;  %v18197_v3 = vpop.f32.mrf.mxu0  ;;  %v4442_v47 = vrot.slane %v17772_v44, 4  ;;  %v18233_v18 = vld [vmem:[%s22175_s0 + $0x200] sm:$0xff]  ;;  %v4174_v44 = vsel %vm641_vm1, %v4169_v32, %v4173_v8 }
 0x32b   :  { %v18199_v27 = vpop.f32.mrf.mxu1  ;;  %4329 = vmatprep.mubr.f32.mxu1 %v4168_v24  ;;  %4586 = vmatprep.mubr.f32.mxu0 %v4431_v41  ;;  %v4177_v25 = vrot.slane %v18233_v18, 3 }
 0x32c   :  { %v18209_v11 = vpop.f32.mrf.mxu0 }
 0x32d   :  { %v18211_v61 = vpop.f32.mrf.mxu1 }
 0x32e   :  { %4330 = vmatmul.mubr.f32.gmra.mxu1 %v4166_v37  ;;  %4587 = vmatmul.mubr.f32.gmra.mxu0 %v4429_v17  ;;  %v18218_v14 = vpop.f32.mrf.mxu0  ;;  %v4440_v37 = vrot.slane %v17798_v16, 4  ;;  %v4180_v17 = vsel %vm641_vm1, %v4175_v55, %v4179_v1  ;;  %v4178_v16 = vsel %vm641_vm1, %v4173_v8, %v4177_v25 }
 0x32f   :  { %v18220_v62 = vpop.f32.mrf.mxu1  ;;  %4334 = vmatprep.mubr.f32.mxu1 %v4172_v13  ;;  %4591 = vmatprep.mubr.f32.mxu0 %v4435_v57  ;;  %v4443_v13 = vsel %vm930_vm2, %v4438_v58, %v4442_v47  ;;  %v4183_v57 = vrot.slane %v12242_v20, 3  ;;  %v4444_v58 = vrot.slane %v17822_v42, 4 }
 0x330   :  { %v18235_v49 = vpop.f32.mrf.mxu0  ;;  %v4441_v36 = vsel %vm930_vm2, %v4436_v46, %v4440_v37  ;;  %v4448_v46 = vrot.slane %v17851_v26, 4 }
 0x331   :  { %v18237_v38 = vpop.f32.mrf.mxu1  ;;  %v4184_v20 = vsel %vm641_vm1, %v4179_v1, %v4183_v57  ;;  %v4445_v8 = vsel %vm930_vm2, %v4440_v37, %v4444_v58  ;;  %v4737_v57 = vld [vmem:[%s22176_s3 + $0x78] sm:$0xff] }
 0x332   :  { %4335 = vmatmul.mubr.f32.gmra.mxu1 %v4170_v5  ;;  %4592 = vmatmul.mubr.f32.gmra.mxu0 %v4433_v54  ;;  %v18242_v24 = vpop.f32.mrf.mxu0  ;;  %v4446_v5 = vrot.slane %v17807_v9, 4  ;;  %v12241_v54 = vld [vmem:[%s22175_s0 + $0x210] sm:$0x7]  ;;  %v4449_v26 = vsel %vm930_vm2, %v4444_v58, %v4448_v46 }
 0x333   :  { %v18244_v41 = vpop.f32.mrf.mxu1  ;;  %4339 = vmatprep.mubr.f32.mxu1 %v4176_v29  ;;  %4596 = vmatprep.mubr.f32.mxu0 %v4439_v50  ;;  %v4181_v55 = vrot.slane %v12241_v54, 3  ;;  %v12327_v50 = vld [vmem:[%s22176_s3 + $0xf8] sm:$0xff]  ;;  %v4736_v58 = vld [vmem:[%s22176_s3 + $0x70] sm:$0xff] }
 0x334   :  { %15070 = vmatpush3.msra.mxu1 %v12327_v50  ;;  %15141 = vmatpush3.msra.mxu0 %v4737_v57 }
 0x335   :  { %v18256_v29 = vpop.f32.mrf.mxu0  ;;  %15071 = vmatprep.subr.mxu1 %v22200_v39  ;;  %v4182_v42 = vsel %vm641_vm1, %v4177_v25, %v4181_v55  ;;  %v12326_v25 = vld [vmem:[%s22176_s3 + $0xf0] sm:$0xff]  ;;  %15142 = vmatprep.subr.mxu0 %v22200_v39 }
 0x336   :  { %4340 = vmatmul.mubr.f32.gmra.mxu1 %v4174_v44  ;;  %4597 = vmatmul.mubr.f32.gmra.mxu0 %v4437_v2  ;;  %v18258_v32 = vpop.f32.mrf.mxu1  ;;  %v4447_v44 = vsel %vm930_vm2, %v4442_v47, %v4446_v5  ;;  %v4450_v2 = vrot.slane %v17831_v10, 4 }
 0x337   :  { %4344 = vmatprep.mubr.f32.mxu1 %v4180_v17  ;;  %4601 = vmatprep.mubr.f32.mxu0 %v4443_v13  ;;  %v18263_v9 = vpop.f32.mrf.mxu0  ;;  %v4454_v13 = vrot.slane %v17865_v21, 4  ;;  %v4452_v21 = vrot.slane %v17878_v6, 4  ;;  %v12325_v6 = vld [vmem:[%s22176_s3 + $0xe8] sm:$0xff] }
 0x338   :  { %v18271_v17 = vpop.f32.mrf.mxu1  ;;  %v4451_v10 = vsel %vm930_vm2, %v4446_v5, %v4450_v2  ;;  %15072 = vmatpush3.msra.mxu1 %v12326_v25  ;;  %15143 = vmatpush3.msra.mxu0 %v4736_v58  ;;  %v12278_v58 = vld [vmem:[%s22175_s0 + $0x218] sm:$0xf] }
 0x339   :  { %v4455_v5 = vsel %vm930_vm2, %v4450_v2, %v4454_v13  ;;  %15073 = vmatprep.subr.mxu1 %v22200_v39  ;;  %15144 = vmatprep.subr.mxu0 %v22200_v39 }
 0x33a   :  { %4345 = vmatmul.mubr.f32.gmra.mxu1 %v4178_v16  ;;  %4602 = vmatmul.mubr.f32.gmra.mxu0 %v4441_v36  ;;  %v4458_v16 = vrot.slane %v17899_v31, 4  ;;  %v4453_v31 = vsel %vm930_vm2, %v4448_v46, %v4452_v21  ;;  %v12324_v46 = vld [vmem:[%s22176_s3 + $0xe0] sm:$0xff] }
 0x33b   :  { %4349 = vmatprep.mubr.f32.mxu1 %v4184_v20  ;;  %4606 = vmatprep.mubr.f32.mxu0 %v4447_v44  ;;  %v18277_v1 = vpop.f32.mrf.mxu0  ;;  %v18279_v47 = vpop.f32.mrf.mxu1  ;;  %v4456_v20 = vrot.slane %v17912_v43, 4  ;;  %v4735_v43 = vld [vmem:[%s22176_s3 + $0x68] sm:$0xff] }
 0x33c   :  { %22212 = vst [vmem:[#allocation6_spill] sm:$0xff] %v18279_v47  ;;  %15074 = vmatpush3.msra.mxu1 %v12325_v6  ;;  %v4459_v2 = vsel %vm930_vm2, %v4454_v13, %v4458_v16  ;;  %v4460_v13 = vrot.slane %v17946_v52, 4  ;;  %15145 = vmatpush3.msra.mxu0 %v4735_v43 }
 0x33d   :  { %v18289_v54 = vpop.f32.mrf.mxu0  ;;  %v18291_v37 = vpop.f32.mrf.mxu1  ;;  %15075 = vmatprep.subr.mxu1 %v22200_v39  ;;  %15146 = vmatprep.subr.mxu0 %v22200_v39 }
 0x33e   :  { %22213 = vst [vmem:[#allocation8_spill] sm:$0xff] %v18291_v37  ;;  %4350 = vmatmul.mubr.f32.gmra.mxu1 %v4182_v42  ;;  %4607 = vmatmul.mubr.f32.gmra.mxu0 %v4445_v8  ;;  %v4462_v42 = vrot.slane %v17930_v7, 4  ;;  %v4457_v7 = vsel %vm930_vm2, %v4452_v21, %v4456_v20  ;;  %v4461_v21 = vsel %vm930_vm2, %v4456_v20, %v4460_v13 }
 0x33f   :  { %4611 = vmatprep.mubr.f32.mxu0 %v4451_v10  ;;  %15101 = vmatprep.mubr.msk.f32.mxu1 %vm15637_vm3, %v22200_v39 }
 0x340   :  { %v18298_v36 = vpop.f32.mrf.mxu0  ;;  %15076 = vmatpush3.msra.mxu1 %v12324_v46  ;;  %v4470_v46 = vrot.slane %v12278_v58, 4 }
 0x341   :  { %v18303_v55 = vpop.f32.mrf.mxu1  ;;  %15077 = vmatprep.subr.mxu1 %v22200_v39 }
 0x342   :  { %4612 = vmatmul.mubr.f32.gmra.mxu0 %v4449_v26  ;;  %v18311_v50 = vpop.f32.mrf.mxu0  ;;  %v4463_v26 = vsel %vm930_vm2, %v4458_v16, %v4462_v42  ;;  %v4464_v16 = vrot.slane %v18233_v18, 4  ;;  %v4733_v18 = vld [vmem:[%s22176_s3 + $0x58] sm:$0xff] }
 0x343   :  { %4616 = vmatprep.mubr.f32.mxu0 %v4455_v5  ;;  %v18315_v44 = vpop.f32.mrf.mxu1  ;;  %v4466_v5 = vrot.slane %v18216_v56, 4 }
 0x345   :  { %v18321_v8 = vpop.f32.mrf.mxu0  ;;  %v18323_v10 = vpop.f32.mrf.mxu1  ;;  %v4467_v43 = vsel %vm930_vm2, %v4462_v42, %v4466_v5  ;;  %v4465_v42 = vsel %vm930_vm2, %v4460_v13, %v4464_v16  ;;  %v4471_v37 = vsel %vm930_vm2, %v4466_v5, %v4470_v46  ;;  %v12321_v5 = vld [vmem:[%s22176_s3 + $0xc8] sm:$0xff] }
 0x346   :  { %4617 = vmatmul.mubr.f32.gmra.mxu0 %v4453_v31  ;;  %v4734_v31 = vld [vmem:[%s22176_s3 + $0x60] sm:$0xff]  ;;  %v4731_v46 = vld [vmem:[%s22176_s3 + $0x48] sm:$0xff] }
 0x347   :  { %4621 = vmatprep.mubr.f32.mxu0 %v4459_v2  ;;  %v18333_v57 = vpop.f32.mrf.mxu0  ;;  %v18335_v25 = vpop.f32.mrf.mxu1  ;;  %v12323_v2 = vld [vmem:[%s22176_s3 + $0xd8] sm:$0xff]  ;;  %15147 = vmatpush3.msra.mxu0 %v4734_v31  ;;  %v12322_v31 = vld [vmem:[%s22176_s3 + $0xd0] sm:$0xff] }
 0x348   :  { %15078 = vmatpush3.msra.mxu1 %v12323_v2  ;;  %15148 = vmatprep.subr.mxu0 %v22200_v39  ;;  %v4732_v2 = vld [vmem:[%s22176_s3 + $0x50] sm:$0xff] }
 0x349   :  { %v18343_v6 = vpop.f32.mrf.mxu0  ;;  %15079 = vmatprep.subr.mxu1 %v22200_v39  ;;  %15149 = vmatpush3.msra.mxu0 %v4733_v18  ;;  %v12320_v18 = vld [vmem:[%s22176_s3 + $0xc0] sm:$0xff] }
 0x34a   :  { %4622 = vmatmul.mubr.f32.gmra.mxu0 %v4457_v7  ;;  %v18346_v52 = vpop.f32.mrf.mxu1  ;;  %v12277_v7 = vld [vmem:[%s22175_s0 + $0x210] sm:$0xf]  ;;  %15080 = vmatpush3.msra.mxu1 %v12322_v31 }
 0x34b   :  { %4626 = vmatprep.mubr.f32.mxu0 %v4463_v26  ;;  %v18350_v56 = vpop.f32.mrf.mxu0  ;;  %v4468_v26 = vrot.slane %v12277_v7, 4  ;;  %15150 = vmatprep.subr.mxu0 %v22200_v39 }
 0x34c   :  { %v18362_v20 = vpop.f32.mrf.mxu1  ;;  %15151 = vmatpush3.msra.mxu0 %v4732_v2  ;;  %15081 = vmatprep.subr.mxu1 %v22200_v39 }
 0x34d   :  { %22214 = vst [vmem:[#allocation7_spill] sm:$0xff] %v18362_v20  ;;  %15152 = vmatprep.subr.mxu0 %v22200_v39  ;;  %15082 = vmatpush3.msra.mxu1 %v12321_v5  ;;  %v4728_v5 = vld [vmem:[%s22176_s3 + $0x30] sm:$0xff] }
 0x34e   :  { %4627 = vmatmul.mubr.f32.gmra.mxu0 %v4461_v21  ;;  %v4469_v21 = vsel %vm930_vm2, %v4464_v16, %v4468_v26  ;;  %15083 = vmatprep.subr.mxu1 %v22200_v39  ;;  %v4729_v26 = vld [vmem:[%s22176_s3 + $0x38] sm:$0xff] }
 0x34f   :  { %4631 = vmatprep.mubr.f32.mxu0 %v4467_v43  ;;  %v18370_v58 = vpop.f32.mrf.mxu0  ;;  %15153 = vmatpush3.msra.mxu0 %v4731_v46 }
 0x350   :  { %v18379_v20 = vpop.f32.mrf.mxu1  ;;  %15154 = vmatprep.subr.mxu0 %v22200_v39  ;;  %15084 = vmatpush3.msra.mxu1 %v12320_v18  ;;  %v4727_v18 = vld [vmem:[%s22176_s3 + $0x28] sm:$0xff] }
 0x351   :  { %22215 = vst [vmem:[#allocation9_spill] sm:$0xff] %v18379_v20  ;;  %v18382_v13 = vpop.f32.mrf.mxu0  ;;  %15085 = vmatprep.subr.mxu1 %v22200_v39  ;;  %v12317_v20 = vld [vmem:[%s22176_s3 + $0xa8] sm:$0xff] }
 0x352   :  { %4632 = vmatmul.mubr.f32.gmra.mxu0 %v4465_v42  ;;  %v18387_v43 = vpop.f32.mrf.mxu1  ;;  %v4730_v42 = vld [vmem:[%s22176_s3 + $0x40] sm:$0xff] }
 0x353   :  { %4636 = vmatprep.mubr.f32.mxu0 %v4471_v37  ;;  %22216 = vst [vmem:[#allocation10_spill] sm:$0xff] %v18387_v43  ;;  %15155 = vmatpush3.msra.mxu0 %v4730_v42  ;;  %v4723_v43 = vld [vmem:[%s22176_s3 + $0x8] sm:$0xff] }
 0x354   :  { %15156 = vmatprep.subr.mxu0 %v22200_v39 }
 0x355   :  { %v18395_v7 = vpop.f32.mrf.mxu0  ;;  %15157 = vmatpush3.msra.mxu0 %v4729_v26  ;;  %v12318_v26 = vld [vmem:[%s22176_s3 + $0xb0] sm:$0xff] }
 0x356   :  { %4637 = vmatmul.mubr.f32.gmra.mxu0 %v4469_v21  ;;  %v18399_v37 = vpop.f32.mrf.mxu1  ;;  %v12319_v21 = vld [vmem:[%s22176_s3 + $0xb8] sm:$0xff]  ;;  %15158 = vmatprep.subr.mxu0 %v22200_v39 }
 0x357   :  { %22217 = vst [vmem:[#allocation12_spill] sm:$0xff] %v18399_v37  ;;  %v18401_v16 = vpop.f32.mrf.mxu0  ;;  %15172 = vmatprep.mubr.msk.f32.mxu0 %vm15637_vm3, %v22200_v39  ;;  %15086 = vmatpush3.msra.mxu1 %v12319_v21  ;;  %v4726_v21 = vld [vmem:[%s22176_s3 + $0x20] sm:$0xff] }
 0x358   :  { %22218 = vst [vmem:[#allocation11_spill] sm:$0xff] %v18401_v16  ;;  %v18416_v31 = vpop.f32.mrf.mxu1  ;;  %15159 = vmatpush3.msra.mxu0 %v4728_v5  ;;  %15087 = vmatprep.subr.mxu1 %v22200_v39 }
 0x359   :  { %22219 = vst [vmem:[#allocation13_spill] sm:$0xff] %v18416_v31  ;;  %15160 = vmatprep.subr.mxu0 %v22200_v39  ;;  %15088 = vmatpush3.msra.mxu1 %v12318_v26  ;;  %v4724_v26 = vld [vmem:[%s22176_s3 + $0x10] sm:$0xff] }
 0x35a   :  { %15161 = vmatpush3.msra.mxu0 %v4727_v18  ;;  %15089 = vmatprep.subr.mxu1 %v22200_v39  ;;  %v4725_v18 = vld [vmem:[%s22176_s3 + $0x18] sm:$0xff] }
 0x35b   :  { %v18418_v2 = vpop.f32.mrf.mxu0  ;;  %v18434_v42 = vpop.f32.mrf.mxu1  ;;  %15162 = vmatprep.subr.mxu0 %v22200_v39  ;;  %15090 = vmatpush3.msra.mxu1 %v12317_v20  ;;  %v2231_v20 = vadd.f32 %v18125_v34, %v18140_v15  ;;  %v12313_v34 = vld [vmem:[%s22176_s3 + $0x88] sm:$0xff] }
 0x35c   :  { %22220 = vst [vmem:[#allocation14_spill] sm:$0xff] %v18418_v2  ;;  %15163 = vmatpush3.msra.mxu0 %v4726_v21  ;;  %v4722_v2 = vld [vmem:[%s22176_s3] sm:$0xff]  ;;  %15091 = vmatprep.subr.mxu1 %v22200_v39 }
 0x35d   :  { %v18427_v46 = vpop.f32.mrf.mxu0  ;;  %15164 = vmatprep.subr.mxu0 %v22200_v39  ;;  %v18452_v37 = vpop.f32.mrf.mxu1 }
 0x35e   :  { %22221 = vst [vmem:[#allocation16_spill] sm:$0xff] %v18427_v46  ;;  %15165 = vmatpush3.msra.mxu0 %v4725_v18 }
 0x35f   :  { %15166 = vmatprep.subr.mxu0 %v22200_v39 }
 0x360   :  { %v18443_v5 = vpop.f32.mrf.mxu0  ;;  %15167 = vmatpush3.msra.mxu0 %v4724_v26  ;;  %v2226_v26 = vadd.f32 %v18076_v35, %v18093_v59  ;;  %v12316_v35 = vld [vmem:[%s22176_s3 + $0xa0] sm:$0xff] }
 0x361   :  { %15168 = vmatprep.subr.mxu0 %v22200_v39  ;;  %v18464_v46 = vpop.f32.mrf.mxu1  ;;  %15092 = vmatpush3.msra.mxu1 %v12316_v35 }
 0x362   :  { %v18450_v31 = vpop.f32.mrf.mxu0  ;;  %15169 = vmatpush3.msra.mxu0 %v4723_v43  ;;  %22222 = vst [vmem:[#allocation15_spill] sm:$0xff] %v18464_v46  ;;  %v2221_v43 = vadd.f32 %v18091_v0, %v18116_v23  ;;  %v2434_v47 = vadd.f32 %v18209_v11, %v2226_v26  ;;  %15093 = vmatprep.subr.mxu1 %v22200_v39  ;;  %v12315_v23 = vld [vmem:[%s22176_s3 + $0x98] sm:$0xff] }
 0x363   :  { %15170 = vmatprep.subr.mxu0 %v22200_v39  ;;  %v18481_v16 = vpop.f32.mrf.mxu1  ;;  %15094 = vmatpush3.msra.mxu1 %v12315_v23 }
 0x364   :  { %15171 = vmatpush3.msra.mxu0 %v4722_v2  ;;  %v2433_v59 = vadd.f32 %v18218_v14, %v2221_v43  ;;  %v2236_v2 = vadd.f32 %v18105_v28, %v18127_v51  ;;  %v2608_v11 = vadd.f32 %v18195_v63, %v2434_v47  ;;  %15095 = vmatprep.subr.mxu1 %v22200_v39  ;;  %v12314_v28 = vld [vmem:[%s22176_s3 + $0x90] sm:$0xff] }
 0x365   :  { %v18458_v21 = vpop.f32.mrf.mxu0  ;;  %15282 = vmatprep.subr.mxu0 %v22200_v39  ;;  %15096 = vmatpush3.msra.mxu1 %v12314_v28  ;;  %v2435_v63 = vadd.f32 %v18242_v24, %v2231_v20  ;;  %v12312_v24 = vld [vmem:[%s22176_s3 + $0x80] sm:$0xff] }
 0x366   :  { %v2436_v14 = vadd.f32 %v18235_v49, %v2236_v2  ;;  %v18502_v26 = vpop.f32.mrf.mxu1  ;;  %v2782_v51 = vadd.f32 %v18321_v8, %v2608_v11  ;;  %v2607_v43 = vadd.f32 %v18199_v27, %v2433_v59  ;;  %15097 = vmatprep.subr.mxu1 %v22200_v39  ;;  %v2246_v49 = vadd.f32 %v18137_v12, %v18152_v22 }
 0x367   :  { %v18466_v18 = vpop.f32.mrf.mxu0  ;;  %15098 = vmatpush3.msra.mxu1 %v12313_v34  ;;  %v2256_v2 = vadd.f32 %v18155_v33, %v18169_v40 }
 0x368   :  { %v2781_v15 = vadd.f32 %v18333_v57, %v2607_v43  ;;  %v2610_v8 = vadd.f32 %v18211_v61, %v2436_v14  ;;  %v18521_v27 = vpop.f32.mrf.mxu1  ;;  %15099 = vmatprep.subr.mxu1 %v22200_v39  ;;  %v2956_v59 = vadd.f32 %v18303_v55, %v2782_v51  ;;  %v2241_v57 = vadd.f32 %v18150_v19, %v18165_v48 }
 0x369   :  { %15100 = vmatpush3.msra.mxu1 %v12312_v24  ;;  %v2438_v12 = vadd.f32 %v18256_v29, %v2246_v49  ;;  %v2609_v61 = vadd.f32 %v18220_v62, %v2435_v63  ;;  %v2251_v19 = vadd.f32 %v18167_v53, %v18181_v4  ;;  %v2440_v62 = vadd.f32 %v18277_v1, %v2256_v2  ;;  %v22223_v63 = vld [vmem:[#allocation15_spill] sm:$0xff] }
 0x36a   :  { %v2784_v22 = vadd.f32 %v18343_v6, %v2610_v8  ;;  %15211 = vmatprep.subr.mxu1 %v22200_v39  ;;  %v3130_v23 = vadd.f32 %v18443_v5, %v2956_v59  ;;  %v2955_v11 = vadd.f32 %v18315_v44, %v2781_v15  ;;  %v2437_v48 = vadd.f32 %v18263_v9, %v2241_v57  ;;  %v22226_v24 = vld [vmem:[#allocation7_spill] sm:$0xff] }
 0x36b   :  { %v18483_v46 = vpop.f32.mrf.mxu0  ;;  %v2783_v29 = vadd.f32 %v18350_v56, %v2609_v61  ;;  %v2439_v40 = vadd.f32 %v18289_v54, %v2251_v19  ;;  %v2612_v44 = vadd.f32 %v18237_v38, %v2438_v12  ;;  %v2266_v53 = vadd.f32 %v18179_v60, %v18193_v30  ;;  %v22227_v12 = vld [vmem:[#allocation8_spill] sm:$0xff] }
 0x36c   :  { %v18546_v6 = vpop.f32.mrf.mxu1  ;;  %v3129_v20 = vadd.f32 %v18450_v31, %v2955_v11  ;;  %v2958_v5 = vadd.f32 %v18323_v10, %v2784_v22  ;;  %v2261_v4 = vadd.f32 %v18183_v45, %v18197_v3  ;;  %v3304_v9 = vadd.f32 %v18434_v42, %v3130_v23  ;;  %v18567_v10 = vld [vmem:[%s22180_s6] ss:$0 sm:$0xff]  ;;  %v22229_v11 = vld [vmem:[#allocation14_spill] sm:$0xff] }
 0x36d   :  { %v18492_v0 = vpop.f32.mrf.mxu0  ;;  %v2786_v1 = vadd.f32 %v18370_v58, %v2612_v44  ;;  %v2611_v56 = vadd.f32 %v18244_v41, %v2437_v48  ;;  %v2957_v54 = vadd.f32 %v18335_v25, %v2783_v29  ;;  %v2442_v60 = vadd.f32 %v18298_v36, %v2266_v53  ;;  %v22228_v22 = vld [vmem:[#allocation9_spill] sm:$0xff]  ;;  %v22231_v44 = vld [vmem:[#allocation10_spill] sm:$0xff] }
 0x36e   :  { %v3132_v31 = vadd.f32 %v18458_v21, %v2958_v5  ;;  %v3284_v14 = vpop.f32.mrf.mxu1  ;;  %v2614_v45 = vadd.f32 %v18258_v32, %v2440_v62  ;;  %v3303_v3 = vadd.f32 %v18452_v37, %v3129_v20  ;;  %v2613_v58 = vadd.f32 %v18271_v17, %v2439_v40  ;;  %v22224_v37 = vld [vmem:[#allocation11_spill] sm:$0xff]  ;;  %v22230_v20 = vld [vmem:[#allocation16_spill] sm:$0xff] }
 0x36f   :  { %v2785_v41 = vadd.f32 %v18382_v13, %v2611_v56  ;;  %v3131_v25 = vadd.f32 %v18466_v18, %v2957_v54  ;;  %v2441_v21 = vadd.f32 %v18311_v50, %v2261_v4  ;;  %v2960_v36 = vadd.f32 %v18346_v52, %v2786_v1  ;;  %v22225_v13 = vld [vmem:[#allocation6_spill] sm:$0xff] }
 0x370   :  { %v2788_v28 = vadd.f32 %v18395_v7, %v2614_v45  ;;  %v3306_v34 = vadd.f32 %v22223_v63, %v3132_v31  ;;  %v2787_v15 = vadd.f32 %v22224_v37, %v2613_v58  ;;  %v2616_v49 = vadd.f32 %v22225_v13, %v2442_v60  ;;  %v22232_v31 = vld [vmem:[#allocation12_spill] sm:$0xff] }
 0x371   :  { %v18511_v47 = vpop.f32.mrf.mxu0  ;;  %v3134_v50 = vadd.f32 %v18483_v46, %v2960_v36  ;;  %v2959_v7 = vadd.f32 %v22226_v24, %v2785_v41  ;;  %v3305_v57 = vadd.f32 %v18481_v16, %v3131_v25  ;;  %v2615_v52 = vadd.f32 %v22227_v12, %v2441_v21 }
 0x372   :  { %v15037_v32 = vpop.f32.mrf.mxu1  ;;  %v2962_v61 = vadd.f32 %v22228_v22, %v2788_v28  ;;  %v2790_v19 = vadd.f32 %v22229_v11, %v2616_v49  ;;  %v2961_v16 = vadd.f32 %v22231_v44, %v2787_v15 }
 0x373   :  { %v18523_v35 = vpop.f32.mrf.mxu0  ;;  %v3133_v48 = vadd.f32 %v18492_v0, %v2959_v7  ;;  %v2789_v40 = vadd.f32 %v22230_v20, %v2615_v52  ;;  %v3308_v1 = vadd.f32 %v18502_v26, %v3134_v50 }
 0x374   :  { %v3294_v29 = vpop.f32.mrf.mxu1  ;;  %v3136_v5 = vadd.f32 %v18511_v47, %v2962_v61  ;;  %v3135_v0 = vadd.f32 %v18523_v35, %v2961_v16  ;;  %v2964_v54 = vadd.f32 %v22232_v31, %v2790_v19 }
 0x375   :  { %v3307_v47 = vadd.f32 %v18521_v27, %v3133_v48 }
 0x376   :  { %v18540_v55 = vpop.f32.mrf.mxu0  ;;  %v3309_v28 = vadd.f32 %v3284_v14, %v3135_v0 }
 0x377   :  { %v3138_v58 = vadd.f32 %v18540_v55, %v2964_v54 }
 0x378   :  { %v18550_v33 = vpop.f32.mrf.mxu0 }
 0x37b   :  { %v15056_v38 = vpop.f32.mrf.mxu0 }
 0x37c   :  { %v3478_v30 = vadd.f32 %v15056_v38, %v3304_v9 }
 0x37d   :  { %v3428_v42 = vpop.f32.mrf.mxu0 }
 0x37e   :  { %v3495_v51 = vadd.f32 %v18567_v10, %v3478_v30  ;;  %v3477_v43 = vadd.f32 %v3428_v42, %v3303_v3  ;;  %v22233_v30 = vld [vmem:[#allocation13_spill] sm:$0xff]  ;;  %v3310_v42 = vadd.f32 %v18546_v6, %v3136_v5  ;;  %v3312_v6 = vadd.f32 %v15037_v32, %v3138_v58 }
 0x37f   :  { %v2963_v3 = vadd.f32 %v22233_v30, %v2789_v40 }
 0x380   :  { %v3505_v17 = vmax.f32 %v3495_v51, 0.0  ;;  %v3494_v18 = vadd.f32 %v18567_v10, %v3477_v43  ;;  %v15059_v8 = vpop.f32.mrf.mxu0 }
 0x381   :  { %v3480_v59 = vadd.f32 %v15059_v8, %v3306_v34  ;;  %v3137_v51 = vadd.f32 %v18550_v33, %v2963_v3 }
 0x382   :  { %3515 = vst.msk [vmem:[#allocation4 + $0x8] sm:$0xff] %vm1928_vm4, %v3505_v17  ;;  %v3504_v2 = vmax.f32 %v3494_v18, 0.0  ;;  %v3438_v23 = vpop.f32.mrf.mxu0 }
 0x383   :  { %v3497_v46 = vadd.f32 %v18567_v10, %v3480_v59  ;;  %v3479_v62 = vadd.f32 %v3438_v23, %v3305_v57  ;;  %v3311_v8 = vadd.f32 %v3294_v29, %v3137_v51 }
 0x384   :  { %3514 = vst.msk [vmem:[#allocation4] sm:$0xff] %vm1928_vm4, %v3504_v2 }
 0x385   :  { %v3507_v53 = vmax.f32 %v3497_v46, 0.0  ;;  %v3496_v4 = vadd.f32 %v18567_v10, %v3479_v62  ;;  %v18597_v9 = vpop.f32.mrf.mxu1 }
 0x386   :  { %v15062_v56 = vpop.f32.mrf.mxu0 }
 0x387   :  { %3517 = vst.msk [vmem:[#allocation4 + $0x18] sm:$0xff] %vm1928_vm4, %v3507_v53  ;;  %v3506_v38 = vmax.f32 %v3496_v4, 0.0  ;;  %v3482_v60 = vadd.f32 %v15062_v56, %v3308_v1  ;;  %v18603_v45 = vpop.f32.mrf.mxu1 }
 0x388   :  { %v3448_v41 = vpop.f32.mrf.mxu0 }
 0x389   :  { %3516 = vst.msk [vmem:[#allocation4 + $0x10] sm:$0xff] %vm1928_vm4, %v3506_v38  ;;  %v3499_v26 = vadd.f32 %v18567_v10, %v3482_v60  ;;  %v3481_v35 = vadd.f32 %v3448_v41, %v3307_v47  ;;  %v18610_v25 = vpop.f32.mrf.mxu1 }
 0x38a   :  { %v15065_v21 = vpop.f32.mrf.mxu0 }
 0x38b   :  { %v3509_v43 = vmax.f32 %v3499_v26, 0.0  ;;  %v3498_v27 = vadd.f32 %v18567_v10, %v3481_v35  ;;  %v3484_v36 = vadd.f32 %v15065_v21, %v3310_v42  ;;  %v18615_v63 = vpop.f32.mrf.mxu1 }
 0x38c   :  { %v3458_v55 = vpop.f32.mrf.mxu0 }
 0x38d   :  { %3519 = vst.msk [vmem:[#allocation4 + $0x28] sm:$0xff] %vm1928_vm4, %v3509_v43  ;;  %v3508_v34 = vmax.f32 %v3498_v27, 0.0  ;;  %v3501_v37 = vadd.f32 %v18567_v10, %v3484_v36  ;;  %v3483_v15 = vadd.f32 %v3458_v55, %v3309_v28  ;;  %v18619_v13 = vpop.f32.mrf.mxu1 }
 0x38e   :  { %v15068_v49 = vpop.f32.mrf.mxu0 }
 0x38f   :  { %3518 = vst.msk [vmem:[#allocation4 + $0x20] sm:$0xff] %vm1928_vm4, %v3508_v34  ;;  %v3511_v33 = vmax.f32 %v3501_v37, 0.0  ;;  %v3500_v14 = vadd.f32 %v18567_v10, %v3483_v15  ;;  %v3486_v17 = vadd.f32 %v15068_v49, %v3312_v6  ;;  %v18623_v18 = vpop.f32.mrf.mxu1 }
 0x390   :  { %v3468_v50 = vpop.f32.mrf.mxu0 }
 0x391   :  { %3521 = vst.msk [vmem:[#allocation4 + $0x38] sm:$0xff] %vm1928_vm4, %v3511_v33  ;;  %v3510_v24 = vmax.f32 %v3500_v14, 0.0  ;;  %v3503_v7 = vadd.f32 %v18567_v10, %v3486_v17  ;;  %v3485_v59 = vadd.f32 %v3468_v50, %v3311_v8  ;;  %v18627_v57 = vpop.f32.mrf.mxu1 }
 0x393   :  { %3520 = vst.msk [vmem:[#allocation4 + $0x30] sm:$0xff] %vm1928_vm4, %v3510_v24  ;;  %v3513_v32 = vmax.f32 %v3503_v7, 0.0  ;;  %v3502_v12 = vadd.f32 %v18567_v10, %v3485_v59  ;;  %v18631_v52 = vpop.f32.mrf.mxu1 }
 0x395   :  { %3523 = vst.msk [vmem:[#allocation4 + $0x48] sm:$0xff] %vm1928_vm4, %v3513_v32  ;;  %v3512_v22 = vmax.f32 %v3502_v12, 0.0  ;;  %v18634_v61 = vpop.f32.mrf.mxu1 }
 0x397   :  { %3522 = vst.msk [vmem:[#allocation4 + $0x40] sm:$0xff] %vm1928_vm4, %v3512_v22  ;;  %v18637_v2 = vpop.f32.mrf.mxu1 }
 0x399   :  { %v18639_v23 = vpop.f32.mrf.mxu1 }
 0x39b   :  { %v18641_v11 = vpop.f32.mrf.mxu1 }
 0x39d   :  { %v18643_v19 = vpop.f32.mrf.mxu1 }
 0x39e   :  { %v14029_v48 = vpop.f32.mrf.mxu0 }
 0x39f   :  { %v18645_v29 = vpop.f32.mrf.mxu1 }
 0x3a0   :  { %v14030_v10 = vpop.f32.mrf.mxu0 }
 0x3a1   :  { %v18647_v46 = vpop.f32.mrf.mxu1 }
 0x3a2   :  { %v14032_v62 = vpop.f32.mrf.mxu0 }
 0x3a3   :  { %v18649_v20 = vpop.f32.mrf.mxu1 }
 0x3a4   :  { %v14033_v40 = vpop.f32.mrf.mxu0 }
 0x3a5   :  { %v18651_v44 = vpop.f32.mrf.mxu1 }
 0x3a6   :  { %v18653_v16 = vpop.f32.mrf.mxu0 }
 0x3a7   :  { %v18655_v5 = vpop.f32.mrf.mxu1 }
 0x3a8   :  { %v18657_v53 = vpop.f32.mrf.mxu0 }
 0x3a9   :  { %v18659_v4 = vpop.f32.mrf.mxu1 }
 0x3aa   :  { %v18661_v1 = vpop.f32.mrf.mxu0 }
 0x3ab   :  { %v18663_v0 = vpop.f32.mrf.mxu1 }
 0x3ac   :  { %22234 = vst [vmem:[#allocation15_spill] sm:$0xff] %v18663_v0  ;;  %v18665_v56 = vpop.f32.mrf.mxu0  ;;  %v18750_v0 = vld [vmem:[%s22177_s2] ss:$0 sm:$0xff] }
 0x3ad   :  { %v18667_v31 = vpop.f32.mrf.mxu1 }
 0x3ae   :  { %22235 = vst [vmem:[#allocation11_spill] sm:$0xff] %v18667_v31  ;;  %v18669_v54 = vpop.f32.mrf.mxu0 }
 0x3af   :  { %v18671_v38 = vpop.f32.mrf.mxu1 }
 0x3b0   :  { %22236 = vst [vmem:[#allocation6_spill] sm:$0xff] %v18671_v38  ;;  %v18673_v60 = vpop.f32.mrf.mxu0 }
 0x3b1   :  { %v18675_v47 = vpop.f32.mrf.mxu1 }
 0x3b2   :  { %22237 = vst [vmem:[#allocation7_spill] sm:$0xff] %v18675_v47  ;;  %v18677_v30 = vpop.f32.mrf.mxu0  ;;  %v14031_v47 = vadd.f32 %v14030_v10, %v14029_v48 }
 0x3b3   :  { %v18679_v3 = vpop.f32.mrf.mxu1 }
 0x3b4   :  { %22238 = vst [vmem:[#allocation8_spill] sm:$0xff] %v18679_v3  ;;  %v18681_v41 = vpop.f32.mrf.mxu0 }
 0x3b6   :  { %v18683_v58 = vpop.f32.mrf.mxu1 }
 0x3b7   :  { %22239 = vst [vmem:[#allocation9_spill] sm:$0xff] %v18683_v58  ;;  %v18685_v26 = vpop.f32.mrf.mxu0 }
 0x3b8   :  { %v18687_v35 = vpop.f32.mrf.mxu1 }
 0x3b9   :  { %22240 = vst [vmem:[#allocation14_spill] sm:$0xff] %v18687_v35  ;;  %v18689_v42 = vpop.f32.mrf.mxu0 }
 0x3bb   :  { %v18691_v21 = vpop.f32.mrf.mxu1 }
 0x3bc   :  { %22241 = vst [vmem:[#allocation16_spill] sm:$0xff] %v18691_v21  ;;  %v18693_v28 = vpop.f32.mrf.mxu0 }
 0x3bd   :  { %v18695_v51 = vpop.f32.mrf.mxu1 }
 0x3be   :  { %22242 = vst [vmem:[#allocation10_spill] sm:$0xff] %v18695_v51  ;;  %v18697_v43 = vpop.f32.mrf.mxu0 }
 0x3c1   :  { %v18699_v27 = vpop.f32.mrf.mxu1  ;;  %v18701_v36 = vpop.f32.mrf.mxu0 }
 0x3c2   :  { %22243 = vst [vmem:[#allocation12_spill] sm:$0xff] %v18699_v27 }
 0x3c3   :  { %v18703_v55 = vpop.f32.mrf.mxu1  ;;  %v18705_v34 = vpop.f32.mrf.mxu0 }
 0x3c4   :  { %22244 = vst [vmem:[#allocation13_spill] sm:$0xff] %v18703_v55 }
 0x3c6   :  { %v18707_v37 = vpop.f32.mrf.mxu0  ;;  %v14106_v15 = vpop.f32.mrf.mxu1 }
 0x3c8   :  { %v18709_v6 = vpop.f32.mrf.mxu0  ;;  %v14107_v49 = vpop.f32.mrf.mxu1 }
 0x3ca   :  { %v18711_v33 = vpop.f32.mrf.mxu0  ;;  %v14109_v14 = vpop.f32.mrf.mxu1 }
 0x3cb   :  { %22245 = vst [vmem:[#allocation17_spill] sm:$0xff] %v18711_v33 }
 0x3cc   :  { %v18713_v17 = vpop.f32.mrf.mxu0  ;;  %v14110_v8 = vpop.f32.mrf.mxu1 }
 0x3cd   :  { %22246 = vst [vmem:[#allocation18_spill] sm:$0xff] %v18713_v17  ;;  %v14111_v10 = vadd.f32 %v14110_v8, %v14109_v14  ;;  %v14040_v14 = vadd.f32 %v18665_v56, %v18661_v1 }
 0x3ce   :  { %v18715_v50 = vpop.f32.mrf.mxu0  ;;  %v14112_v24 = vpop.f32.mrf.mxu1 }
 0x3cf   :  { %22247 = vst [vmem:[#allocation19_spill] sm:$0xff] %v18715_v50  ;;  %v14108_v50 = vadd.f32 %v14107_v49, %v14106_v15 }
 0x3d0   :  { %v18717_v7 = vpop.f32.mrf.mxu0  ;;  %v14113_v59 = vpop.f32.mrf.mxu1 }
 0x3d1   :  { %22248 = vst [vmem:[#allocation20_spill] sm:$0xff] %v18717_v7 }
 0x3d2   :  { %v18719_v32 = vpop.f32.mrf.mxu0  ;;  %v14115_v12 = vpop.f32.mrf.mxu1 }
 0x3d3   :  { %22249 = vst [vmem:[#allocation21_spill] sm:$0xff] %v18719_v32 }
 0x3d4   :  { %v18721_v22 = vpop.f32.mrf.mxu0  ;;  %v14116_v55 = vpop.f32.mrf.mxu1 }
 0x3d5   :  { %22250 = vst [vmem:[#allocation22_spill] sm:$0xff] %v18721_v22  ;;  %v13954_v22 = vadd.f32 %v18603_v45, %v18597_v9 }
 0x3d6   :  { %v18723_v27 = vpop.f32.mrf.mxu0  ;;  %v18725_v51 = vpop.f32.mrf.mxu1 }
 0x3d7   :  { %22251 = vst [vmem:[#allocation23_spill] sm:$0xff] %v18723_v27  ;;  %v3954_v31 = vadd.f32 %v14031_v47, %v13954_v22  ;;  %v13960_v47 = vadd.f32 %v18623_v18, %v18619_v13  ;;  %v12359_v13 = vld [vmem:[%s22176_s3 + $0x1f8] sm:$0xff]  ;;  %v13963_v18 = vadd.f32 %v18631_v52, %v18627_v57  ;;  %v12358_v22 = vld [vmem:[%s22176_s3 + $0x1f0] sm:$0xff]  ;;  %v14043_v57 = vadd.f32 %v18673_v60, %v18669_v54 }
 0x3d8   :  { %v18727_v21 = vpop.f32.mrf.mxu0  ;;  %v18729_v35 = vpop.f32.mrf.mxu1 }
 0x3d9   :  { %22252 = vst [vmem:[#allocation24_spill] sm:$0xff] %v18727_v21  ;;  %v14034_v21 = vadd.f32 %v14033_v40, %v14032_v62  ;;  %v4355_v48 = vadd.f32 %v14108_v50, %v3954_v31  ;;  %v14037_v62 = vadd.f32 %v18657_v53, %v18653_v16  ;;  %v14117_v50 = vadd.f32 %v14116_v55, %v14115_v12  ;;  %v12357_v12 = vld [vmem:[%s22176_s3 + $0x1e8] sm:$0xff] }
 0x3da   :  { %v18731_v58 = vpop.f32.mrf.mxu0  ;;  %v18733_v3 = vpop.f32.mrf.mxu1 }
 0x3db   :  { %22253 = vst [vmem:[#allocation25_spill] sm:$0xff] %v18731_v58  ;;  %v13957_v58 = vadd.f32 %v18615_v63, %v18610_v25 }
 0x3dc   :  { %v18735_v7 = vpop.f32.mrf.mxu0  ;;  %v18737_v32 = vpop.f32.mrf.mxu1 }
 0x3dd   :  { %22254 = vst [vmem:[#allocation26_spill] sm:$0xff] %v18735_v7  ;;  %v3959_v15 = vadd.f32 %v14034_v21, %v13957_v58  ;;  %v3964_v21 = vadd.f32 %v14037_v62, %v13960_v47 }
 0x3de   :  { %v18741_v27 = vpop.f32.mrf.mxu1  ;;  %v14183_v38 = vpop.f32.mrf.mxu0 }
 0x3df   :  { %v4356_v31 = vadd.f32 %v14111_v10, %v3959_v15  ;;  %v13966_v15 = vadd.f32 %v18637_v2, %v18634_v61  ;;  %v14046_v61 = vadd.f32 %v18681_v41, %v18677_v30  ;;  %v14123_v30 = vadd.f32 %v18737_v32, %v18733_v3 }
 0x3e0   :  { %v18743_v17 = vpop.f32.mrf.mxu1  ;;  %v14184_v33 = vpop.f32.mrf.mxu0 }
 0x3e1   :  { %v14185_v7 = vadd.f32 %v14184_v33, %v14183_v38  ;;  %v14114_v38 = vadd.f32 %v14113_v59, %v14112_v24 }
 0x3e2   :  { %v18752_v9 = vpop.f32.mrf.mxu1  ;;  %v14186_v45 = vpop.f32.mrf.mxu0 }
 0x3e3   :  { %v4642_v40 = vadd.f32 %v14185_v7, %v4355_v48  ;;  %v4357_v59 = vadd.f32 %v14114_v38, %v3964_v21  ;;  %v3969_v48 = vadd.f32 %v14040_v14, %v13963_v18  ;;  %v13969_v14 = vadd.f32 %v18641_v11, %v18639_v23 }
 0x3e4   :  { %v18758_v25 = vpop.f32.mrf.mxu1  ;;  %v14187_v63 = vpop.f32.mrf.mxu0  ;;  %v14049_v11 = vadd.f32 %v18689_v42, %v18685_v26 }
 0x3e5   :  { %v4664_v49 = vadd.f32 %v18750_v0, %v4642_v40  ;;  %v14188_v33 = vadd.f32 %v14187_v63, %v14186_v45  ;;  %v4358_v62 = vadd.f32 %v14117_v50, %v3969_v48  ;;  %v14120_v63 = vadd.f32 %v18729_v35, %v18725_v51  ;;  %v12343_v50 = vld [vmem:[%s22176_s3 + $0x178] sm:$0xff]  ;;  %v12342_v48 = vld [vmem:[%s22176_s3 + $0x170] sm:$0xff] }
 0x3e6   :  { %v18763_v8 = vpop.f32.mrf.mxu1  ;;  %v14189_v58 = vpop.f32.mrf.mxu0  ;;  %v3974_v35 = vadd.f32 %v14043_v57, %v13966_v15 }
 0x3e7   :  { %v4679_v16 = vmax.f32 %v4664_v49, 0.0  ;;  %v4643_v53 = vadd.f32 %v14188_v33, %v4356_v31  ;;  %v12356_v31 = vld [vmem:[%s22176_s3 + $0x1e0] sm:$0xff]  ;;  %v12355_v33 = vld [vmem:[%s22176_s3 + $0x1d8] sm:$0xff] }
 0x3e8   :  { %v18770_v24 = vpop.f32.mrf.mxu1  ;;  %v14190_v7 = vpop.f32.mrf.mxu0 }
 0x3e9   :  { %4694 = vst [vmem:[#allocation2] sm:$0xff] %v4679_v16  ;;  %v4665_v1 = vadd.f32 %v18750_v0, %v4643_v53  ;;  %v14191_v56 = vadd.f32 %v14190_v7, %v14189_v58  ;;  %15173 = vmatmul.mubr.f32.vlgmr.msra.gmra.mxu0 %v4679_v16  ;;  %v4359_v58 = vadd.f32 %v14120_v63, %v3974_v35  ;;  %v12354_v53 = vld [vmem:[%s22176_s3 + $0x1d0] sm:$0xff] }
 0x3ea   :  { %v18776_v10 = vpop.f32.mrf.mxu1  ;;  %v14192_v45 = vpop.f32.mrf.mxu0  ;;  %15175 = vmatprep.mubr.msk.f32.mxu0 %vm15637_vm3, %v22200_v39  ;;  %15283 = vmatpush3.msra.mxu0 %v12359_v13  ;;  %v3979_v13 = vadd.f32 %v14046_v61, %v13969_v14  ;;  %v13972_v7 = vadd.f32 %v18645_v29, %v18643_v19  ;;  %v14052_v19 = vadd.f32 %v18697_v43, %v18693_v28 }
 0x3eb   :  { %v4680_v52 = vmax.f32 %v4665_v1, 0.0  ;;  %v4644_v55 = vadd.f32 %v14191_v56, %v4357_v59  ;;  %15284 = vmatprep.subr.mxu0 %v22200_v39  ;;  %v13975_v28 = vadd.f32 %v18649_v20, %v18647_v46  ;;  %v14129_v43 = vadd.f32 %v18758_v25, %v18752_v9  ;;  %v12340_v46 = vld [vmem:[%s22176_s3 + $0x160] sm:$0xff] }
 0x3ec   :  { %v18788_v40 = vpop.f32.mrf.mxu1  ;;  %v14193_v47 = vpop.f32.mrf.mxu0  ;;  %15285 = vmatpush3.msra.mxu0 %v12358_v22  ;;  %v4360_v59 = vadd.f32 %v14123_v30, %v3979_v13  ;;  %v14126_v22 = vadd.f32 %v18743_v17, %v18741_v27  ;;  %v3984_v27 = vadd.f32 %v14049_v11, %v13972_v7  ;;  %v14055_v25 = vadd.f32 %v18705_v34, %v18701_v36 }
 0x3ed   :  { %4695 = vst [vmem:[#allocation2 + $0x8] sm:$0xff] %v4680_v52  ;;  %v4666_v54 = vadd.f32 %v18750_v0, %v4644_v55  ;;  %v14194_v60 = vadd.f32 %v14193_v47, %v14192_v45  ;;  %15176 = vmatmul.mubr.f32.gmra.mxu0 %v4680_v52  ;;  %15286 = vmatprep.subr.mxu0 %v22200_v39  ;;  %v12341_v52 = vld [vmem:[%s22176_s3 + $0x168] sm:$0xff] }
 0x3ee   :  { %v18799_v2 = vpop.f32.mrf.mxu1  ;;  %v14195_v38 = vpop.f32.mrf.mxu0  ;;  %15178 = vmatprep.mubr.msk.f32.mxu0 %vm15637_vm3, %v22200_v39  ;;  %15287 = vmatpush3.msra.mxu0 %v12357_v12  ;;  %v4361_v15 = vadd.f32 %v14126_v22, %v3984_v27  ;;  %v3989_v20 = vadd.f32 %v14052_v19, %v13975_v28  ;;  %v13978_v61 = vadd.f32 %v18655_v5, %v18651_v44  ;;  %v12338_v44 = vld [vmem:[%s22176_s3 + $0x150] sm:$0xff]  ;;  %v22259_v22 = vld [vmem:[#allocation6_spill] sm:$0xff] }
 0x3ef   :  { %v4681_v51 = vmax.f32 %v4666_v54, 0.0  ;;  %v4645_v49 = vadd.f32 %v14194_v60, %v4358_v62  ;;  %15288 = vmatprep.subr.mxu0 %v22200_v39  ;;  %v14132_v36 = vadd.f32 %v18770_v24, %v18763_v8  ;;  %v14058_v5 = vadd.f32 %v18709_v6, %v18707_v37  ;;  %v22261_v28 = vld [vmem:[#allocation20_spill] sm:$0xff] }
 0x3f0   :  { %v14196_v41 = vpop.f32.mrf.mxu0  ;;  %15289 = vmatpush3.msra.mxu0 %v12356_v31  ;;  %v18816_v18 = vpop.f32.mrf.mxu1  ;;  %v12339_v31 = vld [vmem:[%s22176_s3 + $0x158] sm:$0xff]  ;;  %v3994_v8 = vadd.f32 %v14055_v25, %v13978_v61  ;;  %v14135_v6 = vadd.f32 %v18788_v40, %v18776_v10 }
 0x3f1   :  { %4696 = vst [vmem:[#allocation2 + $0x10] sm:$0xff] %v4681_v51  ;;  %v4667_v21 = vadd.f32 %v18750_v0, %v4645_v49  ;;  %v14197_v16 = vadd.f32 %v14196_v41, %v14195_v38  ;;  %15179 = vmatmul.mubr.f32.gmra.mxu0 %v4681_v51  ;;  %15290 = vmatprep.subr.mxu0 %v22200_v39  ;;  %v12337_v41 = vld [vmem:[%s22176_s3 + $0x148] sm:$0xff] }
 0x3f2   :  { %v14198_v23 = vpop.f32.mrf.mxu0  ;;  %15181 = vmatprep.mubr.msk.f32.mxu0 %vm15637_vm3, %v22200_v39  ;;  %15291 = vmatpush3.msra.mxu0 %v12355_v33  ;;  %v18836_v29 = vpop.f32.mrf.mxu1  ;;  %v4362_v38 = vadd.f32 %v14129_v43, %v3989_v20 }
 0x3f3   :  { %v4682_v3 = vmax.f32 %v4667_v21, 0.0  ;;  %v4646_v32 = vadd.f32 %v14197_v16, %v4359_v58  ;;  %15292 = vmatprep.subr.mxu0 %v22200_v39  ;;  %v22255_v58 = vld [vmem:[#allocation15_spill] sm:$0xff] }
 0x3f4   :  { %v14199_v1 = vpop.f32.mrf.mxu0  ;;  %v4738_v56 = vld [vmem:[#allocation2 + $0x1] sm:$0xff]  ;;  %15293 = vmatpush3.msra.mxu0 %v12354_v53  ;;  %v18856_v63 = vpop.f32.mrf.mxu1  ;;  %v13981_v37 = vadd.f32 %v22255_v58, %v18659_v4  ;;  %v4363_v53 = vadd.f32 %v14132_v36, %v3994_v8 }
 0x3f5   :  { %4697 = vst [vmem:[#allocation2 + $0x18] sm:$0xff] %v4682_v3  ;;  %v4668_v26 = vadd.f32 %v18750_v0, %v4646_v32  ;;  %v14200_v42 = vadd.f32 %v14199_v1, %v14198_v23  ;;  %15102 = vmatmul.mubr.f32.vlgmr.msra.gmra.mxu1 %v4738_v56  ;;  %15182 = vmatmul.mubr.f32.gmra.mxu0 %v4682_v3  ;;  %v12353_v4 = vld [vmem:[%s22176_s3 + $0x1c8] sm:$0xff]  ;;  %v22256_v3 = vld [vmem:[#allocation17_spill] sm:$0xff] }
 0x3f6   :  { %v14201_v45 = vpop.f32.mrf.mxu0  ;;  %15212 = vmatpush3.msra.mxu1 %v12343_v50  ;;  %15104 = vmatprep.mubr.msk.f32.mxu1 %vm15637_vm3, %v22200_v39  ;;  %v18879_v33 = vpop.f32.mrf.mxu1  ;;  %v3999_v11 = vadd.f32 %v14058_v5, %v13981_v37  ;;  %v22257_v32 = vld [vmem:[#allocation18_spill] sm:$0xff]  ;;  %v22258_v56 = vld [vmem:[#allocation11_spill] sm:$0xff] }
 0x3f7   :  { %v4683_v17 = vmax.f32 %v4668_v26, 0.0  ;;  %v4647_v57 = vadd.f32 %v14200_v42, %v4360_v59  ;;  %15213 = vmatprep.subr.mxu1 %v22200_v39  ;;  %15184 = vmatprep.mubr.msk.f32.mxu0 %vm15637_vm3, %v22200_v39  ;;  %v14061_v50 = vadd.f32 %v22257_v32, %v22256_v3  ;;  %v12336_v1 = vld [vmem:[%s22176_s3 + $0x140] sm:$0xff]  ;;  %v13984_v26 = vadd.f32 %v22259_v22, %v22258_v56  ;;  %v12334_v5 = vld [vmem:[%s22176_s3 + $0x130] sm:$0xff] }
 0x3f8   :  { %v14202_v55 = vpop.f32.mrf.mxu0  ;;  %v4739_v12 = vld [vmem:[#allocation2 + $0x9] sm:$0xff]  ;;  %15214 = vmatpush3.msra.mxu1 %v12342_v48  ;;  %15294 = vmatprep.subr.mxu0 %v22200_v39  ;;  %v18898_v10 = vpop.f32.mrf.mxu1  ;;  %v4364_v42 = vadd.f32 %v14135_v6, %v3999_v11  ;;  %v22265_v36 = vld [vmem:[#allocation22_spill] sm:$0xff]  ;;  %v22270_v32 = vld [vmem:[#allocation16_spill] sm:$0xff] }
 0x3f9   :  { %4698 = vst [vmem:[#allocation2 + $0x20] sm:$0xff] %v4683_v17  ;;  %v4669_v62 = vadd.f32 %v18750_v0, %v4647_v57  ;;  %v14203_v47 = vadd.f32 %v14202_v55, %v14201_v45  ;;  %15105 = vmatmul.mubr.f32.gmra.mxu1 %v4739_v12  ;;  %15215 = vmatprep.subr.mxu1 %v22200_v39  ;;  %v12352_v57 = vld [vmem:[%s22176_s3 + $0x1c0] sm:$0xff] }
 0x3fa   :  { %v14204_v9 = vpop.f32.mrf.mxu0  ;;  %15107 = vmatprep.mubr.msk.f32.mxu1 %vm15637_vm3, %v22200_v39  ;;  %15216 = vmatpush3.msra.mxu1 %v12341_v52  ;;  %v14138_v45 = vadd.f32 %v18816_v18, %v18799_v2  ;;  %v22260_v52 = vld [vmem:[#allocation19_spill] sm:$0xff]  ;;  %v14145_v55 = vpop.f32.mrf.mxu1  ;;  %v4004_v2 = vadd.f32 %v14061_v50, %v13984_v26  ;;  %v22267_v8 = vld [vmem:[#allocation14_spill] sm:$0xff]  ;;  %v14144_v37 = vadd.f32 %v18898_v10, %v18879_v33 }
 0x3fb   :  { %v4684_v54 = vmax.f32 %v4669_v62, 0.0  ;;  %v4648_v60 = vadd.f32 %v14203_v47, %v4361_v15  ;;  %15217 = vmatprep.subr.mxu1 %v22200_v39  ;;  %15185 = vmatmul.mubr.f32.gmra.mxu0 %v4683_v17  ;;  %v14064_v43 = vadd.f32 %v22261_v28, %v22260_v52  ;;  %v12335_v62 = vld [vmem:[%s22176_s3 + $0x138] sm:$0xff]  ;;  %v22262_v47 = vld [vmem:[#allocation7_spill] sm:$0xff]  ;;  %v22271_v50 = vld [vmem:[#allocation10_spill] sm:$0xff] }
 0x3fc   :  { %v14205_v35 = vpop.f32.mrf.mxu0  ;;  %v4740_v51 = vld [vmem:[#allocation2 + $0x11] sm:$0xff]  ;;  %15218 = vmatpush3.msra.mxu1 %v12340_v46  ;;  %15187 = vmatprep.mubr.msk.f32.mxu0 %vm15637_vm3, %v22200_v39  ;;  %v22273_v52 = vld [vmem:[#allocation26_spill] sm:$0xff] }
 0x3fd   :  { %4699 = vst [vmem:[#allocation2 + $0x28] sm:$0xff] %v4684_v54  ;;  %v4670_v34 = vadd.f32 %v18750_v0, %v4648_v60  ;;  %v14206_v49 = vadd.f32 %v14205_v35, %v14204_v9  ;;  %15108 = vmatmul.mubr.f32.gmra.mxu1 %v4740_v51  ;;  %15219 = vmatprep.subr.mxu1 %v22200_v39  ;;  %v22263_v46 = vld [vmem:[#allocation8_spill] sm:$0xff]  ;;  %v22264_v51 = vld [vmem:[#allocation21_spill] sm:$0xff] }
 0x3fe   :  { %v14207_v14 = vpop.f32.mrf.mxu0  ;;  %15110 = vmatprep.mubr.msk.f32.mxu1 %vm15637_vm3, %v22200_v39  ;;  %15220 = vmatpush3.msra.mxu1 %v12339_v31  ;;  %v13987_v20 = vadd.f32 %v22263_v46, %v22262_v47  ;;  %v14141_v9 = vadd.f32 %v18856_v63, %v18836_v29  ;;  %v4365_v60 = vadd.f32 %v14138_v45, %v4004_v2  ;;  %v14146_v29 = vpop.f32.mrf.mxu1  ;;  %v22275_v2 = vld [vmem:[#allocation13_spill] sm:$0xff] }
 0x3ff   :  { %v4685_v24 = vmax.f32 %v4670_v34, 0.0  ;;  %v4649_v30 = vadd.f32 %v14206_v49, %v4362_v38  ;;  %15188 = vmatmul.mubr.f32.gmra.mxu0 %v4684_v54  ;;  %15221 = vmatprep.subr.mxu1 %v22200_v39  ;;  %v12351_v38 = vld [vmem:[%s22176_s3 + $0x1b8] sm:$0xff]  ;;  %v14067_v34 = vadd.f32 %v22265_v36, %v22264_v51  ;;  %v12348_v46 = vld [vmem:[%s22176_s3 + $0x1a0] sm:$0xff] }
 0x400   :  { %v14208_v21 = vpop.f32.mrf.mxu0  ;;  %v4741_v16 = vld [vmem:[#allocation2 + $0x19] sm:$0xff]  ;;  %15222 = vmatpush3.msra.mxu1 %v12338_v44  ;;  %15190 = vmatprep.mubr.msk.f32.mxu0 %vm15637_vm3, %v22200_v39  ;;  %v4009_v35 = vadd.f32 %v14064_v43, %v13987_v20  ;;  %v14148_v11 = vpop.f32.mrf.mxu1 }
 0x401   :  { %4700 = vst [vmem:[#allocation2 + $0x30] sm:$0xff] %v4685_v24  ;;  %v4671_v13 = vadd.f32 %v18750_v0, %v4649_v30  ;;  %v14209_v23 = vadd.f32 %v14208_v21, %v14207_v14  ;;  %15111 = vmatmul.mubr.f32.gmra.mxu1 %v4741_v16  ;;  %15223 = vmatprep.subr.mxu1 %v22200_v39  ;;  %v22266_v14 = vld [vmem:[#allocation9_spill] sm:$0xff]  ;;  %v12350_v16 = vld [vmem:[%s22176_s3 + $0x1b0] sm:$0xff] }
 0x402   :  { %v14210_v40 = vpop.f32.mrf.mxu0  ;;  %15113 = vmatprep.mubr.msk.f32.mxu1 %vm15637_vm3, %v22200_v39  ;;  %15224 = vmatpush3.msra.mxu1 %v12337_v41  ;;  %v4366_v30 = vadd.f32 %v14141_v9, %v4009_v35  ;;  %v12347_v35 = vld [vmem:[%s22176_s3 + $0x198] sm:$0xff] }
 0x403   :  { %v4686_v7 = vmax.f32 %v4671_v13, 0.0  ;;  %v4650_v59 = vadd.f32 %v14209_v23, %v4363_v53  ;;  %15191 = vmatmul.mubr.f32.gmra.mxu0 %v4685_v24  ;;  %15225 = vmatprep.subr.mxu1 %v22200_v39  ;;  %v13990_v24 = vadd.f32 %v22267_v8, %v22266_v14  ;;  %v12333_v53 = vld [vmem:[%s22176_s3 + $0x128] sm:$0xff]  ;;  %v22269_v23 = vld [vmem:[#allocation24_spill] sm:$0xff] }
 0x404   :  { %v14211_v48 = vpop.f32.mrf.mxu0  ;;  %v4742_v19 = vld [vmem:[#allocation2 + $0x21] sm:$0xff]  ;;  %15193 = vmatprep.mubr.msk.f32.mxu0 %vm15637_vm3, %v22200_v39  ;;  %15295 = vmatpush3.msra.mxu0 %v12353_v4  ;;  %v22268_v13 = vld [vmem:[#allocation23_spill] sm:$0xff] }
 0x405   :  { %4701 = vst [vmem:[#allocation2 + $0x38] sm:$0xff] %v4686_v7  ;;  %v4672_v27 = vadd.f32 %v18750_v0, %v4650_v59  ;;  %v14212_v17 = vadd.f32 %v14211_v48, %v14210_v40  ;;  %15114 = vmatmul.mubr.f32.gmra.mxu1 %v4742_v19  ;;  %15296 = vmatprep.subr.mxu0 %v22200_v39  ;;  %v12349_v48 = vld [vmem:[%s22176_s3 + $0x1a8] sm:$0xff]  ;;  %v12332_v19 = vld [vmem:[%s22176_s3 + $0x120] sm:$0xff]  ;;  %v12330_v14 = vld [vmem:[%s22176_s3 + $0x110] sm:$0xff] }
 0x406   :  { %v14213_v12 = vpop.f32.mrf.mxu0  ;;  %15116 = vmatprep.mubr.msk.f32.mxu1 %vm15637_vm3, %v22200_v39  ;;  %15226 = vmatpush3.msra.mxu1 %v12336_v1  ;;  %v14070_v4 = vadd.f32 %v22269_v23, %v22268_v13  ;;  %v4014_v10 = vadd.f32 %v14067_v34, %v13990_v24  ;;  %v14147_v59 = vadd.f32 %v14146_v29, %v14145_v55  ;;  %v5027_v13 = vld [vmem:[#allocation2 + $0xb] sm:$0xff]  ;;  %v5201_v23 = vld [vmem:[#allocation2 + $0x1c] sm:$0xff] }
 0x407   :  { %v4687_v18 = vmax.f32 %v4672_v27, 0.0  ;;  %v4651_v15 = vadd.f32 %v14212_v17, %v4364_v42  ;;  %15194 = vmatmul.mubr.f32.gmra.mxu0 %v4686_v7  ;;  %15227 = vmatprep.subr.mxu1 %v22200_v39  ;;  %v13993_v7 = vadd.f32 %v22271_v50, %v22270_v32  ;;  %v14149_v27 = vpop.f32.mrf.mxu1 }
 0x408   :  { %v14214_v25 = vpop.f32.mrf.mxu0  ;;  %v4743_v54 = vld [vmem:[#allocation2 + $0x29] sm:$0xff]  ;;  %15297 = vmatpush3.msra.mxu0 %v12352_v57  ;;  %15196 = vmatprep.mubr.msk.f32.mxu0 %vm15637_vm3, %v22200_v39  ;;  %v4367_v22 = vadd.f32 %v14144_v37, %v4014_v10  ;;  %v22272_v57 = vld [vmem:[#allocation25_spill] sm:$0xff]  ;;  %v14150_v20 = vadd.f32 %v14149_v27, %v14148_v11 }
 0x409   :  { %4702 = vst [vmem:[#allocation2 + $0x40] sm:$0xff] %v4687_v18  ;;  %v4673_v31 = vadd.f32 %v18750_v0, %v4651_v15  ;;  %v14215_v61 = vadd.f32 %v14214_v25, %v14213_v12  ;;  %15117 = vmatmul.mubr.f32.gmra.mxu1 %v4743_v54  ;;  %15298 = vmatprep.subr.mxu0 %v22200_v39  ;;  %v22274_v12 = vld [vmem:[#allocation12_spill] sm:$0xff]  ;;  %v5202_v11 = vld [vmem:[#allocation2 + $0x24] sm:$0xff] }
 0x40a   :  { %v14216_v63 = vpop.f32.mrf.mxu0  ;;  %15119 = vmatprep.mubr.msk.f32.mxu1 %vm15637_vm3, %v22200_v39  ;;  %15228 = vmatpush3.msra.mxu1 %v12335_v62  ;;  %v4019_v45 = vadd.f32 %v14070_v4, %v13993_v7  ;;  %v14073_v28 = vadd.f32 %v22273_v52, %v22272_v57  ;;  %v12331_v54 = vld [vmem:[%s22176_s3 + $0x118] sm:$0xff]  ;;  %v5203_v10 = vld [vmem:[#allocation2 + $0x2c] sm:$0xff] }
 0x40b   :  { %v4688_v49 = vmax.f32 %v4673_v31, 0.0  ;;  %v4652_v44 = vadd.f32 %v14215_v61, %v4365_v60  ;;  %15197 = vmatmul.mubr.f32.gmra.mxu0 %v4687_v18  ;;  %15229 = vmatprep.subr.mxu1 %v22200_v39  ;;  %v13996_v18 = vadd.f32 %v22275_v2, %v22274_v12  ;;  %v5028_v4 = vld [vmem:[#allocation2 + $0x13] sm:$0xff]  ;;  %v5031_v32 = vld [vmem:[#allocation2 + $0x2b] sm:$0xff] }
 0x40c   :  { %v14217_v41 = vpop.f32.mrf.mxu0  ;;  %v4744_v58 = vld [vmem:[#allocation2 + $0x31] sm:$0xff]  ;;  %15299 = vmatpush3.msra.mxu0 %v12351_v38  ;;  %15199 = vmatprep.mubr.msk.f32.mxu0 %vm15637_vm3, %v22200_v39  ;;  %v4368_v15 = vadd.f32 %v14147_v59, %v4019_v45 }
 0x40d   :  { %4703 = vst [vmem:[#allocation2 + $0x48] sm:$0xff] %v4688_v49  ;;  %v4674_v6 = vadd.f32 %v18750_v0, %v4652_v44  ;;  %v14218_v21 = vadd.f32 %v14217_v41, %v14216_v63  ;;  %15120 = vmatmul.mubr.f32.gmra.mxu1 %v4744_v58  ;;  %15300 = vmatprep.subr.mxu0 %v22200_v39  ;;  %v12329_v41 = vld [vmem:[%s22176_s3 + $0x108] sm:$0xff]  ;;  %v5032_v7 = vld [vmem:[#allocation2 + $0x33] sm:$0xff] }
 0x40e   :  { %v14219_v33 = vpop.f32.mrf.mxu0  ;;  %15122 = vmatprep.mubr.msk.f32.mxu1 %vm15637_vm3, %v22200_v39  ;;  %15230 = vmatpush3.msra.mxu1 %v12334_v5  ;;  %v4024_v31 = vadd.f32 %v14073_v28, %v13996_v18  ;;  %v12368_v28 = vld [vmem:[%s22178_s5 + $0x78] sm:$0xff]  ;;  %v5433_v2 = vld [vmem:[%s22178_s5 + $0x30] sm:$0xff]  ;;  %v5432_v18 = vld [vmem:[%s22178_s5 + $0x28] sm:$0xff] }
 0x40f   :  { %v4689_v40 = vmax.f32 %v4674_v6, 0.0  ;;  %v4653_v3 = vadd.f32 %v14218_v21, %v4366_v30  ;;  %15200 = vmatmul.mubr.f32.gmra.mxu0 %v4688_v49  ;;  %15231 = vmatprep.subr.mxu1 %v22200_v39  ;;  %v12346_v49 = vld [vmem:[%s22176_s3 + $0x190] sm:$0xff]  ;;  %v12345_v30 = vld [vmem:[%s22176_s3 + $0x188] sm:$0xff]  ;;  %v12328_v6 = vld [vmem:[%s22176_s3 + $0x100] sm:$0xff] }
 0x410   :  { %v14220_v1 = vpop.f32.mrf.mxu0  ;;  %v4745_v56 = vld [vmem:[#allocation2 + $0x39] sm:$0xff]  ;;  %15301 = vmatpush3.msra.mxu0 %v12350_v16  ;;  %15232 = vmatpush3.msra.mxu1 %v12333_v53  ;;  %v4369_v51 = vadd.f32 %v14150_v20, %v4024_v31  ;;  %v5199_v21 = vld [vmem:[#allocation2 + $0xc] sm:$0xff] }
 0x411   :  { %4704 = vst [vmem:[#allocation2 + $0x50] sm:$0xff] %v4689_v40  ;;  %v4675_v26 = vadd.f32 %v18750_v0, %v4653_v3  ;;  %v14221_v42 = vadd.f32 %v14220_v1, %v14219_v33  ;;  %15123 = vmatmul.mubr.f32.gmra.mxu1 %v4745_v56  ;;  %15202 = vmatprep.mubr.msk.f32.mxu0 %vm15637_vm3, %v22200_v39  ;;  %v5200_v53 = vld [vmem:[#allocation2 + $0x14] sm:$0xff]  ;;  %v5205_v50 = vld [vmem:[#allocation2 + $0x3c] sm:$0xff] }
 0x412   :  { %v14222_v17 = vpop.f32.mrf.mxu0  ;;  %15125 = vmatprep.mubr.msk.f32.mxu1 %vm15637_vm3, %v22200_v39  ;;  %15302 = vmatprep.subr.mxu0 %v22200_v39  ;;  %v5029_v33 = vld [vmem:[#allocation2 + $0x1b] sm:$0xff]  ;;  %v5429_v20 = vld [vmem:[%s22178_s5 + $0x10] sm:$0xff] }
 0x413   :  { %v4690_v43 = vmax.f32 %v4675_v26, 0.0  ;;  %v4654_v55 = vadd.f32 %v14221_v42, %v4367_v22  ;;  %15203 = vmatmul.mubr.f32.gmra.mxu0 %v4689_v40  ;;  %15233 = vmatprep.subr.mxu1 %v22200_v39  ;;  %v5030_v40 = vld [vmem:[#allocation2 + $0x23] sm:$0xff]  ;;  %v5204_v3 = vld [vmem:[#allocation2 + $0x34] sm:$0xff] }
 0x414   :  { %v14223_v62 = vpop.f32.mrf.mxu0  ;;  %v4746_v47 = vld [vmem:[#allocation2 + $0x41] sm:$0xff]  ;;  %15303 = vmatpush3.msra.mxu0 %v12349_v48  ;;  %15234 = vmatpush3.msra.mxu1 %v12332_v19  ;;  %v5434_v12 = vld [vmem:[%s22178_s5 + $0x38] sm:$0xff] }
 0x415   :  { %4705 = vst [vmem:[#allocation2 + $0x58] sm:$0xff] %v4690_v43  ;;  %v4676_v9 = vadd.f32 %v18750_v0, %v4654_v55  ;;  %v14224_v25 = vadd.f32 %v14223_v62, %v14222_v17  ;;  %15126 = vmatmul.mubr.f32.gmra.mxu1 %v4746_v47  ;;  %15304 = vmatprep.subr.mxu0 %v22200_v39  ;;  %v5206_v59 = vld [vmem:[#allocation2 + $0x44] sm:$0xff]  ;;  %v5033_v1 = vld [vmem:[#allocation2 + $0x3b] sm:$0xff] }
 0x416   :  { %v14225_v60 = vpop.f32.mrf.mxu0  ;;  %15128 = vmatprep.mubr.msk.f32.mxu1 %vm15637_vm3, %v22200_v39  ;;  %15205 = vmatprep.mubr.msk.f32.mxu0 %vm15637_vm3, %v22200_v39  ;;  %v5034_v22 = vld [vmem:[#allocation2 + $0x43] sm:$0xff]  ;;  %v5430_v47 = vld [vmem:[%s22178_s5 + $0x18] sm:$0xff] }
 0x417   :  { %v4691_v61 = vmax.f32 %v4676_v9, 0.0  ;;  %v4655_v38 = vadd.f32 %v14224_v25, %v4368_v15  ;;  %15235 = vmatprep.subr.mxu1 %v22200_v39  ;;  %15305 = vmatpush3.msra.mxu0 %v12348_v46  ;;  %v12366_v55 = vld [vmem:[%s22178_s5 + $0x68] sm:$0xff]  ;;  %v12365_v15 = vld [vmem:[%s22178_s5 + $0x60] sm:$0xff]  ;;  %v12364_v46 = vld [vmem:[%s22178_s5 + $0x58] sm:$0xff] }
 0x418   :  { %v14226_v29 = vpop.f32.mrf.mxu0  ;;  %v4747_v63 = vld [vmem:[#allocation2 + $0x49] sm:$0xff]  ;;  %15206 = vmatmul.mubr.f32.gmra.mxu0 %v4690_v43  ;;  %15236 = vmatpush3.msra.mxu1 %v12331_v54  ;;  %v5431_v62 = vld [vmem:[%s22178_s5 + $0x20] sm:$0xff] }
 0x419   :  { %4706 = vst [vmem:[#allocation2 + $0x60] sm:$0xff] %v4691_v61  ;;  %v4677_v36 = vadd.f32 %v18750_v0, %v4655_v38  ;;  %v14227_v34 = vadd.f32 %v14226_v29, %v14225_v60  ;;  %15129 = vmatmul.mubr.f32.gmra.mxu1 %v4747_v63  ;;  %15306 = vmatprep.subr.mxu0 %v22200_v39  ;;  %v5207_v56 = vld [vmem:[#allocation2 + $0x4c] sm:$0xff]  ;;  %v5427_v54 = vld [vmem:[%s22178_s5] sm:$0xff]  ;;  %v19144_v38 = vld [vmem:[%s22178_s5 + $0xb8] sm:$0xff] }
 0x41a   :  { %15131 = vmatprep.mubr.msk.f32.mxu1 %vm15637_vm3, %v22200_v39  ;;  %15307 = vmatpush3.msra.mxu0 %v12347_v35  ;;  %v5035_v42 = vld [vmem:[#allocation2 + $0x4b] sm:$0xff]  ;;  %v12361_v31 = vld [vmem:[%s22178_s5 + $0x40] sm:$0xff] }
 0x41b   :  { %v4692_v44 = vmax.f32 %v4677_v36, 0.0  ;;  %v4656_v5 = vadd.f32 %v14227_v34, %v4369_v51  ;;  %15308 = vmatprep.subr.mxu0 %v22200_v39  ;;  %15208 = vmatprep.mubr.msk.f32.mxu0 %vm15637_vm3, %v22200_v39  ;;  %v12367_v43 = vld [vmem:[%s22178_s5 + $0x70] sm:$0xff]  ;;  %v5428_v9 = vld [vmem:[%s22178_s5 + $0x8] sm:$0xff] }
 0x41c   :  { %v4748_v8 = vld [vmem:[#allocation2 + $0x51] sm:$0xff]  ;;  %15237 = vmatprep.subr.mxu1 %v22200_v39  ;;  %15309 = vmatpush3.msra.mxu0 %v12346_v49  ;;  %v12362_v60 = vld [vmem:[%s22178_s5 + $0x48] sm:$0xff] }
 0x41d   :  { %4707 = vst [vmem:[#allocation2 + $0x68] sm:$0xff] %v4692_v44  ;;  %v4678_v24 = vadd.f32 %v18750_v0, %v4656_v5  ;;  %15132 = vmatmul.mubr.f32.gmra.mxu1 %v4748_v8  ;;  %15209 = vmatmul.mubr.f32.gmra.mxu0 %v4691_v61  ;;  %v12344_v0 = vld [vmem:[%s22176_s3 + $0x180] sm:$0xff]  ;;  %v5208_v26 = vld [vmem:[#allocation2 + $0x54] sm:$0xff] }
 0x41e   :  { %15134 = vmatprep.mubr.msk.f32.mxu1 %vm15637_vm3, %v22200_v39  ;;  %15238 = vmatpush3.msra.mxu1 %v12330_v14  ;;  %v5036_v19 = vld [vmem:[#allocation2 + $0x53] sm:$0xff] }
 0x41f   :  { %v4693_v58 = vmax.f32 %v4678_v24, 0.0  ;;  %15310 = vmatprep.subr.mxu0 %v22200_v39  ;;  %15239 = vmatprep.subr.mxu1 %v22200_v39  ;;  %v12363_v25 = vld [vmem:[%s22178_s5 + $0x50] sm:$0xff]  ;;  %v19138_v61 = vld [vmem:[%s22178_s5 + $0xf8] sm:$0xff] }
 0x420   :  { %v4749_v37 = vld [vmem:[#allocation2 + $0x59] sm:$0xff]  ;;  %15311 = vmatpush3.msra.mxu0 %v12345_v30  ;;  %15240 = vmatpush3.msra.mxu1 %v12329_v41 }
 0x421   :  { %4708 = vst [vmem:[#allocation2 + $0x70] sm:$0xff] %v4693_v58  ;;  %15135 = vmatmul.mubr.f32.gmra.mxu1 %v4749_v37  ;;  %15312 = vmatprep.subr.mxu0 %v22200_v39  ;;  %v5209_v48 = vld [vmem:[#allocation2 + $0x5c] sm:$0xff] }
 0x422   :  { %15137 = vmatprep.mubr.msk.f32.mxu1 %vm15637_vm3, %v22200_v39  ;;  %15313 = vmatpush3.msra.mxu0 %v12344_v0  ;;  %v5037_v27 = vld [vmem:[#allocation2 + $0x5b] sm:$0xff] }
 0x423   :  { %15314 = vmatprep.mubr.msk.f32.mxu0 %vm15637_vm3, %v22200_v39  ;;  %15241 = vmatprep.subr.mxu1 %v22200_v39 }
 0x424   :  { %v4750_v16 = vld [vmem:[#allocation2 + $0x61] sm:$0xff]  ;;  %15315 = vmatmul.mubr.f32.vlgmr.msra.gmra.mxu0 %v5199_v21  ;;  %15242 = vmatpush3.msra.mxu1 %v12328_v6 }
 0x425   :  { %15138 = vmatmul.mubr.f32.gmra.mxu1 %v4750_v16  ;;  %15317 = vmatprep.mubr.msk.f32.mxu0 %vm15637_vm3, %v22200_v39  ;;  %v5210_v45 = vld [vmem:[#allocation2 + $0x64] sm:$0xff] }
 0x426   :  { %15243 = vmatprep.mubr.msk.f32.mxu1 %vm15637_vm3, %v22200_v39  ;;  %v5038_v57 = vld [vmem:[#allocation2 + $0x63] sm:$0xff]  ;;  %15353 = vmatprep.subr.mxu1 %v12368_v28 }
 0x427   :  { %15384 = vmatprep.subr.mxu0 %v5434_v12 }
 0x428   :  { %15318 = vmatmul.mubr.f32.gmra.mxu0 %v5200_v53  ;;  %v5211_v17 = vld [vmem:[#allocation2 + $0x6c] sm:$0xff] }
 0x429   :  { %15244 = vmatmul.mubr.f32.vlgmr.msra.gmra.mxu1 %v5027_v13  ;;  %15320 = vmatprep.mubr.msk.f32.mxu0 %vm15637_vm3, %v22200_v39  ;;  %v5039_v52 = vld [vmem:[#allocation2 + $0x6b] sm:$0xff] }
 0x42a   :  { %15246 = vmatprep.mubr.msk.f32.mxu1 %vm15637_vm3, %v22200_v39  ;;  %15354 = vmatpush3.msra.mxu1 %v12368_v28 }
 0x42b   :  { %15355 = vmatprep.subr.mxu1 %v12367_v43  ;;  %15385 = vmatpush3.msra.mxu0 %v5434_v12 }
 0x42c   :  { %15321 = vmatmul.mubr.f32.gmra.mxu0 %v5201_v23  ;;  %15356 = vmatpush3.msra.mxu1 %v12367_v43 }
 0x42d   :  { %15247 = vmatmul.mubr.f32.gmra.mxu1 %v5028_v4  ;;  %15323 = vmatprep.mubr.msk.f32.mxu0 %vm15637_vm3, %v22200_v39 }
 0x42e   :  { %15249 = vmatprep.mubr.msk.f32.mxu1 %vm15637_vm3, %v22200_v39  ;;  %15357 = vmatprep.subr.mxu1 %v12366_v55 }
 0x42f   :  { %15358 = vmatpush3.msra.mxu1 %v12366_v55  ;;  %15386 = vmatprep.subr.mxu0 %v5433_v2 }
 0x430   :  { %15324 = vmatmul.mubr.f32.gmra.mxu0 %v5202_v11  ;;  %15359 = vmatprep.subr.mxu1 %v12365_v15 }
 0x431   :  { %15250 = vmatmul.mubr.f32.gmra.mxu1 %v5029_v33  ;;  %15326 = vmatprep.mubr.msk.f32.mxu0 %vm15637_vm3, %v22200_v39 }
 0x432   :  { %15252 = vmatprep.mubr.msk.f32.mxu1 %vm15637_vm3, %v22200_v39  ;;  %15387 = vmatpush3.msra.mxu0 %v5433_v2 }
 0x433   :  { %15388 = vmatprep.subr.mxu0 %v5432_v18  ;;  %15360 = vmatpush3.msra.mxu1 %v12365_v15 }
 0x434   :  { %15327 = vmatmul.mubr.f32.gmra.mxu0 %v5203_v10  ;;  %15361 = vmatprep.subr.mxu1 %v12364_v46 }
 0x435   :  { %15253 = vmatmul.mubr.f32.gmra.mxu1 %v5030_v40  ;;  %15329 = vmatprep.mubr.msk.f32.mxu0 %vm15637_vm3, %v22200_v39 }
 0x436   :  { %15255 = vmatprep.mubr.msk.f32.mxu1 %vm15637_vm3, %v22200_v39  ;;  %15389 = vmatpush3.msra.mxu0 %v5432_v18 }
 0x437   :  { %15390 = vmatprep.subr.mxu0 %v5431_v62  ;;  %15362 = vmatpush3.msra.mxu1 %v12364_v46 }
 0x438   :  { %15330 = vmatmul.mubr.f32.gmra.mxu0 %v5204_v3  ;;  %15363 = vmatprep.subr.mxu1 %v12363_v25 }
 0x439   :  { %15256 = vmatmul.mubr.f32.gmra.mxu1 %v5031_v32  ;;  %15332 = vmatprep.mubr.msk.f32.mxu0 %vm15637_vm3, %v22200_v39 }
 0x43a   :  { %15258 = vmatprep.mubr.msk.f32.mxu1 %vm15637_vm3, %v22200_v39  ;;  %15391 = vmatpush3.msra.mxu0 %v5431_v62 }
 0x43b   :  { %15392 = vmatprep.subr.mxu0 %v5430_v47  ;;  %15364 = vmatpush3.msra.mxu1 %v12363_v25 }
 0x43c   :  { %15333 = vmatmul.mubr.f32.gmra.mxu0 %v5205_v50  ;;  %15365 = vmatprep.subr.mxu1 %v12362_v60 }
 0x43d   :  { %15259 = vmatmul.mubr.f32.gmra.mxu1 %v5032_v7  ;;  %15335 = vmatprep.mubr.msk.f32.mxu0 %vm15637_vm3, %v22200_v39 }
 0x43e   :  { %15261 = vmatprep.mubr.msk.f32.mxu1 %vm15637_vm3, %v22200_v39  ;;  %15393 = vmatpush3.msra.mxu0 %v5430_v47 }
 0x43f   :  { %15394 = vmatprep.subr.mxu0 %v5429_v20  ;;  %15366 = vmatpush3.msra.mxu1 %v12362_v60  ;;  %v19190_v60 = vld [vmem:[%s22179_s4] ss:$0 sm:$0xff] }
 0x440   :  { %15336 = vmatmul.mubr.f32.gmra.mxu0 %v5206_v59  ;;  %15367 = vmatprep.subr.mxu1 %v12361_v31 }
 0x441   :  { %15262 = vmatmul.mubr.f32.gmra.mxu1 %v5033_v1  ;;  %15338 = vmatprep.mubr.msk.f32.mxu0 %vm15637_vm3, %v22200_v39 }
 0x442   :  { %15264 = vmatprep.mubr.msk.f32.mxu1 %vm15637_vm3, %v22200_v39  ;;  %15395 = vmatpush3.msra.mxu0 %v5429_v20 }
 0x443   :  { %15396 = vmatprep.subr.mxu0 %v5428_v9  ;;  %15368 = vmatpush3.msra.mxu1 %v12361_v31 }
 0x444   :  { %15339 = vmatmul.mubr.f32.gmra.mxu0 %v5207_v56  ;;  %15415 = vmatprep.subr.mxu1 %v19144_v38 }
 0x445   :  { %15265 = vmatmul.mubr.f32.gmra.mxu1 %v5034_v22  ;;  %15341 = vmatprep.mubr.msk.f32.mxu0 %vm15637_vm3, %v22200_v39 }
 0x446   :  { %15267 = vmatprep.mubr.msk.f32.mxu1 %vm15637_vm3, %v22200_v39  ;;  %15397 = vmatpush3.msra.mxu0 %v5428_v9 }
 0x447   :  { %15398 = vmatprep.subr.mxu0 %v5427_v54 }
 0x448   :  { %15342 = vmatmul.mubr.f32.gmra.mxu0 %v5208_v26 }
 0x449   :  { %15268 = vmatmul.mubr.f32.gmra.mxu1 %v5035_v42  ;;  %15344 = vmatprep.mubr.msk.f32.mxu0 %vm15637_vm3, %v22200_v39 }
 0x44a   :  { %15270 = vmatprep.mubr.msk.f32.mxu1 %vm15637_vm3, %v22200_v39  ;;  %15399 = vmatpush3.msra.mxu0 %v5427_v54 }
 0x44b   :  { %15446 = vmatprep.subr.mxu0 %v19138_v61 }
 0x44c   :  { %15345 = vmatmul.mubr.f32.gmra.mxu0 %v5209_v48 }
 0x44d   :  { %15271 = vmatmul.mubr.f32.gmra.mxu1 %v5036_v19  ;;  %15347 = vmatprep.mubr.msk.f32.mxu0 %vm15637_vm3, %v22200_v39 }
 0x44e   :  { %15273 = vmatprep.mubr.msk.f32.mxu1 %vm15637_vm3, %v22200_v39 }
 0x450   :  { %15348 = vmatmul.mubr.f32.gmra.mxu0 %v5210_v45 }
 0x451   :  { %15274 = vmatmul.mubr.f32.gmra.mxu1 %v5037_v27  ;;  %15350 = vmatprep.mubr.msk.f32.mxu0 %vm15637_vm3, %v22200_v39 }
 0x452   :  { %15276 = vmatprep.mubr.msk.f32.mxu1 %vm15637_vm3, %v22200_v39 }
 0x454   :  { %15351 = vmatmul.mubr.f32.gmra.mxu0 %v5211_v17 }
 0x455   :  { %15277 = vmatmul.mubr.f32.gmra.mxu1 %v5038_v57 }
 0x456   :  { %15279 = vmatprep.mubr.msk.f32.mxu1 %vm15637_vm3, %v22200_v39 }
 0x459   :  { %15280 = vmatmul.mubr.f32.gmra.mxu1 %v5039_v52 }
 0x4a9   :  { %v4963_v35 = vpop.f32.mrf.mxu0 }
 0x4ab   :  { %v15174_v29 = vpop.f32.mrf.mxu0 }
 0x4ad   :  { %v4968_v63 = vpop.f32.mrf.mxu0 }
 0x4af   :  { %v15177_v51 = vpop.f32.mrf.mxu0 }
 0x4b1   :  { %v19147_v36 = vpop.f32.mrf.mxu0 }
 0x4b3   :  { %v15180_v34 = vpop.f32.mrf.mxu0 }
 0x4b5   :  { %v4833_v49 = vpop.f32.mrf.mxu1  ;;  %v19149_v44 = vpop.f32.mrf.mxu0 }
 0x4b6   :  { %v4964_v46 = vadd.f32 %v4963_v35, %v4833_v49 }
 0x4b7   :  { %v15103_v5 = vpop.f32.mrf.mxu1  ;;  %v15183_v14 = vpop.f32.mrf.mxu0 }
 0x4b9   :  { %v4838_v8 = vpop.f32.mrf.mxu1 }
 0x4ba   :  { %v4969_v29 = vadd.f32 %v4968_v63, %v4838_v8 }
 0x4bb   :  { %v15106_v24 = vpop.f32.mrf.mxu1  ;;  %v19151_v30 = vpop.f32.mrf.mxu0 }
 0x4bd   :  { %v4843_v41 = vpop.f32.mrf.mxu1  ;;  %v15186_v58 = vpop.f32.mrf.mxu0 }
 0x4be   :  { %v4974_v35 = vadd.f32 %v19147_v36, %v4843_v41 }
 0x4bf   :  { %v15109_v0 = vpop.f32.mrf.mxu1  ;;  %v19153_v37 = vpop.f32.mrf.mxu0 }
 0x4c1   :  { %v4848_v6 = vpop.f32.mrf.mxu1  ;;  %v15189_v21 = vpop.f32.mrf.mxu0 }
 0x4c3   :  { %v15112_v16 = vpop.f32.mrf.mxu1  ;;  %v19155_v53 = vpop.f32.mrf.mxu0 }
 0x4c5   :  { %v19157_v13 = vpop.f32.mrf.mxu1  ;;  %v15192_v23 = vpop.f32.mrf.mxu0 }
 0x4c7   :  { %v15115_v4 = vpop.f32.mrf.mxu1  ;;  %v19159_v11 = vpop.f32.mrf.mxu0 }
 0x4c9   :  { %v19161_v33 = vpop.f32.mrf.mxu1  ;;  %v15195_v10 = vpop.f32.mrf.mxu0 }
 0x4cb   :  { %v15118_v40 = vpop.f32.mrf.mxu1  ;;  %v19163_v3 = vpop.f32.mrf.mxu0 }
 0x4cc   :  { %v4979_v40 = vadd.f32 %v19149_v44, %v4848_v6 }
 0x4cd   :  { %v19165_v32 = vpop.f32.mrf.mxu1  ;;  %v15198_v50 = vpop.f32.mrf.mxu0 }
 0x4cf   :  { %v15121_v7 = vpop.f32.mrf.mxu1  ;;  %v19167_v59 = vpop.f32.mrf.mxu0 }
 0x4d1   :  { %v19169_v1 = vpop.f32.mrf.mxu1  ;;  %v15201_v56 = vpop.f32.mrf.mxu0 }
 0x4d3   :  { %v15124_v22 = vpop.f32.mrf.mxu1  ;;  %v19171_v26 = vpop.f32.mrf.mxu0 }
 0x4d5   :  { %v19173_v42 = vpop.f32.mrf.mxu1  ;;  %v15204_v48 = vpop.f32.mrf.mxu0 }
 0x4d7   :  { %v15127_v19 = vpop.f32.mrf.mxu1 }
 0x4d8   :  { %v19175_v45 = vpop.f32.mrf.mxu0 }
 0x4d9   :  { %v19177_v27 = vpop.f32.mrf.mxu1 }
 0x4da   :  { %v15207_v17 = vpop.f32.mrf.mxu0 }
 0x4db   :  { %v15130_v57 = vpop.f32.mrf.mxu1  ;;  %v4984_v17 = vadd.f32 %v19151_v30, %v19157_v13 }
 0x4dd   :  { %v19179_v52 = vpop.f32.mrf.mxu1  ;;  %v19181_v28 = vpop.f32.mrf.mxu0 }
 0x4df   :  { %v15133_v43 = vpop.f32.mrf.mxu1  ;;  %v15210_v55 = vpop.f32.mrf.mxu0 }
 0x4e1   :  { %v19183_v12 = vpop.f32.mrf.mxu1 }
 0x4e3   :  { %v15136_v2 = vpop.f32.mrf.mxu1 }
 0x4e4   :  { %v5294_v18 = vpop.f32.mrf.mxu0 }
 0x4e5   :  { %v19185_v15 = vpop.f32.mrf.mxu1 }
 0x4e6   :  { %v15316_v62 = vpop.f32.mrf.mxu0 }
 0x4e7   :  { %v15139_v47 = vpop.f32.mrf.mxu1 }
 0x4e8   :  { %v5299_v20 = vpop.f32.mrf.mxu0 }
 0x4e9   :  { %v5122_v9 = vpop.f32.mrf.mxu1 }
 0x4ea   :  { %v5186_v25 = vadd.f32 %v5122_v9, %v4964_v46  ;;  %v15319_v54 = vpop.f32.mrf.mxu0  ;;  %v4989_v46 = vadd.f32 %v19153_v37, %v19161_v33 }
 0x4eb   :  { %v15245_v31 = vpop.f32.mrf.mxu1 }
 0x4ec   :  { %v5358_v51 = vadd.f32 %v5294_v18, %v5186_v25  ;;  %v5304_v34 = vpop.f32.mrf.mxu0  ;;  %v12413_v31 = vld [vmem:[%s22178_s5 + $0xf0] sm:$0xff] }
 0x4ed   :  { %v5127_v5 = vpop.f32.mrf.mxu1 }
 0x4ee   :  { %v5378_v14 = vadd.f32 %v19190_v60, %v5358_v51  ;;  %v5187_v24 = vadd.f32 %v5127_v5, %v4969_v29  ;;  %v15322_v58 = vpop.f32.mrf.mxu0 }
 0x4ef   :  { %v15248_v0 = vpop.f32.mrf.mxu1  ;;  %v12412_v58 = vld [vmem:[%s22178_s5 + $0xe8] sm:$0xff] }
 0x4f0   :  { %v5391_v49 = vmax.f32 %v5378_v14, 0.0  ;;  %v5359_v21 = vadd.f32 %v5299_v20, %v5187_v24  ;;  %v5309_v16 = vpop.f32.mrf.mxu0 }
 0x4f1   :  { %v5132_v23 = vpop.f32.mrf.mxu1 }
 0x4f2   :  { %5404 = vst.msk [vmem:[#allocation3] sm:$0xff] %vm1928_vm4, %v5391_v49  ;;  %v5379_v4 = vadd.f32 %v19190_v60, %v5359_v21  ;;  %v5188_v10 = vadd.f32 %v5132_v23, %v4974_v35  ;;  %v15325_v63 = vpop.f32.mrf.mxu0  ;;  %v12395_v21 = vld [vmem:[%s22178_s5 + $0xb0] sm:$0xff] }
 0x4f3   :  { %v15251_v8 = vpop.f32.mrf.mxu1 }
 0x4f4   :  { %v5392_v50 = vmax.f32 %v5379_v4, 0.0  ;;  %v5360_v7 = vadd.f32 %v5304_v34, %v5188_v10  ;;  %v5314_v56 = vpop.f32.mrf.mxu0  ;;  %v4994_v34 = vadd.f32 %v19155_v53, %v19165_v32  ;;  %v4999_v4 = vadd.f32 %v19159_v11, %v19169_v1 }
 0x4f5   :  { %v5137_v22 = vpop.f32.mrf.mxu1 }
 0x4f6   :  { %5405 = vst.msk [vmem:[#allocation3 + $0x8] sm:$0xff] %vm1928_vm4, %v5392_v50  ;;  %v5380_v36 = vadd.f32 %v19190_v60, %v5360_v7  ;;  %v5189_v41 = vadd.f32 %v5137_v22, %v4979_v40  ;;  %v15328_v48 = vpop.f32.mrf.mxu0  ;;  %v12394_v40 = vld [vmem:[%s22178_s5 + $0xa8] sm:$0xff] }
 0x4f7   :  { %v15254_v19 = vpop.f32.mrf.mxu1  ;;  %v5004_v48 = vadd.f32 %v19163_v3, %v19173_v42 }
 0x4f8   :  { %v5393_v57 = vmax.f32 %v5380_v36, 0.0  ;;  %v5361_v43 = vadd.f32 %v5309_v16, %v5189_v41  ;;  %v5319_v55 = vpop.f32.mrf.mxu0  ;;  %v12411_v16 = vld [vmem:[%s22178_s5 + $0xe0] sm:$0xff] }
 0x4f9   :  { %v5142_v2 = vpop.f32.mrf.mxu1  ;;  %v5417_v18 = vld [vmem:[#allocation3] sm:$0xff]  ;;  %v12393_v36 = vld [vmem:[%s22178_s5 + $0xa0] sm:$0xff] }
 0x4fa   :  { %5406 = vst.msk [vmem:[#allocation3 + $0x10] sm:$0xff] %vm1928_vm4, %v5393_v57  ;;  %v5381_v44 = vadd.f32 %v19190_v60, %v5361_v43  ;;  %v5190_v6 = vadd.f32 %v5142_v2, %v4984_v17  ;;  %15400 = vmatprep.mubr.msk.f32.mxu0 %vm1928_vm4, %v5417_v18  ;;  %v15331_v62 = vpop.f32.mrf.mxu0  ;;  %v12409_v43 = vld [vmem:[%s22178_s5 + $0xd0] sm:$0xff] }
 0x4fb   :  { %v15257_v47 = vpop.f32.mrf.mxu1  ;;  %v12408_v62 = vld [vmem:[%s22178_s5 + $0xc8] sm:$0xff] }
 0x4fc   :  { %v5394_v20 = vmax.f32 %v5381_v44, 0.0  ;;  %v5362_v9 = vadd.f32 %v5314_v56, %v5190_v6  ;;  %v5324_v30 = vpop.f32.mrf.mxu0  ;;  %v12392_v44 = vld [vmem:[%s22178_s5 + $0x98] sm:$0xff] }
 0x4fd   :  { %v5147_v13 = vpop.f32.mrf.mxu1  ;;  %v5435_v25 = vld [vmem:[#allocation3 + $0x1] sm:$0xff] }
 0x4fe   :  { %v5418_v54 = vld [vmem:[#allocation3 + $0x8] sm:$0xff]  ;;  %5407 = vst.msk [vmem:[#allocation3 + $0x18] sm:$0xff] %vm1928_vm4, %v5394_v20  ;;  %v5382_v29 = vadd.f32 %v19190_v60, %v5362_v9  ;;  %v5191_v51 = vadd.f32 %v5147_v13, %v4989_v46  ;;  %15369 = vmatprep.mubr.msk.f32.mxu1 %vm1928_vm4, %v5435_v25  ;;  %v15334_v37 = vpop.f32.mrf.mxu0  ;;  %v5009_v46 = vadd.f32 %v19167_v59, %v19177_v27  ;;  %v12391_v13 = vld [vmem:[%s22178_s5 + $0x90] sm:$0xff] }
 0x4ff   :  { %15401 = vmatmul.mubr.msk.f32.vlgmr.msra.gmra.mxu0 %vm1928_vm4, %v5418_v54  ;;  %v15260_v33 = vpop.f32.mrf.mxu1  ;;  %v12390_v37 = vld [vmem:[%s22178_s5 + $0x88] sm:$0xff] }
 0x500   :  { %15447 = vmatpush3.msra.mxu0 %v19138_v61  ;;  %v5395_v5 = vmax.f32 %v5382_v29, 0.0  ;;  %v5363_v14 = vadd.f32 %v5319_v55, %v5191_v51  ;;  %v5329_v24 = vpop.f32.mrf.mxu0  ;;  %v12407_v29 = vld [vmem:[%s22178_s5 + $0xc0] sm:$0xff] }
 0x501   :  { %15448 = vmatprep.subr.mxu0 %v12413_v31  ;;  %v5152_v0 = vpop.f32.mrf.mxu1  ;;  %v5436_v35 = vld [vmem:[#allocation3 + $0x9] sm:$0xff] }
 0x502   :  { %v5419_v49 = vld [vmem:[#allocation3 + $0x10] sm:$0xff]  ;;  %15449 = vmatpush3.msra.mxu0 %v12413_v31  ;;  %5408 = vst.msk [vmem:[#allocation3 + $0x20] sm:$0xff] %vm1928_vm4, %v5395_v5  ;;  %v5383_v61 = vadd.f32 %v19190_v60, %v5363_v14  ;;  %v5192_v53 = vadd.f32 %v5152_v0, %v4994_v34  ;;  %15370 = vmatmul.mubr.msk.f32.vlgmr.msra.gmra.mxu1 %vm1928_vm4, %v5436_v35  ;;  %v15337_v32 = vpop.f32.mrf.mxu0 }
 0x503   :  { %15403 = vmatprep.mubr.msk.f32.mxu0 %vm1928_vm4, %v5419_v49  ;;  %v15263_v23 = vpop.f32.mrf.mxu1  ;;  %15416 = vmatpush3.msra.mxu1 %v19144_v38  ;;  %v12410_v38 = vld [vmem:[%s22178_s5 + $0xd8] sm:$0xff]  ;;  %v5014_v34 = vadd.f32 %v19171_v26, %v19179_v52  ;;  %v12389_v26 = vld [vmem:[%s22178_s5 + $0x80] sm:$0xff]  ;;  %v5019_v32 = vadd.f32 %v19175_v45, %v19183_v12 }
 0x504   :  { %15450 = vmatprep.subr.mxu0 %v12412_v58  ;;  %v5396_v10 = vmax.f32 %v5383_v61, 0.0  ;;  %v5364_v63 = vadd.f32 %v5324_v30, %v5192_v53  ;;  %v5334_v8 = vpop.f32.mrf.mxu0  ;;  %15417 = vmatprep.subr.mxu1 %v12395_v21 }
 0x505   :  { %15451 = vmatpush3.msra.mxu0 %v12412_v58  ;;  %v5157_v50 = vpop.f32.mrf.mxu1  ;;  %v5437_v7 = vld [vmem:[#allocation3 + $0x11] sm:$0xff]  ;;  %15418 = vmatpush3.msra.mxu1 %v12395_v21  ;;  %v19289_v58 = vld [vmem:[%s22178_s5 + $0x178] sm:$0xff] }
 0x506   :  { %v19235_v56 = vld [vmem:[#allocation3 + $0x18] sm:$0xff]  ;;  %15452 = vmatprep.subr.mxu0 %v12411_v16  ;;  %5409 = vst.msk [vmem:[#allocation3 + $0x28] sm:$0xff] %vm1928_vm4, %v5396_v10  ;;  %v5384_v11 = vadd.f32 %v19190_v60, %v5364_v63  ;;  %v5193_v1 = vadd.f32 %v5157_v50, %v4999_v4  ;;  %15372 = vmatprep.mubr.msk.f32.mxu1 %vm1928_vm4, %v5437_v7  ;;  %v15340_v22 = vpop.f32.mrf.mxu0  ;;  %v12432_v10 = vld [vmem:[%s22178_s5 + $0x138] sm:$0xff] }
 0x507   :  { %15404 = vmatmul.mubr.msk.f32.gmra.mxu0 %vm1928_vm4, %v19235_v56  ;;  %v15266_v41 = vpop.f32.mrf.mxu1  ;;  %15419 = vmatprep.subr.mxu1 %v12394_v40 }
 0x508   :  { %15453 = vmatpush3.msra.mxu0 %v12411_v16  ;;  %v5397_v19 = vmax.f32 %v5384_v11, 0.0  ;;  %v5365_v17 = vadd.f32 %v5329_v24, %v5193_v1  ;;  %v5339_v57 = vpop.f32.mrf.mxu0  ;;  %15420 = vmatpush3.msra.mxu1 %v12394_v40 }
 0x509   :  { %15454 = vmatprep.subr.mxu0 %v12410_v38  ;;  %v5162_v55 = vpop.f32.mrf.mxu1  ;;  %v5438_v2 = vld [vmem:[#allocation3 + $0x19] sm:$0xff]  ;;  %15421 = vmatprep.subr.mxu1 %v12393_v36 }
 0x50a   :  { %v19253_v18 = vld [vmem:[#allocation3 + $0x20] sm:$0xff]  ;;  %15455 = vmatpush3.msra.mxu0 %v12410_v38  ;;  %5410 = vst.msk [vmem:[#allocation3 + $0x30] sm:$0xff] %vm1928_vm4, %v5397_v19  ;;  %v5385_v3 = vadd.f32 %v19190_v60, %v5365_v17  ;;  %v5194_v42 = vadd.f32 %v5162_v55, %v5004_v48  ;;  %15373 = vmatmul.mubr.msk.f32.gmra.mxu1 %vm1928_vm4, %v5438_v2  ;;  %v15343_v6 = vpop.f32.mrf.mxu0  ;;  %v5916_v2 = vld [vmem:[#allocation3 + $0xb] sm:$0xff] }
 0x50b   :  { %15406 = vmatprep.mubr.msk.f32.mxu0 %vm1928_vm4, %v19253_v18  ;;  %v15269_v47 = vpop.f32.mrf.mxu1  ;;  %15422 = vmatpush3.msra.mxu1 %v12393_v36  ;;  %v5024_v38 = vadd.f32 %v19181_v28, %v19185_v15  ;;  %v5743_v6 = vld [vmem:[#allocation3 + $0x2] sm:$0xff] }
 0x50c   :  { %15456 = vmatprep.subr.mxu0 %v12409_v43  ;;  %v5398_v20 = vmax.f32 %v5385_v3, 0.0  ;;  %v5366_v9 = vadd.f32 %v5334_v8, %v5194_v42  ;;  %v5344_v30 = vpop.f32.mrf.mxu0  ;;  %15423 = vmatprep.subr.mxu1 %v12392_v44  ;;  %v5917_v42 = vld [vmem:[#allocation3 + $0x13] sm:$0xff]  ;;  %v5744_v47 = vld [vmem:[#allocation3 + $0xa] sm:$0xff] }
 0x50d   :  { %15457 = vmatpush3.msra.mxu0 %v12409_v43  ;;  %v5167_v25 = vpop.f32.mrf.mxu1  ;;  %v5439_v54 = vld [vmem:[#allocation3 + $0x21] sm:$0xff]  ;;  %15424 = vmatpush3.msra.mxu1 %v12392_v44 }
 0x50e   :  { %v19271_v31 = vld [vmem:[#allocation3 + $0x28] sm:$0xff]  ;;  %15458 = vmatprep.subr.mxu0 %v12408_v62  ;;  %5411 = vst.msk [vmem:[#allocation3 + $0x38] sm:$0xff] %vm1928_vm4, %v5398_v20  ;;  %v5386_v59 = vadd.f32 %v19190_v60, %v5366_v9  ;;  %v5195_v27 = vadd.f32 %v5167_v25, %v5009_v46  ;;  %15375 = vmatprep.mubr.msk.f32.mxu1 %vm1928_vm4, %v5439_v54  ;;  %v15346_v51 = vpop.f32.mrf.mxu0  ;;  %v12431_v20 = vld [vmem:[%s22178_s5 + $0x130] sm:$0xff] }
 0x50f   :  { %15407 = vmatmul.mubr.msk.f32.gmra.mxu0 %vm1928_vm4, %v19271_v31  ;;  %v15272_v33 = vpop.f32.mrf.mxu1  ;;  %15425 = vmatprep.subr.mxu1 %v12391_v13  ;;  %v5919_v46 = vld [vmem:[#allocation3 + $0x23] sm:$0xff]  ;;  %v5745_v9 = vld [vmem:[#allocation3 + $0x12] sm:$0xff]  ;;  %v5746_v25 = vld [vmem:[#allocation3 + $0x1a] sm:$0xff] }
 0x510   :  { %15459 = vmatpush3.msra.mxu0 %v12408_v62  ;;  %v5399_v5 = vmax.f32 %v5386_v59, 0.0  ;;  %v5367_v14 = vadd.f32 %v5339_v57, %v5195_v27  ;;  %v5349_v24 = vpop.f32.mrf.mxu0  ;;  %15426 = vmatpush3.msra.mxu1 %v12391_v13  ;;  %v5918_v62 = vld [vmem:[#allocation3 + $0x1b] sm:$0xff]  ;;  %v12448_v13 = vld [vmem:[%s22178_s5 + $0x168] sm:$0xff]  ;;  %v12447_v51 = vld [vmem:[%s22178_s5 + $0x160] sm:$0xff] }
 0x511   :  { %15460 = vmatprep.subr.mxu0 %v12407_v29  ;;  %v5172_v0 = vpop.f32.mrf.mxu1  ;;  %v5440_v35 = vld [vmem:[#allocation3 + $0x29] sm:$0xff]  ;;  %15427 = vmatprep.subr.mxu1 %v12390_v37 }
 0x512   :  { %v19291_v49 = vld [vmem:[#allocation3 + $0x30] sm:$0xff]  ;;  %15461 = vmatpush3.msra.mxu0 %v12407_v29  ;;  %5412 = vst.msk [vmem:[#allocation3 + $0x40] sm:$0xff] %vm1928_vm4, %v5399_v5  ;;  %v5387_v52 = vadd.f32 %v19190_v60, %v5367_v14  ;;  %v5196_v21 = vadd.f32 %v5172_v0, %v5014_v34  ;;  %15376 = vmatmul.mubr.msk.f32.gmra.mxu1 %vm1928_vm4, %v5440_v35  ;;  %v15349_v61 = vpop.f32.mrf.mxu0  ;;  %v5747_v59 = vld [vmem:[#allocation3 + $0x22] sm:$0xff]  ;;  %v12445_v0 = vld [vmem:[%s22178_s5 + $0x150] sm:$0xff] }
 0x513   :  { %15409 = vmatprep.mubr.msk.f32.mxu0 %vm1928_vm4, %v19291_v49  ;;  %v15275_v53 = vpop.f32.mrf.mxu1  ;;  %15428 = vmatpush3.msra.mxu1 %v12390_v37  ;;  %v12430_v29 = vld [vmem:[%s22178_s5 + $0x128] sm:$0xff]  ;;  %v12429_v37 = vld [vmem:[%s22178_s5 + $0x120] sm:$0xff]  ;;  %v12446_v34 = vld [vmem:[%s22178_s5 + $0x158] sm:$0xff] }
 0x514   :  { %15508 = vmatprep.subr.mxu0 %v19289_v58  ;;  %v5400_v16 = vmax.f32 %v5387_v52, 0.0  ;;  %v5368_v23 = vadd.f32 %v5344_v30, %v5196_v21  ;;  %v5354_v4 = vpop.f32.mrf.mxu0  ;;  %15429 = vmatprep.subr.mxu1 %v12389_v26  ;;  %v5920_v30 = vld [vmem:[#allocation3 + $0x2b] sm:$0xff]  ;;  %v12428_v14 = vld [vmem:[%s22178_s5 + $0x118] sm:$0xff]  ;;  %v12427_v21 = vld [vmem:[%s22178_s5 + $0x110] sm:$0xff] }
 0x515   :  { %v5177_v63 = vpop.f32.mrf.mxu1  ;;  %v5441_v8 = vld [vmem:[#allocation3 + $0x31] sm:$0xff]  ;;  %15430 = vmatpush3.msra.mxu1 %v12389_v26  ;;  %v12443_v53 = vld [vmem:[%s22178_s5 + $0x140] sm:$0xff] }
 0x516   :  { %v19307_v40 = vld [vmem:[#allocation3 + $0x38] sm:$0xff]  ;;  %5413 = vst.msk [vmem:[#allocation3 + $0x48] sm:$0xff] %vm1928_vm4, %v5400_v16  ;;  %v5388_v50 = vadd.f32 %v19190_v60, %v5368_v23  ;;  %v5197_v7 = vadd.f32 %v5177_v63, %v5019_v32  ;;  %15378 = vmatprep.mubr.msk.f32.mxu1 %vm1928_vm4, %v5441_v8  ;;  %v15352_v45 = vpop.f32.mrf.mxu0  ;;  %15477 = vmatprep.subr.mxu1 %v12432_v10  ;;  %v5748_v33 = vld [vmem:[#allocation3 + $0x2a] sm:$0xff]  ;;  %v12486_v63 = vld [vmem:[%s22178_s5 + $0x1f8] sm:$0xff] }
 0x517   :  { %15410 = vmatmul.mubr.msk.f32.gmra.mxu0 %vm1928_vm4, %v19307_v40  ;;  %v15278_v12 = vpop.f32.mrf.mxu1  ;;  %v5921_v54 = vld [vmem:[#allocation3 + $0x33] sm:$0xff] }
 0x518   :  { %v5401_v11 = vmax.f32 %v5388_v50, 0.0  ;;  %v5369_v1 = vadd.f32 %v5349_v24, %v5197_v7  ;;  %v5749_v24 = vld [vmem:[#allocation3 + $0x32] sm:$0xff]  ;;  %v6264_v50 = vld [vmem:[#allocation3 + $0x1d] sm:$0xff]  ;;  %v6265_v12 = vld [vmem:[#allocation3 + $0x25] sm:$0xff] }
 0x519   :  { %v5182_v22 = vpop.f32.mrf.mxu1  ;;  %v5442_v36 = vld [vmem:[#allocation3 + $0x39] sm:$0xff]  ;;  %v12444_v35 = vld [vmem:[%s22178_s5 + $0x148] sm:$0xff] }
 0x51a   :  { %v19316_v41 = vld [vmem:[#allocation3 + $0x40] sm:$0xff]  ;;  %5414 = vst.msk [vmem:[#allocation3 + $0x50] sm:$0xff] %vm1928_vm4, %v5401_v11  ;;  %v5389_v48 = vadd.f32 %v19190_v60, %v5369_v1  ;;  %v5198_v19 = vadd.f32 %v5182_v22, %v5024_v38  ;;  %15379 = vmatmul.mubr.msk.f32.gmra.mxu1 %vm1928_vm4, %v5442_v36  ;;  %v12426_v32 = vld [vmem:[%s22178_s5 + $0x108] sm:$0xff]  ;;  %v12485_v11 = vld [vmem:[%s22178_s5 + $0x1f0] sm:$0xff] }
 0x51b   :  { %15412 = vmatprep.mubr.msk.f32.mxu0 %vm1928_vm4, %v19316_v41  ;;  %v15281_v17 = vpop.f32.mrf.mxu1  ;;  %v5922_v27 = vld [vmem:[#allocation3 + $0x3b] sm:$0xff]  ;;  %v6262_v16 = vld [vmem:[#allocation3 + $0xd] sm:$0xff]  ;;  %v6092_v36 = vld [vmem:[#allocation3 + $0x24] sm:$0xff] }
 0x51c   :  { %v5402_v57 = vmax.f32 %v5389_v48, 0.0  ;;  %v5370_v43 = vadd.f32 %v5354_v4, %v5198_v19  ;;  %v5750_v26 = vld [vmem:[#allocation3 + $0x3a] sm:$0xff]  ;;  %v6089_v8 = vld [vmem:[#allocation3 + $0xc] sm:$0xff] }
 0x51d   :  { %v5443_v28 = vld [vmem:[#allocation3 + $0x41] sm:$0xff]  ;;  %v6263_v4 = vld [vmem:[#allocation3 + $0x15] sm:$0xff]  ;;  %v6266_v22 = vld [vmem:[#allocation3 + $0x2d] sm:$0xff] }
 0x51e   :  { %v19323_v15 = vld [vmem:[#allocation3 + $0x48] sm:$0xff]  ;;  %5415 = vst.msk [vmem:[#allocation3 + $0x58] sm:$0xff] %vm1928_vm4, %v5402_v57  ;;  %v5390_v55 = vadd.f32 %v19190_v60, %v5370_v43  ;;  %15381 = vmatprep.mubr.msk.f32.mxu1 %vm1928_vm4, %v5443_v28  ;;  %v12449_v60 = vld [vmem:[%s22178_s5 + $0x170] sm:$0xff]  ;;  %v12468_v7 = vld [vmem:[%s22178_s5 + $0x1b8] sm:$0xff] }
 0x51f   :  { %15413 = vmatmul.mubr.msk.f32.gmra.mxu0 %vm1928_vm4, %v19323_v15  ;;  %v5923_v5 = vld [vmem:[#allocation3 + $0x43] sm:$0xff]  ;;  %v6090_v45 = vld [vmem:[#allocation3 + $0x14] sm:$0xff]  ;;  %v6093_v57 = vld [vmem:[#allocation3 + $0x2c] sm:$0xff] }
 0x520   :  { %15462 = vmatprep.mubr.msk.f32.mxu0 %vm1928_vm4, %v5916_v2  ;;  %v5403_v44 = vmax.f32 %v5390_v55, 0.0  ;;  %v5751_v61 = vld [vmem:[#allocation3 + $0x42] sm:$0xff]  ;;  %v12467_v1 = vld [vmem:[%s22178_s5 + $0x1b0] sm:$0xff]  ;;  %v12484_v48 = vld [vmem:[%s22178_s5 + $0x1e8] sm:$0xff] }
 0x521   :  { %v5444_v3 = vld [vmem:[#allocation3 + $0x49] sm:$0xff]  ;;  %v6091_v38 = vld [vmem:[#allocation3 + $0x1c] sm:$0xff]  ;;  %v6094_v2 = vld [vmem:[#allocation3 + $0x34] sm:$0xff] }
 0x522   :  { %5416 = vst.msk [vmem:[#allocation3 + $0x60] sm:$0xff] %vm1928_vm4, %v5403_v44  ;;  %15382 = vmatmul.mubr.msk.f32.gmra.mxu1 %vm1928_vm4, %v5444_v3  ;;  %v5752_v23 = vld [vmem:[#allocation3 + $0x4a] sm:$0xff]  ;;  %v6267_v19 = vld [vmem:[#allocation3 + $0x35] sm:$0xff]  ;;  %v6268_v43 = vld [vmem:[#allocation3 + $0x3d] sm:$0xff] }
 0x523   :  { %15463 = vmatmul.mubr.msk.f32.vlgmr.msra.gmra.mxu0 %vm1928_vm4, %v5917_v42  ;;  %15431 = vmatprep.mubr.msk.f32.mxu1 %vm1928_vm4, %v5743_v6  ;;  %v12466_v17 = vld [vmem:[%s22178_s5 + $0x1a8] sm:$0xff]  ;;  %v12483_v28 = vld [vmem:[%s22178_s5 + $0x1e0] sm:$0xff]  ;;  %v12482_v44 = vld [vmem:[%s22178_s5 + $0x1d8] sm:$0xff] }
 0x524   :  { %15465 = vmatprep.mubr.msk.f32.mxu0 %vm1928_vm4, %v5918_v62  ;;  %15509 = vmatpush3.msra.mxu0 %v19289_v58  ;;  %v5924_v58 = vld [vmem:[#allocation3 + $0x4b] sm:$0xff]  ;;  %v12464_v42 = vld [vmem:[%s22178_s5 + $0x198] sm:$0xff] }
 0x525   :  { %15510 = vmatprep.subr.mxu0 %v12449_v60  ;;  %v5925_v52 = vld [vmem:[#allocation3 + $0x53] sm:$0xff]  ;;  %v12465_v55 = vld [vmem:[%s22178_s5 + $0x1a0] sm:$0xff]  ;;  %v6095_v6 = vld [vmem:[#allocation3 + $0x3c] sm:$0xff] }
 0x526   :  { %15432 = vmatmul.mubr.msk.f32.vlgmr.msra.gmra.mxu1 %vm1928_vm4, %v5744_v47  ;;  %15511 = vmatpush3.msra.mxu0 %v12449_v60  ;;  %v6269_v3 = vld [vmem:[#allocation3 + $0x45] sm:$0xff]  ;;  %v6270_v62 = vld [vmem:[#allocation3 + $0x4d] sm:$0xff]  ;;  %v12481_v60 = vld [vmem:[%s22178_s5 + $0x1d0] sm:$0xff] }
 0x527   :  { %15466 = vmatmul.mubr.msk.f32.gmra.mxu0 %vm1928_vm4, %v5919_v46  ;;  %15434 = vmatprep.mubr.msk.f32.mxu1 %vm1928_vm4, %v5745_v9  ;;  %v12480_v47 = vld [vmem:[%s22178_s5 + $0x1c8] sm:$0xff]  ;;  %v6096_v46 = vld [vmem:[#allocation3 + $0x44] sm:$0xff]  ;;  %v12463_v9 = vld [vmem:[%s22178_s5 + $0x190] sm:$0xff] }
 0x528   :  { %15468 = vmatprep.mubr.msk.f32.mxu0 %vm1928_vm4, %v5920_v30  ;;  %15478 = vmatpush3.msra.mxu1 %v12432_v10  ;;  %v12425_v10 = vld [vmem:[%s22178_s5 + $0x100] sm:$0xff] }
 0x529   :  { %15479 = vmatprep.subr.mxu1 %v12431_v20  ;;  %15512 = vmatprep.subr.mxu0 %v12448_v13  ;;  %v6097_v30 = vld [vmem:[#allocation3 + $0x4c] sm:$0xff] }
 0x52a   :  { %15435 = vmatmul.mubr.msk.f32.gmra.mxu1 %vm1928_vm4, %v5746_v25  ;;  %15513 = vmatpush3.msra.mxu0 %v12448_v13  ;;  %v12479_v13 = vld [vmem:[%s22178_s5 + $0x1c0] sm:$0xff]  ;;  %v12462_v25 = vld [vmem:[%s22178_s5 + $0x188] sm:$0xff] }
 0x52b   :  { %15469 = vmatmul.mubr.msk.f32.gmra.mxu0 %vm1928_vm4, %v5921_v54  ;;  %15480 = vmatpush3.msra.mxu1 %v12431_v20  ;;  %v6271_v20 = vld [vmem:[#allocation3 + $0x55] sm:$0xff] }
 0x52c   :  { %15437 = vmatprep.mubr.msk.f32.mxu1 %vm1928_vm4, %v5747_v59  ;;  %15471 = vmatprep.mubr.msk.f32.mxu0 %vm1928_vm4, %v5922_v27  ;;  %v6608_v54 = vld [vmem:[#allocation3 + $0x17] sm:$0xff]  ;;  %v6609_v59 = vld [vmem:[#allocation3 + $0x1f] sm:$0xff]  ;;  %v12461_v27 = vld [vmem:[%s22178_s5 + $0x180] sm:$0xff] }
 0x52d   :  { %15481 = vmatprep.subr.mxu1 %v12430_v29  ;;  %15514 = vmatprep.subr.mxu0 %v12447_v51 }
 0x52e   :  { %15482 = vmatpush3.msra.mxu1 %v12430_v29  ;;  %15515 = vmatpush3.msra.mxu0 %v12447_v51  ;;  %v6098_v29 = vld [vmem:[#allocation3 + $0x54] sm:$0xff] }
 0x52f   :  { %15438 = vmatmul.mubr.msk.f32.gmra.mxu1 %vm1928_vm4, %v5748_v33  ;;  %15483 = vmatprep.subr.mxu1 %v12429_v37  ;;  %v6435_v51 = vld [vmem:[#allocation3 + $0x16] sm:$0xff]  ;;  %v12504_v33 = vld [vmem:[%s22178_s5 + $0x238] sm:$0xff] }
 0x530   :  { %15472 = vmatmul.mubr.msk.f32.gmra.mxu0 %vm1928_vm4, %v5923_v5  ;;  %15516 = vmatprep.subr.mxu0 %v12446_v34  ;;  %v6611_v5 = vld [vmem:[#allocation3 + $0x2f] sm:$0xff] }
 0x531   :  { %15440 = vmatprep.mubr.msk.f32.mxu1 %vm1928_vm4, %v5749_v24  ;;  %15474 = vmatprep.mubr.msk.f32.mxu0 %vm1928_vm4, %v5924_v58  ;;  %v12503_v24 = vld [vmem:[%s22178_s5 + $0x230] sm:$0xff] }
 0x532   :  { %15484 = vmatpush3.msra.mxu1 %v12429_v37  ;;  %15517 = vmatpush3.msra.mxu0 %v12446_v34  ;;  %v6610_v37 = vld [vmem:[#allocation3 + $0x27] sm:$0xff]  ;;  %v6436_v34 = vld [vmem:[#allocation3 + $0x1e] sm:$0xff] }
 0x533   :  { %15485 = vmatprep.subr.mxu1 %v12428_v14  ;;  %15518 = vmatprep.subr.mxu0 %v12445_v0  ;;  %v6612_v58 = vld [vmem:[#allocation3 + $0x37] sm:$0xff] }
 0x534   :  { %15486 = vmatpush3.msra.mxu1 %v12428_v14  ;;  %15519 = vmatpush3.msra.mxu0 %v12445_v0  ;;  %v6437_v14 = vld [vmem:[#allocation3 + $0x26] sm:$0xff]  ;;  %v6438_v0 = vld [vmem:[#allocation3 + $0x2e] sm:$0xff] }
 0x535   :  { %15441 = vmatmul.mubr.msk.f32.gmra.mxu1 %vm1928_vm4, %v5750_v26  ;;  %15475 = vmatmul.mubr.msk.f32.gmra.mxu0 %vm1928_vm4, %v5925_v52  ;;  %v12502_v26 = vld [vmem:[%s22178_s5 + $0x228] sm:$0xff] }
 0x536   :  { %15520 = vmatprep.subr.mxu0 %v12444_v35  ;;  %15443 = vmatprep.mubr.msk.f32.mxu1 %vm1928_vm4, %v5751_v61  ;;  %v6439_v52 = vld [vmem:[#allocation3 + $0x36] sm:$0xff]  ;;  %v12501_v61 = vld [vmem:[%s22178_s5 + $0x220] sm:$0xff] }
 0x537   :  { %15487 = vmatprep.subr.mxu1 %v12427_v21  ;;  %15521 = vmatpush3.msra.mxu0 %v12444_v35  ;;  %v6613_v35 = vld [vmem:[#allocation3 + $0x3f] sm:$0xff] }
 0x538   :  { %15524 = vmatprep.mubr.msk.f32.mxu0 %vm1928_vm4, %v6262_v16  ;;  %15488 = vmatpush3.msra.mxu1 %v12427_v21  ;;  %v6614_v21 = vld [vmem:[#allocation3 + $0x47] sm:$0xff] }
 0x539   :  { %15522 = vmatprep.subr.mxu0 %v12443_v53  ;;  %15489 = vmatprep.subr.mxu1 %v12426_v32  ;;  %v6441_v16 = vld [vmem:[#allocation3 + $0x46] sm:$0xff] }
 0x53a   :  { %15523 = vmatpush3.msra.mxu0 %v12443_v53  ;;  %15444 = vmatmul.mubr.msk.f32.gmra.mxu1 %vm1928_vm4, %v5752_v23  ;;  %v6440_v53 = vld [vmem:[#allocation3 + $0x3e] sm:$0xff] }
 0x53b   :  { %15490 = vmatpush3.msra.mxu1 %v12426_v32  ;;  %15525 = vmatmul.mubr.msk.f32.vlgmr.msra.gmra.mxu0 %vm1928_vm4, %v6263_v4  ;;  %v6615_v32 = vld [vmem:[#allocation3 + $0x4f] sm:$0xff]  ;;  %v12500_v23 = vld [vmem:[%s22178_s5 + $0x218] sm:$0xff]  ;;  %v6616_v4 = vld [vmem:[#allocation3 + $0x57] sm:$0xff] }
 0x53c   :  { %15493 = vmatprep.mubr.msk.f32.mxu1 %vm1928_vm4, %v6089_v8  ;;  %15527 = vmatprep.mubr.msk.f32.mxu0 %vm1928_vm4, %v6264_v50  ;;  %v6442_v8 = vld [vmem:[#allocation3 + $0x4e] sm:$0xff] }
 0x53d   :  { %15491 = vmatprep.subr.mxu1 %v12425_v10  ;;  %15570 = vmatprep.subr.mxu0 %v12486_v63  ;;  %v12498_v50 = vld [vmem:[%s22178_s5 + $0x208] sm:$0xff] }
 0x53e   :  { %15492 = vmatpush3.msra.mxu1 %v12425_v10  ;;  %15571 = vmatpush3.msra.mxu0 %v12486_v63  ;;  %v12499_v10 = vld [vmem:[%s22178_s5 + $0x210] sm:$0xff] }
 0x53f   :  { %15494 = vmatmul.mubr.msk.f32.vlgmr.msra.gmra.mxu1 %vm1928_vm4, %v6090_v45  ;;  %15528 = vmatmul.mubr.msk.f32.gmra.mxu0 %vm1928_vm4, %v6265_v12  ;;  %v6617_v63 = vld [vmem:[#allocation3 + $0x5f] sm:$0xff]  ;;  %v12497_v45 = vld [vmem:[%s22178_s5 + $0x200] sm:$0xff] }
 0x540   :  { %15539 = vmatprep.subr.mxu1 %v12468_v7  ;;  %15496 = vmatprep.mubr.msk.f32.mxu1 %vm1928_vm4, %v6091_v38  ;;  %v6444_v12 = vld [vmem:[#allocation3 + $0x5e] sm:$0xff] }
 0x541   :  { %15530 = vmatprep.mubr.msk.f32.mxu0 %vm1928_vm4, %v6266_v22  ;;  %15540 = vmatpush3.msra.mxu1 %v12468_v7  ;;  %v6443_v7 = vld [vmem:[#allocation3 + $0x56] sm:$0xff]  ;;  %v7006_v22 = vld [vmem:[%s22181_s7 + $0x60] sm:$0xff] }
 0x542   :  { %15572 = vmatprep.subr.mxu0 %v12485_v11  ;;  %15541 = vmatprep.subr.mxu1 %v12467_v1  ;;  %v6789_v38 = vld [vmem:[#allocation3 + $0x58] sm:$0xff] }
 0x543   :  { %15573 = vmatpush3.msra.mxu0 %v12485_v11  ;;  %15497 = vmatmul.mubr.msk.f32.gmra.mxu1 %vm1928_vm4, %v6092_v36  ;;  %v7007_v11 = vld [vmem:[%s22181_s7 + $0x68] sm:$0xff]  ;;  %v12527_v36 = vld [vmem:[%s22181_s7 + $0xd8] sm:$0xff] }
 0x544   :  { %15531 = vmatmul.mubr.msk.f32.gmra.mxu0 %vm1928_vm4, %v6267_v19  ;;  %15542 = vmatpush3.msra.mxu1 %v12467_v1  ;;  %v12528_v1 = vld [vmem:[%s22181_s7 + $0xe0] sm:$0xff]  ;;  %v12526_v19 = vld [vmem:[%s22181_s7 + $0xd0] sm:$0xff] }
 0x545   :  { %15574 = vmatprep.subr.mxu0 %v12484_v48  ;;  %15499 = vmatprep.mubr.msk.f32.mxu1 %vm1928_vm4, %v6093_v57  ;;  %v12525_v57 = vld [vmem:[%s22181_s7 + $0xc8] sm:$0xff] }
 0x546   :  { %15533 = vmatprep.mubr.msk.f32.mxu0 %vm1928_vm4, %v6268_v43  ;;  %15543 = vmatprep.subr.mxu1 %v12466_v17  ;;  %v7003_v43 = vld [vmem:[%s22181_s7 + $0x48] sm:$0xff] }
 0x547   :  { %15575 = vmatpush3.msra.mxu0 %v12484_v48  ;;  %15544 = vmatpush3.msra.mxu1 %v12466_v17  ;;  %v7005_v48 = vld [vmem:[%s22181_s7 + $0x58] sm:$0xff]  ;;  %v7004_v17 = vld [vmem:[%s22181_s7 + $0x50] sm:$0xff] }
 0x548   :  { %15576 = vmatprep.subr.mxu0 %v12483_v28  ;;  %15500 = vmatmul.mubr.msk.f32.gmra.mxu1 %vm1928_vm4, %v6094_v2  ;;  %v12523_v2 = vld [vmem:[%s22181_s7 + $0xb8] sm:$0xff] }
 0x549   :  { %15577 = vmatpush3.msra.mxu0 %v12483_v28  ;;  %15545 = vmatprep.subr.mxu1 %v12465_v55  ;;  %v12524_v28 = vld [vmem:[%s22181_s7 + $0xc0] sm:$0xff] }
 0x54a   :  { %15534 = vmatmul.mubr.msk.f32.gmra.mxu0 %vm1928_vm4, %v6269_v3  ;;  %15578 = vmatprep.subr.mxu0 %v12482_v44  ;;  %v12522_v3 = vld [vmem:[%s22181_s7 + $0xb0] sm:$0xff] }
 0x54b   :  { %15502 = vmatprep.mubr.msk.f32.mxu1 %vm1928_vm4, %v6095_v6  ;;  %15536 = vmatprep.mubr.msk.f32.mxu0 %vm1928_vm4, %v6270_v62  ;;  %v12521_v6 = vld [vmem:[%s22181_s7 + $0xa8] sm:$0xff] }
 0x54c   :  { %15546 = vmatpush3.msra.mxu1 %v12465_v55  ;;  %15579 = vmatpush3.msra.mxu0 %v12482_v44  ;;  %v7002_v55 = vld [vmem:[%s22181_s7 + $0x40] sm:$0xff]  ;;  %v7001_v44 = vld [vmem:[%s22181_s7 + $0x38] sm:$0xff]  ;;  %v6999_v62 = vld [vmem:[%s22181_s7 + $0x28] sm:$0xff] }
 0x54d   :  { %15547 = vmatprep.subr.mxu1 %v12464_v42  ;;  %15580 = vmatprep.subr.mxu0 %v12481_v60 }
 0x54e   :  { %15548 = vmatpush3.msra.mxu1 %v12464_v42  ;;  %15581 = vmatpush3.msra.mxu0 %v12481_v60  ;;  %v7000_v42 = vld [vmem:[%s22181_s7 + $0x30] sm:$0xff]  ;;  %v12520_v60 = vld [vmem:[%s22181_s7 + $0xa0] sm:$0xff] }
 0x54f   :  { %15503 = vmatmul.mubr.msk.f32.gmra.mxu1 %vm1928_vm4, %v6096_v46  ;;  %15537 = vmatmul.mubr.msk.f32.gmra.mxu0 %vm1928_vm4, %v6271_v20  ;;  %v12519_v46 = vld [vmem:[%s22181_s7 + $0x98] sm:$0xff] }
 0x550   :  { %15582 = vmatprep.subr.mxu0 %v12480_v47  ;;  %15505 = vmatprep.mubr.msk.f32.mxu1 %vm1928_vm4, %v6097_v30  ;;  %v6997_v20 = vld [vmem:[%s22181_s7 + $0x18] sm:$0xff]  ;;  %v6996_v30 = vld [vmem:[%s22181_s7 + $0x10] sm:$0xff] }
 0x551   :  { %15549 = vmatprep.subr.mxu1 %v12463_v9  ;;  %15583 = vmatpush3.msra.mxu0 %v12480_v47  ;;  %v6998_v47 = vld [vmem:[%s22181_s7 + $0x20] sm:$0xff] }
 0x552   :  { %15586 = vmatprep.mubr.msk.f32.mxu0 %vm1928_vm4, %v6608_v54  ;;  %15550 = vmatpush3.msra.mxu1 %v12463_v9  ;;  %v12518_v9 = vld [vmem:[%s22181_s7 + $0x90] sm:$0xff]  ;;  %v12516_v54 = vld [vmem:[%s22181_s7 + $0x80] sm:$0xff] }
 0x553   :  { %15584 = vmatprep.subr.mxu0 %v12479_v13  ;;  %15551 = vmatprep.subr.mxu1 %v12462_v25 }
 0x554   :  { %15585 = vmatpush3.msra.mxu0 %v12479_v13  ;;  %15506 = vmatmul.mubr.msk.f32.gmra.mxu1 %vm1928_vm4, %v6098_v29  ;;  %v12517_v13 = vld [vmem:[%s22181_s7 + $0x88] sm:$0xff]  ;;  %v6994_v29 = vld [vmem:[%s22181_s7] sm:$0xff] }
 0x555   :  { %15552 = vmatpush3.msra.mxu1 %v12462_v25  ;;  %15587 = vmatmul.mubr.msk.f32.vlgmr.msra.gmra.mxu0 %vm1928_vm4, %v6609_v59  ;;  %v6995_v25 = vld [vmem:[%s22181_s7 + $0x8] sm:$0xff]  ;;  %v12549_v59 = vld [vmem:[%s22181_s7 + $0x178] sm:$0xff] }
 0x556   :  { %15555 = vmatprep.mubr.msk.f32.mxu1 %vm1928_vm4, %v6435_v51  ;;  %15589 = vmatprep.mubr.msk.f32.mxu0 %vm1928_vm4, %v6610_v37 }
 0x557   :  { %15553 = vmatprep.subr.mxu1 %v12461_v27 }
 0x558   :  { %15554 = vmatpush3.msra.mxu1 %v12461_v27  ;;  %v12566_v27 = vld [vmem:[%s22181_s7 + $0x1f8] sm:$0xff] }
 0x559   :  { %15556 = vmatmul.mubr.msk.f32.vlgmr.msra.gmra.mxu1 %vm1928_vm4, %v6436_v34  ;;  %15590 = vmatmul.mubr.msk.f32.gmra.mxu0 %vm1928_vm4, %v6611_v5 }
 0x55a   :  { %15601 = vmatprep.subr.mxu1 %v12504_v33  ;;  %15558 = vmatprep.mubr.msk.f32.mxu1 %vm1928_vm4, %v6437_v14 }
 0x55b   :  { %15592 = vmatprep.mubr.msk.f32.mxu0 %vm1928_vm4, %v6612_v58  ;;  %15602 = vmatpush3.msra.mxu1 %v12504_v33 }
 0x55c   :  { %15603 = vmatprep.subr.mxu1 %v12503_v24 }
 0x55d   :  { %15559 = vmatmul.mubr.msk.f32.gmra.mxu1 %vm1928_vm4, %v6438_v0  ;;  %15593 = vmatmul.mubr.msk.f32.gmra.mxu0 %vm1928_vm4, %v6613_v35 }
 0x55e   :  { %15604 = vmatpush3.msra.mxu1 %v12503_v24  ;;  %15561 = vmatprep.mubr.msk.f32.mxu1 %vm1928_vm4, %v6439_v52 }
 0x55f   :  { %15595 = vmatprep.mubr.msk.f32.mxu0 %vm1928_vm4, %v6614_v21  ;;  %15605 = vmatprep.subr.mxu1 %v12502_v26 }
 0x560   :  { %15606 = vmatpush3.msra.mxu1 %v12502_v26 }
 0x561   :  { %15562 = vmatmul.mubr.msk.f32.gmra.mxu1 %vm1928_vm4, %v6440_v53  ;;  %15596 = vmatmul.mubr.msk.f32.gmra.mxu0 %vm1928_vm4, %v6615_v32 }
 0x562   :  { %15607 = vmatprep.subr.mxu1 %v12501_v61  ;;  %15564 = vmatprep.mubr.msk.f32.mxu1 %vm1928_vm4, %v6441_v16 }
 0x563   :  { %15598 = vmatprep.mubr.msk.f32.mxu0 %vm1928_vm4, %v6616_v4  ;;  %15608 = vmatpush3.msra.mxu1 %v12501_v61 }
 0x564   :  { %15609 = vmatprep.subr.mxu1 %v12500_v23 }
 0x565   :  { %15610 = vmatpush3.msra.mxu1 %v12500_v23  ;;  %15599 = vmatmul.mubr.msk.f32.gmra.mxu0 %vm1928_vm4, %v6617_v63 }
 0x566   :  { %15565 = vmatmul.mubr.msk.f32.gmra.mxu1 %vm1928_vm4, %v6442_v8  ;;  %15611 = vmatprep.subr.mxu1 %v12499_v10 }
 0x567   :  { %15567 = vmatprep.mubr.msk.f32.mxu1 %vm1928_vm4, %v6443_v7  ;;  %15612 = vmatpush3.msra.mxu1 %v12499_v10 }
 0x568   :  { %15613 = vmatprep.subr.mxu1 %v12498_v50  ;;  %7100 = vmatprep.mubr.f32.mxu0 %v22200_v39 }
 0x569   :  { %15614 = vmatpush3.msra.mxu1 %v12498_v50 }
 0x56a   :  { %15568 = vmatmul.mubr.msk.f32.gmra.mxu1 %vm1928_vm4, %v6444_v12  ;;  %15615 = vmatprep.subr.mxu1 %v12497_v45 }
 0x56b   :  { %15617 = vmatprep.mubr.msk.f32.mxu1 %vm1928_vm4, %v19235_v56  ;;  %15616 = vmatpush3.msra.mxu1 %v12497_v45  ;;  %v6788_v56 = vld [vmem:[#allocation3 + $0x50] sm:$0xff] }
 0x56e   :  { %15618 = vmatmul.mubr.msk.f32.vlgmr.msra.gmra.mxu1 %vm1928_vm4, %v19253_v18  ;;  %v6790_v18 = vld [vmem:[#allocation3 + $0x60] sm:$0xff] }
 0x56f   :  { %15620 = vmatprep.mubr.msk.f32.mxu1 %vm1928_vm4, %v19271_v31  ;;  %v12531_v31 = vld [vmem:[%s22181_s7 + $0xf8] sm:$0xff] }
 0x570   :  { %7052 = vmatprep.subr.mxu0 %v12531_v31 }
 0x572   :  { %15621 = vmatmul.mubr.msk.f32.gmra.mxu1 %vm1928_vm4, %v19291_v49  ;;  %v7009_v49 = vld [vmem:[%s22181_s7 + $0x78] sm:$0xff] }
 0x573   :  { %15623 = vmatprep.mubr.msk.f32.mxu1 %vm1928_vm4, %v19307_v40  ;;  %v12530_v40 = vld [vmem:[%s22181_s7 + $0xf0] sm:$0xff]  ;;  %7129 = vmatprep.subr.mxu1 %v7009_v49 }
 0x574   :  { %7053 = vmatpush1.msra.mxu0 %v12530_v40 }
 0x576   :  { %15624 = vmatmul.mubr.msk.f32.gmra.mxu1 %vm1928_vm4, %v19316_v41  ;;  %v7008_v41 = vld [vmem:[%s22181_s7 + $0x70] sm:$0xff] }
 0x577   :  { %15626 = vmatprep.mubr.msk.f32.mxu1 %vm1928_vm4, %v19323_v15  ;;  %v12529_v15 = vld [vmem:[%s22181_s7 + $0xe8] sm:$0xff]  ;;  %7130 = vmatpush1.msra.mxu1 %v7008_v41 }
 0x578   :  { %7054 = vmatprep.subr.mxu0 %v12529_v15  ;;  %7131 = vmatprep.subr.mxu1 %v7007_v11 }
 0x579   :  { %7055 = vmatpush1.msra.mxu0 %v12528_v1  ;;  %7132 = vmatpush1.msra.mxu1 %v7006_v22 }
 0x57a   :  { %15627 = vmatmul.mubr.msk.f32.gmra.mxu1 %vm1928_vm4, %v6788_v56  ;;  %7056 = vmatprep.subr.mxu0 %v12527_v36 }
 0x57b   :  { %15629 = vmatprep.mubr.msk.f32.mxu1 %vm1928_vm4, %v6789_v38  ;;  %7133 = vmatprep.subr.mxu1 %v7005_v48 }
 0x57c   :  { %7057 = vmatpush1.msra.mxu0 %v12526_v19  ;;  %7134 = vmatpush1.msra.mxu1 %v7004_v17 }
 0x57d   :  { %7058 = vmatprep.subr.mxu0 %v12525_v57  ;;  %7135 = vmatprep.subr.mxu1 %v7003_v43 }
 0x57e   :  { %15630 = vmatmul.mubr.msk.f32.gmra.mxu1 %vm1928_vm4, %v6790_v18  ;;  %7059 = vmatpush1.msra.mxu0 %v12524_v28 }
 0x57f   :  { %7177 = vmatprep.mubr.f32.mxu1 %v22200_v39  ;;  %7136 = vmatpush1.msra.mxu1 %v7002_v55 }
 0x580   :  { %7060 = vmatprep.subr.mxu0 %v12523_v2  ;;  %7137 = vmatprep.subr.mxu1 %v7001_v44 }
 0x581   :  { %7061 = vmatpush1.msra.mxu0 %v12522_v3  ;;  %7138 = vmatpush1.msra.mxu1 %v7000_v42 }
 0x582   :  { %7062 = vmatprep.subr.mxu0 %v12521_v6  ;;  %7139 = vmatprep.subr.mxu1 %v6999_v62 }
 0x583   :  { %7063 = vmatpush1.msra.mxu0 %v12520_v60  ;;  %7140 = vmatpush1.msra.mxu1 %v6998_v47 }
 0x584   :  { %7064 = vmatprep.subr.mxu0 %v12519_v46  ;;  %7141 = vmatprep.subr.mxu1 %v6997_v20 }
 0x585   :  { %7065 = vmatpush1.msra.mxu0 %v12518_v9  ;;  %7142 = vmatpush1.msra.mxu1 %v6996_v30 }
 0x586   :  { %7066 = vmatprep.subr.mxu0 %v12517_v13  ;;  %7143 = vmatprep.subr.mxu1 %v6995_v25 }
 0x587   :  { %7067 = vmatpush1.msra.mxu0 %v12516_v54  ;;  %7144 = vmatpush1.msra.mxu1 %v6994_v29 }
 0x588   :  { %7225 = vmatprep.subr.mxu0 %v12549_v59  ;;  %7323 = vmatprep.subr.mxu1 %v12566_v27 }
 0x5bf   :  { %v15402_v51 = vpop.f32.mrf.mxu0 }
 0x5c1   :  { %v19628_v37 = vpop.f32.mrf.mxu0 }
 0x5c2   :  { %v15371_v33 = vpop.f32.mrf.mxu1 }
 0x5c3   :  { %v5700_v27 = vadd.f32 %v15402_v51, %v15371_v33 }
 0x5c4   :  { %v5549_v5 = vpop.f32.mrf.mxu1 }
 0x5c7   :  { %v19630_v34 = vpop.f32.mrf.mxu0 }
 0x5c9   :  { %v19632_v14 = vpop.f32.mrf.mxu0 }
 0x5ca   :  { %v15374_v24 = vpop.f32.mrf.mxu1 }
 0x5cc   :  { %v19636_v0 = vpop.f32.mrf.mxu1 }
 0x5cf   :  { %v19634_v58 = vpop.f32.mrf.mxu0 }
 0x5d1   :  { %v19638_v35 = vpop.f32.mrf.mxu0 }
 0x5d2   :  { %v19640_v26 = vpop.f32.mrf.mxu1 }
 0x5d3   :  { %v5720_v51 = vadd.f32 %v19634_v58, %v19640_v26 }
 0x5d4   :  { %v19644_v21 = vpop.f32.mrf.mxu1 }
 0x5d7   :  { %v19642_v52 = vpop.f32.mrf.mxu0 }
 0x5d9   :  { %v19646_v61 = vpop.f32.mrf.mxu0 }
 0x5da   :  { %v19648_v53 = vpop.f32.mrf.mxu1 }
 0x5dc   :  { %v19652_v16 = vpop.f32.mrf.mxu1 }
 0x5dd   :  { %v5725_v26 = vadd.f32 %v19646_v61, %v19652_v16 }
 0x5df   :  { %v19650_v32 = vpop.f32.mrf.mxu0 }
 0x5e1   :  { %v19654_v23 = vpop.f32.mrf.mxu0 }
 0x5e2   :  { %v19656_v4 = vpop.f32.mrf.mxu1 }
 0x5e3   :  { %v15464_v10 = vpop.f32.mrf.mxu0 }
 0x5e4   :  { %v19658_v63 = vpop.f32.mrf.mxu1 }
 0x5e5   :  { %v6030_v8 = vpop.f32.mrf.mxu0  ;;  %v5735_v16 = vadd.f32 %v19654_v23, %v19658_v63  ;;  %v19734_v23 = vld [vmem:[%s22180_s6] ss:$0 sm:$0xff] }
 0x5e6   :  { %v15433_v50 = vpop.f32.mrf.mxu1 }
 0x5e7   :  { %v15467_v7 = vpop.f32.mrf.mxu0 }
 0x5e8   :  { %v5857_v45 = vpop.f32.mrf.mxu1 }
 0x5e9   :  { %v19660_v12 = vpop.f32.mrf.mxu0 }
 0x5ea   :  { %v15436_v56 = vpop.f32.mrf.mxu1 }
 0x5eb   :  { %v19662_v38 = vpop.f32.mrf.mxu0 }
 0x5ec   :  { %v5867_v18 = vpop.f32.mrf.mxu1 }
 0x5ed   :  { %v19664_v31 = vpop.f32.mrf.mxu0 }
 0x5ef   :  { %v15439_v49 = vpop.f32.mrf.mxu1 }
 0x5f0   :  { %v19666_v40 = vpop.f32.mrf.mxu0 }
 0x5f1   :  { %v5877_v41 = vpop.f32.mrf.mxu1 }
 0x5f2   :  { %v19668_v15 = vpop.f32.mrf.mxu0 }
 0x5f3   :  { %22276 = vst [vmem:[#allocation15_spill] sm:$0xff] %v19668_v15 }
 0x5f5   :  { %v15442_v11 = vpop.f32.mrf.mxu1  ;;  %v19670_v1 = vpop.f32.mrf.mxu0 }
 0x5f6   :  { %22277 = vst [vmem:[#allocation17_spill] sm:$0xff] %v19670_v1  ;;  %v5710_v1 = vadd.f32 %v19630_v34, %v15374_v24  ;;  %v5911_v34 = vadd.f32 %v15439_v49, %v5720_v51 }
 0x5f7   :  { %v19672_v22 = vpop.f32.mrf.mxu1  ;;  %v19674_v36 = vpop.f32.mrf.mxu0 }
 0x5f8   :  { %22278 = vst [vmem:[#allocation18_spill] sm:$0xff] %v19674_v36  ;;  %v5907_v36 = vadd.f32 %v15433_v50, %v5700_v27  ;;  %v5715_v50 = vadd.f32 %v19638_v35, %v19644_v21  ;;  %v6084_v35 = vadd.f32 %v19662_v38, %v5911_v34 }
 0x5fa   :  { %v19676_v48 = vpop.f32.mrf.mxu1 }
 0x5fb   :  { %v15526_v19 = vpop.f32.mrf.mxu0 }
 0x5fc   :  { %v19678_v17 = vpop.f32.mrf.mxu1 }
 0x5fd   :  { %v6376_v57 = vpop.f32.mrf.mxu0 }
 0x5ff   :  { %v15495_v43 = vpop.f32.mrf.mxu1  ;;  %v19680_v28 = vpop.f32.mrf.mxu0 }
 0x601   :  { %v6203_v55 = vpop.f32.mrf.mxu1  ;;  %v19682_v2 = vpop.f32.mrf.mxu0 }
 0x603   :  { %v15498_v44 = vpop.f32.mrf.mxu1 }
 0x604   :  { %v19684_v3 = vpop.f32.mrf.mxu0 }
 0x605   :  { %22279 = vst [vmem:[#allocation11_spill] sm:$0xff] %v19684_v3  ;;  %v6213_v42 = vpop.f32.mrf.mxu1 }
 0x606   :  { %v19686_v6 = vpop.f32.mrf.mxu0 }
 0x607   :  { %22280 = vst [vmem:[#allocation6_spill] sm:$0xff] %v19686_v6 }
 0x608   :  { %v15501_v62 = vpop.f32.mrf.mxu1 }
 0x60a   :  { %v19688_v60 = vpop.f32.mrf.mxu0  ;;  %v6223_v47 = vpop.f32.mrf.mxu1 }
 0x60b   :  { %22281 = vst [vmem:[#allocation19_spill] sm:$0xff] %v19688_v60  ;;  %v5695_v60 = vadd.f32 %v19628_v37, %v5549_v5 }
 0x60c   :  { %v19690_v46 = vpop.f32.mrf.mxu0 }
 0x60d   :  { %22282 = vst [vmem:[#allocation20_spill] sm:$0xff] %v19690_v46 }
 0x60f   :  { %v19692_v20 = vpop.f32.mrf.mxu1  ;;  %v19694_v9 = vpop.f32.mrf.mxu0 }
 0x610   :  { %22283 = vst [vmem:[#allocation7_spill] sm:$0xff] %v19692_v20  ;;  %22284 = vst [vmem:[#allocation8_spill] sm:$0xff] %v19694_v9  ;;  %v5906_v9 = vadd.f32 %v5857_v45, %v5695_v60 }
 0x611   :  { %v19696_v30 = vpop.f32.mrf.mxu1  ;;  %v19700_v25 = vpop.f32.mrf.mxu0 }
 0x612   :  { %22285 = vst [vmem:[#allocation21_spill] sm:$0xff] %v19696_v30  ;;  %22287 = vst [vmem:[#allocation9_spill] sm:$0xff] %v19700_v25  ;;  %v5909_v30 = vadd.f32 %v15436_v56, %v5710_v1  ;;  %v6080_v25 = vadd.f32 %v15464_v10, %v5907_v36  ;;  %v6079_v37 = vadd.f32 %v6030_v8, %v5906_v9 }
 0x614   :  { %v19698_v13 = vpop.f32.mrf.mxu1  ;;  %v6253_v20 = vadd.f32 %v15495_v43, %v6080_v25  ;;  %v6252_v24 = vadd.f32 %v6203_v55, %v6079_v37  ;;  %v6082_v45 = vadd.f32 %v15467_v7, %v5909_v30  ;;  %v22293_v30 = vld [vmem:[#allocation17_spill] sm:$0xff] }
 0x615   :  { %22286 = vst [vmem:[#allocation22_spill] sm:$0xff] %v19698_v13  ;;  %v15588_v29 = vpop.f32.mrf.mxu0  ;;  %v5705_v13 = vadd.f32 %v19632_v14, %v19636_v0  ;;  %v5730_v14 = vadd.f32 %v19642_v52, %v19648_v53  ;;  %v5910_v0 = vadd.f32 %v5877_v41, %v5715_v50  ;;  %v5740_v52 = vadd.f32 %v19650_v32, %v19656_v4 }
 0x616   :  { %v19702_v54 = vpop.f32.mrf.mxu1  ;;  %v6255_v56 = vadd.f32 %v15498_v44, %v6082_v45  ;;  %v6426_v58 = vadd.f32 %v15526_v19, %v6253_v20  ;;  %v6425_v7 = vadd.f32 %v6376_v57, %v6252_v24  ;;  %v5912_v53 = vadd.f32 %v19672_v22, %v5725_v26 }
 0x617   :  { %22288 = vst [vmem:[#allocation14_spill] sm:$0xff] %v19702_v54  ;;  %v6722_v46 = vpop.f32.mrf.mxu0  ;;  %v5908_v33 = vadd.f32 %v5867_v18, %v5705_v13  ;;  %v5913_v8 = vadd.f32 %v15442_v11, %v5730_v14  ;;  %v6083_v41 = vadd.f32 %v19664_v31, %v5910_v0  ;;  %v6257_v19 = vadd.f32 %v15501_v62, %v6084_v35  ;;  %v22290_v62 = vld [vmem:[#allocation15_spill] sm:$0xff]  ;;  %v22299_v35 = vld [vmem:[#allocation20_spill] sm:$0xff] }
 0x618   :  { %v6428_v61 = vadd.f32 %v19680_v28, %v6255_v56  ;;  %v5915_v38 = vadd.f32 %v19676_v48, %v5740_v52  ;;  %v5914_v31 = vadd.f32 %v19678_v17, %v5735_v16  ;;  %v6085_v28 = vadd.f32 %v22290_v62, %v5912_v53  ;;  %v22294_v17 = vld [vmem:[#allocation6_spill] sm:$0xff]  ;;  %v22297_v14 = vld [vmem:[#allocation19_spill] sm:$0xff] }
 0x619   :  { %v15557_v59 = vpop.f32.mrf.mxu1  ;;  %v15591_v15 = vpop.f32.mrf.mxu0  ;;  %v6081_v1 = vadd.f32 %v19660_v12, %v5908_v33  ;;  %v6256_v11 = vadd.f32 %v6223_v47, %v6083_v41  ;;  %v6086_v57 = vadd.f32 %v19666_v40, %v5913_v8  ;;  %v22291_v40 = vld [vmem:[#allocation11_spill] sm:$0xff] }
 0x61a   :  { %v6599_v21 = vadd.f32 %v15557_v59, %v6426_v58  ;;  %v6430_v48 = vadd.f32 %v22291_v40, %v6257_v19  ;;  %v6088_v13 = vadd.f32 %v22293_v30, %v5915_v38  ;;  %v22300_v19 = vld [vmem:[#allocation8_spill] sm:$0xff] }
 0x61b   :  { %v6549_v39 = vpop.f32.mrf.mxu1  ;;  %v6732_v60 = vpop.f32.mrf.mxu0  ;;  %v6254_v36 = vadd.f32 %v6213_v42, %v6081_v1  ;;  %v22289_v42 = vld [vmem:[#allocation7_spill] sm:$0xff]  ;;  %v6429_v25 = vadd.f32 %v22294_v17, %v6256_v11 }
 0x61c   :  { %v6598_v43 = vadd.f32 %v6549_v39, %v6425_v7  ;;  %v6772_v22 = vadd.f32 %v15588_v29, %v6599_v21  ;;  %v6259_v39 = vadd.f32 %v22289_v42, %v6086_v57  ;;  %v22295_v50 = vld [vmem:[#allocation22_spill] sm:$0xff]  ;;  %v22301_v57 = vld [vmem:[#allocation9_spill] sm:$0xff] }
 0x61d   :  { %v15560_v6 = vpop.f32.mrf.mxu1  ;;  %v15594_v49 = vpop.f32.mrf.mxu0  ;;  %v6427_v32 = vadd.f32 %v19682_v2, %v6254_v36  ;;  %v22292_v2 = vld [vmem:[#allocation21_spill] sm:$0xff]  ;;  %v6261_v34 = vadd.f32 %v22295_v50, %v6088_v13  ;;  %v12548_v50 = vld [vmem:[%s22181_s7 + $0x170] sm:$0xff] }
 0x61e   :  { %v6601_v44 = vadd.f32 %v15560_v6, %v6428_v61  ;;  %v6771_v47 = vadd.f32 %v6722_v46, %v6598_v43  ;;  %v6258_v9 = vadd.f32 %v22292_v2, %v6085_v28  ;;  %v6432_v46 = vadd.f32 %v22297_v14, %v6259_v39  ;;  %v22298_v8 = vld [vmem:[#allocation14_spill] sm:$0xff]  ;;  %v6992_v14 = vld [vmem:[#allocation4] sm:$0x1] }
 0x61f   :  { %v6559_v3 = vpop.f32.mrf.mxu1  ;;  %v6742_v4 = vpop.f32.mrf.mxu0  ;;  %v6434_v43 = vadd.f32 %v22300_v19, %v6261_v34  ;;  %v12558_v19 = vld [vmem:[%s22181_s7 + $0x1b8] sm:$0xff] }
 0x620   :  { %v6600_v63 = vadd.f32 %v6559_v3, %v6427_v32  ;;  %v6774_v37 = vadd.f32 %v15591_v15, %v6601_v44  ;;  %v22296_v3 = vld [vmem:[#allocation18_spill] sm:$0xff]  ;;  %v6431_v21 = vadd.f32 %v22299_v35, %v6258_v9  ;;  %v12562_v35 = vld [vmem:[%s22181_s7 + $0x1d8] sm:$0xff] }
 0x621   :  { %v15563_v54 = vpop.f32.mrf.mxu1  ;;  %v15597_v27 = vpop.f32.mrf.mxu0  ;;  %v6087_v24 = vadd.f32 %v22296_v3, %v5914_v31 }
 0x622   :  { %v6603_v59 = vadd.f32 %v15563_v54, %v6430_v48  ;;  %v6773_v26 = vadd.f32 %v6732_v60, %v6600_v63 }
 0x623   :  { %v6569_v5 = vpop.f32.mrf.mxu1  ;;  %v6260_v54 = vadd.f32 %v22298_v8, %v6087_v24  ;;  %v6752_v15 = vpop.f32.mrf.mxu0 }
 0x624   :  { %v6602_v45 = vadd.f32 %v6569_v5, %v6429_v25  ;;  %v6776_v41 = vadd.f32 %v15594_v49, %v6603_v59 }
 0x625   :  { %v6433_v44 = vadd.f32 %v22301_v57, %v6260_v54  ;;  %v15600_v31 = vpop.f32.mrf.mxu0  ;;  %v12563_v54 = vld [vmem:[%s22181_s7 + $0x1e0] sm:$0xff] }
 0x626   :  { %v15566_v10 = vpop.f32.mrf.mxu1  ;;  %v6775_v16 = vadd.f32 %v6742_v4, %v6602_v45 }
 0x627   :  { %v6605_v36 = vadd.f32 %v15566_v10, %v6432_v46  ;;  %v12565_v46 = vld [vmem:[%s22181_s7 + $0x1f0] sm:$0xff] }
 0x628   :  { %v6579_v18 = vpop.f32.mrf.mxu1 }
 0x629   :  { %v6604_v38 = vadd.f32 %v6579_v18, %v6431_v21 }
 0x62a   :  { %v15569_v12 = vpop.f32.mrf.mxu1 }
 0x62b   :  { %v6607_v42 = vadd.f32 %v15569_v12, %v6434_v43  ;;  %v6777_v40 = vadd.f32 %v6752_v15, %v6604_v38  ;;  %v12543_v15 = vld [vmem:[%s22181_s7 + $0x148] sm:$0xff]  ;;  %v12540_v43 = vld [vmem:[%s22181_s7 + $0x130] sm:$0xff] }
 0x62c   :  { %v6589_v55 = vpop.f32.mrf.mxu1  ;;  %v12556_v38 = vld [vmem:[%s22181_s7 + $0x1a8] sm:$0xff] }
 0x62d   :  { %v6606_v4 = vadd.f32 %v6589_v55, %v6433_v44  ;;  %v6780_v9 = vadd.f32 %v15600_v31, %v6607_v42  ;;  %v12554_v44 = vld [vmem:[%s22181_s7 + $0x198] sm:$0xff]  ;;  %v12553_v31 = vld [vmem:[%s22181_s7 + $0x190] sm:$0xff]  ;;  %v12535_v42 = vld [vmem:[%s22181_s7 + $0x108] sm:$0xff] }
 0x62e   :  { %v15619_v20 = vpop.f32.mrf.mxu1 }
 0x62f   :  { %v6945_v6 = vadd.f32 %v15619_v20, %v6772_v22  ;;  %v6778_v22 = vadd.f32 %v15597_v27, %v6605_v36  ;;  %v12545_v36 = vld [vmem:[%s22181_s7 + $0x158] sm:$0xff] }
 0x630   :  { %v6895_v29 = vpop.f32.mrf.mxu1 }
 0x631   :  { %v6962_v51 = vadd.f32 %v19734_v23, %v6945_v6  ;;  %v6944_v33 = vadd.f32 %v6895_v29, %v6771_v47  ;;  %v6762_v6 = vpop.f32.mrf.mxu0 }
 0x632   :  { %v15622_v0 = vpop.f32.mrf.mxu1  ;;  %v6779_v13 = vadd.f32 %v6762_v6, %v6606_v4  ;;  %v12551_v4 = vld [vmem:[%s22181_s7 + $0x180] sm:$0xff]  ;;  %v12600_v6 = vld [vmem:[%s22181_s7 + $0x2f8] sm:$0xff] }
 0x633   :  { %v6972_v56 = vmax.f32 %v6962_v51, 0.0  ;;  %v6961_v1 = vadd.f32 %v19734_v23, %v6944_v33  ;;  %v6947_v58 = vadd.f32 %v15622_v0, %v6774_v37  ;;  %v7010_v33 = vld [vmem:[#allocation4 + $0x1] sm:$0x1]  ;;  %v12547_v0 = vld [vmem:[%s22181_s7 + $0x168] sm:$0xff] }
 0x634   :  { %v6905_v7 = vpop.f32.mrf.mxu1 }
 0x635   :  { %6983 = vst.msk [vmem:[#allocation4 + $0x58] sm:$0xff] %vm1928_vm4, %v6972_v56  ;;  %v6971_v52 = vmax.f32 %v6961_v1, 0.0  ;;  %v6964_v5 = vadd.f32 %v19734_v23, %v6947_v58  ;;  %v6946_v53 = vadd.f32 %v6905_v7, %v6773_v26  ;;  %v12564_v1 = vld [vmem:[%s22181_s7 + $0x1e8] sm:$0xff]  ;;  %v12546_v58 = vld [vmem:[%s22181_s7 + $0x160] sm:$0xff]  ;;  %v12561_v7 = vld [vmem:[%s22181_s7 + $0x1d0] sm:$0xff] }
 0x636   :  { %v15625_v61 = vpop.f32.mrf.mxu1 }
 0x637   :  { %6982 = vst.msk [vmem:[#allocation4 + $0x50] sm:$0xff] %vm1928_vm4, %v6971_v52  ;;  %v6974_v60 = vmax.f32 %v6964_v5, 0.0  ;;  %v6963_v10 = vadd.f32 %v19734_v23, %v6946_v53  ;;  %v6949_v11 = vadd.f32 %v15625_v61, %v6776_v41  ;;  %v12560_v52 = vld [vmem:[%s22181_s7 + $0x1c8] sm:$0xff]  ;;  %v12542_v5 = vld [vmem:[%s22181_s7 + $0x140] sm:$0xff]  ;;  %v12541_v41 = vld [vmem:[%s22181_s7 + $0x138] sm:$0xff] }
 0x638   :  { %v6915_v32 = vpop.f32.mrf.mxu1  ;;  %v12559_v53 = vld [vmem:[%s22181_s7 + $0x1c0] sm:$0xff]  ;;  %v12557_v61 = vld [vmem:[%s22181_s7 + $0x1b0] sm:$0xff] }
 0x639   :  { %6985 = vst.msk [vmem:[#allocation4 + $0x68] sm:$0xff] %vm1928_vm4, %v6974_v60  ;;  %v6973_v49 = vmax.f32 %v6963_v10, 0.0  ;;  %v6966_v39 = vadd.f32 %v19734_v23, %v6949_v11  ;;  %v6948_v62 = vadd.f32 %v6915_v32, %v6775_v16  ;;  %v12539_v16 = vld [vmem:[%s22181_s7 + $0x128] sm:$0xff]  ;;  %v12538_v60 = vld [vmem:[%s22181_s7 + $0x120] sm:$0xff]  ;;  %v12537_v11 = vld [vmem:[%s22181_s7 + $0x118] sm:$0xff] }
 0x63a   :  { %v15628_v18 = vpop.f32.mrf.mxu1  ;;  %v12555_v10 = vld [vmem:[%s22181_s7 + $0x1a0] sm:$0xff]  ;;  %v12536_v32 = vld [vmem:[%s22181_s7 + $0x110] sm:$0xff] }
 0x63b   :  { %6984 = vst.msk [vmem:[#allocation4 + $0x60] sm:$0xff] %vm1928_vm4, %v6973_v49  ;;  %v6976_v28 = vmax.f32 %v6966_v39, 0.0  ;;  %v6965_v20 = vadd.f32 %v19734_v23, %v6948_v62  ;;  %v6951_v63 = vadd.f32 %v15628_v18, %v6778_v22  ;;  %v12552_v49 = vld [vmem:[%s22181_s7 + $0x188] sm:$0xff]  ;;  %v12534_v39 = vld [vmem:[%s22181_s7 + $0x100] sm:$0xff] }
 0x63c   :  { %v6925_v48 = vpop.f32.mrf.mxu1 }
 0x63d   :  { %6987 = vst.msk [vmem:[#allocation4 + $0x78] sm:$0xff] %vm1928_vm4, %v6976_v28  ;;  %v6975_v12 = vmax.f32 %v6965_v20, 0.0  ;;  %v6968_v47 = vadd.f32 %v19734_v23, %v6951_v63  ;;  %v6950_v2 = vadd.f32 %v6925_v48, %v6777_v40  ;;  %v7184_v28 = vld [vmem:[#allocation4 + $0x2] sm:$0x1]  ;;  %v12583_v20 = vld [vmem:[%s22181_s7 + $0x278] sm:$0xff]  ;;  %v22302_v63 = vmov 0.0  }
 0x63e   :  { %v15631_v30 = vpop.f32.mrf.mxu1  ;;  %v7011_v55 = vld [vmem:[#allocation4 + $0x51] sm:$0x1]  ;;  %v6993_v17 = vld [vmem:[#allocation4 + $0x50] sm:$0x1]  ;;  %v7185_v57 = vld [vmem:[#allocation4 + $0x52] sm:$0x1] }
 0x63f   :  { %6986 = vst.msk [vmem:[#allocation4 + $0x70] sm:$0xff] %vm1928_vm4, %v6975_v12  ;;  %v6978_v25 = vmax.f32 %v6968_v47, 0.0  ;;  %v6967_v29 = vadd.f32 %v19734_v23, %v6950_v2  ;;  %v6953_v59 = vadd.f32 %v15631_v30, %v6780_v9  ;;  %v7031_v27 = vrot.slane %v7011_v55, 7  ;;  %v7283_v22 = vld [vmem:[#allocation4 + $0x53] sm:$0x1]  ;;  %v12581_v9 = vld [vmem:[%s22181_s7 + $0x268] sm:$0xff] }
 0x640   :  { %v6935_v51 = vpop.f32.mrf.mxu1  ;;  %v7109_v37 = vrot.slane %v6993_v17, 7  ;;  %v7205_v62 = vrot.slane %v7185_v57, 7  ;;  %v7303_v18 = vrot.slane %v7283_v22, 7  ;;  %v7282_v48 = vld [vmem:[#allocation4 + $0x3] sm:$0x1]  ;;  %v12582_v12 = vld [vmem:[%s22181_s7 + $0x270] sm:$0xff] }
 0x641   :  { %6989 = vst.msk [vmem:[#allocation4 + $0x88] sm:$0xff] %vm1928_vm4, %v6978_v25  ;;  %v6977_v34 = vmax.f32 %v6967_v29, 0.0  ;;  %v6970_v3 = vadd.f32 %v19734_v23, %v6953_v59  ;;  %v6952_v24 = vadd.f32 %v6935_v51, %v6779_v13  ;;  %v7033_v45 = vsel %vm7032_vm5, %v7031_v27, %v7010_v33  ;;  %v12599_v2 = vld [vmem:[%s22181_s7 + $0x2f0] sm:$0xff]  ;;  %v12598_v30 = vld [vmem:[%s22181_s7 + $0x2e8] sm:$0xff]  ;;  %v12580_v13 = vld [vmem:[%s22181_s7 + $0x260] sm:$0xff] }
 0x642   :  { %12532 = vmatmul.mubr.msk.f32.vlgmr.msra.gmra.mxu0 %vm1928_vm4, %v7033_v45  ;;  %v7110_v56 = vsel %vm7032_vm5, %v7109_v37, %v6992_v14  ;;  %v7206_v40 = vsel %vm7032_vm5, %v7205_v62, %v7184_v28  ;;  %v7304_v47 = vsel %vm7032_vm5, %v7303_v18, %v7282_v48  ;;  %v12597_v55 = vld [vmem:[%s22181_s7 + $0x2e0] sm:$0xff]  ;;  %v12579_v17 = vld [vmem:[%s22181_s7 + $0x258] sm:$0xff]  ;;  %v12578_v29 = vld [vmem:[%s22181_s7 + $0x250] sm:$0xff] }
 0x643   :  { %6988 = vst.msk [vmem:[#allocation4 + $0x80] sm:$0xff] %vm1928_vm4, %v6977_v34  ;;  %v6980_v26 = vmax.f32 %v6970_v3, 0.0  ;;  %v6969_v8 = vadd.f32 %v19734_v23, %v6952_v24  ;;  %12533 = vmatmul.mubr.msk.f32.vlgmr.msra.gmra.mxu1 %vm1928_vm4, %v7110_v56  ;;  %7226 = vmatpush1.msra.mxu0 %v12548_v50  ;;  %v12544_v23 = vld [vmem:[%s22181_s7 + $0x150] sm:$0xff]  ;;  %v12596_v25 = vld [vmem:[%s22181_s7 + $0x2d8] sm:$0xff]  ;;  %v12577_v27 = vld [vmem:[%s22181_s7 + $0x248] sm:$0xff] }
 0x644   :  { %7324 = vmatpush1.msra.mxu1 %v12565_v46  ;;  %7227 = vmatprep.subr.mxu0 %v12547_v0  ;;  %v12595_v59 = vld [vmem:[%s22181_s7 + $0x2d0] sm:$0xff]  ;;  %v12594_v51 = vld [vmem:[%s22181_s7 + $0x2c8] sm:$0xff]  ;;  %v12576_v33 = vld [vmem:[%s22181_s7 + $0x240] sm:$0xff] }
 0x645   :  { %6991 = vst.msk [vmem:[#allocation4 + $0x98] sm:$0xff] %vm1928_vm4, %v6980_v26  ;;  %v6979_v21 = vmax.f32 %v6969_v8, 0.0  ;;  %7325 = vmatprep.subr.mxu1 %v12564_v1  ;;  %7228 = vmatpush1.msra.mxu0 %v12546_v58  ;;  %v12593_v37 = vld [vmem:[%s22181_s7 + $0x2c0] sm:$0xff]  ;;  %v12575_v50 = vld [vmem:[%s22181_s7 + $0x238] sm:$0xff]  ;;  %v12574_v3 = vld [vmem:[%s22181_s7 + $0x230] sm:$0xff] }
 0x646   :  { %7326 = vmatpush1.msra.mxu1 %v12563_v54  ;;  %7229 = vmatprep.subr.mxu0 %v12545_v36  ;;  %v12592_v34 = vld [vmem:[%s22181_s7 + $0x2b8] sm:$0xff]  ;;  %v12591_v24 = vld [vmem:[%s22181_s7 + $0x2b0] sm:$0xff]  ;;  %v12573_v45 = vld [vmem:[%s22181_s7 + $0x228] sm:$0xff] }
 0x647   :  { %6990 = vst.msk [vmem:[#allocation4 + $0x90] sm:$0xff] %vm1928_vm4, %v6979_v21  ;;  %7327 = vmatprep.subr.mxu1 %v12562_v35  ;;  %7230 = vmatpush1.msra.mxu0 %v12544_v23  ;;  %v12590_v14 = vld [vmem:[%s22181_s7 + $0x2a8] sm:$0xff]  ;;  %v12572_v46 = vld [vmem:[%s22181_s7 + $0x220] sm:$0xff]  ;;  %v12571_v56 = vld [vmem:[%s22181_s7 + $0x218] sm:$0xff] }
 0x648   :  { %7328 = vmatpush1.msra.mxu1 %v12561_v7  ;;  %7231 = vmatprep.subr.mxu0 %v12543_v15  ;;  %v12589_v0 = vld [vmem:[%s22181_s7 + $0x2a0] sm:$0xff]  ;;  %v7381_v1 = vld [vmem:[#allocation4 + $0x54] sm:$0x1]  ;;  %v12588_v58 = vld [vmem:[%s22181_s7 + $0x298] sm:$0xff] }
 0x649   :  { %7329 = vmatprep.subr.mxu1 %v12560_v52  ;;  %7232 = vmatpush1.msra.mxu0 %v12542_v5  ;;  %v12570_v26 = vld [vmem:[%s22181_s7 + $0x210] sm:$0xff]  ;;  %v12569_v36 = vld [vmem:[%s22181_s7 + $0x208] sm:$0xff]  ;;  %v12568_v23 = vld [vmem:[%s22181_s7 + $0x200] sm:$0xff]  ;;  %v7401_v21 = vrot.slane %v7381_v1, 7 }
 0x64a   :  { %7330 = vmatpush1.msra.mxu1 %v12559_v53  ;;  %7233 = vmatprep.subr.mxu0 %v12541_v41  ;;  %v7479_v8 = vld [vmem:[#allocation4 + $0x55] sm:$0x1]  ;;  %v12586_v35 = vld [vmem:[%s22181_s7 + $0x288] sm:$0xff]  ;;  %v12585_v7 = vld [vmem:[%s22181_s7 + $0x280] sm:$0xff] }
 0x64b   :  { %7331 = vmatprep.subr.mxu1 %v12558_v19  ;;  %7234 = vmatpush1.msra.mxu0 %v12540_v43  ;;  %v12587_v54 = vld [vmem:[%s22181_s7 + $0x290] sm:$0xff]  ;;  %v7499_v15 = vrot.slane %v7479_v8, 7  ;;  %v7380_v52 = vld [vmem:[#allocation4 + $0x4] sm:$0x1]  ;;  %v12617_v5 = vld [vmem:[%s22181_s7 + $0x378] sm:$0xff] }
 0x64c   :  { %7332 = vmatpush1.msra.mxu1 %v12557_v61  ;;  %7235 = vmatprep.subr.mxu0 %v12539_v16  ;;  %v7402_v53 = vsel %vm7032_vm5, %v7401_v21, %v7380_v52  ;;  %v7478_v41 = vld [vmem:[#allocation4 + $0x5] sm:$0x1]  ;;  %v12634_v19 = vld [vmem:[%s22181_s7 + $0x3f8] sm:$0xff]  ;;  %v12616_v43 = vld [vmem:[%s22181_s7 + $0x370] sm:$0xff] }
 0x64d   :  { %7333 = vmatprep.subr.mxu1 %v12556_v38  ;;  %7236 = vmatpush1.msra.mxu0 %v12538_v60  ;;  %v7500_v61 = vsel %vm7032_vm5, %v7499_v15, %v7478_v41  ;;  %v12633_v16 = vld [vmem:[%s22181_s7 + $0x3f0] sm:$0xff]  ;;  %v12615_v38 = vld [vmem:[%s22181_s7 + $0x368] sm:$0xff]  ;;  %v12613_v57 = vld [vmem:[%s22181_s7 + $0x358] sm:$0xff] }
 0x64e   :  { %7334 = vmatpush1.msra.mxu1 %v12555_v10  ;;  %7237 = vmatprep.subr.mxu0 %v12537_v11  ;;  %v12632_v60 = vld [vmem:[%s22181_s7 + $0x3e8] sm:$0xff]  ;;  %v12614_v10 = vld [vmem:[%s22181_s7 + $0x360] sm:$0xff]  ;;  %v12629_v22 = vld [vmem:[%s22181_s7 + $0x3d0] sm:$0xff] }
 0x64f   :  { %7335 = vmatprep.subr.mxu1 %v12554_v44  ;;  %7238 = vmatpush1.msra.mxu0 %v12536_v32  ;;  %v12631_v11 = vld [vmem:[%s22181_s7 + $0x3e0] sm:$0xff]  ;;  %v12630_v44 = vld [vmem:[%s22181_s7 + $0x3d8] sm:$0xff]  ;;  %v12612_v32 = vld [vmem:[%s22181_s7 + $0x350] sm:$0xff] }
 0x650   :  { %7336 = vmatpush1.msra.mxu1 %v12553_v31  ;;  %7239 = vmatprep.subr.mxu0 %v12535_v42  ;;  %v12611_v31 = vld [vmem:[%s22181_s7 + $0x348] sm:$0xff]  ;;  %v12609_v62 = vld [vmem:[%s22181_s7 + $0x338] sm:$0xff]  ;;  %v12608_v18 = vld [vmem:[%s22181_s7 + $0x330] sm:$0xff] }
 0x651   :  { %7337 = vmatprep.subr.mxu1 %v12552_v49  ;;  %7240 = vmatpush1.msra.mxu0 %v12534_v39  ;;  %v12628_v42 = vld [vmem:[%s22181_s7 + $0x3c8] sm:$0xff]  ;;  %v12610_v49 = vld [vmem:[%s22181_s7 + $0x340] sm:$0xff]  ;;  %v12625_v28 = vld [vmem:[%s22181_s7 + $0x3b0] sm:$0xff] }
 0x652   :  { %7273 = vmatprep.mubr.f32.mxu0 %v22302_v63  ;;  %7338 = vmatpush1.msra.mxu1 %v12551_v4  ;;  %v12627_v39 = vld [vmem:[%s22181_s7 + $0x3c0] sm:$0xff]  ;;  %v12626_v4 = vld [vmem:[%s22181_s7 + $0x3b8] sm:$0xff]  ;;  %v12663_v8 = vld [vmem:[%s22181_s7 + $0x4d0] sm:$0xff] }
 0x653   :  { %7371 = vmatprep.mubr.f32.mxu1 %v22302_v63  ;;  %12550 = vmatmul.mubr.msk.f32.vlgmr.msra.gmra.mxu0 %vm1928_vm4, %v7206_v40  ;;  %v12624_v40 = vld [vmem:[%s22181_s7 + $0x3a8] sm:$0xff]  ;;  %v12606_v48 = vld [vmem:[%s22181_s7 + $0x320] sm:$0xff]  ;;  %v12647_v1 = vld [vmem:[%s22181_s7 + $0x458] sm:$0xff] }
 0x654   :  { %12567 = vmatmul.mubr.msk.f32.vlgmr.msra.gmra.mxu1 %vm1928_vm4, %v7304_v47  ;;  %7421 = vmatprep.subr.mxu0 %v12583_v20  ;;  %v12607_v20 = vld [vmem:[%s22181_s7 + $0x328] sm:$0xff]  ;;  %v7577_v47 = vld [vmem:[#allocation4 + $0x56] sm:$0x1]  ;;  %v12643_v21 = vld [vmem:[%s22181_s7 + $0x438] sm:$0xff] }
 0x655   :  { %7519 = vmatprep.subr.mxu1 %v12600_v6  ;;  %7422 = vmatpush1.msra.mxu0 %v12582_v12  ;;  %v12623_v6 = vld [vmem:[%s22181_s7 + $0x3a0] sm:$0xff]  ;;  %v12605_v12 = vld [vmem:[%s22181_s7 + $0x318] sm:$0xff]  ;;  %v12642_v15 = vld [vmem:[%s22181_s7 + $0x430] sm:$0xff] }
 0x656   :  { %7520 = vmatpush1.msra.mxu1 %v12599_v2  ;;  %7423 = vmatprep.subr.mxu0 %v12581_v9  ;;  %v12622_v2 = vld [vmem:[%s22181_s7 + $0x398] sm:$0xff]  ;;  %v12604_v9 = vld [vmem:[%s22181_s7 + $0x310] sm:$0xff]  ;;  %v12640_v41 = vld [vmem:[%s22181_s7 + $0x420] sm:$0xff] }
 0x657   :  { %7521 = vmatprep.subr.mxu1 %v12598_v30  ;;  %7424 = vmatpush1.msra.mxu0 %v12580_v13  ;;  %v7675_v30 = vld [vmem:[#allocation4 + $0x5b] sm:$0x1]  ;;  %v12621_v13 = vld [vmem:[%s22181_s7 + $0x390] sm:$0xff] }
 0x658   :  { %7522 = vmatpush1.msra.mxu1 %v12597_v55  ;;  %7425 = vmatprep.subr.mxu0 %v12579_v17  ;;  %v12603_v55 = vld [vmem:[%s22181_s7 + $0x308] sm:$0xff]  ;;  %v12659_v52 = vld [vmem:[%s22181_s7 + $0x4b0] sm:$0xff] }
 0x659   :  { %7523 = vmatprep.subr.mxu1 %v12596_v25  ;;  %7426 = vmatpush1.msra.mxu0 %v12578_v29  ;;  %v12620_v17 = vld [vmem:[%s22181_s7 + $0x388] sm:$0xff]  ;;  %v12602_v25 = vld [vmem:[%s22181_s7 + $0x300] sm:$0xff]  ;;  %v7597_v29 = vrot.slane %v7577_v47, 7  ;;  %v12681_v47 = vld [vmem:[%s22181_s7 + $0x558] sm:$0xff] }
 0x65a   :  { %7524 = vmatpush1.msra.mxu1 %v12595_v59  ;;  %7427 = vmatprep.subr.mxu0 %v12577_v27  ;;  %v12619_v59 = vld [vmem:[%s22181_s7 + $0x380] sm:$0xff]  ;;  %v7695_v27 = vrot.slane %v7675_v30, 7  ;;  %v12697_v30 = vld [vmem:[%s22181_s7 + $0x5d0] sm:$0xff] }
 0x65b   :  { %7525 = vmatprep.subr.mxu1 %v12594_v51  ;;  %7428 = vmatpush1.msra.mxu0 %v12576_v33  ;;  %v7576_v51 = vld [vmem:[#allocation4 + $0x6] sm:$0x1]  ;;  %v12651_v33 = vld [vmem:[%s22181_s7 + $0x478] sm:$0xff] }
 0x65c   :  { %7526 = vmatpush1.msra.mxu1 %v12593_v37  ;;  %7429 = vmatprep.subr.mxu0 %v12575_v50  ;;  %v7598_v37 = vsel %vm7032_vm5, %v7597_v29, %v7576_v51  ;;  %v7674_v50 = vld [vmem:[#allocation4 + $0xb] sm:$0x1]  ;;  %v12677_v29 = vld [vmem:[%s22181_s7 + $0x538] sm:$0xff]  ;;  %v12693_v51 = vld [vmem:[%s22181_s7 + $0x5b0] sm:$0xff] }
 0x65d   :  { %7527 = vmatprep.subr.mxu1 %v12592_v34  ;;  %7430 = vmatpush1.msra.mxu0 %v12574_v3  ;;  %v12668_v34 = vld [vmem:[%s22181_s7 + $0x4f8] sm:$0xff]  ;;  %v12650_v3 = vld [vmem:[%s22181_s7 + $0x470] sm:$0xff] }
 0x65e   :  { %7528 = vmatpush1.msra.mxu1 %v12591_v24  ;;  %7431 = vmatprep.subr.mxu0 %v12573_v45  ;;  %v7696_v24 = vsel %vm7032_vm5, %v7695_v27, %v7674_v50  ;;  %v12667_v45 = vld [vmem:[%s22181_s7 + $0x4f0] sm:$0xff]  ;;  %v12674_v50 = vld [vmem:[%s22181_s7 + $0x520] sm:$0xff] }
 0x65f   :  { %7529 = vmatprep.subr.mxu1 %v12590_v14  ;;  %7432 = vmatpush1.msra.mxu0 %v12572_v46  ;;  %v12649_v14 = vld [vmem:[%s22181_s7 + $0x468] sm:$0xff]  ;;  %v12676_v27 = vld [vmem:[%s22181_s7 + $0x530] sm:$0xff] }
 0x660   :  { %7530 = vmatpush1.msra.mxu1 %v12589_v0  ;;  %7433 = vmatprep.subr.mxu0 %v12571_v56  ;;  %v12666_v46 = vld [vmem:[%s22181_s7 + $0x4e8] sm:$0xff]  ;;  %v12648_v0 = vld [vmem:[%s22181_s7 + $0x460] sm:$0xff] }
 0x661   :  { %7531 = vmatprep.subr.mxu1 %v12588_v58  ;;  %7434 = vmatpush1.msra.mxu0 %v12570_v26  ;;  %v12665_v56 = vld [vmem:[%s22181_s7 + $0x4e0] sm:$0xff]  ;;  %v12664_v58 = vld [vmem:[%s22181_s7 + $0x4d8] sm:$0xff]  ;;  %v12646_v26 = vld [vmem:[%s22181_s7 + $0x450] sm:$0xff] }
 0x662   :  { %7532 = vmatpush1.msra.mxu1 %v12587_v54  ;;  %7435 = vmatprep.subr.mxu0 %v12569_v36  ;;  %v12645_v54 = vld [vmem:[%s22181_s7 + $0x448] sm:$0xff] }
 0x663   :  { %7533 = vmatprep.subr.mxu1 %v12586_v35  ;;  %7436 = vmatpush1.msra.mxu0 %v12568_v23  ;;  %v12662_v36 = vld [vmem:[%s22181_s7 + $0x4c8] sm:$0xff]  ;;  %v12644_v35 = vld [vmem:[%s22181_s7 + $0x440] sm:$0xff] }
 0x664   :  { %7469 = vmatprep.mubr.f32.mxu0 %v22302_v63  ;;  %7534 = vmatpush1.msra.mxu1 %v12585_v7  ;;  %v12661_v23 = vld [vmem:[%s22181_s7 + $0x4c0] sm:$0xff]  ;;  %v12660_v7 = vld [vmem:[%s22181_s7 + $0x4b8] sm:$0xff] }
 0x665   :  { %7567 = vmatprep.mubr.f32.mxu1 %v22302_v63  ;;  %12584 = vmatmul.mubr.msk.f32.vlgmr.msra.gmra.mxu0 %vm1928_vm4, %v7402_v53  ;;  %v12658_v53 = vld [vmem:[%s22181_s7 + $0x4a8] sm:$0xff] }
 0x666   :  { %12601 = vmatmul.mubr.msk.f32.vlgmr.msra.gmra.mxu1 %vm1928_vm4, %v7500_v61  ;;  %7617 = vmatprep.subr.mxu0 %v12617_v5  ;;  %v12641_v5 = vld [vmem:[%s22181_s7 + $0x428] sm:$0xff]  ;;  %v7773_v61 = vld [vmem:[#allocation4 + $0x5c] sm:$0x1] }
 0x667   :  { %7715 = vmatprep.subr.mxu1 %v12634_v19  ;;  %7618 = vmatpush1.msra.mxu0 %v12616_v43  ;;  %v12657_v19 = vld [vmem:[%s22181_s7 + $0x4a0] sm:$0xff]  ;;  %v12639_v43 = vld [vmem:[%s22181_s7 + $0x418] sm:$0xff] }
 0x668   :  { %7716 = vmatpush1.msra.mxu1 %v12633_v16  ;;  %7619 = vmatprep.subr.mxu0 %v12615_v38  ;;  %v12656_v16 = vld [vmem:[%s22181_s7 + $0x498] sm:$0xff]  ;;  %v12638_v38 = vld [vmem:[%s22181_s7 + $0x410] sm:$0xff] }
 0x669   :  { %7717 = vmatprep.subr.mxu1 %v12632_v60  ;;  %7620 = vmatpush1.msra.mxu0 %v12614_v10  ;;  %v7871_v60 = vld [vmem:[#allocation4 + $0x5d] sm:$0x1]  ;;  %v12655_v10 = vld [vmem:[%s22181_s7 + $0x490] sm:$0xff] }
 0x66a   :  { %7718 = vmatpush1.msra.mxu1 %v12631_v11  ;;  %7621 = vmatprep.subr.mxu0 %v12613_v57  ;;  %v12637_v11 = vld [vmem:[%s22181_s7 + $0x408] sm:$0xff] }
 0x66b   :  { %7719 = vmatprep.subr.mxu1 %v12630_v44  ;;  %7622 = vmatpush1.msra.mxu0 %v12612_v32  ;;  %v12654_v57 = vld [vmem:[%s22181_s7 + $0x488] sm:$0xff]  ;;  %v12636_v44 = vld [vmem:[%s22181_s7 + $0x400] sm:$0xff]  ;;  %v7793_v32 = vrot.slane %v7773_v61, 7  ;;  %v12715_v61 = vld [vmem:[%s22181_s7 + $0x658] sm:$0xff] }
 0x66c   :  { %7720 = vmatpush1.msra.mxu1 %v12629_v22  ;;  %7623 = vmatprep.subr.mxu0 %v12611_v31  ;;  %v12653_v22 = vld [vmem:[%s22181_s7 + $0x480] sm:$0xff]  ;;  %v7891_v31 = vrot.slane %v7871_v60, 7  ;;  %v12731_v60 = vld [vmem:[%s22181_s7 + $0x6d0] sm:$0xff] }
 0x66d   :  { %7721 = vmatprep.subr.mxu1 %v12628_v42  ;;  %7624 = vmatpush1.msra.mxu0 %v12610_v49  ;;  %v7772_v42 = vld [vmem:[#allocation4 + $0xc] sm:$0x1]  ;;  %v12685_v49 = vld [vmem:[%s22181_s7 + $0x578] sm:$0xff] }
 0x66e   :  { %7722 = vmatpush1.msra.mxu1 %v12627_v39  ;;  %7625 = vmatprep.subr.mxu0 %v12609_v62  ;;  %v7794_v39 = vsel %vm7032_vm5, %v7793_v32, %v7772_v42  ;;  %v7870_v62 = vld [vmem:[#allocation4 + $0xd] sm:$0x1]  ;;  %v12711_v32 = vld [vmem:[%s22181_s7 + $0x638] sm:$0xff]  ;;  %v12727_v42 = vld [vmem:[%s22181_s7 + $0x6b0] sm:$0xff] }
 0x66f   :  { %7723 = vmatprep.subr.mxu1 %v12626_v4  ;;  %7626 = vmatpush1.msra.mxu0 %v12608_v18  ;;  %v12702_v4 = vld [vmem:[%s22181_s7 + $0x5f8] sm:$0xff]  ;;  %v12684_v18 = vld [vmem:[%s22181_s7 + $0x570] sm:$0xff] }
 0x670   :  { %7724 = vmatpush1.msra.mxu1 %v12625_v28  ;;  %7627 = vmatprep.subr.mxu0 %v12607_v20  ;;  %v7892_v28 = vsel %vm7032_vm5, %v7891_v31, %v7870_v62  ;;  %v12701_v20 = vld [vmem:[%s22181_s7 + $0x5f0] sm:$0xff]  ;;  %v12708_v62 = vld [vmem:[%s22181_s7 + $0x620] sm:$0xff] }
 0x671   :  { %7725 = vmatprep.subr.mxu1 %v12624_v40  ;;  %7628 = vmatpush1.msra.mxu0 %v12606_v48  ;;  %v12683_v40 = vld [vmem:[%s22181_s7 + $0x568] sm:$0xff]  ;;  %v12710_v31 = vld [vmem:[%s22181_s7 + $0x630] sm:$0xff] }
 0x672   :  { %7726 = vmatpush1.msra.mxu1 %v12623_v6  ;;  %7629 = vmatprep.subr.mxu0 %v12605_v12  ;;  %v12700_v48 = vld [vmem:[%s22181_s7 + $0x5e8] sm:$0xff]  ;;  %v12682_v6 = vld [vmem:[%s22181_s7 + $0x560] sm:$0xff] }
 0x673   :  { %7727 = vmatprep.subr.mxu1 %v12622_v2  ;;  %7630 = vmatpush1.msra.mxu0 %v12604_v9  ;;  %v12699_v12 = vld [vmem:[%s22181_s7 + $0x5e0] sm:$0xff]  ;;  %v12698_v2 = vld [vmem:[%s22181_s7 + $0x5d8] sm:$0xff]  ;;  %v12680_v9 = vld [vmem:[%s22181_s7 + $0x550] sm:$0xff] }
 0x674   :  { %7728 = vmatpush1.msra.mxu1 %v12621_v13  ;;  %7631 = vmatprep.subr.mxu0 %v12603_v55  ;;  %v12679_v13 = vld [vmem:[%s22181_s7 + $0x548] sm:$0xff] }
 0x675   :  { %7729 = vmatprep.subr.mxu1 %v12620_v17  ;;  %7632 = vmatpush1.msra.mxu0 %v12602_v25  ;;  %v12696_v55 = vld [vmem:[%s22181_s7 + $0x5c8] sm:$0xff]  ;;  %v12678_v17 = vld [vmem:[%s22181_s7 + $0x540] sm:$0xff] }
 0x676   :  { %7665 = vmatprep.mubr.f32.mxu0 %v22302_v63  ;;  %7730 = vmatpush1.msra.mxu1 %v12619_v59  ;;  %v12695_v25 = vld [vmem:[%s22181_s7 + $0x5c0] sm:$0xff]  ;;  %v12694_v59 = vld [vmem:[%s22181_s7 + $0x5b8] sm:$0xff] }
 0x677   :  { %7763 = vmatprep.mubr.f32.mxu1 %v22302_v63  ;;  %12618 = vmatmul.mubr.msk.f32.vlgmr.msra.gmra.mxu0 %vm1928_vm4, %v7598_v37  ;;  %v12692_v37 = vld [vmem:[%s22181_s7 + $0x5a8] sm:$0xff] }
 0x678   :  { %12635 = vmatmul.mubr.msk.f32.vlgmr.msra.gmra.mxu1 %vm1928_vm4, %v7696_v24  ;;  %7813 = vmatprep.subr.mxu0 %v12651_v33  ;;  %v12675_v33 = vld [vmem:[%s22181_s7 + $0x528] sm:$0xff]  ;;  %v7969_v24 = vld [vmem:[#allocation4 + $0x5e] sm:$0x1] }
 0x679   :  { %7911 = vmatprep.subr.mxu1 %v12668_v34  ;;  %7814 = vmatpush1.msra.mxu0 %v12650_v3  ;;  %v12691_v34 = vld [vmem:[%s22181_s7 + $0x5a0] sm:$0xff]  ;;  %v12673_v3 = vld [vmem:[%s22181_s7 + $0x518] sm:$0xff] }
 0x67a   :  { %7912 = vmatpush1.msra.mxu1 %v12667_v45  ;;  %7815 = vmatprep.subr.mxu0 %v12649_v14  ;;  %v12690_v45 = vld [vmem:[%s22181_s7 + $0x598] sm:$0xff]  ;;  %v12672_v14 = vld [vmem:[%s22181_s7 + $0x510] sm:$0xff] }
 0x67b   :  { %7913 = vmatprep.subr.mxu1 %v12666_v46  ;;  %7816 = vmatpush1.msra.mxu0 %v12648_v0  ;;  %v8067_v46 = vld [vmem:[#allocation4 + $0x5f] sm:$0x1]  ;;  %v12689_v0 = vld [vmem:[%s22181_s7 + $0x590] sm:$0xff] }
 0x67c   :  { %7914 = vmatpush1.msra.mxu1 %v12665_v56  ;;  %7817 = vmatprep.subr.mxu0 %v12647_v1  ;;  %v12671_v56 = vld [vmem:[%s22181_s7 + $0x508] sm:$0xff] }
 0x67d   :  { %7915 = vmatprep.subr.mxu1 %v12664_v58  ;;  %7818 = vmatpush1.msra.mxu0 %v12646_v26  ;;  %v12688_v1 = vld [vmem:[%s22181_s7 + $0x588] sm:$0xff]  ;;  %v12670_v58 = vld [vmem:[%s22181_s7 + $0x500] sm:$0xff]  ;;  %v7989_v26 = vrot.slane %v7969_v24, 7  ;;  %v12749_v24 = vld [vmem:[%s22181_s7 + $0x758] sm:$0xff] }
 0x67e   :  { %7916 = vmatpush1.msra.mxu1 %v12663_v8  ;;  %7819 = vmatprep.subr.mxu0 %v12645_v54  ;;  %v12687_v8 = vld [vmem:[%s22181_s7 + $0x580] sm:$0xff]  ;;  %v8087_v54 = vrot.slane %v8067_v46, 7  ;;  %v12765_v46 = vld [vmem:[%s22181_s7 + $0x7d0] sm:$0xff] }
 0x67f   :  { %7917 = vmatprep.subr.mxu1 %v12662_v36  ;;  %7820 = vmatpush1.msra.mxu0 %v12644_v35  ;;  %v7968_v36 = vld [vmem:[#allocation4 + $0xe] sm:$0x1]  ;;  %v12719_v35 = vld [vmem:[%s22181_s7 + $0x678] sm:$0xff] }
 0x680   :  { %7918 = vmatpush1.msra.mxu1 %v12661_v23  ;;  %7821 = vmatprep.subr.mxu0 %v12643_v21  ;;  %v7990_v23 = vsel %vm7032_vm5, %v7989_v26, %v7968_v36  ;;  %v8066_v21 = vld [vmem:[#allocation4 + $0xf] sm:$0x1]  ;;  %v12745_v26 = vld [vmem:[%s22181_s7 + $0x738] sm:$0xff]  ;;  %v12761_v36 = vld [vmem:[%s22181_s7 + $0x7b0] sm:$0xff] }
 0x681   :  { %7919 = vmatprep.subr.mxu1 %v12660_v7  ;;  %7822 = vmatpush1.msra.mxu0 %v12642_v15  ;;  %v12736_v7 = vld [vmem:[%s22181_s7 + $0x6f8] sm:$0xff]  ;;  %v12718_v15 = vld [vmem:[%s22181_s7 + $0x670] sm:$0xff] }
 0x682   :  { %7920 = vmatpush1.msra.mxu1 %v12659_v52  ;;  %7823 = vmatprep.subr.mxu0 %v12641_v5  ;;  %v8088_v52 = vsel %vm7032_vm5, %v8087_v54, %v8066_v21  ;;  %v12735_v5 = vld [vmem:[%s22181_s7 + $0x6f0] sm:$0xff]  ;;  %v12742_v21 = vld [vmem:[%s22181_s7 + $0x720] sm:$0xff] }
 0x683   :  { %7921 = vmatprep.subr.mxu1 %v12658_v53  ;;  %7824 = vmatpush1.msra.mxu0 %v12640_v41  ;;  %v12717_v53 = vld [vmem:[%s22181_s7 + $0x668] sm:$0xff]  ;;  %v12744_v54 = vld [vmem:[%s22181_s7 + $0x730] sm:$0xff] }
 0x684   :  { %7922 = vmatpush1.msra.mxu1 %v12657_v19  ;;  %7825 = vmatprep.subr.mxu0 %v12639_v43  ;;  %v12734_v41 = vld [vmem:[%s22181_s7 + $0x6e8] sm:$0xff]  ;;  %v12716_v19 = vld [vmem:[%s22181_s7 + $0x660] sm:$0xff] }
 0x685   :  { %7923 = vmatprep.subr.mxu1 %v12656_v16  ;;  %7826 = vmatpush1.msra.mxu0 %v12638_v38  ;;  %v12733_v43 = vld [vmem:[%s22181_s7 + $0x6e0] sm:$0xff]  ;;  %v12732_v16 = vld [vmem:[%s22181_s7 + $0x6d8] sm:$0xff]  ;;  %v12714_v38 = vld [vmem:[%s22181_s7 + $0x650] sm:$0xff] }
 0x686   :  { %7924 = vmatpush1.msra.mxu1 %v12655_v10  ;;  %7827 = vmatprep.subr.mxu0 %v12637_v11  ;;  %v12713_v10 = vld [vmem:[%s22181_s7 + $0x648] sm:$0xff] }
 0x687   :  { %7925 = vmatprep.subr.mxu1 %v12654_v57  ;;  %7828 = vmatpush1.msra.mxu0 %v12636_v44  ;;  %v12730_v11 = vld [vmem:[%s22181_s7 + $0x6c8] sm:$0xff]  ;;  %v12712_v57 = vld [vmem:[%s22181_s7 + $0x640] sm:$0xff] }
 0x688   :  { %7861 = vmatprep.mubr.f32.mxu0 %v22302_v63  ;;  %7926 = vmatpush1.msra.mxu1 %v12653_v22  ;;  %v12729_v44 = vld [vmem:[%s22181_s7 + $0x6c0] sm:$0xff]  ;;  %v12728_v22 = vld [vmem:[%s22181_s7 + $0x6b8] sm:$0xff] }
 0x689   :  { %7959 = vmatprep.mubr.f32.mxu1 %v22302_v63  ;;  %12652 = vmatmul.mubr.msk.f32.vlgmr.msra.gmra.mxu0 %vm1928_vm4, %v7794_v39  ;;  %v12726_v39 = vld [vmem:[%s22181_s7 + $0x6a8] sm:$0xff] }
 0x68a   :  { %12669 = vmatmul.mubr.msk.f32.vlgmr.msra.gmra.mxu1 %vm1928_vm4, %v7892_v28  ;;  %8009 = vmatprep.subr.mxu0 %v12685_v49  ;;  %v12709_v49 = vld [vmem:[%s22181_s7 + $0x628] sm:$0xff]  ;;  %v8165_v28 = vld [vmem:[#allocation4 + $0x60] sm:$0x1] }
 0x68b   :  { %8107 = vmatprep.subr.mxu1 %v12702_v4  ;;  %8010 = vmatpush1.msra.mxu0 %v12684_v18  ;;  %v12725_v4 = vld [vmem:[%s22181_s7 + $0x6a0] sm:$0xff]  ;;  %v12707_v18 = vld [vmem:[%s22181_s7 + $0x618] sm:$0xff] }
 0x68c   :  { %8108 = vmatpush1.msra.mxu1 %v12701_v20  ;;  %8011 = vmatprep.subr.mxu0 %v12683_v40  ;;  %v12724_v20 = vld [vmem:[%s22181_s7 + $0x698] sm:$0xff]  ;;  %v12706_v40 = vld [vmem:[%s22181_s7 + $0x610] sm:$0xff] }
 0x68d   :  { %8109 = vmatprep.subr.mxu1 %v12700_v48  ;;  %8012 = vmatpush1.msra.mxu0 %v12682_v6  ;;  %v8263_v48 = vld [vmem:[#allocation4 + $0x61] sm:$0x1]  ;;  %v12723_v6 = vld [vmem:[%s22181_s7 + $0x690] sm:$0xff] }
 0x68e   :  { %8110 = vmatpush1.msra.mxu1 %v12699_v12  ;;  %8013 = vmatprep.subr.mxu0 %v12681_v47  ;;  %v12705_v12 = vld [vmem:[%s22181_s7 + $0x608] sm:$0xff] }
 0x68f   :  { %8111 = vmatprep.subr.mxu1 %v12698_v2  ;;  %8014 = vmatpush1.msra.mxu0 %v12680_v9  ;;  %v12722_v47 = vld [vmem:[%s22181_s7 + $0x688] sm:$0xff]  ;;  %v12704_v2 = vld [vmem:[%s22181_s7 + $0x600] sm:$0xff]  ;;  %v8185_v9 = vrot.slane %v8165_v28, 7  ;;  %v12783_v28 = vld [vmem:[%s22181_s7 + $0x858] sm:$0xff] }
 0x690   :  { %8112 = vmatpush1.msra.mxu1 %v12697_v30  ;;  %8015 = vmatprep.subr.mxu0 %v12679_v13  ;;  %v12721_v30 = vld [vmem:[%s22181_s7 + $0x680] sm:$0xff]  ;;  %v8283_v13 = vrot.slane %v8263_v48, 7  ;;  %v12799_v48 = vld [vmem:[%s22181_s7 + $0x8d0] sm:$0xff] }
 0x691   :  { %8113 = vmatprep.subr.mxu1 %v12696_v55  ;;  %8016 = vmatpush1.msra.mxu0 %v12678_v17  ;;  %v8164_v55 = vld [vmem:[#allocation4 + $0x10] sm:$0x1]  ;;  %v12753_v17 = vld [vmem:[%s22181_s7 + $0x778] sm:$0xff] }
 0x692   :  { %8114 = vmatpush1.msra.mxu1 %v12695_v25  ;;  %8017 = vmatprep.subr.mxu0 %v12677_v29  ;;  %v8186_v25 = vsel %vm7032_vm5, %v8185_v9, %v8164_v55  ;;  %v8262_v29 = vld [vmem:[#allocation4 + $0x11] sm:$0x1]  ;;  %v12779_v9 = vld [vmem:[%s22181_s7 + $0x838] sm:$0xff] }
 0x693   :  { %8115 = vmatprep.subr.mxu1 %v12694_v59  ;;  %8018 = vmatpush1.msra.mxu0 %v12676_v27  ;;  %v12770_v59 = vld [vmem:[%s22181_s7 + $0x7f8] sm:$0xff]  ;;  %v12752_v27 = vld [vmem:[%s22181_s7 + $0x770] sm:$0xff] }
 0x694   :  { %8116 = vmatpush1.msra.mxu1 %v12693_v51  ;;  %8019 = vmatprep.subr.mxu0 %v12675_v33  ;;  %v8284_v51 = vsel %vm7032_vm5, %v8283_v13, %v8262_v29  ;;  %v12769_v33 = vld [vmem:[%s22181_s7 + $0x7f0] sm:$0xff]  ;;  %v12776_v29 = vld [vmem:[%s22181_s7 + $0x820] sm:$0xff] }
 0x695   :  { %8117 = vmatprep.subr.mxu1 %v12692_v37  ;;  %8020 = vmatpush1.msra.mxu0 %v12674_v50  ;;  %v12751_v37 = vld [vmem:[%s22181_s7 + $0x768] sm:$0xff]  ;;  %v12778_v13 = vld [vmem:[%s22181_s7 + $0x830] sm:$0xff] }
 0x696   :  { %8118 = vmatpush1.msra.mxu1 %v12691_v34  ;;  %8021 = vmatprep.subr.mxu0 %v12673_v3  ;;  %v12768_v50 = vld [vmem:[%s22181_s7 + $0x7e8] sm:$0xff]  ;;  %v12750_v34 = vld [vmem:[%s22181_s7 + $0x760] sm:$0xff]  ;;  %v12795_v55 = vld [vmem:[%s22181_s7 + $0x8b0] sm:$0xff] }
 0x697   :  { %8119 = vmatprep.subr.mxu1 %v12690_v45  ;;  %8022 = vmatpush1.msra.mxu0 %v12672_v14  ;;  %v12767_v3 = vld [vmem:[%s22181_s7 + $0x7e0] sm:$0xff]  ;;  %v12766_v45 = vld [vmem:[%s22181_s7 + $0x7d8] sm:$0xff]  ;;  %v12748_v14 = vld [vmem:[%s22181_s7 + $0x750] sm:$0xff] }
 0x698   :  { %8120 = vmatpush1.msra.mxu1 %v12689_v0  ;;  %8023 = vmatprep.subr.mxu0 %v12671_v56  ;;  %v12747_v0 = vld [vmem:[%s22181_s7 + $0x748] sm:$0xff] }
 0x699   :  { %8121 = vmatprep.subr.mxu1 %v12688_v1  ;;  %8024 = vmatpush1.msra.mxu0 %v12670_v58  ;;  %v12764_v56 = vld [vmem:[%s22181_s7 + $0x7c8] sm:$0xff]  ;;  %v12746_v1 = vld [vmem:[%s22181_s7 + $0x740] sm:$0xff] }
 0x69a   :  { %8057 = vmatprep.mubr.f32.mxu0 %v22302_v63  ;;  %8122 = vmatpush1.msra.mxu1 %v12687_v8  ;;  %v12763_v58 = vld [vmem:[%s22181_s7 + $0x7c0] sm:$0xff]  ;;  %v12762_v8 = vld [vmem:[%s22181_s7 + $0x7b8] sm:$0xff] }
 0x69b   :  { %8155 = vmatprep.mubr.f32.mxu1 %v22302_v63  ;;  %12686 = vmatmul.mubr.msk.f32.vlgmr.msra.gmra.mxu0 %vm1928_vm4, %v7990_v23  ;;  %v12760_v23 = vld [vmem:[%s22181_s7 + $0x7a8] sm:$0xff] }
 0x69c   :  { %12703 = vmatmul.mubr.msk.f32.vlgmr.msra.gmra.mxu1 %vm1928_vm4, %v8088_v52  ;;  %8205 = vmatprep.subr.mxu0 %v12719_v35  ;;  %v12743_v35 = vld [vmem:[%s22181_s7 + $0x728] sm:$0xff]  ;;  %v8361_v52 = vld [vmem:[#allocation4 + $0x66] sm:$0x1] }
 0x69d   :  { %8303 = vmatprep.subr.mxu1 %v12736_v7  ;;  %8206 = vmatpush1.msra.mxu0 %v12718_v15  ;;  %v12759_v7 = vld [vmem:[%s22181_s7 + $0x7a0] sm:$0xff]  ;;  %v12741_v15 = vld [vmem:[%s22181_s7 + $0x718] sm:$0xff] }
 0x69e   :  { %8304 = vmatpush1.msra.mxu1 %v12735_v5  ;;  %8207 = vmatprep.subr.mxu0 %v12717_v53  ;;  %v12758_v5 = vld [vmem:[%s22181_s7 + $0x798] sm:$0xff]  ;;  %v12740_v53 = vld [vmem:[%s22181_s7 + $0x710] sm:$0xff] }
 0x69f   :  { %8305 = vmatprep.subr.mxu1 %v12734_v41  ;;  %8208 = vmatpush1.msra.mxu0 %v12716_v19  ;;  %v8459_v41 = vld [vmem:[#allocation4 + $0x67] sm:$0x1]  ;;  %v12757_v19 = vld [vmem:[%s22181_s7 + $0x790] sm:$0xff] }
 0x6a0   :  { %8306 = vmatpush1.msra.mxu1 %v12733_v43  ;;  %8209 = vmatprep.subr.mxu0 %v12715_v61  ;;  %v12739_v43 = vld [vmem:[%s22181_s7 + $0x708] sm:$0xff] }
 0x6a1   :  { %8307 = vmatprep.subr.mxu1 %v12732_v16  ;;  %8210 = vmatpush1.msra.mxu0 %v12714_v38  ;;  %v12756_v61 = vld [vmem:[%s22181_s7 + $0x788] sm:$0xff]  ;;  %v12738_v16 = vld [vmem:[%s22181_s7 + $0x700] sm:$0xff]  ;;  %v8381_v38 = vrot.slane %v8361_v52, 7  ;;  %v12817_v52 = vld [vmem:[%s22181_s7 + $0x958] sm:$0xff] }
 0x6a2   :  { %8308 = vmatpush1.msra.mxu1 %v12731_v60  ;;  %8211 = vmatprep.subr.mxu0 %v12713_v10  ;;  %v12755_v60 = vld [vmem:[%s22181_s7 + $0x780] sm:$0xff]  ;;  %v8479_v10 = vrot.slane %v8459_v41, 7  ;;  %v12833_v41 = vld [vmem:[%s22181_s7 + $0x9d0] sm:$0xff] }
 0x6a3   :  { %8309 = vmatprep.subr.mxu1 %v12730_v11  ;;  %8212 = vmatpush1.msra.mxu0 %v12712_v57  ;;  %v8360_v11 = vld [vmem:[#allocation4 + $0x16] sm:$0x1]  ;;  %v12787_v57 = vld [vmem:[%s22181_s7 + $0x878] sm:$0xff] }
 0x6a4   :  { %8310 = vmatpush1.msra.mxu1 %v12729_v44  ;;  %8213 = vmatprep.subr.mxu0 %v12711_v32  ;;  %v8382_v44 = vsel %vm7032_vm5, %v8381_v38, %v8360_v11  ;;  %v8458_v32 = vld [vmem:[#allocation4 + $0x17] sm:$0x1]  ;;  %v12813_v38 = vld [vmem:[%s22181_s7 + $0x938] sm:$0xff] }
 0x6a5   :  { %8311 = vmatprep.subr.mxu1 %v12728_v22  ;;  %8214 = vmatpush1.msra.mxu0 %v12710_v31  ;;  %v12804_v22 = vld [vmem:[%s22181_s7 + $0x8f8] sm:$0xff]  ;;  %v12786_v31 = vld [vmem:[%s22181_s7 + $0x870] sm:$0xff] }
 0x6a6   :  { %8312 = vmatpush1.msra.mxu1 %v12727_v42  ;;  %8215 = vmatprep.subr.mxu0 %v12709_v49  ;;  %v8480_v42 = vsel %vm7032_vm5, %v8479_v10, %v8458_v32  ;;  %v12803_v49 = vld [vmem:[%s22181_s7 + $0x8f0] sm:$0xff]  ;;  %v12810_v32 = vld [vmem:[%s22181_s7 + $0x920] sm:$0xff] }
 0x6a7   :  { %8313 = vmatprep.subr.mxu1 %v12726_v39  ;;  %8216 = vmatpush1.msra.mxu0 %v12708_v62  ;;  %v12785_v39 = vld [vmem:[%s22181_s7 + $0x868] sm:$0xff]  ;;  %v12812_v10 = vld [vmem:[%s22181_s7 + $0x930] sm:$0xff] }
 0x6a8   :  { %8314 = vmatpush1.msra.mxu1 %v12725_v4  ;;  %8217 = vmatprep.subr.mxu0 %v12707_v18  ;;  %v12802_v62 = vld [vmem:[%s22181_s7 + $0x8e8] sm:$0xff]  ;;  %v12784_v4 = vld [vmem:[%s22181_s7 + $0x860] sm:$0xff]  ;;  %v12829_v11 = vld [vmem:[%s22181_s7 + $0x9b0] sm:$0xff] }
 0x6a9   :  { %8315 = vmatprep.subr.mxu1 %v12724_v20  ;;  %8218 = vmatpush1.msra.mxu0 %v12706_v40  ;;  %v12801_v18 = vld [vmem:[%s22181_s7 + $0x8e0] sm:$0xff]  ;;  %v12800_v20 = vld [vmem:[%s22181_s7 + $0x8d8] sm:$0xff]  ;;  %v12782_v40 = vld [vmem:[%s22181_s7 + $0x850] sm:$0xff] }
 0x6aa   :  { %8316 = vmatpush1.msra.mxu1 %v12723_v6  ;;  %8219 = vmatprep.subr.mxu0 %v12705_v12  ;;  %v12781_v6 = vld [vmem:[%s22181_s7 + $0x848] sm:$0xff] }
 0x6ab   :  { %8317 = vmatprep.subr.mxu1 %v12722_v47  ;;  %8220 = vmatpush1.msra.mxu0 %v12704_v2  ;;  %v12798_v12 = vld [vmem:[%s22181_s7 + $0x8c8] sm:$0xff]  ;;  %v12780_v47 = vld [vmem:[%s22181_s7 + $0x840] sm:$0xff] }
 0x6ac   :  { %8253 = vmatprep.mubr.f32.mxu0 %v22302_v63  ;;  %8318 = vmatpush1.msra.mxu1 %v12721_v30  ;;  %v12797_v2 = vld [vmem:[%s22181_s7 + $0x8c0] sm:$0xff]  ;;  %v12796_v30 = vld [vmem:[%s22181_s7 + $0x8b8] sm:$0xff] }
 0x6ad   :  { %8351 = vmatprep.mubr.f32.mxu1 %v22302_v63  ;;  %12720 = vmatmul.mubr.msk.f32.vlgmr.msra.gmra.mxu0 %vm1928_vm4, %v8186_v25  ;;  %v12794_v25 = vld [vmem:[%s22181_s7 + $0x8a8] sm:$0xff] }
 0x6ae   :  { %12737 = vmatmul.mubr.msk.f32.vlgmr.msra.gmra.mxu1 %vm1928_vm4, %v8284_v51  ;;  %8401 = vmatprep.subr.mxu0 %v12753_v17  ;;  %v12777_v17 = vld [vmem:[%s22181_s7 + $0x828] sm:$0xff] }
 0x6af   :  { %8499 = vmatprep.subr.mxu1 %v12770_v59  ;;  %8402 = vmatpush1.msra.mxu0 %v12752_v27  ;;  %v12793_v59 = vld [vmem:[%s22181_s7 + $0x8a0] sm:$0xff]  ;;  %v12775_v27 = vld [vmem:[%s22181_s7 + $0x818] sm:$0xff]  ;;  %v8557_v51 = vld [vmem:[#allocation4 + $0x68] sm:$0x1] }
 0x6b0   :  { %8500 = vmatpush1.msra.mxu1 %v12769_v33  ;;  %8403 = vmatprep.subr.mxu0 %v12751_v37  ;;  %v12792_v33 = vld [vmem:[%s22181_s7 + $0x898] sm:$0xff]  ;;  %v12774_v37 = vld [vmem:[%s22181_s7 + $0x810] sm:$0xff] }
 0x6b1   :  { %8501 = vmatprep.subr.mxu1 %v12768_v50  ;;  %8404 = vmatpush1.msra.mxu0 %v12750_v34  ;;  %v8655_v50 = vld [vmem:[#allocation4 + $0x69] sm:$0x1]  ;;  %v12791_v34 = vld [vmem:[%s22181_s7 + $0x890] sm:$0xff] }
 0x6b2   :  { %8502 = vmatpush1.msra.mxu1 %v12767_v3  ;;  %8405 = vmatprep.subr.mxu0 %v12749_v24  ;;  %v12773_v3 = vld [vmem:[%s22181_s7 + $0x808] sm:$0xff] }
 0x6b3   :  { %8503 = vmatprep.subr.mxu1 %v12766_v45  ;;  %8406 = vmatpush1.msra.mxu0 %v12748_v14  ;;  %v12790_v24 = vld [vmem:[%s22181_s7 + $0x888] sm:$0xff]  ;;  %v12772_v45 = vld [vmem:[%s22181_s7 + $0x800] sm:$0xff]  ;;  %v8577_v14 = vrot.slane %v8557_v51, 7  ;;  %v12851_v51 = vld [vmem:[%s22181_s7 + $0xa58] sm:$0xff] }
 0x6b4   :  { %8504 = vmatpush1.msra.mxu1 %v12765_v46  ;;  %8407 = vmatprep.subr.mxu0 %v12747_v0  ;;  %v12789_v46 = vld [vmem:[%s22181_s7 + $0x880] sm:$0xff]  ;;  %v8675_v0 = vrot.slane %v8655_v50, 7  ;;  %v12867_v50 = vld [vmem:[%s22181_s7 + $0xad0] sm:$0xff] }
 0x6b5   :  { %8505 = vmatprep.subr.mxu1 %v12764_v56  ;;  %8408 = vmatpush1.msra.mxu0 %v12746_v1  ;;  %v8556_v56 = vld [vmem:[#allocation4 + $0x18] sm:$0x1] }
 0x6b6   :  { %8506 = vmatpush1.msra.mxu1 %v12763_v58  ;;  %8409 = vmatprep.subr.mxu0 %v12745_v26  ;;  %v12821_v1 = vld [vmem:[%s22181_s7 + $0x978] sm:$0xff]  ;;  %v8578_v58 = vsel %vm7032_vm5, %v8577_v14, %v8556_v56  ;;  %v12863_v56 = vld [vmem:[%s22181_s7 + $0xab0] sm:$0xff] }
 0x6b7   :  { %8507 = vmatprep.subr.mxu1 %v12762_v8  ;;  %8410 = vmatpush1.msra.mxu0 %v12744_v54  ;;  %v8654_v26 = vld [vmem:[#allocation4 + $0x19] sm:$0x1]  ;;  %v12820_v54 = vld [vmem:[%s22181_s7 + $0x970] sm:$0xff] }
 0x6b8   :  { %8508 = vmatpush1.msra.mxu1 %v12761_v36  ;;  %8411 = vmatprep.subr.mxu0 %v12743_v35  ;;  %v12838_v8 = vld [vmem:[%s22181_s7 + $0x9f8] sm:$0xff]  ;;  %v8676_v36 = vsel %vm7032_vm5, %v8675_v0, %v8654_v26  ;;  %v12837_v35 = vld [vmem:[%s22181_s7 + $0x9f0] sm:$0xff]  ;;  %v12844_v26 = vld [vmem:[%s22181_s7 + $0xa20] sm:$0xff] }
 0x6b9   :  { %8509 = vmatprep.subr.mxu1 %v12760_v23  ;;  %8412 = vmatpush1.msra.mxu0 %v12742_v21  ;;  %v12819_v23 = vld [vmem:[%s22181_s7 + $0x968] sm:$0xff]  ;;  %v12847_v14 = vld [vmem:[%s22181_s7 + $0xa38] sm:$0xff]  ;;  %v12846_v0 = vld [vmem:[%s22181_s7 + $0xa30] sm:$0xff] }
 0x6ba   :  { %8510 = vmatpush1.msra.mxu1 %v12759_v7  ;;  %8413 = vmatprep.subr.mxu0 %v12741_v15  ;;  %v12836_v21 = vld [vmem:[%s22181_s7 + $0x9e8] sm:$0xff]  ;;  %v12818_v7 = vld [vmem:[%s22181_s7 + $0x960] sm:$0xff] }
 0x6bb   :  { %8511 = vmatprep.subr.mxu1 %v12758_v5  ;;  %8414 = vmatpush1.msra.mxu0 %v12740_v53  ;;  %v12835_v15 = vld [vmem:[%s22181_s7 + $0x9e0] sm:$0xff]  ;;  %v12834_v5 = vld [vmem:[%s22181_s7 + $0x9d8] sm:$0xff]  ;;  %v12816_v53 = vld [vmem:[%s22181_s7 + $0x950] sm:$0xff] }
 0x6bc   :  { %8512 = vmatpush1.msra.mxu1 %v12757_v19  ;;  %8415 = vmatprep.subr.mxu0 %v12739_v43  ;;  %v12815_v19 = vld [vmem:[%s22181_s7 + $0x948] sm:$0xff] }
 0x6bd   :  { %8513 = vmatprep.subr.mxu1 %v12756_v61  ;;  %8416 = vmatpush1.msra.mxu0 %v12738_v16  ;;  %v12832_v43 = vld [vmem:[%s22181_s7 + $0x9c8] sm:$0xff]  ;;  %v12814_v61 = vld [vmem:[%s22181_s7 + $0x940] sm:$0xff] }
 0x6be   :  { %8449 = vmatprep.mubr.f32.mxu0 %v22302_v63  ;;  %8514 = vmatpush1.msra.mxu1 %v12755_v60  ;;  %v12831_v16 = vld [vmem:[%s22181_s7 + $0x9c0] sm:$0xff]  ;;  %v12830_v60 = vld [vmem:[%s22181_s7 + $0x9b8] sm:$0xff] }
 0x6bf   :  { %8547 = vmatprep.mubr.f32.mxu1 %v22302_v63  ;;  %12754 = vmatmul.mubr.msk.f32.vlgmr.msra.gmra.mxu0 %vm1928_vm4, %v8382_v44  ;;  %v12828_v44 = vld [vmem:[%s22181_s7 + $0x9a8] sm:$0xff] }
 0x6c0   :  { %12771 = vmatmul.mubr.msk.f32.vlgmr.msra.gmra.mxu1 %vm1928_vm4, %v8480_v42  ;;  %8597 = vmatprep.subr.mxu0 %v12787_v57  ;;  %v12811_v57 = vld [vmem:[%s22181_s7 + $0x928] sm:$0xff] }
 0x6c1   :  { %8695 = vmatprep.subr.mxu1 %v12804_v22  ;;  %8598 = vmatpush1.msra.mxu0 %v12786_v31  ;;  %v12827_v22 = vld [vmem:[%s22181_s7 + $0x9a0] sm:$0xff]  ;;  %v12809_v31 = vld [vmem:[%s22181_s7 + $0x918] sm:$0xff]  ;;  %v8753_v42 = vld [vmem:[#allocation4 + $0x6a] sm:$0x1] }
 0x6c2   :  { %8696 = vmatpush1.msra.mxu1 %v12803_v49  ;;  %8599 = vmatprep.subr.mxu0 %v12785_v39  ;;  %v12826_v49 = vld [vmem:[%s22181_s7 + $0x998] sm:$0xff]  ;;  %v12808_v39 = vld [vmem:[%s22181_s7 + $0x910] sm:$0xff] }
 0x6c3   :  { %8697 = vmatprep.subr.mxu1 %v12802_v62  ;;  %8600 = vmatpush1.msra.mxu0 %v12784_v4  ;;  %v8851_v62 = vld [vmem:[#allocation4 + $0x6b] sm:$0x1]  ;;  %v12825_v4 = vld [vmem:[%s22181_s7 + $0x990] sm:$0xff] }
 0x6c4   :  { %8698 = vmatpush1.msra.mxu1 %v12801_v18  ;;  %8601 = vmatprep.subr.mxu0 %v12783_v28  ;;  %v12807_v18 = vld [vmem:[%s22181_s7 + $0x908] sm:$0xff] }
 0x6c5   :  { %8699 = vmatprep.subr.mxu1 %v12800_v20  ;;  %8602 = vmatpush1.msra.mxu0 %v12782_v40  ;;  %v12824_v28 = vld [vmem:[%s22181_s7 + $0x988] sm:$0xff]  ;;  %v12806_v20 = vld [vmem:[%s22181_s7 + $0x900] sm:$0xff]  ;;  %v8773_v40 = vrot.slane %v8753_v42, 7  ;;  %v12885_v42 = vld [vmem:[%s22181_s7 + $0xb58] sm:$0xff] }
 0x6c6   :  { %8700 = vmatpush1.msra.mxu1 %v12799_v48  ;;  %8603 = vmatprep.subr.mxu0 %v12781_v6  ;;  %v12823_v48 = vld [vmem:[%s22181_s7 + $0x980] sm:$0xff]  ;;  %v8871_v6 = vrot.slane %v8851_v62, 7  ;;  %v12901_v62 = vld [vmem:[%s22181_s7 + $0xbd0] sm:$0xff] }
 0x6c7   :  { %8701 = vmatprep.subr.mxu1 %v12798_v12  ;;  %8604 = vmatpush1.msra.mxu0 %v12780_v47  ;;  %v8752_v12 = vld [vmem:[#allocation4 + $0x1a] sm:$0x1] }
 0x6c8   :  { %8702 = vmatpush1.msra.mxu1 %v12797_v2  ;;  %8605 = vmatprep.subr.mxu0 %v12779_v9  ;;  %v12855_v47 = vld [vmem:[%s22181_s7 + $0xa78] sm:$0xff]  ;;  %v8774_v2 = vsel %vm7032_vm5, %v8773_v40, %v8752_v12  ;;  %v12897_v12 = vld [vmem:[%s22181_s7 + $0xbb0] sm:$0xff] }
 0x6c9   :  { %8703 = vmatprep.subr.mxu1 %v12796_v30  ;;  %8606 = vmatpush1.msra.mxu0 %v12778_v13  ;;  %v8850_v9 = vld [vmem:[#allocation4 + $0x1b] sm:$0x1]  ;;  %v12854_v13 = vld [vmem:[%s22181_s7 + $0xa70] sm:$0xff] }
 0x6ca   :  { %8704 = vmatpush1.msra.mxu1 %v12795_v55  ;;  %8607 = vmatprep.subr.mxu0 %v12777_v17  ;;  %v12872_v30 = vld [vmem:[%s22181_s7 + $0xaf8] sm:$0xff]  ;;  %v8872_v55 = vsel %vm7032_vm5, %v8871_v6, %v8850_v9  ;;  %v12871_v17 = vld [vmem:[%s22181_s7 + $0xaf0] sm:$0xff]  ;;  %v12878_v9 = vld [vmem:[%s22181_s7 + $0xb20] sm:$0xff] }
 0x6cb   :  { %8705 = vmatprep.subr.mxu1 %v12794_v25  ;;  %8608 = vmatpush1.msra.mxu0 %v12776_v29  ;;  %v12853_v25 = vld [vmem:[%s22181_s7 + $0xa68] sm:$0xff]  ;;  %v12881_v40 = vld [vmem:[%s22181_s7 + $0xb38] sm:$0xff]  ;;  %v12880_v6 = vld [vmem:[%s22181_s7 + $0xb30] sm:$0xff] }
 0x6cc   :  { %8706 = vmatpush1.msra.mxu1 %v12793_v59  ;;  %8609 = vmatprep.subr.mxu0 %v12775_v27  ;;  %v12870_v29 = vld [vmem:[%s22181_s7 + $0xae8] sm:$0xff]  ;;  %v12852_v59 = vld [vmem:[%s22181_s7 + $0xa60] sm:$0xff] }
 0x6cd   :  { %8707 = vmatprep.subr.mxu1 %v12792_v33  ;;  %8610 = vmatpush1.msra.mxu0 %v12774_v37  ;;  %v12869_v27 = vld [vmem:[%s22181_s7 + $0xae0] sm:$0xff]  ;;  %v12868_v33 = vld [vmem:[%s22181_s7 + $0xad8] sm:$0xff]  ;;  %v12850_v37 = vld [vmem:[%s22181_s7 + $0xa50] sm:$0xff] }
 0x6ce   :  { %8708 = vmatpush1.msra.mxu1 %v12791_v34  ;;  %8611 = vmatprep.subr.mxu0 %v12773_v3  ;;  %v12849_v34 = vld [vmem:[%s22181_s7 + $0xa48] sm:$0xff] }
 0x6cf   :  { %8709 = vmatprep.subr.mxu1 %v12790_v24  ;;  %8612 = vmatpush1.msra.mxu0 %v12772_v45  ;;  %v12866_v3 = vld [vmem:[%s22181_s7 + $0xac8] sm:$0xff]  ;;  %v12848_v24 = vld [vmem:[%s22181_s7 + $0xa40] sm:$0xff] }
 0x6d0   :  { %8645 = vmatprep.mubr.f32.mxu0 %v22302_v63  ;;  %8710 = vmatpush1.msra.mxu1 %v12789_v46  ;;  %v12865_v45 = vld [vmem:[%s22181_s7 + $0xac0] sm:$0xff]  ;;  %v12864_v46 = vld [vmem:[%s22181_s7 + $0xab8] sm:$0xff] }
 0x6d1   :  { %8743 = vmatprep.mubr.f32.mxu1 %v22302_v63  ;;  %12788 = vmatmul.mubr.msk.f32.vlgmr.msra.gmra.mxu0 %vm1928_vm4, %v8578_v58  ;;  %v12862_v58 = vld [vmem:[%s22181_s7 + $0xaa8] sm:$0xff] }
 0x6d2   :  { %12805 = vmatmul.mubr.msk.f32.vlgmr.msra.gmra.mxu1 %vm1928_vm4, %v8676_v36  ;;  %8793 = vmatprep.subr.mxu0 %v12821_v1  ;;  %v12845_v1 = vld [vmem:[%s22181_s7 + $0xa28] sm:$0xff] }
 0x6d3   :  { %8891 = vmatprep.subr.mxu1 %v12838_v8  ;;  %8794 = vmatpush1.msra.mxu0 %v12820_v54  ;;  %v12861_v8 = vld [vmem:[%s22181_s7 + $0xaa0] sm:$0xff]  ;;  %v12843_v54 = vld [vmem:[%s22181_s7 + $0xa18] sm:$0xff]  ;;  %v8949_v36 = vld [vmem:[#allocation4 + $0x6c] sm:$0x1] }
 0x6d4   :  { %8892 = vmatpush1.msra.mxu1 %v12837_v35  ;;  %8795 = vmatprep.subr.mxu0 %v12819_v23  ;;  %v12860_v35 = vld [vmem:[%s22181_s7 + $0xa98] sm:$0xff]  ;;  %v12842_v23 = vld [vmem:[%s22181_s7 + $0xa10] sm:$0xff] }
 0x6d5   :  { %8893 = vmatprep.subr.mxu1 %v12836_v21  ;;  %8796 = vmatpush1.msra.mxu0 %v12818_v7  ;;  %v9047_v21 = vld [vmem:[#allocation4 + $0x71] sm:$0x1] }
 0x6d6   :  { %8894 = vmatpush1.msra.mxu1 %v12835_v15  ;;  %8797 = vmatprep.subr.mxu0 %v12817_v52  ;;  %v12859_v7 = vld [vmem:[%s22181_s7 + $0xa90] sm:$0xff]  ;;  %v12841_v15 = vld [vmem:[%s22181_s7 + $0xa08] sm:$0xff] }
 0x6d7   :  { %8895 = vmatprep.subr.mxu1 %v12834_v5  ;;  %8798 = vmatpush1.msra.mxu0 %v12816_v53  ;;  %v12858_v52 = vld [vmem:[%s22181_s7 + $0xa88] sm:$0xff]  ;;  %v12840_v5 = vld [vmem:[%s22181_s7 + $0xa00] sm:$0xff]  ;;  %v8969_v53 = vrot.slane %v8949_v36, 7  ;;  %v12919_v36 = vld [vmem:[%s22181_s7 + $0xc58] sm:$0xff] }
 0x6d8   :  { %8896 = vmatpush1.msra.mxu1 %v12833_v41  ;;  %8799 = vmatprep.subr.mxu0 %v12815_v19  ;;  %v12857_v41 = vld [vmem:[%s22181_s7 + $0xa80] sm:$0xff]  ;;  %v9067_v19 = vrot.slane %v9047_v21, 7  ;;  %v12935_v21 = vld [vmem:[%s22181_s7 + $0xcd0] sm:$0xff] }
 0x6d9   :  { %8897 = vmatprep.subr.mxu1 %v12832_v43  ;;  %8800 = vmatpush1.msra.mxu0 %v12814_v61  ;;  %v8948_v43 = vld [vmem:[#allocation4 + $0x1c] sm:$0x1] }
 0x6da   :  { %8898 = vmatpush1.msra.mxu1 %v12831_v16  ;;  %8801 = vmatprep.subr.mxu0 %v12813_v38  ;;  %v12889_v61 = vld [vmem:[%s22181_s7 + $0xb78] sm:$0xff]  ;;  %v8970_v16 = vsel %vm7032_vm5, %v8969_v53, %v8948_v43  ;;  %v9046_v38 = vld [vmem:[#allocation4 + $0x21] sm:$0x1]  ;;  %v12931_v43 = vld [vmem:[%s22181_s7 + $0xcb0] sm:$0xff] }
 0x6db   :  { %8899 = vmatprep.subr.mxu1 %v12830_v60  ;;  %8802 = vmatpush1.msra.mxu0 %v12812_v10  ;;  %v12906_v60 = vld [vmem:[%s22181_s7 + $0xbf8] sm:$0xff]  ;;  %v12888_v10 = vld [vmem:[%s22181_s7 + $0xb70] sm:$0xff] }
 0x6dc   :  { %8900 = vmatpush1.msra.mxu1 %v12829_v11  ;;  %8803 = vmatprep.subr.mxu0 %v12811_v57  ;;  %v9068_v11 = vsel %vm7032_vm5, %v9067_v19, %v9046_v38  ;;  %v12905_v57 = vld [vmem:[%s22181_s7 + $0xbf0] sm:$0xff]  ;;  %v12915_v53 = vld [vmem:[%s22181_s7 + $0xc38] sm:$0xff]  ;;  %v12912_v38 = vld [vmem:[%s22181_s7 + $0xc20] sm:$0xff] }
 0x6dd   :  { %8901 = vmatprep.subr.mxu1 %v12828_v44  ;;  %8804 = vmatpush1.msra.mxu0 %v12810_v32  ;;  %v12887_v44 = vld [vmem:[%s22181_s7 + $0xb68] sm:$0xff]  ;;  %v12914_v19 = vld [vmem:[%s22181_s7 + $0xc30] sm:$0xff] }
 0x6de   :  { %8902 = vmatpush1.msra.mxu1 %v12827_v22  ;;  %8805 = vmatprep.subr.mxu0 %v12809_v31  ;;  %v12904_v32 = vld [vmem:[%s22181_s7 + $0xbe8] sm:$0xff]  ;;  %v12886_v22 = vld [vmem:[%s22181_s7 + $0xb60] sm:$0xff] }
 0x6df   :  { %8903 = vmatprep.subr.mxu1 %v12826_v49  ;;  %8806 = vmatpush1.msra.mxu0 %v12808_v39  ;;  %v12903_v31 = vld [vmem:[%s22181_s7 + $0xbe0] sm:$0xff]  ;;  %v12902_v49 = vld [vmem:[%s22181_s7 + $0xbd8] sm:$0xff]  ;;  %v12884_v39 = vld [vmem:[%s22181_s7 + $0xb50] sm:$0xff] }
 0x6e0   :  { %8904 = vmatpush1.msra.mxu1 %v12825_v4  ;;  %8807 = vmatprep.subr.mxu0 %v12807_v18  ;;  %v12883_v4 = vld [vmem:[%s22181_s7 + $0xb48] sm:$0xff] }
 0x6e1   :  { %8905 = vmatprep.subr.mxu1 %v12824_v28  ;;  %8808 = vmatpush1.msra.mxu0 %v12806_v20  ;;  %v12900_v18 = vld [vmem:[%s22181_s7 + $0xbc8] sm:$0xff]  ;;  %v12882_v28 = vld [vmem:[%s22181_s7 + $0xb40] sm:$0xff] }
 0x6e2   :  { %8841 = vmatprep.mubr.f32.mxu0 %v22302_v63  ;;  %8906 = vmatpush1.msra.mxu1 %v12823_v48  ;;  %v12899_v20 = vld [vmem:[%s22181_s7 + $0xbc0] sm:$0xff]  ;;  %v12898_v48 = vld [vmem:[%s22181_s7 + $0xbb8] sm:$0xff] }
 0x6e3   :  { %8939 = vmatprep.mubr.f32.mxu1 %v22302_v63  ;;  %12822 = vmatmul.mubr.msk.f32.vlgmr.msra.gmra.mxu0 %vm1928_vm4, %v8774_v2  ;;  %v12896_v2 = vld [vmem:[%s22181_s7 + $0xba8] sm:$0xff] }
 0x6e4   :  { %12839 = vmatmul.mubr.msk.f32.vlgmr.msra.gmra.mxu1 %vm1928_vm4, %v8872_v55  ;;  %8989 = vmatprep.subr.mxu0 %v12855_v47  ;;  %v12879_v47 = vld [vmem:[%s22181_s7 + $0xb28] sm:$0xff]  ;;  %v9145_v55 = vld [vmem:[#allocation4 + $0x72] sm:$0x1] }
 0x6e5   :  { %9087 = vmatprep.subr.mxu1 %v12872_v30  ;;  %8990 = vmatpush1.msra.mxu0 %v12854_v13  ;;  %v12895_v30 = vld [vmem:[%s22181_s7 + $0xba0] sm:$0xff]  ;;  %v12877_v13 = vld [vmem:[%s22181_s7 + $0xb18] sm:$0xff] }
 0x6e6   :  { %9088 = vmatpush1.msra.mxu1 %v12871_v17  ;;  %8991 = vmatprep.subr.mxu0 %v12853_v25  ;;  %v12894_v17 = vld [vmem:[%s22181_s7 + $0xb98] sm:$0xff]  ;;  %v12876_v25 = vld [vmem:[%s22181_s7 + $0xb10] sm:$0xff] }
 0x6e7   :  { %9089 = vmatprep.subr.mxu1 %v12870_v29  ;;  %8992 = vmatpush1.msra.mxu0 %v12852_v59  ;;  %v9243_v29 = vld [vmem:[#allocation4 + $0x73] sm:$0x1] }
 0x6e8   :  { %9090 = vmatpush1.msra.mxu1 %v12869_v27  ;;  %8993 = vmatprep.subr.mxu0 %v12851_v51  ;;  %v12893_v59 = vld [vmem:[%s22181_s7 + $0xb90] sm:$0xff]  ;;  %v12875_v27 = vld [vmem:[%s22181_s7 + $0xb08] sm:$0xff] }
 0x6e9   :  { %9091 = vmatprep.subr.mxu1 %v12868_v33  ;;  %8994 = vmatpush1.msra.mxu0 %v12850_v37  ;;  %v12892_v51 = vld [vmem:[%s22181_s7 + $0xb88] sm:$0xff]  ;;  %v12874_v33 = vld [vmem:[%s22181_s7 + $0xb00] sm:$0xff]  ;;  %v9165_v37 = vrot.slane %v9145_v55, 7  ;;  %v12953_v55 = vld [vmem:[%s22181_s7 + $0xd58] sm:$0xff] }
 0x6ea   :  { %9092 = vmatpush1.msra.mxu1 %v12867_v50  ;;  %8995 = vmatprep.subr.mxu0 %v12849_v34  ;;  %v12891_v50 = vld [vmem:[%s22181_s7 + $0xb80] sm:$0xff]  ;;  %v9263_v34 = vrot.slane %v9243_v29, 7  ;;  %v12969_v29 = vld [vmem:[%s22181_s7 + $0xdd0] sm:$0xff] }
 0x6eb   :  { %9093 = vmatprep.subr.mxu1 %v12866_v3  ;;  %8996 = vmatpush1.msra.mxu0 %v12848_v24  ;;  %v9144_v3 = vld [vmem:[#allocation4 + $0x22] sm:$0x1]  ;;  %v12923_v24 = vld [vmem:[%s22181_s7 + $0xc78] sm:$0xff] }
 0x6ec   :  { %9094 = vmatpush1.msra.mxu1 %v12865_v45  ;;  %8997 = vmatprep.subr.mxu0 %v12847_v14  ;;  %v9166_v45 = vsel %vm7032_vm5, %v9165_v37, %v9144_v3  ;;  %v9242_v14 = vld [vmem:[#allocation4 + $0x23] sm:$0x1]  ;;  %v12949_v37 = vld [vmem:[%s22181_s7 + $0xd38] sm:$0xff]  ;;  %v12965_v3 = vld [vmem:[%s22181_s7 + $0xdb0] sm:$0xff] }
 0x6ed   :  { %9095 = vmatprep.subr.mxu1 %v12864_v46  ;;  %8998 = vmatpush1.msra.mxu0 %v12846_v0  ;;  %v12940_v46 = vld [vmem:[%s22181_s7 + $0xcf8] sm:$0xff]  ;;  %v12922_v0 = vld [vmem:[%s22181_s7 + $0xc70] sm:$0xff] }
 0x6ee   :  { %9096 = vmatpush1.msra.mxu1 %v12863_v56  ;;  %8999 = vmatprep.subr.mxu0 %v12845_v1  ;;  %v9264_v56 = vsel %vm7032_vm5, %v9263_v34, %v9242_v14  ;;  %v12939_v1 = vld [vmem:[%s22181_s7 + $0xcf0] sm:$0xff]  ;;  %v12946_v14 = vld [vmem:[%s22181_s7 + $0xd20] sm:$0xff] }
 0x6ef   :  { %9097 = vmatprep.subr.mxu1 %v12862_v58  ;;  %9000 = vmatpush1.msra.mxu0 %v12844_v26  ;;  %v12921_v58 = vld [vmem:[%s22181_s7 + $0xc68] sm:$0xff]  ;;  %v12948_v34 = vld [vmem:[%s22181_s7 + $0xd30] sm:$0xff] }
 0x6f0   :  { %9098 = vmatpush1.msra.mxu1 %v12861_v8  ;;  %9001 = vmatprep.subr.mxu0 %v12843_v54  ;;  %v12938_v26 = vld [vmem:[%s22181_s7 + $0xce8] sm:$0xff]  ;;  %v12920_v8 = vld [vmem:[%s22181_s7 + $0xc60] sm:$0xff] }
 0x6f1   :  { %9099 = vmatprep.subr.mxu1 %v12860_v35  ;;  %9002 = vmatpush1.msra.mxu0 %v12842_v23  ;;  %v12937_v54 = vld [vmem:[%s22181_s7 + $0xce0] sm:$0xff]  ;;  %v12936_v35 = vld [vmem:[%s22181_s7 + $0xcd8] sm:$0xff]  ;;  %v12918_v23 = vld [vmem:[%s22181_s7 + $0xc50] sm:$0xff] }
 0x6f2   :  { %9100 = vmatpush1.msra.mxu1 %v12859_v7  ;;  %9003 = vmatprep.subr.mxu0 %v12841_v15  ;;  %v12917_v7 = vld [vmem:[%s22181_s7 + $0xc48] sm:$0xff] }
 0x6f3   :  { %9101 = vmatprep.subr.mxu1 %v12858_v52  ;;  %9004 = vmatpush1.msra.mxu0 %v12840_v5  ;;  %v12934_v15 = vld [vmem:[%s22181_s7 + $0xcc8] sm:$0xff]  ;;  %v12916_v52 = vld [vmem:[%s22181_s7 + $0xc40] sm:$0xff] }
 0x6f4   :  { %9037 = vmatprep.mubr.f32.mxu0 %v22302_v63  ;;  %9102 = vmatpush1.msra.mxu1 %v12857_v41  ;;  %v12933_v5 = vld [vmem:[%s22181_s7 + $0xcc0] sm:$0xff]  ;;  %v12932_v41 = vld [vmem:[%s22181_s7 + $0xcb8] sm:$0xff] }
 0x6f5   :  { %9135 = vmatprep.mubr.f32.mxu1 %v22302_v63  ;;  %12856 = vmatmul.mubr.msk.f32.vlgmr.msra.gmra.mxu0 %vm1928_vm4, %v8970_v16  ;;  %v12930_v16 = vld [vmem:[%s22181_s7 + $0xca8] sm:$0xff] }
 0x6f6   :  { %12873 = vmatmul.mubr.msk.f32.vlgmr.msra.gmra.mxu1 %vm1928_vm4, %v9068_v11  ;;  %9185 = vmatprep.subr.mxu0 %v12889_v61  ;;  %v12913_v61 = vld [vmem:[%s22181_s7 + $0xc28] sm:$0xff]  ;;  %v9341_v11 = vld [vmem:[#allocation4 + $0x74] sm:$0x1] }
 0x6f7   :  { %9283 = vmatprep.subr.mxu1 %v12906_v60  ;;  %9186 = vmatpush1.msra.mxu0 %v12888_v10  ;;  %v12929_v60 = vld [vmem:[%s22181_s7 + $0xca0] sm:$0xff]  ;;  %v12911_v10 = vld [vmem:[%s22181_s7 + $0xc18] sm:$0xff] }
 0x6f8   :  { %9284 = vmatpush1.msra.mxu1 %v12905_v57  ;;  %9187 = vmatprep.subr.mxu0 %v12887_v44  ;;  %v12928_v57 = vld [vmem:[%s22181_s7 + $0xc98] sm:$0xff]  ;;  %v12910_v44 = vld [vmem:[%s22181_s7 + $0xc10] sm:$0xff] }
 0x6f9   :  { %9285 = vmatprep.subr.mxu1 %v12904_v32  ;;  %9188 = vmatpush1.msra.mxu0 %v12886_v22  ;;  %v9439_v32 = vld [vmem:[#allocation4 + $0x75] sm:$0x1] }
 0x6fa   :  { %9286 = vmatpush1.msra.mxu1 %v12903_v31  ;;  %9189 = vmatprep.subr.mxu0 %v12885_v42  ;;  %v12927_v22 = vld [vmem:[%s22181_s7 + $0xc90] sm:$0xff]  ;;  %v12909_v31 = vld [vmem:[%s22181_s7 + $0xc08] sm:$0xff] }
 0x6fb   :  { %9287 = vmatprep.subr.mxu1 %v12902_v49  ;;  %9190 = vmatpush1.msra.mxu0 %v12884_v39  ;;  %v12926_v42 = vld [vmem:[%s22181_s7 + $0xc88] sm:$0xff]  ;;  %v12908_v49 = vld [vmem:[%s22181_s7 + $0xc00] sm:$0xff]  ;;  %v9361_v39 = vrot.slane %v9341_v11, 7  ;;  %v12987_v11 = vld [vmem:[%s22181_s7 + $0xe58] sm:$0xff] }
 0x6fc   :  { %9288 = vmatpush1.msra.mxu1 %v12901_v62  ;;  %9191 = vmatprep.subr.mxu0 %v12883_v4  ;;  %v12925_v62 = vld [vmem:[%s22181_s7 + $0xc80] sm:$0xff]  ;;  %v9459_v4 = vrot.slane %v9439_v32, 7  ;;  %v13003_v32 = vld [vmem:[%s22181_s7 + $0xed0] sm:$0xff] }
 0x6fd   :  { %9289 = vmatprep.subr.mxu1 %v12900_v18  ;;  %9192 = vmatpush1.msra.mxu0 %v12882_v28  ;;  %v9340_v18 = vld [vmem:[#allocation4 + $0x24] sm:$0x1]  ;;  %v12957_v28 = vld [vmem:[%s22181_s7 + $0xd78] sm:$0xff] }
 0x6fe   :  { %9290 = vmatpush1.msra.mxu1 %v12899_v20  ;;  %9193 = vmatprep.subr.mxu0 %v12881_v40  ;;  %v9362_v20 = vsel %vm7032_vm5, %v9361_v39, %v9340_v18  ;;  %v9438_v40 = vld [vmem:[#allocation4 + $0x25] sm:$0x1]  ;;  %v12983_v39 = vld [vmem:[%s22181_s7 + $0xe38] sm:$0xff]  ;;  %v12999_v18 = vld [vmem:[%s22181_s7 + $0xeb0] sm:$0xff] }
 0x6ff   :  { %9291 = vmatprep.subr.mxu1 %v12898_v48  ;;  %9194 = vmatpush1.msra.mxu0 %v12880_v6  ;;  %v12974_v48 = vld [vmem:[%s22181_s7 + $0xdf8] sm:$0xff]  ;;  %v12956_v6 = vld [vmem:[%s22181_s7 + $0xd70] sm:$0xff] }
 0x700   :  { %9292 = vmatpush1.msra.mxu1 %v12897_v12  ;;  %9195 = vmatprep.subr.mxu0 %v12879_v47  ;;  %v9460_v12 = vsel %vm7032_vm5, %v9459_v4, %v9438_v40  ;;  %v12973_v47 = vld [vmem:[%s22181_s7 + $0xdf0] sm:$0xff]  ;;  %v12980_v40 = vld [vmem:[%s22181_s7 + $0xe20] sm:$0xff] }
 0x701   :  { %9293 = vmatprep.subr.mxu1 %v12896_v2  ;;  %9196 = vmatpush1.msra.mxu0 %v12878_v9  ;;  %v12955_v2 = vld [vmem:[%s22181_s7 + $0xd68] sm:$0xff]  ;;  %v12982_v4 = vld [vmem:[%s22181_s7 + $0xe30] sm:$0xff] }
 0x702   :  { %9294 = vmatpush1.msra.mxu1 %v12895_v30  ;;  %9197 = vmatprep.subr.mxu0 %v12877_v13  ;;  %v12972_v9 = vld [vmem:[%s22181_s7 + $0xde8] sm:$0xff]  ;;  %v12954_v30 = vld [vmem:[%s22181_s7 + $0xd60] sm:$0xff] }
 0x703   :  { %9295 = vmatprep.subr.mxu1 %v12894_v17  ;;  %9198 = vmatpush1.msra.mxu0 %v12876_v25  ;;  %v12971_v13 = vld [vmem:[%s22181_s7 + $0xde0] sm:$0xff]  ;;  %v12970_v17 = vld [vmem:[%s22181_s7 + $0xdd8] sm:$0xff]  ;;  %v12952_v25 = vld [vmem:[%s22181_s7 + $0xd50] sm:$0xff] }
 0x704   :  { %9296 = vmatpush1.msra.mxu1 %v12893_v59  ;;  %9199 = vmatprep.subr.mxu0 %v12875_v27  ;;  %v12951_v59 = vld [vmem:[%s22181_s7 + $0xd48] sm:$0xff] }
 0x705   :  { %9297 = vmatprep.subr.mxu1 %v12892_v51  ;;  %9200 = vmatpush1.msra.mxu0 %v12874_v33  ;;  %v12968_v27 = vld [vmem:[%s22181_s7 + $0xdc8] sm:$0xff]  ;;  %v12950_v51 = vld [vmem:[%s22181_s7 + $0xd40] sm:$0xff] }
 0x706   :  { %9233 = vmatprep.mubr.f32.mxu0 %v22302_v63  ;;  %9298 = vmatpush1.msra.mxu1 %v12891_v50  ;;  %v12967_v33 = vld [vmem:[%s22181_s7 + $0xdc0] sm:$0xff]  ;;  %v12966_v50 = vld [vmem:[%s22181_s7 + $0xdb8] sm:$0xff] }
 0x707   :  { %9331 = vmatprep.mubr.f32.mxu1 %v22302_v63  ;;  %12890 = vmatmul.mubr.msk.f32.vlgmr.msra.gmra.mxu0 %vm1928_vm4, %v9166_v45  ;;  %v12964_v45 = vld [vmem:[%s22181_s7 + $0xda8] sm:$0xff] }
 0x708   :  { %12907 = vmatmul.mubr.msk.f32.vlgmr.msra.gmra.mxu1 %vm1928_vm4, %v9264_v56  ;;  %9381 = vmatprep.subr.mxu0 %v12923_v24  ;;  %v12947_v24 = vld [vmem:[%s22181_s7 + $0xd28] sm:$0xff]  ;;  %v9537_v56 = vld [vmem:[#allocation4 + $0x76] sm:$0x1] }
 0x709   :  { %9479 = vmatprep.subr.mxu1 %v12940_v46  ;;  %9382 = vmatpush1.msra.mxu0 %v12922_v0  ;;  %v12963_v46 = vld [vmem:[%s22181_s7 + $0xda0] sm:$0xff]  ;;  %v12945_v0 = vld [vmem:[%s22181_s7 + $0xd18] sm:$0xff] }
 0x70a   :  { %9480 = vmatpush1.msra.mxu1 %v12939_v1  ;;  %9383 = vmatprep.subr.mxu0 %v12921_v58  ;;  %v12962_v1 = vld [vmem:[%s22181_s7 + $0xd98] sm:$0xff]  ;;  %v12944_v58 = vld [vmem:[%s22181_s7 + $0xd10] sm:$0xff] }
 0x70b   :  { %9481 = vmatprep.subr.mxu1 %v12938_v26  ;;  %9384 = vmatpush1.msra.mxu0 %v12920_v8  ;;  %v9635_v26 = vld [vmem:[#allocation4 + $0x77] sm:$0x1] }
 0x70c   :  { %9482 = vmatpush1.msra.mxu1 %v12937_v54  ;;  %9385 = vmatprep.subr.mxu0 %v12919_v36  ;;  %v12961_v8 = vld [vmem:[%s22181_s7 + $0xd90] sm:$0xff]  ;;  %v12943_v54 = vld [vmem:[%s22181_s7 + $0xd08] sm:$0xff] }
 0x70d   :  { %9483 = vmatprep.subr.mxu1 %v12936_v35  ;;  %9386 = vmatpush1.msra.mxu0 %v12918_v23  ;;  %v12960_v36 = vld [vmem:[%s22181_s7 + $0xd88] sm:$0xff]  ;;  %v12942_v35 = vld [vmem:[%s22181_s7 + $0xd00] sm:$0xff]  ;;  %v9557_v23 = vrot.slane %v9537_v56, 7  ;;  %v13021_v56 = vld [vmem:[%s22181_s7 + $0xf58] sm:$0xff] }
 0x70e   :  { %9484 = vmatpush1.msra.mxu1 %v12935_v21  ;;  %9387 = vmatprep.subr.mxu0 %v12917_v7  ;;  %v12959_v21 = vld [vmem:[%s22181_s7 + $0xd80] sm:$0xff]  ;;  %v9655_v7 = vrot.slane %v9635_v26, 7  ;;  %v13037_v26 = vld [vmem:[%s22181_s7 + $0xfd0] sm:$0xff] }
 0x70f   :  { %9485 = vmatprep.subr.mxu1 %v12934_v15  ;;  %9388 = vmatpush1.msra.mxu0 %v12916_v52  ;;  %v9536_v15 = vld [vmem:[#allocation4 + $0x26] sm:$0x1]  ;;  %v12991_v52 = vld [vmem:[%s22181_s7 + $0xe78] sm:$0xff] }
 0x710   :  { %9486 = vmatpush1.msra.mxu1 %v12933_v5  ;;  %9389 = vmatprep.subr.mxu0 %v12915_v53  ;;  %v9558_v5 = vsel %vm7032_vm5, %v9557_v23, %v9536_v15  ;;  %v9634_v53 = vld [vmem:[#allocation4 + $0x27] sm:$0x1]  ;;  %v13017_v23 = vld [vmem:[%s22181_s7 + $0xf38] sm:$0xff]  ;;  %v13033_v15 = vld [vmem:[%s22181_s7 + $0xfb0] sm:$0xff] }
 0x711   :  { %9487 = vmatprep.subr.mxu1 %v12932_v41  ;;  %9390 = vmatpush1.msra.mxu0 %v12914_v19  ;;  %v13008_v41 = vld [vmem:[%s22181_s7 + $0xef8] sm:$0xff]  ;;  %v12990_v19 = vld [vmem:[%s22181_s7 + $0xe70] sm:$0xff] }
 0x712   :  { %9488 = vmatpush1.msra.mxu1 %v12931_v43  ;;  %9391 = vmatprep.subr.mxu0 %v12913_v61  ;;  %v9656_v43 = vsel %vm7032_vm5, %v9655_v7, %v9634_v53  ;;  %v13007_v61 = vld [vmem:[%s22181_s7 + $0xef0] sm:$0xff]  ;;  %v13014_v53 = vld [vmem:[%s22181_s7 + $0xf20] sm:$0xff] }
 0x713   :  { %9489 = vmatprep.subr.mxu1 %v12930_v16  ;;  %9392 = vmatpush1.msra.mxu0 %v12912_v38  ;;  %v12989_v16 = vld [vmem:[%s22181_s7 + $0xe68] sm:$0xff]  ;;  %v13016_v7 = vld [vmem:[%s22181_s7 + $0xf30] sm:$0xff] }
 0x714   :  { %9490 = vmatpush1.msra.mxu1 %v12929_v60  ;;  %9393 = vmatprep.subr.mxu0 %v12911_v10  ;;  %v13006_v38 = vld [vmem:[%s22181_s7 + $0xee8] sm:$0xff]  ;;  %v12988_v60 = vld [vmem:[%s22181_s7 + $0xe60] sm:$0xff] }
 0x715   :  { %9491 = vmatprep.subr.mxu1 %v12928_v57  ;;  %9394 = vmatpush1.msra.mxu0 %v12910_v44  ;;  %v13005_v10 = vld [vmem:[%s22181_s7 + $0xee0] sm:$0xff]  ;;  %v13004_v57 = vld [vmem:[%s22181_s7 + $0xed8] sm:$0xff]  ;;  %v12986_v44 = vld [vmem:[%s22181_s7 + $0xe50] sm:$0xff] }
 0x716   :  { %9492 = vmatpush1.msra.mxu1 %v12927_v22  ;;  %9395 = vmatprep.subr.mxu0 %v12909_v31  ;;  %v12985_v22 = vld [vmem:[%s22181_s7 + $0xe48] sm:$0xff] }
 0x717   :  { %9493 = vmatprep.subr.mxu1 %v12926_v42  ;;  %9396 = vmatpush1.msra.mxu0 %v12908_v49  ;;  %v13002_v31 = vld [vmem:[%s22181_s7 + $0xec8] sm:$0xff]  ;;  %v12984_v42 = vld [vmem:[%s22181_s7 + $0xe40] sm:$0xff] }
 0x718   :  { %9429 = vmatprep.mubr.f32.mxu0 %v22302_v63  ;;  %9494 = vmatpush1.msra.mxu1 %v12925_v62  ;;  %v13001_v49 = vld [vmem:[%s22181_s7 + $0xec0] sm:$0xff]  ;;  %v13000_v62 = vld [vmem:[%s22181_s7 + $0xeb8] sm:$0xff] }
 0x719   :  { %9527 = vmatprep.mubr.f32.mxu1 %v22302_v63  ;;  %12924 = vmatmul.mubr.msk.f32.vlgmr.msra.gmra.mxu0 %vm1928_vm4, %v9362_v20  ;;  %v12998_v20 = vld [vmem:[%s22181_s7 + $0xea8] sm:$0xff] }
 0x71a   :  { %12941 = vmatmul.mubr.msk.f32.vlgmr.msra.gmra.mxu1 %vm1928_vm4, %v9460_v12  ;;  %9577 = vmatprep.subr.mxu0 %v12957_v28  ;;  %v12981_v28 = vld [vmem:[%s22181_s7 + $0xe28] sm:$0xff]  ;;  %v9733_v12 = vld [vmem:[#allocation4 + $0x7c] sm:$0x1] }
 0x71b   :  { %9675 = vmatprep.subr.mxu1 %v12974_v48  ;;  %9578 = vmatpush1.msra.mxu0 %v12956_v6  ;;  %v12997_v48 = vld [vmem:[%s22181_s7 + $0xea0] sm:$0xff]  ;;  %v12979_v6 = vld [vmem:[%s22181_s7 + $0xe18] sm:$0xff] }
 0x71c   :  { %9676 = vmatpush1.msra.mxu1 %v12973_v47  ;;  %9579 = vmatprep.subr.mxu0 %v12955_v2  ;;  %v12996_v47 = vld [vmem:[%s22181_s7 + $0xe98] sm:$0xff]  ;;  %v12978_v2 = vld [vmem:[%s22181_s7 + $0xe10] sm:$0xff] }
 0x71d   :  { %9677 = vmatprep.subr.mxu1 %v12972_v9  ;;  %9580 = vmatpush1.msra.mxu0 %v12954_v30  ;;  %v9831_v9 = vld [vmem:[#allocation4 + $0x7d] sm:$0x1]  ;;  %v12995_v30 = vld [vmem:[%s22181_s7 + $0xe90] sm:$0xff] }
 0x71e   :  { %9678 = vmatpush1.msra.mxu1 %v12971_v13  ;;  %9581 = vmatprep.subr.mxu0 %v12953_v55  ;;  %v12977_v13 = vld [vmem:[%s22181_s7 + $0xe08] sm:$0xff] }
 0x71f   :  { %9679 = vmatprep.subr.mxu1 %v12970_v17  ;;  %9582 = vmatpush1.msra.mxu0 %v12952_v25  ;;  %v12994_v55 = vld [vmem:[%s22181_s7 + $0xe88] sm:$0xff]  ;;  %v12976_v17 = vld [vmem:[%s22181_s7 + $0xe00] sm:$0xff]  ;;  %v9753_v25 = vrot.slane %v9733_v12, 7  ;;  %v13055_v12 = vld [vmem:[%s22181_s7 + $0x1058] sm:$0xff] }
 0x720   :  { %9680 = vmatpush1.msra.mxu1 %v12969_v29  ;;  %9583 = vmatprep.subr.mxu0 %v12951_v59  ;;  %v12993_v29 = vld [vmem:[%s22181_s7 + $0xe80] sm:$0xff]  ;;  %v9851_v59 = vrot.slane %v9831_v9, 7  ;;  %v13071_v9 = vld [vmem:[%s22181_s7 + $0x10d0] sm:$0xff] }
 0x721   :  { %9681 = vmatprep.subr.mxu1 %v12968_v27  ;;  %9584 = vmatpush1.msra.mxu0 %v12950_v51  ;;  %v9732_v27 = vld [vmem:[#allocation4 + $0x2c] sm:$0x1]  ;;  %v13025_v51 = vld [vmem:[%s22181_s7 + $0xf78] sm:$0xff] }
 0x722   :  { %9682 = vmatpush1.msra.mxu1 %v12967_v33  ;;  %9585 = vmatprep.subr.mxu0 %v12949_v37  ;;  %v9754_v33 = vsel %vm7032_vm5, %v9753_v25, %v9732_v27  ;;  %v9830_v37 = vld [vmem:[#allocation4 + $0x2d] sm:$0x1]  ;;  %v13051_v25 = vld [vmem:[%s22181_s7 + $0x1038] sm:$0xff]  ;;  %v13067_v27 = vld [vmem:[%s22181_s7 + $0x10b0] sm:$0xff] }
 0x723   :  { %9683 = vmatprep.subr.mxu1 %v12966_v50  ;;  %9586 = vmatpush1.msra.mxu0 %v12948_v34  ;;  %v13042_v50 = vld [vmem:[%s22181_s7 + $0xff8] sm:$0xff]  ;;  %v13024_v34 = vld [vmem:[%s22181_s7 + $0xf70] sm:$0xff] }
 0x724   :  { %9684 = vmatpush1.msra.mxu1 %v12965_v3  ;;  %9587 = vmatprep.subr.mxu0 %v12947_v24  ;;  %v9852_v3 = vsel %vm7032_vm5, %v9851_v59, %v9830_v37  ;;  %v13041_v24 = vld [vmem:[%s22181_s7 + $0xff0] sm:$0xff]  ;;  %v13048_v37 = vld [vmem:[%s22181_s7 + $0x1020] sm:$0xff] }
 0x725   :  { %9685 = vmatprep.subr.mxu1 %v12964_v45  ;;  %9588 = vmatpush1.msra.mxu0 %v12946_v14  ;;  %v13023_v45 = vld [vmem:[%s22181_s7 + $0xf68] sm:$0xff]  ;;  %v13050_v59 = vld [vmem:[%s22181_s7 + $0x1030] sm:$0xff] }
 0x726   :  { %9686 = vmatpush1.msra.mxu1 %v12963_v46  ;;  %9589 = vmatprep.subr.mxu0 %v12945_v0  ;;  %v13040_v14 = vld [vmem:[%s22181_s7 + $0xfe8] sm:$0xff]  ;;  %v13022_v46 = vld [vmem:[%s22181_s7 + $0xf60] sm:$0xff] }
 0x727   :  { %9687 = vmatprep.subr.mxu1 %v12962_v1  ;;  %9590 = vmatpush1.msra.mxu0 %v12944_v58  ;;  %v13039_v0 = vld [vmem:[%s22181_s7 + $0xfe0] sm:$0xff]  ;;  %v13038_v1 = vld [vmem:[%s22181_s7 + $0xfd8] sm:$0xff]  ;;  %v13020_v58 = vld [vmem:[%s22181_s7 + $0xf50] sm:$0xff] }
 0x728   :  { %9688 = vmatpush1.msra.mxu1 %v12961_v8  ;;  %9591 = vmatprep.subr.mxu0 %v12943_v54  ;;  %v13019_v8 = vld [vmem:[%s22181_s7 + $0xf48] sm:$0xff] }
 0x729   :  { %9689 = vmatprep.subr.mxu1 %v12960_v36  ;;  %9592 = vmatpush1.msra.mxu0 %v12942_v35  ;;  %v13036_v54 = vld [vmem:[%s22181_s7 + $0xfc8] sm:$0xff]  ;;  %v13018_v36 = vld [vmem:[%s22181_s7 + $0xf40] sm:$0xff] }
 0x72a   :  { %9625 = vmatprep.mubr.f32.mxu0 %v22302_v63  ;;  %9690 = vmatpush1.msra.mxu1 %v12959_v21  ;;  %v13035_v35 = vld [vmem:[%s22181_s7 + $0xfc0] sm:$0xff]  ;;  %v13034_v21 = vld [vmem:[%s22181_s7 + $0xfb8] sm:$0xff] }
 0x72b   :  { %9723 = vmatprep.mubr.f32.mxu1 %v22302_v63  ;;  %12958 = vmatmul.mubr.msk.f32.vlgmr.msra.gmra.mxu0 %vm1928_vm4, %v9558_v5  ;;  %v13032_v5 = vld [vmem:[%s22181_s7 + $0xfa8] sm:$0xff] }
 0x72c   :  { %12975 = vmatmul.mubr.msk.f32.vlgmr.msra.gmra.mxu1 %vm1928_vm4, %v9656_v43  ;;  %9773 = vmatprep.subr.mxu0 %v12991_v52  ;;  %v13015_v52 = vld [vmem:[%s22181_s7 + $0xf28] sm:$0xff]  ;;  %v9929_v43 = vld [vmem:[#allocation4 + $0x7e] sm:$0x1] }
 0x72d   :  { %9871 = vmatprep.subr.mxu1 %v13008_v41  ;;  %9774 = vmatpush1.msra.mxu0 %v12990_v19  ;;  %v13031_v41 = vld [vmem:[%s22181_s7 + $0xfa0] sm:$0xff]  ;;  %v13013_v19 = vld [vmem:[%s22181_s7 + $0xf18] sm:$0xff] }
 0x72e   :  { %9872 = vmatpush1.msra.mxu1 %v13007_v61  ;;  %9775 = vmatprep.subr.mxu0 %v12989_v16  ;;  %v13030_v61 = vld [vmem:[%s22181_s7 + $0xf98] sm:$0xff]  ;;  %v13012_v16 = vld [vmem:[%s22181_s7 + $0xf10] sm:$0xff] }
 0x72f   :  { %9873 = vmatprep.subr.mxu1 %v13006_v38  ;;  %9776 = vmatpush1.msra.mxu0 %v12988_v60  ;;  %v10027_v38 = vld [vmem:[#allocation4 + $0x7f] sm:$0x1]  ;;  %v13029_v60 = vld [vmem:[%s22181_s7 + $0xf90] sm:$0xff] }
 0x730   :  { %9874 = vmatpush1.msra.mxu1 %v13005_v10  ;;  %9777 = vmatprep.subr.mxu0 %v12987_v11  ;;  %v13011_v10 = vld [vmem:[%s22181_s7 + $0xf08] sm:$0xff] }
 0x731   :  { %9875 = vmatprep.subr.mxu1 %v13004_v57  ;;  %9778 = vmatpush1.msra.mxu0 %v12986_v44  ;;  %v13028_v11 = vld [vmem:[%s22181_s7 + $0xf88] sm:$0xff]  ;;  %v13010_v57 = vld [vmem:[%s22181_s7 + $0xf00] sm:$0xff]  ;;  %v9949_v44 = vrot.slane %v9929_v43, 7  ;;  %v13089_v43 = vld [vmem:[%s22181_s7 + $0x1158] sm:$0xff] }
 0x732   :  { %9876 = vmatpush1.msra.mxu1 %v13003_v32  ;;  %9779 = vmatprep.subr.mxu0 %v12985_v22  ;;  %v13027_v32 = vld [vmem:[%s22181_s7 + $0xf80] sm:$0xff]  ;;  %v10047_v22 = vrot.slane %v10027_v38, 7  ;;  %v13105_v38 = vld [vmem:[%s22181_s7 + $0x11d0] sm:$0xff] }
 0x733   :  { %9877 = vmatprep.subr.mxu1 %v13002_v31  ;;  %9780 = vmatpush1.msra.mxu0 %v12984_v42  ;;  %v9928_v31 = vld [vmem:[#allocation4 + $0x2e] sm:$0x1]  ;;  %v13059_v42 = vld [vmem:[%s22181_s7 + $0x1078] sm:$0xff] }
 0x734   :  { %9878 = vmatpush1.msra.mxu1 %v13001_v49  ;;  %9781 = vmatprep.subr.mxu0 %v12983_v39  ;;  %v9950_v49 = vsel %vm7032_vm5, %v9949_v44, %v9928_v31  ;;  %v10026_v39 = vld [vmem:[#allocation4 + $0x2f] sm:$0x1]  ;;  %v13085_v44 = vld [vmem:[%s22181_s7 + $0x1138] sm:$0xff]  ;;  %v13101_v31 = vld [vmem:[%s22181_s7 + $0x11b0] sm:$0xff] }
 0x735   :  { %9879 = vmatprep.subr.mxu1 %v13000_v62  ;;  %9782 = vmatpush1.msra.mxu0 %v12982_v4  ;;  %v13076_v62 = vld [vmem:[%s22181_s7 + $0x10f8] sm:$0xff]  ;;  %v13058_v4 = vld [vmem:[%s22181_s7 + $0x1070] sm:$0xff] }
 0x736   :  { %9880 = vmatpush1.msra.mxu1 %v12999_v18  ;;  %9783 = vmatprep.subr.mxu0 %v12981_v28  ;;  %v10048_v18 = vsel %vm7032_vm5, %v10047_v22, %v10026_v39  ;;  %v13075_v28 = vld [vmem:[%s22181_s7 + $0x10f0] sm:$0xff]  ;;  %v13082_v39 = vld [vmem:[%s22181_s7 + $0x1120] sm:$0xff] }
 0x737   :  { %9881 = vmatprep.subr.mxu1 %v12998_v20  ;;  %9784 = vmatpush1.msra.mxu0 %v12980_v40  ;;  %v13057_v20 = vld [vmem:[%s22181_s7 + $0x1068] sm:$0xff]  ;;  %v13084_v22 = vld [vmem:[%s22181_s7 + $0x1130] sm:$0xff] }
 0x738   :  { %9882 = vmatpush1.msra.mxu1 %v12997_v48  ;;  %9785 = vmatprep.subr.mxu0 %v12979_v6  ;;  %v13074_v40 = vld [vmem:[%s22181_s7 + $0x10e8] sm:$0xff]  ;;  %v13056_v48 = vld [vmem:[%s22181_s7 + $0x1060] sm:$0xff] }
 0x739   :  { %9883 = vmatprep.subr.mxu1 %v12996_v47  ;;  %9786 = vmatpush1.msra.mxu0 %v12978_v2  ;;  %v13073_v6 = vld [vmem:[%s22181_s7 + $0x10e0] sm:$0xff]  ;;  %v13072_v47 = vld [vmem:[%s22181_s7 + $0x10d8] sm:$0xff]  ;;  %v13054_v2 = vld [vmem:[%s22181_s7 + $0x1050] sm:$0xff] }
 0x73a   :  { %9884 = vmatpush1.msra.mxu1 %v12995_v30  ;;  %9787 = vmatprep.subr.mxu0 %v12977_v13  ;;  %v13053_v30 = vld [vmem:[%s22181_s7 + $0x1048] sm:$0xff] }
 0x73b   :  { %9885 = vmatprep.subr.mxu1 %v12994_v55  ;;  %9788 = vmatpush1.msra.mxu0 %v12976_v17  ;;  %v13070_v13 = vld [vmem:[%s22181_s7 + $0x10c8] sm:$0xff]  ;;  %v13052_v55 = vld [vmem:[%s22181_s7 + $0x1040] sm:$0xff] }
 0x73c   :  { %9821 = vmatprep.mubr.f32.mxu0 %v22302_v63  ;;  %9886 = vmatpush1.msra.mxu1 %v12993_v29  ;;  %v13069_v17 = vld [vmem:[%s22181_s7 + $0x10c0] sm:$0xff]  ;;  %v13068_v29 = vld [vmem:[%s22181_s7 + $0x10b8] sm:$0xff] }
 0x73d   :  { %9919 = vmatprep.mubr.f32.mxu1 %v22302_v63  ;;  %12992 = vmatmul.mubr.msk.f32.vlgmr.msra.gmra.mxu0 %vm1928_vm4, %v9754_v33  ;;  %v13066_v33 = vld [vmem:[%s22181_s7 + $0x10a8] sm:$0xff] }
 0x73e   :  { %13009 = vmatmul.mubr.msk.f32.vlgmr.msra.gmra.mxu1 %vm1928_vm4, %v9852_v3  ;;  %9969 = vmatprep.subr.mxu0 %v13025_v51  ;;  %v13049_v51 = vld [vmem:[%s22181_s7 + $0x1028] sm:$0xff]  ;;  %v10125_v3 = vld [vmem:[#allocation4 + $0x80] sm:$0x1] }
 0x73f   :  { %10067 = vmatprep.subr.mxu1 %v13042_v50  ;;  %9970 = vmatpush1.msra.mxu0 %v13024_v34  ;;  %v13065_v50 = vld [vmem:[%s22181_s7 + $0x10a0] sm:$0xff]  ;;  %v13047_v34 = vld [vmem:[%s22181_s7 + $0x1018] sm:$0xff] }
 0x740   :  { %10068 = vmatpush1.msra.mxu1 %v13041_v24  ;;  %9971 = vmatprep.subr.mxu0 %v13023_v45  ;;  %v13064_v24 = vld [vmem:[%s22181_s7 + $0x1098] sm:$0xff]  ;;  %v13046_v45 = vld [vmem:[%s22181_s7 + $0x1010] sm:$0xff] }
 0x741   :  { %10069 = vmatprep.subr.mxu1 %v13040_v14  ;;  %9972 = vmatpush1.msra.mxu0 %v13022_v46  ;;  %v10223_v14 = vld [vmem:[#allocation4 + $0x81] sm:$0x1]  ;;  %v13063_v46 = vld [vmem:[%s22181_s7 + $0x1090] sm:$0xff] }
 0x742   :  { %10070 = vmatpush1.msra.mxu1 %v13039_v0  ;;  %9973 = vmatprep.subr.mxu0 %v13021_v56  ;;  %v13045_v0 = vld [vmem:[%s22181_s7 + $0x1008] sm:$0xff] }
 0x743   :  { %10071 = vmatprep.subr.mxu1 %v13038_v1  ;;  %9974 = vmatpush1.msra.mxu0 %v13020_v58  ;;  %v13062_v56 = vld [vmem:[%s22181_s7 + $0x1088] sm:$0xff]  ;;  %v13044_v1 = vld [vmem:[%s22181_s7 + $0x1000] sm:$0xff]  ;;  %v10145_v58 = vrot.slane %v10125_v3, 7  ;;  %v13123_v3 = vld [vmem:[%s22181_s7 + $0x1258] sm:$0xff] }
 0x744   :  { %10072 = vmatpush1.msra.mxu1 %v13037_v26  ;;  %9975 = vmatprep.subr.mxu0 %v13019_v8  ;;  %v13061_v26 = vld [vmem:[%s22181_s7 + $0x1080] sm:$0xff]  ;;  %v10243_v8 = vrot.slane %v10223_v14, 7  ;;  %v13139_v14 = vld [vmem:[%s22181_s7 + $0x12d0] sm:$0xff] }
 0x745   :  { %10073 = vmatprep.subr.mxu1 %v13036_v54  ;;  %9976 = vmatpush1.msra.mxu0 %v13018_v36  ;;  %v10124_v54 = vld [vmem:[#allocation4 + $0x30] sm:$0x1]  ;;  %v13093_v36 = vld [vmem:[%s22181_s7 + $0x1178] sm:$0xff] }
 0x746   :  { %10074 = vmatpush1.msra.mxu1 %v13035_v35  ;;  %9977 = vmatprep.subr.mxu0 %v13017_v23  ;;  %v10146_v35 = vsel %vm7032_vm5, %v10145_v58, %v10124_v54  ;;  %v10222_v23 = vld [vmem:[#allocation4 + $0x31] sm:$0x1]  ;;  %v13119_v58 = vld [vmem:[%s22181_s7 + $0x1238] sm:$0xff] }
 0x747   :  { %10075 = vmatprep.subr.mxu1 %v13034_v21  ;;  %9978 = vmatpush1.msra.mxu0 %v13016_v7  ;;  %v13110_v21 = vld [vmem:[%s22181_s7 + $0x11f8] sm:$0xff]  ;;  %v13092_v7 = vld [vmem:[%s22181_s7 + $0x1170] sm:$0xff] }
 0x748   :  { %10076 = vmatpush1.msra.mxu1 %v13033_v15  ;;  %9979 = vmatprep.subr.mxu0 %v13015_v52  ;;  %v10244_v15 = vsel %vm7032_vm5, %v10243_v8, %v10222_v23  ;;  %v13109_v52 = vld [vmem:[%s22181_s7 + $0x11f0] sm:$0xff]  ;;  %v13116_v23 = vld [vmem:[%s22181_s7 + $0x1220] sm:$0xff] }
 0x749   :  { %10077 = vmatprep.subr.mxu1 %v13032_v5  ;;  %9980 = vmatpush1.msra.mxu0 %v13014_v53  ;;  %v13091_v5 = vld [vmem:[%s22181_s7 + $0x1168] sm:$0xff]  ;;  %v13118_v8 = vld [vmem:[%s22181_s7 + $0x1230] sm:$0xff] }
 0x74a   :  { %10078 = vmatpush1.msra.mxu1 %v13031_v41  ;;  %9981 = vmatprep.subr.mxu0 %v13013_v19  ;;  %v13108_v53 = vld [vmem:[%s22181_s7 + $0x11e8] sm:$0xff]  ;;  %v13090_v41 = vld [vmem:[%s22181_s7 + $0x1160] sm:$0xff]  ;;  %v13135_v54 = vld [vmem:[%s22181_s7 + $0x12b0] sm:$0xff] }
 0x74b   :  { %10079 = vmatprep.subr.mxu1 %v13030_v61  ;;  %9982 = vmatpush1.msra.mxu0 %v13012_v16  ;;  %v13107_v19 = vld [vmem:[%s22181_s7 + $0x11e0] sm:$0xff]  ;;  %v13106_v61 = vld [vmem:[%s22181_s7 + $0x11d8] sm:$0xff]  ;;  %v13088_v16 = vld [vmem:[%s22181_s7 + $0x1150] sm:$0xff] }
 0x74c   :  { %10080 = vmatpush1.msra.mxu1 %v13029_v60  ;;  %9983 = vmatprep.subr.mxu0 %v13011_v10  ;;  %v13087_v60 = vld [vmem:[%s22181_s7 + $0x1148] sm:$0xff] }
 0x74d   :  { %10081 = vmatprep.subr.mxu1 %v13028_v11  ;;  %9984 = vmatpush1.msra.mxu0 %v13010_v57  ;;  %v13104_v10 = vld [vmem:[%s22181_s7 + $0x11c8] sm:$0xff]  ;;  %v13086_v11 = vld [vmem:[%s22181_s7 + $0x1140] sm:$0xff] }
 0x74e   :  { %10017 = vmatprep.mubr.f32.mxu0 %v22302_v63  ;;  %10082 = vmatpush1.msra.mxu1 %v13027_v32  ;;  %v13103_v57 = vld [vmem:[%s22181_s7 + $0x11c0] sm:$0xff]  ;;  %v13102_v32 = vld [vmem:[%s22181_s7 + $0x11b8] sm:$0xff] }
 0x74f   :  { %10115 = vmatprep.mubr.f32.mxu1 %v22302_v63  ;;  %13026 = vmatmul.mubr.msk.f32.vlgmr.msra.gmra.mxu0 %vm1928_vm4, %v9950_v49  ;;  %v13100_v49 = vld [vmem:[%s22181_s7 + $0x11a8] sm:$0xff] }
 0x750   :  { %13043 = vmatmul.mubr.msk.f32.vlgmr.msra.gmra.mxu1 %vm1928_vm4, %v10048_v18  ;;  %10165 = vmatprep.subr.mxu0 %v13059_v42  ;;  %v13083_v42 = vld [vmem:[%s22181_s7 + $0x1128] sm:$0xff]  ;;  %v10321_v18 = vld [vmem:[#allocation4 + $0x82] sm:$0x1] }
 0x751   :  { %10263 = vmatprep.subr.mxu1 %v13076_v62  ;;  %10166 = vmatpush1.msra.mxu0 %v13058_v4  ;;  %v13099_v62 = vld [vmem:[%s22181_s7 + $0x11a0] sm:$0xff]  ;;  %v13081_v4 = vld [vmem:[%s22181_s7 + $0x1118] sm:$0xff] }
 0x752   :  { %10264 = vmatpush1.msra.mxu1 %v13075_v28  ;;  %10167 = vmatprep.subr.mxu0 %v13057_v20  ;;  %v13098_v28 = vld [vmem:[%s22181_s7 + $0x1198] sm:$0xff]  ;;  %v13080_v20 = vld [vmem:[%s22181_s7 + $0x1110] sm:$0xff] }
 0x753   :  { %10265 = vmatprep.subr.mxu1 %v13074_v40  ;;  %10168 = vmatpush1.msra.mxu0 %v13056_v48  ;;  %v10419_v40 = vld [vmem:[#allocation4 + $0x87] sm:$0x1]  ;;  %v13097_v48 = vld [vmem:[%s22181_s7 + $0x1190] sm:$0xff] }
 0x754   :  { %10266 = vmatpush1.msra.mxu1 %v13073_v6  ;;  %10169 = vmatprep.subr.mxu0 %v13055_v12  ;;  %v13079_v6 = vld [vmem:[%s22181_s7 + $0x1108] sm:$0xff] }
 0x755   :  { %10267 = vmatprep.subr.mxu1 %v13072_v47  ;;  %10170 = vmatpush1.msra.mxu0 %v13054_v2  ;;  %v13096_v12 = vld [vmem:[%s22181_s7 + $0x1188] sm:$0xff]  ;;  %v13078_v47 = vld [vmem:[%s22181_s7 + $0x1100] sm:$0xff]  ;;  %v10341_v2 = vrot.slane %v10321_v18, 7  ;;  %v13157_v18 = vld [vmem:[%s22181_s7 + $0x1358] sm:$0xff] }
 0x756   :  { %10268 = vmatpush1.msra.mxu1 %v13071_v9  ;;  %10171 = vmatprep.subr.mxu0 %v13053_v30  ;;  %v13095_v9 = vld [vmem:[%s22181_s7 + $0x1180] sm:$0xff]  ;;  %v10439_v30 = vrot.slane %v10419_v40, 7  ;;  %v13173_v40 = vld [vmem:[%s22181_s7 + $0x13d0] sm:$0xff] }
 0x757   :  { %10269 = vmatprep.subr.mxu1 %v13070_v13  ;;  %10172 = vmatpush1.msra.mxu0 %v13052_v55  ;;  %v10320_v13 = vld [vmem:[#allocation4 + $0x32] sm:$0x1]  ;;  %v13127_v55 = vld [vmem:[%s22181_s7 + $0x1278] sm:$0xff] }
 0x758   :  { %10270 = vmatpush1.msra.mxu1 %v13069_v17  ;;  %10173 = vmatprep.subr.mxu0 %v13051_v25  ;;  %v10342_v17 = vsel %vm7032_vm5, %v10341_v2, %v10320_v13  ;;  %v10418_v25 = vld [vmem:[#allocation4 + $0x37] sm:$0x1]  ;;  %v13153_v2 = vld [vmem:[%s22181_s7 + $0x1338] sm:$0xff] }
 0x759   :  { %10271 = vmatprep.subr.mxu1 %v13068_v29  ;;  %10174 = vmatpush1.msra.mxu0 %v13050_v59  ;;  %v13144_v29 = vld [vmem:[%s22181_s7 + $0x12f8] sm:$0xff]  ;;  %v13126_v59 = vld [vmem:[%s22181_s7 + $0x1270] sm:$0xff] }
 0x75a   :  { %10272 = vmatpush1.msra.mxu1 %v13067_v27  ;;  %10175 = vmatprep.subr.mxu0 %v13049_v51  ;;  %v10440_v27 = vsel %vm7032_vm5, %v10439_v30, %v10418_v25  ;;  %v13143_v51 = vld [vmem:[%s22181_s7 + $0x12f0] sm:$0xff]  ;;  %v13150_v25 = vld [vmem:[%s22181_s7 + $0x1320] sm:$0xff] }
 0x75b   :  { %10273 = vmatprep.subr.mxu1 %v13066_v33  ;;  %10176 = vmatpush1.msra.mxu0 %v13048_v37  ;;  %v13125_v33 = vld [vmem:[%s22181_s7 + $0x1268] sm:$0xff]  ;;  %v13152_v30 = vld [vmem:[%s22181_s7 + $0x1330] sm:$0xff] }
 0x75c   :  { %10274 = vmatpush1.msra.mxu1 %v13065_v50  ;;  %10177 = vmatprep.subr.mxu0 %v13047_v34  ;;  %v13142_v37 = vld [vmem:[%s22181_s7 + $0x12e8] sm:$0xff]  ;;  %v13124_v50 = vld [vmem:[%s22181_s7 + $0x1260] sm:$0xff]  ;;  %v13169_v13 = vld [vmem:[%s22181_s7 + $0x13b0] sm:$0xff] }
 0x75d   :  { %10275 = vmatprep.subr.mxu1 %v13064_v24  ;;  %10178 = vmatpush1.msra.mxu0 %v13046_v45  ;;  %v13141_v34 = vld [vmem:[%s22181_s7 + $0x12e0] sm:$0xff]  ;;  %v13140_v24 = vld [vmem:[%s22181_s7 + $0x12d8] sm:$0xff]  ;;  %v13122_v45 = vld [vmem:[%s22181_s7 + $0x1250] sm:$0xff] }
 0x75e   :  { %10276 = vmatpush1.msra.mxu1 %v13063_v46  ;;  %10179 = vmatprep.subr.mxu0 %v13045_v0  ;;  %v13121_v46 = vld [vmem:[%s22181_s7 + $0x1248] sm:$0xff] }
 0x75f   :  { %10277 = vmatprep.subr.mxu1 %v13062_v56  ;;  %10180 = vmatpush1.msra.mxu0 %v13044_v1  ;;  %v13138_v0 = vld [vmem:[%s22181_s7 + $0x12c8] sm:$0xff]  ;;  %v13120_v56 = vld [vmem:[%s22181_s7 + $0x1240] sm:$0xff] }
 0x760   :  { %10213 = vmatprep.mubr.f32.mxu0 %v22302_v63  ;;  %10278 = vmatpush1.msra.mxu1 %v13061_v26  ;;  %v13137_v1 = vld [vmem:[%s22181_s7 + $0x12c0] sm:$0xff]  ;;  %v13136_v26 = vld [vmem:[%s22181_s7 + $0x12b8] sm:$0xff] }
 0x761   :  { %10311 = vmatprep.mubr.f32.mxu1 %v22302_v63  ;;  %13060 = vmatmul.mubr.msk.f32.vlgmr.msra.gmra.mxu0 %vm1928_vm4, %v10146_v35  ;;  %v13134_v35 = vld [vmem:[%s22181_s7 + $0x12a8] sm:$0xff] }
 0x762   :  { %13077 = vmatmul.mubr.msk.f32.vlgmr.msra.gmra.mxu1 %vm1928_vm4, %v10244_v15  ;;  %10361 = vmatprep.subr.mxu0 %v13093_v36  ;;  %v13117_v36 = vld [vmem:[%s22181_s7 + $0x1228] sm:$0xff] }
 0x763   :  { %10459 = vmatprep.subr.mxu1 %v13110_v21  ;;  %10362 = vmatpush1.msra.mxu0 %v13092_v7  ;;  %v13133_v21 = vld [vmem:[%s22181_s7 + $0x12a0] sm:$0xff]  ;;  %v13115_v7 = vld [vmem:[%s22181_s7 + $0x1218] sm:$0xff]  ;;  %v10517_v15 = vld [vmem:[#allocation4 + $0x88] sm:$0x1] }
 0x764   :  { %10460 = vmatpush1.msra.mxu1 %v13109_v52  ;;  %10363 = vmatprep.subr.mxu0 %v13091_v5  ;;  %v13132_v52 = vld [vmem:[%s22181_s7 + $0x1298] sm:$0xff]  ;;  %v13114_v5 = vld [vmem:[%s22181_s7 + $0x1210] sm:$0xff] }
 0x765   :  { %10461 = vmatprep.subr.mxu1 %v13108_v53  ;;  %10364 = vmatpush1.msra.mxu0 %v13090_v41  ;;  %v10615_v53 = vld [vmem:[#allocation4 + $0x89] sm:$0x1]  ;;  %v13131_v41 = vld [vmem:[%s22181_s7 + $0x1290] sm:$0xff] }
 0x766   :  { %10462 = vmatpush1.msra.mxu1 %v13107_v19  ;;  %10365 = vmatprep.subr.mxu0 %v13089_v43  ;;  %v13113_v19 = vld [vmem:[%s22181_s7 + $0x1208] sm:$0xff] }
 0x767   :  { %10463 = vmatprep.subr.mxu1 %v13106_v61  ;;  %10366 = vmatpush1.msra.mxu0 %v13088_v16  ;;  %v13130_v43 = vld [vmem:[%s22181_s7 + $0x1288] sm:$0xff]  ;;  %v13112_v61 = vld [vmem:[%s22181_s7 + $0x1200] sm:$0xff]  ;;  %v10537_v16 = vrot.slane %v10517_v15, 7  ;;  %v13191_v15 = vld [vmem:[%s22181_s7 + $0x1458] sm:$0xff] }
 0x768   :  { %10464 = vmatpush1.msra.mxu1 %v13105_v38  ;;  %10367 = vmatprep.subr.mxu0 %v13087_v60  ;;  %v13129_v38 = vld [vmem:[%s22181_s7 + $0x1280] sm:$0xff]  ;;  %v10635_v60 = vrot.slane %v10615_v53, 7  ;;  %v13207_v53 = vld [vmem:[%s22181_s7 + $0x14d0] sm:$0xff] }
 0x769   :  { %10465 = vmatprep.subr.mxu1 %v13104_v10  ;;  %10368 = vmatpush1.msra.mxu0 %v13086_v11  ;;  %v10516_v10 = vld [vmem:[#allocation4 + $0x38] sm:$0x1] }
 0x76a   :  { %10466 = vmatpush1.msra.mxu1 %v13103_v57  ;;  %10369 = vmatprep.subr.mxu0 %v13085_v44  ;;  %v13161_v11 = vld [vmem:[%s22181_s7 + $0x1378] sm:$0xff]  ;;  %v10538_v57 = vsel %vm7032_vm5, %v10537_v16, %v10516_v10  ;;  %v13203_v10 = vld [vmem:[%s22181_s7 + $0x14b0] sm:$0xff] }
 0x76b   :  { %10467 = vmatprep.subr.mxu1 %v13102_v32  ;;  %10370 = vmatpush1.msra.mxu0 %v13084_v22  ;;  %v10614_v44 = vld [vmem:[#allocation4 + $0x39] sm:$0x1]  ;;  %v13160_v22 = vld [vmem:[%s22181_s7 + $0x1370] sm:$0xff] }
 0x76c   :  { %10468 = vmatpush1.msra.mxu1 %v13101_v31  ;;  %10371 = vmatprep.subr.mxu0 %v13083_v42  ;;  %v13178_v32 = vld [vmem:[%s22181_s7 + $0x13f8] sm:$0xff]  ;;  %v10636_v31 = vsel %vm7032_vm5, %v10635_v60, %v10614_v44  ;;  %v13177_v42 = vld [vmem:[%s22181_s7 + $0x13f0] sm:$0xff]  ;;  %v13184_v44 = vld [vmem:[%s22181_s7 + $0x1420] sm:$0xff] }
 0x76d   :  { %10469 = vmatprep.subr.mxu1 %v13100_v49  ;;  %10372 = vmatpush1.msra.mxu0 %v13082_v39  ;;  %v13159_v49 = vld [vmem:[%s22181_s7 + $0x1368] sm:$0xff]  ;;  %v13187_v16 = vld [vmem:[%s22181_s7 + $0x1438] sm:$0xff]  ;;  %v13186_v60 = vld [vmem:[%s22181_s7 + $0x1430] sm:$0xff] }
 0x76e   :  { %10470 = vmatpush1.msra.mxu1 %v13099_v62  ;;  %10373 = vmatprep.subr.mxu0 %v13081_v4  ;;  %v13176_v39 = vld [vmem:[%s22181_s7 + $0x13e8] sm:$0xff]  ;;  %v13158_v62 = vld [vmem:[%s22181_s7 + $0x1360] sm:$0xff] }
 0x76f   :  { %10471 = vmatprep.subr.mxu1 %v13098_v28  ;;  %10374 = vmatpush1.msra.mxu0 %v13080_v20  ;;  %v13175_v4 = vld [vmem:[%s22181_s7 + $0x13e0] sm:$0xff]  ;;  %v13174_v28 = vld [vmem:[%s22181_s7 + $0x13d8] sm:$0xff]  ;;  %v13156_v20 = vld [vmem:[%s22181_s7 + $0x1350] sm:$0xff] }
 0x770   :  { %10472 = vmatpush1.msra.mxu1 %v13097_v48  ;;  %10375 = vmatprep.subr.mxu0 %v13079_v6  ;;  %v13155_v48 = vld [vmem:[%s22181_s7 + $0x1348] sm:$0xff] }
 0x771   :  { %10473 = vmatprep.subr.mxu1 %v13096_v12  ;;  %10376 = vmatpush1.msra.mxu0 %v13078_v47  ;;  %v13172_v6 = vld [vmem:[%s22181_s7 + $0x13c8] sm:$0xff]  ;;  %v13154_v12 = vld [vmem:[%s22181_s7 + $0x1340] sm:$0xff] }
 0x772   :  { %10409 = vmatprep.mubr.f32.mxu0 %v22302_v63  ;;  %10474 = vmatpush1.msra.mxu1 %v13095_v9  ;;  %v13171_v47 = vld [vmem:[%s22181_s7 + $0x13c0] sm:$0xff]  ;;  %v13170_v9 = vld [vmem:[%s22181_s7 + $0x13b8] sm:$0xff] }
 0x773   :  { %10507 = vmatprep.mubr.f32.mxu1 %v22302_v63  ;;  %13094 = vmatmul.mubr.msk.f32.vlgmr.msra.gmra.mxu0 %vm1928_vm4, %v10342_v17  ;;  %v13168_v17 = vld [vmem:[%s22181_s7 + $0x13a8] sm:$0xff] }
 0x774   :  { %13111 = vmatmul.mubr.msk.f32.vlgmr.msra.gmra.mxu1 %vm1928_vm4, %v10440_v27  ;;  %10557 = vmatprep.subr.mxu0 %v13127_v55  ;;  %v13151_v55 = vld [vmem:[%s22181_s7 + $0x1328] sm:$0xff] }
 0x775   :  { %10655 = vmatprep.subr.mxu1 %v13144_v29  ;;  %10558 = vmatpush1.msra.mxu0 %v13126_v59  ;;  %v13167_v29 = vld [vmem:[%s22181_s7 + $0x13a0] sm:$0xff]  ;;  %v13149_v59 = vld [vmem:[%s22181_s7 + $0x1318] sm:$0xff]  ;;  %v10713_v27 = vld [vmem:[#allocation4 + $0x8a] sm:$0x1] }
 0x776   :  { %10656 = vmatpush1.msra.mxu1 %v13143_v51  ;;  %10559 = vmatprep.subr.mxu0 %v13125_v33  ;;  %v13166_v51 = vld [vmem:[%s22181_s7 + $0x1398] sm:$0xff]  ;;  %v13148_v33 = vld [vmem:[%s22181_s7 + $0x1310] sm:$0xff] }
 0x777   :  { %10657 = vmatprep.subr.mxu1 %v13142_v37  ;;  %10560 = vmatpush1.msra.mxu0 %v13124_v50  ;;  %v10811_v37 = vld [vmem:[#allocation4 + $0x8b] sm:$0x1]  ;;  %v13165_v50 = vld [vmem:[%s22181_s7 + $0x1390] sm:$0xff] }
 0x778   :  { %10658 = vmatpush1.msra.mxu1 %v13141_v34  ;;  %10561 = vmatprep.subr.mxu0 %v13123_v3  ;;  %v13147_v34 = vld [vmem:[%s22181_s7 + $0x1308] sm:$0xff] }
 0x779   :  { %10659 = vmatprep.subr.mxu1 %v13140_v24  ;;  %10562 = vmatpush1.msra.mxu0 %v13122_v45  ;;  %v13164_v3 = vld [vmem:[%s22181_s7 + $0x1388] sm:$0xff]  ;;  %v13146_v24 = vld [vmem:[%s22181_s7 + $0x1300] sm:$0xff]  ;;  %v10733_v45 = vrot.slane %v10713_v27, 7  ;;  %v13225_v27 = vld [vmem:[%s22181_s7 + $0x1558] sm:$0xff] }
 0x77a   :  { %10660 = vmatpush1.msra.mxu1 %v13139_v14  ;;  %10563 = vmatprep.subr.mxu0 %v13121_v46  ;;  %v13163_v14 = vld [vmem:[%s22181_s7 + $0x1380] sm:$0xff]  ;;  %v10831_v46 = vrot.slane %v10811_v37, 7  ;;  %v13241_v37 = vld [vmem:[%s22181_s7 + $0x15d0] sm:$0xff] }
 0x77b   :  { %10661 = vmatprep.subr.mxu1 %v13138_v0  ;;  %10564 = vmatpush1.msra.mxu0 %v13120_v56  ;;  %v10712_v0 = vld [vmem:[#allocation4 + $0x3a] sm:$0x1] }
 0x77c   :  { %10662 = vmatpush1.msra.mxu1 %v13137_v1  ;;  %10565 = vmatprep.subr.mxu0 %v13119_v58  ;;  %v13195_v56 = vld [vmem:[%s22181_s7 + $0x1478] sm:$0xff]  ;;  %v10734_v1 = vsel %vm7032_vm5, %v10733_v45, %v10712_v0  ;;  %v13237_v0 = vld [vmem:[%s22181_s7 + $0x15b0] sm:$0xff] }
 0x77d   :  { %10663 = vmatprep.subr.mxu1 %v13136_v26  ;;  %10566 = vmatpush1.msra.mxu0 %v13118_v8  ;;  %v10810_v58 = vld [vmem:[#allocation4 + $0x3b] sm:$0x1]  ;;  %v13194_v8 = vld [vmem:[%s22181_s7 + $0x1470] sm:$0xff] }
 0x77e   :  { %10664 = vmatpush1.msra.mxu1 %v13135_v54  ;;  %10567 = vmatprep.subr.mxu0 %v13117_v36  ;;  %v13212_v26 = vld [vmem:[%s22181_s7 + $0x14f8] sm:$0xff]  ;;  %v10832_v54 = vsel %vm7032_vm5, %v10831_v46, %v10810_v58  ;;  %v13211_v36 = vld [vmem:[%s22181_s7 + $0x14f0] sm:$0xff]  ;;  %v13218_v58 = vld [vmem:[%s22181_s7 + $0x1520] sm:$0xff] }
 0x77f   :  { %10665 = vmatprep.subr.mxu1 %v13134_v35  ;;  %10568 = vmatpush1.msra.mxu0 %v13116_v23  ;;  %v13193_v35 = vld [vmem:[%s22181_s7 + $0x1468] sm:$0xff]  ;;  %v13221_v45 = vld [vmem:[%s22181_s7 + $0x1538] sm:$0xff]  ;;  %v13220_v46 = vld [vmem:[%s22181_s7 + $0x1530] sm:$0xff] }
 0x780   :  { %10666 = vmatpush1.msra.mxu1 %v13133_v21  ;;  %10569 = vmatprep.subr.mxu0 %v13115_v7  ;;  %v13210_v23 = vld [vmem:[%s22181_s7 + $0x14e8] sm:$0xff]  ;;  %v13192_v21 = vld [vmem:[%s22181_s7 + $0x1460] sm:$0xff] }
 0x781   :  { %10667 = vmatprep.subr.mxu1 %v13132_v52  ;;  %10570 = vmatpush1.msra.mxu0 %v13114_v5  ;;  %v13209_v7 = vld [vmem:[%s22181_s7 + $0x14e0] sm:$0xff]  ;;  %v13208_v52 = vld [vmem:[%s22181_s7 + $0x14d8] sm:$0xff]  ;;  %v13190_v5 = vld [vmem:[%s22181_s7 + $0x1450] sm:$0xff] }
 0x782   :  { %10668 = vmatpush1.msra.mxu1 %v13131_v41  ;;  %10571 = vmatprep.subr.mxu0 %v13113_v19  ;;  %v13189_v41 = vld [vmem:[%s22181_s7 + $0x1448] sm:$0xff] }
 0x783   :  { %10669 = vmatprep.subr.mxu1 %v13130_v43  ;;  %10572 = vmatpush1.msra.mxu0 %v13112_v61  ;;  %v13206_v19 = vld [vmem:[%s22181_s7 + $0x14c8] sm:$0xff]  ;;  %v13188_v43 = vld [vmem:[%s22181_s7 + $0x1440] sm:$0xff] }
 0x784   :  { %10605 = vmatprep.mubr.f32.mxu0 %v22302_v63  ;;  %10670 = vmatpush1.msra.mxu1 %v13129_v38  ;;  %v13205_v61 = vld [vmem:[%s22181_s7 + $0x14c0] sm:$0xff]  ;;  %v13204_v38 = vld [vmem:[%s22181_s7 + $0x14b8] sm:$0xff] }
 0x785   :  { %10703 = vmatprep.mubr.f32.mxu1 %v22302_v63  ;;  %13128 = vmatmul.mubr.msk.f32.vlgmr.msra.gmra.mxu0 %vm1928_vm4, %v10538_v57  ;;  %v13202_v57 = vld [vmem:[%s22181_s7 + $0x14a8] sm:$0xff] }
 0x786   :  { %13145 = vmatmul.mubr.msk.f32.vlgmr.msra.gmra.mxu1 %vm1928_vm4, %v10636_v31  ;;  %10753 = vmatprep.subr.mxu0 %v13161_v11  ;;  %v13185_v11 = vld [vmem:[%s22181_s7 + $0x1428] sm:$0xff] }
 0x787   :  { %10851 = vmatprep.subr.mxu1 %v13178_v32  ;;  %10754 = vmatpush1.msra.mxu0 %v13160_v22  ;;  %v13201_v32 = vld [vmem:[%s22181_s7 + $0x14a0] sm:$0xff]  ;;  %v13183_v22 = vld [vmem:[%s22181_s7 + $0x1418] sm:$0xff]  ;;  %v10909_v31 = vld [vmem:[#allocation4 + $0x8c] sm:$0x1] }
 0x788   :  { %10852 = vmatpush1.msra.mxu1 %v13177_v42  ;;  %10755 = vmatprep.subr.mxu0 %v13159_v49  ;;  %v13200_v42 = vld [vmem:[%s22181_s7 + $0x1498] sm:$0xff]  ;;  %v13182_v49 = vld [vmem:[%s22181_s7 + $0x1410] sm:$0xff] }
 0x789   :  { %10853 = vmatprep.subr.mxu1 %v13176_v39  ;;  %10756 = vmatpush1.msra.mxu0 %v13158_v62  ;;  %v11007_v39 = vld [vmem:[#allocation4 + $0x8d] sm:$0x1]  ;;  %v13199_v62 = vld [vmem:[%s22181_s7 + $0x1490] sm:$0xff] }
 0x78a   :  { %10854 = vmatpush1.msra.mxu1 %v13175_v4  ;;  %10757 = vmatprep.subr.mxu0 %v13157_v18  ;;  %v13181_v4 = vld [vmem:[%s22181_s7 + $0x1408] sm:$0xff] }
 0x78b   :  { %10855 = vmatprep.subr.mxu1 %v13174_v28  ;;  %10758 = vmatpush1.msra.mxu0 %v13156_v20  ;;  %v13198_v18 = vld [vmem:[%s22181_s7 + $0x1488] sm:$0xff]  ;;  %v13180_v28 = vld [vmem:[%s22181_s7 + $0x1400] sm:$0xff]  ;;  %v10929_v20 = vrot.slane %v10909_v31, 7  ;;  %v13259_v31 = vld [vmem:[%s22181_s7 + $0x1658] sm:$0xff] }
 0x78c   :  { %10856 = vmatpush1.msra.mxu1 %v13173_v40  ;;  %10759 = vmatprep.subr.mxu0 %v13155_v48  ;;  %v13197_v40 = vld [vmem:[%s22181_s7 + $0x1480] sm:$0xff]  ;;  %v11027_v48 = vrot.slane %v11007_v39, 7  ;;  %v13275_v39 = vld [vmem:[%s22181_s7 + $0x16d0] sm:$0xff] }
 0x78d   :  { %10857 = vmatprep.subr.mxu1 %v13172_v6  ;;  %10760 = vmatpush1.msra.mxu0 %v13154_v12  ;;  %v10908_v6 = vld [vmem:[#allocation4 + $0x3c] sm:$0x1] }
 0x78e   :  { %10858 = vmatpush1.msra.mxu1 %v13171_v47  ;;  %10761 = vmatprep.subr.mxu0 %v13153_v2  ;;  %v13229_v12 = vld [vmem:[%s22181_s7 + $0x1578] sm:$0xff]  ;;  %v10930_v47 = vsel %vm7032_vm5, %v10929_v20, %v10908_v6  ;;  %v13271_v6 = vld [vmem:[%s22181_s7 + $0x16b0] sm:$0xff] }
 0x78f   :  { %10859 = vmatprep.subr.mxu1 %v13170_v9  ;;  %10762 = vmatpush1.msra.mxu0 %v13152_v30  ;;  %v11006_v2 = vld [vmem:[#allocation4 + $0x3d] sm:$0x1]  ;;  %v13228_v30 = vld [vmem:[%s22181_s7 + $0x1570] sm:$0xff] }
 0x790   :  { %10860 = vmatpush1.msra.mxu1 %v13169_v13  ;;  %10763 = vmatprep.subr.mxu0 %v13151_v55  ;;  %v13246_v9 = vld [vmem:[%s22181_s7 + $0x15f8] sm:$0xff]  ;;  %v11028_v13 = vsel %vm7032_vm5, %v11027_v48, %v11006_v2  ;;  %v13245_v55 = vld [vmem:[%s22181_s7 + $0x15f0] sm:$0xff]  ;;  %v13252_v2 = vld [vmem:[%s22181_s7 + $0x1620] sm:$0xff] }
 0x791   :  { %10861 = vmatprep.subr.mxu1 %v13168_v17  ;;  %10764 = vmatpush1.msra.mxu0 %v13150_v25  ;;  %v13227_v17 = vld [vmem:[%s22181_s7 + $0x1568] sm:$0xff]  ;;  %v13255_v20 = vld [vmem:[%s22181_s7 + $0x1638] sm:$0xff]  ;;  %v13254_v48 = vld [vmem:[%s22181_s7 + $0x1630] sm:$0xff] }
 0x792   :  { %10862 = vmatpush1.msra.mxu1 %v13167_v29  ;;  %10765 = vmatprep.subr.mxu0 %v13149_v59  ;;  %v13244_v25 = vld [vmem:[%s22181_s7 + $0x15e8] sm:$0xff]  ;;  %v13226_v29 = vld [vmem:[%s22181_s7 + $0x1560] sm:$0xff] }
 0x793   :  { %10863 = vmatprep.subr.mxu1 %v13166_v51  ;;  %10766 = vmatpush1.msra.mxu0 %v13148_v33  ;;  %v13243_v59 = vld [vmem:[%s22181_s7 + $0x15e0] sm:$0xff]  ;;  %v13242_v51 = vld [vmem:[%s22181_s7 + $0x15d8] sm:$0xff]  ;;  %v13224_v33 = vld [vmem:[%s22181_s7 + $0x1550] sm:$0xff] }
 0x794   :  { %10864 = vmatpush1.msra.mxu1 %v13165_v50  ;;  %10767 = vmatprep.subr.mxu0 %v13147_v34  ;;  %v13223_v50 = vld [vmem:[%s22181_s7 + $0x1548] sm:$0xff] }
 0x795   :  { %10865 = vmatprep.subr.mxu1 %v13164_v3  ;;  %10768 = vmatpush1.msra.mxu0 %v13146_v24  ;;  %v13240_v34 = vld [vmem:[%s22181_s7 + $0x15c8] sm:$0xff]  ;;  %v13222_v3 = vld [vmem:[%s22181_s7 + $0x1540] sm:$0xff] }
 0x796   :  { %10801 = vmatprep.mubr.f32.mxu0 %v22302_v63  ;;  %10866 = vmatpush1.msra.mxu1 %v13163_v14  ;;  %v13239_v24 = vld [vmem:[%s22181_s7 + $0x15c0] sm:$0xff]  ;;  %v13238_v14 = vld [vmem:[%s22181_s7 + $0x15b8] sm:$0xff] }
 0x797   :  { %10899 = vmatprep.mubr.f32.mxu1 %v22302_v63  ;;  %13162 = vmatmul.mubr.msk.f32.vlgmr.msra.gmra.mxu0 %vm1928_vm4, %v10734_v1  ;;  %v13236_v1 = vld [vmem:[%s22181_s7 + $0x15a8] sm:$0xff] }
 0x798   :  { %13179 = vmatmul.mubr.msk.f32.vlgmr.msra.gmra.mxu1 %vm1928_vm4, %v10832_v54  ;;  %10949 = vmatprep.subr.mxu0 %v13195_v56  ;;  %v13219_v56 = vld [vmem:[%s22181_s7 + $0x1528] sm:$0xff]  ;;  %v11105_v54 = vld [vmem:[#allocation4 + $0x92] sm:$0x1] }
 0x799   :  { %11047 = vmatprep.subr.mxu1 %v13212_v26  ;;  %10950 = vmatpush1.msra.mxu0 %v13194_v8  ;;  %v13235_v26 = vld [vmem:[%s22181_s7 + $0x15a0] sm:$0xff]  ;;  %v13217_v8 = vld [vmem:[%s22181_s7 + $0x1518] sm:$0xff] }
 0x79a   :  { %11048 = vmatpush1.msra.mxu1 %v13211_v36  ;;  %10951 = vmatprep.subr.mxu0 %v13193_v35  ;;  %v13234_v36 = vld [vmem:[%s22181_s7 + $0x1598] sm:$0xff]  ;;  %v13216_v35 = vld [vmem:[%s22181_s7 + $0x1510] sm:$0xff] }
 0x79b   :  { %11049 = vmatprep.subr.mxu1 %v13210_v23  ;;  %10952 = vmatpush1.msra.mxu0 %v13192_v21  ;;  %v11203_v23 = vld [vmem:[#allocation4 + $0x93] sm:$0x1] }
 0x79c   :  { %11050 = vmatpush1.msra.mxu1 %v13209_v7  ;;  %10953 = vmatprep.subr.mxu0 %v13191_v15  ;;  %v13233_v21 = vld [vmem:[%s22181_s7 + $0x1590] sm:$0xff]  ;;  %v13215_v7 = vld [vmem:[%s22181_s7 + $0x1508] sm:$0xff] }
 0x79d   :  { %11051 = vmatprep.subr.mxu1 %v13208_v52  ;;  %10954 = vmatpush1.msra.mxu0 %v13190_v5  ;;  %v13232_v15 = vld [vmem:[%s22181_s7 + $0x1588] sm:$0xff]  ;;  %v13214_v52 = vld [vmem:[%s22181_s7 + $0x1500] sm:$0xff]  ;;  %v11125_v5 = vrot.slane %v11105_v54, 7  ;;  %v13293_v54 = vld [vmem:[%s22181_s7 + $0x1758] sm:$0xff] }
 0x79e   :  { %11052 = vmatpush1.msra.mxu1 %v13207_v53  ;;  %10955 = vmatprep.subr.mxu0 %v13189_v41  ;;  %v13231_v53 = vld [vmem:[%s22181_s7 + $0x1580] sm:$0xff]  ;;  %v11223_v41 = vrot.slane %v11203_v23, 7  ;;  %v13309_v23 = vld [vmem:[%s22181_s7 + $0x17d0] sm:$0xff] }
 0x79f   :  { %11053 = vmatprep.subr.mxu1 %v13206_v19  ;;  %10956 = vmatpush1.msra.mxu0 %v13188_v43  ;;  %v11104_v19 = vld [vmem:[#allocation4 + $0x42] sm:$0x1]  ;;  %v13263_v43 = vld [vmem:[%s22181_s7 + $0x1678] sm:$0xff] }
 0x7a0   :  { %11054 = vmatpush1.msra.mxu1 %v13205_v61  ;;  %10957 = vmatprep.subr.mxu0 %v13187_v16  ;;  %v11126_v61 = vsel %vm7032_vm5, %v11125_v5, %v11104_v19  ;;  %v11202_v16 = vld [vmem:[#allocation4 + $0x43] sm:$0x1]  ;;  %v13289_v5 = vld [vmem:[%s22181_s7 + $0x1738] sm:$0xff]  ;;  %v13305_v19 = vld [vmem:[%s22181_s7 + $0x17b0] sm:$0xff] }
 0x7a1   :  { %11055 = vmatprep.subr.mxu1 %v13204_v38  ;;  %10958 = vmatpush1.msra.mxu0 %v13186_v60  ;;  %v13280_v38 = vld [vmem:[%s22181_s7 + $0x16f8] sm:$0xff]  ;;  %v13262_v60 = vld [vmem:[%s22181_s7 + $0x1670] sm:$0xff] }
 0x7a2   :  { %11056 = vmatpush1.msra.mxu1 %v13203_v10  ;;  %10959 = vmatprep.subr.mxu0 %v13185_v11  ;;  %v11224_v10 = vsel %vm7032_vm5, %v11223_v41, %v11202_v16  ;;  %v13279_v11 = vld [vmem:[%s22181_s7 + $0x16f0] sm:$0xff]  ;;  %v13286_v16 = vld [vmem:[%s22181_s7 + $0x1720] sm:$0xff] }
 0x7a3   :  { %11057 = vmatprep.subr.mxu1 %v13202_v57  ;;  %10960 = vmatpush1.msra.mxu0 %v13184_v44  ;;  %v13261_v57 = vld [vmem:[%s22181_s7 + $0x1668] sm:$0xff]  ;;  %v13288_v41 = vld [vmem:[%s22181_s7 + $0x1730] sm:$0xff] }
 0x7a4   :  { %11058 = vmatpush1.msra.mxu1 %v13201_v32  ;;  %10961 = vmatprep.subr.mxu0 %v13183_v22  ;;  %v13278_v44 = vld [vmem:[%s22181_s7 + $0x16e8] sm:$0xff]  ;;  %v13260_v32 = vld [vmem:[%s22181_s7 + $0x1660] sm:$0xff] }
 0x7a5   :  { %11059 = vmatprep.subr.mxu1 %v13200_v42  ;;  %10962 = vmatpush1.msra.mxu0 %v13182_v49  ;;  %v13277_v22 = vld [vmem:[%s22181_s7 + $0x16e0] sm:$0xff]  ;;  %v13276_v42 = vld [vmem:[%s22181_s7 + $0x16d8] sm:$0xff]  ;;  %v13258_v49 = vld [vmem:[%s22181_s7 + $0x1650] sm:$0xff] }
 0x7a6   :  { %11060 = vmatpush1.msra.mxu1 %v13199_v62  ;;  %10963 = vmatprep.subr.mxu0 %v13181_v4  ;;  %v13257_v62 = vld [vmem:[%s22181_s7 + $0x1648] sm:$0xff] }
 0x7a7   :  { %11061 = vmatprep.subr.mxu1 %v13198_v18  ;;  %10964 = vmatpush1.msra.mxu0 %v13180_v28  ;;  %v13274_v4 = vld [vmem:[%s22181_s7 + $0x16c8] sm:$0xff]  ;;  %v13256_v18 = vld [vmem:[%s22181_s7 + $0x1640] sm:$0xff] }
 0x7a8   :  { %10997 = vmatprep.mubr.f32.mxu0 %v22302_v63  ;;  %11062 = vmatpush1.msra.mxu1 %v13197_v40  ;;  %v13273_v28 = vld [vmem:[%s22181_s7 + $0x16c0] sm:$0xff]  ;;  %v13272_v40 = vld [vmem:[%s22181_s7 + $0x16b8] sm:$0xff] }
 0x7a9   :  { %11095 = vmatprep.mubr.f32.mxu1 %v22302_v63  ;;  %13196 = vmatmul.mubr.msk.f32.vlgmr.msra.gmra.mxu0 %vm1928_vm4, %v10930_v47  ;;  %v13270_v47 = vld [vmem:[%s22181_s7 + $0x16a8] sm:$0xff] }
 0x7aa   :  { %13213 = vmatmul.mubr.msk.f32.vlgmr.msra.gmra.mxu1 %vm1928_vm4, %v11028_v13  ;;  %11145 = vmatprep.subr.mxu0 %v13229_v12  ;;  %v13253_v12 = vld [vmem:[%s22181_s7 + $0x1628] sm:$0xff]  ;;  %v11301_v13 = vld [vmem:[#allocation4 + $0x94] sm:$0x1] }
 0x7ab   :  { %11243 = vmatprep.subr.mxu1 %v13246_v9  ;;  %11146 = vmatpush1.msra.mxu0 %v13228_v30  ;;  %v13269_v9 = vld [vmem:[%s22181_s7 + $0x16a0] sm:$0xff]  ;;  %v13251_v30 = vld [vmem:[%s22181_s7 + $0x1618] sm:$0xff] }
 0x7ac   :  { %11244 = vmatpush1.msra.mxu1 %v13245_v55  ;;  %11147 = vmatprep.subr.mxu0 %v13227_v17  ;;  %v13268_v55 = vld [vmem:[%s22181_s7 + $0x1698] sm:$0xff]  ;;  %v13250_v17 = vld [vmem:[%s22181_s7 + $0x1610] sm:$0xff] }
 0x7ad   :  { %11245 = vmatprep.subr.mxu1 %v13244_v25  ;;  %11148 = vmatpush1.msra.mxu0 %v13226_v29  ;;  %v11399_v25 = vld [vmem:[#allocation4 + $0x95] sm:$0x1] }
 0x7ae   :  { %11246 = vmatpush1.msra.mxu1 %v13243_v59  ;;  %11149 = vmatprep.subr.mxu0 %v13225_v27  ;;  %v13267_v29 = vld [vmem:[%s22181_s7 + $0x1690] sm:$0xff]  ;;  %v13249_v59 = vld [vmem:[%s22181_s7 + $0x1608] sm:$0xff] }
 0x7af   :  { %11247 = vmatprep.subr.mxu1 %v13242_v51  ;;  %11150 = vmatpush1.msra.mxu0 %v13224_v33  ;;  %v13266_v27 = vld [vmem:[%s22181_s7 + $0x1688] sm:$0xff]  ;;  %v13248_v51 = vld [vmem:[%s22181_s7 + $0x1600] sm:$0xff]  ;;  %v11321_v33 = vrot.slane %v11301_v13, 7  ;;  %v13322_v13 = vld [vmem:[%s22181_s7 + $0x1830] sm:$0xff] }
 0x7b0   :  { %11248 = vmatpush1.msra.mxu1 %v13241_v37  ;;  %11151 = vmatprep.subr.mxu0 %v13223_v50  ;;  %v13265_v37 = vld [vmem:[%s22181_s7 + $0x1680] sm:$0xff]  ;;  %v11419_v50 = vrot.slane %v11399_v25, 7  ;;  %v11693_v25 = vld [vmem:[#allocation4 + $0x98] sm:$0x1] }
 0x7b1   :  { %11249 = vmatprep.subr.mxu1 %v13240_v34  ;;  %11152 = vmatpush1.msra.mxu0 %v13222_v3  ;;  %v11300_v34 = vld [vmem:[#allocation4 + $0x44] sm:$0x1]  ;;  %v13297_v3 = vld [vmem:[%s22181_s7 + $0x1778] sm:$0xff] }
 0x7b2   :  { %11250 = vmatpush1.msra.mxu1 %v13239_v24  ;;  %11153 = vmatprep.subr.mxu0 %v13221_v45  ;;  %v11322_v24 = vsel %vm7032_vm5, %v11321_v33, %v11300_v34  ;;  %v11398_v45 = vld [vmem:[#allocation4 + $0x45] sm:$0x1]  ;;  %v7102_v34 = vpop.f32.mrf.mxu0 }
 0x7b3   :  { %11251 = vmatprep.subr.mxu1 %v13238_v14  ;;  %11154 = vmatpush1.msra.mxu0 %v13220_v46  ;;  %v13314_v14 = vld [vmem:[%s22181_s7 + $0x17f8] sm:$0xff]  ;;  %v13296_v46 = vld [vmem:[%s22181_s7 + $0x1770] sm:$0xff]  ;;  %v13316_v33 = vld [vmem:[%s22181_s7 + $0x1800] sm:$0xff] }
 0x7b4   :  { %11252 = vmatpush1.msra.mxu1 %v13237_v0  ;;  %11155 = vmatprep.subr.mxu0 %v13219_v56  ;;  %v11420_v0 = vsel %vm7032_vm5, %v11419_v50, %v11398_v45  ;;  %v13313_v56 = vld [vmem:[%s22181_s7 + $0x17f0] sm:$0xff] }
 0x7b5   :  { %11253 = vmatprep.subr.mxu1 %v13236_v1  ;;  %11156 = vmatpush1.msra.mxu0 %v13218_v58  ;;  %v13295_v1 = vld [vmem:[%s22181_s7 + $0x1768] sm:$0xff] }
 0x7b6   :  { %11254 = vmatpush1.msra.mxu1 %v13235_v26  ;;  %11157 = vmatprep.subr.mxu0 %v13217_v8  ;;  %v13312_v58 = vld [vmem:[%s22181_s7 + $0x17e8] sm:$0xff]  ;;  %v13294_v26 = vld [vmem:[%s22181_s7 + $0x1760] sm:$0xff] }
 0x7b7   :  { %11255 = vmatprep.subr.mxu1 %v13234_v36  ;;  %11158 = vmatpush1.msra.mxu0 %v13216_v35  ;;  %v13311_v8 = vld [vmem:[%s22181_s7 + $0x17e0] sm:$0xff]  ;;  %v13310_v36 = vld [vmem:[%s22181_s7 + $0x17d8] sm:$0xff]  ;;  %v13292_v35 = vld [vmem:[%s22181_s7 + $0x1750] sm:$0xff] }
 0x7b8   :  { %11256 = vmatpush1.msra.mxu1 %v13233_v21  ;;  %11159 = vmatprep.subr.mxu0 %v13215_v7  ;;  %v13291_v21 = vld [vmem:[%s22181_s7 + $0x1748] sm:$0xff] }
 0x7b9   :  { %11257 = vmatprep.subr.mxu1 %v13232_v15  ;;  %11160 = vmatpush1.msra.mxu0 %v13214_v52  ;;  %v13308_v7 = vld [vmem:[%s22181_s7 + $0x17c8] sm:$0xff]  ;;  %v13290_v15 = vld [vmem:[%s22181_s7 + $0x1740] sm:$0xff] }
 0x7ba   :  { %11193 = vmatprep.mubr.f32.mxu0 %v22302_v63  ;;  %11258 = vmatpush1.msra.mxu1 %v13231_v53  ;;  %v13307_v52 = vld [vmem:[%s22181_s7 + $0x17c0] sm:$0xff]  ;;  %v13306_v53 = vld [vmem:[%s22181_s7 + $0x17b8] sm:$0xff] }
 0x7bb   :  { %11291 = vmatprep.mubr.f32.mxu1 %v22302_v63  ;;  %13230 = vmatmul.mubr.msk.f32.vlgmr.msra.gmra.mxu0 %vm1928_vm4, %v11126_v61  ;;  %v13304_v61 = vld [vmem:[%s22181_s7 + $0x17a8] sm:$0xff] }
 0x7bc   :  { %13247 = vmatmul.mubr.msk.f32.vlgmr.msra.gmra.mxu1 %vm1928_vm4, %v11224_v10  ;;  %11341 = vmatprep.subr.mxu0 %v13263_v43  ;;  %v13287_v43 = vld [vmem:[%s22181_s7 + $0x1728] sm:$0xff]  ;;  %v11497_v10 = vld [vmem:[#allocation4 + $0x96] sm:$0x1] }
 0x7bd   :  { %11439 = vmatprep.subr.mxu1 %v13280_v38  ;;  %11342 = vmatpush1.msra.mxu0 %v13262_v60  ;;  %v13303_v38 = vld [vmem:[%s22181_s7 + $0x17a0] sm:$0xff]  ;;  %v13285_v60 = vld [vmem:[%s22181_s7 + $0x1718] sm:$0xff] }
 0x7be   :  { %11440 = vmatpush1.msra.mxu1 %v13279_v11  ;;  %11343 = vmatprep.subr.mxu0 %v13261_v57  ;;  %v13302_v11 = vld [vmem:[%s22181_s7 + $0x1798] sm:$0xff]  ;;  %v13284_v57 = vld [vmem:[%s22181_s7 + $0x1710] sm:$0xff] }
 0x7bf   :  { %11441 = vmatprep.subr.mxu1 %v13278_v44  ;;  %11344 = vmatpush1.msra.mxu0 %v13260_v32  ;;  %v11595_v44 = vld [vmem:[#allocation4 + $0x97] sm:$0x1] }
 0x7c0   :  { %11442 = vmatpush1.msra.mxu1 %v13277_v22  ;;  %11345 = vmatprep.subr.mxu0 %v13259_v31  ;;  %v13301_v32 = vld [vmem:[%s22181_s7 + $0x1790] sm:$0xff]  ;;  %v13283_v22 = vld [vmem:[%s22181_s7 + $0x1708] sm:$0xff] }
 0x7c1   :  { %11443 = vmatprep.subr.mxu1 %v13276_v42  ;;  %11346 = vmatpush1.msra.mxu0 %v13258_v49  ;;  %v13300_v31 = vld [vmem:[%s22181_s7 + $0x1788] sm:$0xff]  ;;  %v13282_v42 = vld [vmem:[%s22181_s7 + $0x1700] sm:$0xff]  ;;  %v11517_v49 = vrot.slane %v11497_v10, 7 }
 0x7c2   :  { %11444 = vmatpush1.msra.mxu1 %v13275_v39  ;;  %11347 = vmatprep.subr.mxu0 %v13257_v62  ;;  %v13299_v39 = vld [vmem:[%s22181_s7 + $0x1780] sm:$0xff]  ;;  %v11615_v62 = vrot.slane %v11595_v44, 7 }
 0x7c3   :  { %11445 = vmatprep.subr.mxu1 %v13274_v4  ;;  %11348 = vmatpush1.msra.mxu0 %v13256_v18  ;;  %v11496_v4 = vld [vmem:[#allocation4 + $0x46] sm:$0x1]  ;;  %v13331_v18 = vld [vmem:[%s22181_s7 + $0x1878] sm:$0xff] }
 0x7c4   :  { %11446 = vmatpush1.msra.mxu1 %v13273_v28  ;;  %11349 = vmatprep.subr.mxu0 %v13255_v20  ;;  %v11518_v28 = vsel %vm7032_vm5, %v11517_v49, %v11496_v4  ;;  %v11594_v20 = vld [vmem:[#allocation4 + $0x47] sm:$0x1] }
 0x7c5   :  { %11447 = vmatprep.subr.mxu1 %v13272_v40  ;;  %11350 = vmatpush1.msra.mxu0 %v13254_v48  ;;  %v13330_v40 = vld [vmem:[%s22181_s7 + $0x1870] sm:$0xff]  ;;  %v11616_v48 = vsel %vm7032_vm5, %v11615_v62, %v11594_v20 }
 0x7c6   :  { %11448 = vmatpush1.msra.mxu1 %v13271_v6  ;;  %11351 = vmatprep.subr.mxu0 %v13253_v12  ;;  %v13329_v6 = vld [vmem:[%s22181_s7 + $0x1868] sm:$0xff]  ;;  %v13328_v12 = vld [vmem:[%s22181_s7 + $0x1860] sm:$0xff] }
 0x7c7   :  { %11449 = vmatprep.subr.mxu1 %v13270_v47  ;;  %11352 = vmatpush1.msra.mxu0 %v13252_v2  ;;  %v13327_v47 = vld [vmem:[%s22181_s7 + $0x1858] sm:$0xff]  ;;  %v13326_v2 = vld [vmem:[%s22181_s7 + $0x1850] sm:$0xff] }
 0x7c8   :  { %11450 = vmatpush1.msra.mxu1 %v13269_v9  ;;  %11353 = vmatprep.subr.mxu0 %v13251_v30  ;;  %v13325_v9 = vld [vmem:[%s22181_s7 + $0x1848] sm:$0xff]  ;;  %v13324_v30 = vld [vmem:[%s22181_s7 + $0x1840] sm:$0xff] }
 0x7c9   :  { %11451 = vmatprep.subr.mxu1 %v13268_v55  ;;  %11354 = vmatpush1.msra.mxu0 %v13250_v17  ;;  %v13321_v55 = vld [vmem:[%s22181_s7 + $0x1828] sm:$0xff]  ;;  %v13320_v17 = vld [vmem:[%s22181_s7 + $0x1820] sm:$0xff] }
 0x7ca   :  { %11452 = vmatpush1.msra.mxu1 %v13267_v29  ;;  %11355 = vmatprep.subr.mxu0 %v13249_v59  ;;  %v13319_v29 = vld [vmem:[%s22181_s7 + $0x1818] sm:$0xff]  ;;  %v13318_v59 = vld [vmem:[%s22181_s7 + $0x1810] sm:$0xff] }
 0x7cb   :  { %11453 = vmatprep.subr.mxu1 %v13266_v27  ;;  %11356 = vmatpush1.msra.mxu0 %v13248_v51  ;;  %v13317_v27 = vld [vmem:[%s22181_s7 + $0x1808] sm:$0xff]  ;;  %v11713_v51 = vrot.slane %v11693_v25, 7 }
 0x7cc   :  { %11389 = vmatprep.mubr.f32.mxu0 %v22302_v63  ;;  %11454 = vmatpush1.msra.mxu1 %v13265_v37  ;;  %v11692_v37 = vld [vmem:[#allocation4 + $0x48] sm:$0x1] }
 0x7cd   :  { %11487 = vmatprep.mubr.f32.mxu1 %v22302_v63  ;;  %13264 = vmatmul.mubr.msk.f32.vlgmr.msra.gmra.mxu0 %vm1928_vm4, %v11322_v24  ;;  %v11714_v50 = vsel %vm7032_vm5, %v11713_v51, %v11692_v37  ;;  %v7104_v24 = vpop.f32.mrf.mxu0 }
 0x7ce   :  { %13281 = vmatmul.mubr.msk.f32.vlgmr.msra.gmra.mxu1 %vm1928_vm4, %v11420_v0  ;;  %11537 = vmatprep.subr.mxu0 %v13297_v3  ;;  %v7179_v3 = vpop.f32.mrf.mxu1 }
 0x7cf   :  { %11635 = vmatprep.subr.mxu1 %v13314_v14  ;;  %11538 = vmatpush1.msra.mxu0 %v13296_v46  ;;  %v7275_v45 = vpop.f32.mrf.mxu0  ;;  %v7180_v46 = vadd.f32 %v7179_v3, %v7102_v34 }
 0x7d0   :  { %11636 = vmatpush1.msra.mxu1 %v13313_v56  ;;  %11539 = vmatprep.subr.mxu0 %v13295_v1  ;;  %v7181_v14 = vpop.f32.mrf.mxu1 }
 0x7d1   :  { %11637 = vmatprep.subr.mxu1 %v13312_v58  ;;  %11540 = vmatpush1.msra.mxu0 %v13294_v26  ;;  %v7277_v0 = vpop.f32.mrf.mxu0  ;;  %v7182_v56 = vadd.f32 %v7181_v14, %v7104_v24  ;;  %v7280_v1 = vadd.f32 %v7275_v45, %v7180_v46 }
 0x7d2   :  { %11638 = vmatpush1.msra.mxu1 %v13311_v8  ;;  %11541 = vmatprep.subr.mxu0 %v13293_v54  ;;  %v7373_v58 = vpop.f32.mrf.mxu1 }
 0x7d3   :  { %11639 = vmatprep.subr.mxu1 %v13310_v36  ;;  %11542 = vmatpush1.msra.mxu0 %v13292_v35  ;;  %v7471_v26 = vpop.f32.mrf.mxu0  ;;  %v7281_v8 = vadd.f32 %v7277_v0, %v7182_v56  ;;  %v7378_v54 = vadd.f32 %v7373_v58, %v7280_v1 }
 0x7d4   :  { %11640 = vmatpush1.msra.mxu1 %v13309_v23  ;;  %11543 = vmatprep.subr.mxu0 %v13291_v21  ;;  %v7375_v36 = vpop.f32.mrf.mxu1 }
 0x7d5   :  { %11641 = vmatprep.subr.mxu1 %v13308_v7  ;;  %11544 = vmatpush1.msra.mxu0 %v13290_v15  ;;  %v7473_v35 = vpop.f32.mrf.mxu0  ;;  %v7379_v23 = vadd.f32 %v7375_v36, %v7281_v8  ;;  %v7476_v21 = vadd.f32 %v7471_v26, %v7378_v54 }
 0x7d6   :  { %11642 = vmatpush1.msra.mxu1 %v13307_v52  ;;  %11545 = vmatprep.subr.mxu0 %v13289_v5  ;;  %v7569_v7 = vpop.f32.mrf.mxu1 }
 0x7d7   :  { %11643 = vmatprep.subr.mxu1 %v13306_v53  ;;  %11546 = vmatpush1.msra.mxu0 %v13288_v41  ;;  %v7667_v15 = vpop.f32.mrf.mxu0  ;;  %v7477_v52 = vadd.f32 %v7473_v35, %v7379_v23  ;;  %v7574_v5 = vadd.f32 %v7569_v7, %v7476_v21 }
 0x7d8   :  { %11644 = vmatpush1.msra.mxu1 %v13305_v19  ;;  %11547 = vmatprep.subr.mxu0 %v13287_v43  ;;  %v7571_v53 = vpop.f32.mrf.mxu1 }
 0x7d9   :  { %11645 = vmatprep.subr.mxu1 %v13304_v61  ;;  %11548 = vmatpush1.msra.mxu0 %v13286_v16  ;;  %v7669_v41 = vpop.f32.mrf.mxu0  ;;  %v7575_v19 = vadd.f32 %v7571_v53, %v7477_v52  ;;  %v7672_v43 = vadd.f32 %v7667_v15, %v7574_v5 }
 0x7da   :  { %11646 = vmatpush1.msra.mxu1 %v13303_v38  ;;  %11549 = vmatprep.subr.mxu0 %v13285_v60  ;;  %v7765_v61 = vpop.f32.mrf.mxu1 }
 0x7db   :  { %11647 = vmatprep.subr.mxu1 %v13302_v11  ;;  %11550 = vmatpush1.msra.mxu0 %v13284_v57  ;;  %v7863_v16 = vpop.f32.mrf.mxu0  ;;  %v7673_v38 = vadd.f32 %v7669_v41, %v7575_v19  ;;  %v7770_v60 = vadd.f32 %v7765_v61, %v7672_v43 }
 0x7dc   :  { %11648 = vmatpush1.msra.mxu1 %v13301_v32  ;;  %11551 = vmatprep.subr.mxu0 %v13283_v22  ;;  %v7767_v10 = vpop.f32.mrf.mxu1 }
 0x7dd   :  { %11649 = vmatprep.subr.mxu1 %v13300_v31  ;;  %11552 = vmatpush1.msra.mxu0 %v13282_v42  ;;  %v7865_v11 = vpop.f32.mrf.mxu0  ;;  %v7771_v57 = vadd.f32 %v7767_v10, %v7673_v38  ;;  %v7868_v44 = vadd.f32 %v7863_v16, %v7770_v60 }
 0x7de   :  { %11585 = vmatprep.mubr.f32.mxu0 %v22302_v63  ;;  %11650 = vmatpush1.msra.mxu1 %v13299_v39  ;;  %v7961_v32 = vpop.f32.mrf.mxu1 }
 0x7df   :  { %11683 = vmatprep.mubr.f32.mxu1 %v22302_v63  ;;  %13298 = vmatmul.mubr.msk.f32.vlgmr.msra.gmra.mxu0 %vm1928_vm4, %v11518_v28  ;;  %v8059_v22 = vpop.f32.mrf.mxu0  ;;  %v7869_v31 = vadd.f32 %v7865_v11, %v7771_v57  ;;  %v7966_v42 = vadd.f32 %v7961_v32, %v7868_v44 }
 0x7e0   :  { %13315 = vmatmul.mubr.msk.f32.vlgmr.msra.gmra.mxu1 %vm1928_vm4, %v11616_v48  ;;  %11733 = vmatprep.subr.mxu0 %v13331_v18  ;;  %v7963_v49 = vpop.f32.mrf.mxu1  ;;  %v16_v18 = vstv %s22182_s10 }
 0x7e1   :  { %11734 = vmatpush1.msra.mxu0 %v13330_v40  ;;  %11781 = vmatprep.mubr.f32.mxu0 %v22302_v63  ;;  %v13323_v63 = vld [vmem:[%s22181_s7 + $0x1838] sm:$0xff]  ;;  %v8061_v39 = vpop.f32.mrf.mxu0  ;;  %v7967_v62 = vadd.f32 %v7963_v49, %v7869_v31  ;;  %v8064_v4 = vadd.f32 %v8059_v22, %v7966_v42  ;;  %17 = vst [vmem:[#allocation5] sm:$0x1] %v16_v18 }
 0x7e2   :  { %11735 = vmatprep.subr.mxu0 %v13329_v6  ;;  %v8157_v28 = vpop.f32.mrf.mxu1 }
 0x7e3   :  { %11736 = vmatpush1.msra.mxu0 %v13328_v12  ;;  %v8255_v20 = vpop.f32.mrf.mxu0  ;;  %v8065_v40 = vadd.f32 %v8061_v39, %v7967_v62  ;;  %v8162_v48 = vadd.f32 %v8157_v28, %v8064_v4 }
 0x7e4   :  { %11737 = vmatprep.subr.mxu0 %v13327_v47  ;;  %v8159_v6 = vpop.f32.mrf.mxu1 }
 0x7e5   :  { %11738 = vmatpush1.msra.mxu0 %v13326_v2  ;;  %v8257_v12 = vpop.f32.mrf.mxu0  ;;  %v8163_v47 = vadd.f32 %v8159_v6, %v8065_v40  ;;  %v8260_v2 = vadd.f32 %v8255_v20, %v8162_v48 }
 0x7e6   :  { %11739 = vmatprep.subr.mxu0 %v13325_v9  ;;  %v8353_v9 = vpop.f32.mrf.mxu1 }
 0x7e7   :  { %11740 = vmatpush1.msra.mxu0 %v13324_v30  ;;  %v8451_v30 = vpop.f32.mrf.mxu0 }
 0x7e8   :  { %11741 = vmatprep.subr.mxu0 %v13323_v63  ;;  %v8261_v63 = vadd.f32 %v8257_v12, %v8163_v47 }
 0x7e9   :  { %11742 = vmatpush1.msra.mxu0 %v13322_v13  ;;  %v8358_v13 = vadd.f32 %v8353_v9, %v8260_v2 }
 0x7ea   :  { %11743 = vmatprep.subr.mxu0 %v13321_v55  ;;  %v8355_v55 = vpop.f32.mrf.mxu1 }
 0x7eb   :  { %11744 = vmatpush1.msra.mxu0 %v13320_v17  ;;  %v8453_v17 = vpop.f32.mrf.mxu0  ;;  %v8359_v25 = vadd.f32 %v8355_v55, %v8261_v63 }
 0x7ec   :  { %11745 = vmatprep.subr.mxu0 %v13319_v29  ;;  %v8456_v29 = vadd.f32 %v8451_v30, %v8358_v13 }
 0x7ed   :  { %11746 = vmatpush1.msra.mxu0 %v13318_v59  ;;  %v8549_v59 = vpop.f32.mrf.mxu1  ;;  %v8457_v51 = vadd.f32 %v8453_v17, %v8359_v25 }
 0x7ee   :  { %11747 = vmatprep.subr.mxu0 %v13317_v27  ;;  %v8647_v27 = vpop.f32.mrf.mxu0 }
 0x7ef   :  { %11748 = vmatpush1.msra.mxu0 %v13316_v33  ;;  %v8554_v33 = vadd.f32 %v8549_v59, %v8456_v29  ;;  %v8551_v37 = vpop.f32.mrf.mxu1 }
 0x7f0   :  { %13332 = vmatmul.mubr.msk.f32.vlgmr.msra.gmra.mxu0 %vm1928_vm4, %v11714_v50  ;;  %v8649_v50 = vpop.f32.mrf.mxu0  ;;  %v8555_v34 = vadd.f32 %v8551_v37, %v8457_v51 }
 0x7f1   :  { %v8652_v3 = vadd.f32 %v8647_v27, %v8554_v33  ;;  %v8745_v24 = vpop.f32.mrf.mxu1 }
 0x7f2   :  { %v8843_v45 = vpop.f32.mrf.mxu0  ;;  %v8653_v14 = vadd.f32 %v8649_v50, %v8555_v34 }
 0x7f3   :  { %v8750_v46 = vadd.f32 %v8745_v24, %v8652_v3  ;;  %v8747_v0 = vpop.f32.mrf.mxu1 }
 0x7f4   :  { %v8845_v56 = vpop.f32.mrf.mxu0  ;;  %v8751_v1 = vadd.f32 %v8747_v0, %v8653_v14 }
 0x7f5   :  { %v8848_v58 = vadd.f32 %v8843_v45, %v8750_v46  ;;  %v8941_v26 = vpop.f32.mrf.mxu1 }
 0x7f6   :  { %v9039_v8 = vpop.f32.mrf.mxu0  ;;  %v8849_v54 = vadd.f32 %v8845_v56, %v8751_v1 }
 0x7f7   :  { %v8946_v36 = vadd.f32 %v8941_v26, %v8848_v58  ;;  %v8943_v35 = vpop.f32.mrf.mxu1 }
 0x7f8   :  { %v9041_v23 = vpop.f32.mrf.mxu0  ;;  %v8947_v21 = vadd.f32 %v8943_v35, %v8849_v54 }
 0x7f9   :  { %v9044_v7 = vadd.f32 %v9039_v8, %v8946_v36  ;;  %v9137_v15 = vpop.f32.mrf.mxu1 }
 0x7fa   :  { %v9235_v52 = vpop.f32.mrf.mxu0  ;;  %v9045_v5 = vadd.f32 %v9041_v23, %v8947_v21 }
 0x7fb   :  { %v9142_v53 = vadd.f32 %v9137_v15, %v9044_v7  ;;  %v9139_v41 = vpop.f32.mrf.mxu1 }
 0x7fc   :  { %v9237_v19 = vpop.f32.mrf.mxu0  ;;  %v9143_v43 = vadd.f32 %v9139_v41, %v9045_v5 }
 0x7fd   :  { %v9240_v61 = vadd.f32 %v9235_v52, %v9142_v53  ;;  %v9333_v16 = vpop.f32.mrf.mxu1 }
 0x7fe   :  { %v9431_v38 = vpop.f32.mrf.mxu0  ;;  %v9241_v60 = vadd.f32 %v9237_v19, %v9143_v43 }
 0x7ff   :  { %v9338_v10 = vadd.f32 %v9333_v16, %v9240_v61  ;;  %v9335_v11 = vpop.f32.mrf.mxu1 }
 0x800   :  { %v9433_v57 = vpop.f32.mrf.mxu0  ;;  %v9339_v44 = vadd.f32 %v9335_v11, %v9241_v60 }
 0x801   :  { %v9436_v32 = vadd.f32 %v9431_v38, %v9338_v10  ;;  %v9529_v22 = vpop.f32.mrf.mxu1 }
 0x802   :  { %v9627_v31 = vpop.f32.mrf.mxu0  ;;  %v9437_v42 = vadd.f32 %v9433_v57, %v9339_v44 }
 0x803   :  { %v9534_v49 = vadd.f32 %v9529_v22, %v9436_v32  ;;  %v9531_v39 = vpop.f32.mrf.mxu1 }
 0x804   :  { %v9629_v62 = vpop.f32.mrf.mxu0  ;;  %v9535_v4 = vadd.f32 %v9531_v39, %v9437_v42 }
 0x805   :  { %v9632_v18 = vadd.f32 %v9627_v31, %v9534_v49  ;;  %v9725_v28 = vpop.f32.mrf.mxu1 }
 0x806   :  { %v9823_v20 = vpop.f32.mrf.mxu0  ;;  %v9633_v40 = vadd.f32 %v9629_v62, %v9535_v4 }
 0x807   :  { %v9730_v48 = vadd.f32 %v9725_v28, %v9632_v18  ;;  %v9727_v6 = vpop.f32.mrf.mxu1 }
 0x808   :  { %v9825_v12 = vpop.f32.mrf.mxu0  ;;  %v9731_v47 = vadd.f32 %v9727_v6, %v9633_v40  ;;  %v11792_v6 = vlaneseq }
 0x809   :  { %v9828_v2 = vadd.f32 %v9823_v20, %v9730_v48  ;;  %v9921_v9 = vpop.f32.mrf.mxu1 }
 0x80a   :  { %v9829_v63 = vadd.f32 %v9825_v12, %v9731_v47 }
 0x80b   :  { %v9926_v13 = vadd.f32 %v9921_v9, %v9828_v2  ;;  %v9923_v55 = vpop.f32.mrf.mxu1 }
 0x80c   :  { %v9927_v25 = vadd.f32 %v9923_v55, %v9829_v63  ;;  %v11793_v55 = vshrl.u32 %v11792_v6, 7 }
 0x80f   :  { %v10019_v30 = vpop.f32.mrf.mxu0 }
 0x810   :  { %v10024_v29 = vadd.f32 %v10019_v30, %v9926_v13  ;;  %v10117_v59 = vpop.f32.mrf.mxu1 }
 0x811   :  { %v10021_v17 = vpop.f32.mrf.mxu0 }
 0x812   :  { %v10025_v51 = vadd.f32 %v10021_v17, %v9927_v25  ;;  %v10122_v33 = vadd.f32 %v10117_v59, %v10024_v29  ;;  %v10119_v37 = vpop.f32.mrf.mxu1 }
 0x814   :  { %v10123_v34 = vadd.f32 %v10119_v37, %v10025_v51  ;;  %v11794_v51 = vsub.s32 0, %v11793_v55  ;;  %v11790_v37 = vld [vmem:[%s22183_s8] sm:$0x3] }
 0x821   :  { %v10215_v27 = vpop.f32.mrf.mxu0 }
 0x822   :  { %v10220_v3 = vadd.f32 %v10215_v27, %v10122_v33  ;;  %v10313_v24 = vpop.f32.mrf.mxu1 }
 0x823   :  { %v10217_v50 = vpop.f32.mrf.mxu0 }
 0x824   :  { %v10221_v14 = vadd.f32 %v10217_v50, %v10123_v34  ;;  %v10318_v46 = vadd.f32 %v10313_v24, %v10220_v3  ;;  %v10315_v0 = vpop.f32.mrf.mxu1  ;;  %v11798_v34 = vsub.s32 1, %v11793_v55  ;;  %v11795_v24 = vrot.slane %v11790_v37, %v11794_v51 }
 0x826   :  { %v10319_v1 = vadd.f32 %v10315_v0, %v10221_v14 }
 0x833   :  { %v10411_v45 = vpop.f32.mrf.mxu0 }
 0x834   :  { %v10416_v58 = vadd.f32 %v10411_v45, %v10318_v46  ;;  %v10509_v26 = vpop.f32.mrf.mxu1  ;;  %v11806_v46 = vld [vmem:[%s22184_s9] sm:$0x3] }
 0x835   :  { %v10413_v56 = vpop.f32.mrf.mxu0 }
 0x836   :  { %v10417_v54 = vadd.f32 %v10413_v56, %v10319_v1  ;;  %v10514_v36 = vadd.f32 %v10509_v26, %v10416_v58  ;;  %v10511_v35 = vpop.f32.mrf.mxu1  ;;  %v11799_v1 = vrot.slane %v11790_v37, %v11798_v34 }
 0x838   :  { %v10515_v21 = vadd.f32 %v10511_v35, %v10417_v54  ;;  %v11811_v54 = vrot.slane %v11806_v46, %v11794_v51 }
 0x845   :  { %v10607_v8 = vpop.f32.mrf.mxu0 }
 0x846   :  { %v10612_v7 = vadd.f32 %v10607_v8, %v10514_v36  ;;  %v10705_v15 = vpop.f32.mrf.mxu1 }
 0x847   :  { %v10609_v23 = vpop.f32.mrf.mxu0 }
 0x848   :  { %v10613_v5 = vadd.f32 %v10609_v23, %v10515_v21  ;;  %v10710_v53 = vadd.f32 %v10705_v15, %v10612_v7  ;;  %v10707_v41 = vpop.f32.mrf.mxu1  ;;  %v11815_v23 = vrot.slane %v11806_v46, %v11798_v34 }
 0x84a   :  { %v10711_v43 = vadd.f32 %v10707_v41, %v10613_v5  ;;  %v15638_v41 = vmov 0  }
 0x84b   :  { %15635 = vset.pattern.permute.xlu0 %v15638_v41 }
 0x857   :  { %v10803_v52 = vpop.f32.mrf.mxu0 }
 0x858   :  { %v10808_v61 = vadd.f32 %v10803_v52, %v10710_v53  ;;  %v10901_v16 = vpop.f32.mrf.mxu1 }
 0x859   :  { %v10805_v19 = vpop.f32.mrf.mxu0 }
 0x85a   :  { %v10809_v60 = vadd.f32 %v10805_v19, %v10711_v43  ;;  %v10906_v10 = vadd.f32 %v10901_v16, %v10808_v61  ;;  %v10903_v11 = vpop.f32.mrf.mxu1  ;;  %v13333_v19 = vld [vmem:[#allocation5] ss:$0 sm:$0xff] }
 0x85c   :  { %v10907_v44 = vadd.f32 %v10903_v11, %v10809_v60 }
 0x869   :  { %v10999_v38 = vpop.f32.mrf.mxu0 }
 0x86a   :  { %v11004_v32 = vadd.f32 %v10999_v38, %v10906_v10  ;;  %v11097_v22 = vpop.f32.mrf.mxu1 }
 0x86b   :  { %v11001_v57 = vpop.f32.mrf.mxu0 }
 0x86c   :  { %v11005_v42 = vadd.f32 %v11001_v57, %v10907_v44  ;;  %v11102_v49 = vadd.f32 %v11097_v22, %v11004_v32  ;;  %v11099_v39 = vpop.f32.mrf.mxu1 }
 0x86e   :  { %v11103_v4 = vadd.f32 %v11099_v39, %v11005_v42 }
 0x87b   :  { %v11195_v31 = vpop.f32.mrf.mxu0 }
 0x87c   :  { %v11200_v18 = vadd.f32 %v11195_v31, %v11102_v49  ;;  %v11293_v28 = vpop.f32.mrf.mxu1 }
 0x87d   :  { %v11197_v62 = vpop.f32.mrf.mxu0 }
 0x87e   :  { %v11201_v40 = vadd.f32 %v11197_v62, %v11103_v4  ;;  %v11298_v48 = vadd.f32 %v11293_v28, %v11200_v18  ;;  %v11295_v12 = vpop.f32.mrf.mxu1 }
 0x880   :  { %v11299_v2 = vadd.f32 %v11295_v12, %v11201_v40 }
 0x88d   :  { %v11391_v20 = vpop.f32.mrf.mxu0 }
 0x88e   :  { %v11396_v9 = vadd.f32 %v11391_v20, %v11298_v48  ;;  %v11489_v30 = vpop.f32.mrf.mxu1 }
 0x88f   :  { %v11393_v47 = vpop.f32.mrf.mxu0 }
 0x890   :  { %v11397_v13 = vadd.f32 %v11393_v47, %v11299_v2  ;;  %v11494_v17 = vadd.f32 %v11489_v30, %v11396_v9  ;;  %v11491_v25 = vpop.f32.mrf.mxu1 }
 0x892   :  { %v11495_v59 = vadd.f32 %v11491_v25, %v11397_v13 }
 0x89f   :  { %v11587_v63 = vpop.f32.mrf.mxu0 }
 0x8a0   :  { %v11592_v27 = vadd.f32 %v11587_v63, %v11494_v17  ;;  %v11685_v33 = vpop.f32.mrf.mxu1 }
 0x8a1   :  { %v11589_v29 = vpop.f32.mrf.mxu0 }
 0x8a2   :  { %v11593_v50 = vadd.f32 %v11589_v29, %v11495_v59  ;;  %v11690_v3 = vadd.f32 %v11685_v33, %v11592_v27  ;;  %v11687_v45 = vpop.f32.mrf.mxu1 }
 0x8a4   :  { %v11691_v0 = vadd.f32 %v11687_v45, %v11593_v50 }
 0x8b0   :  { %v11783_v14 = vpop.f32.mrf.mxu0 }
 0x8b1   :  { %v11788_v56 = vadd.f32 %v11783_v14, %v11690_v3 }
 0x8b2   :  { %v11785_v58 = vpop.f32.mrf.mxu0 }
 0x8b3   :  { %v11802_v26 = vadd.f32 %v11795_v24, %v11788_v56  ;;  %v11789_v8 = vadd.f32 %v11785_v58, %v11691_v0 }
 0x8b5   :  { %v11804_v36 = vmax.f32 %v11802_v26, 0.0  ;;  %v11803_v35 = vadd.f32 %v11799_v1, %v11789_v8 }
 0x8b7   :  { %v11805_v21 = vmax.f32 %v11803_v35, 0.0  ;;  %v11818_v7 = vmul.f32 %v11811_v54, %v11804_v36 }
 0x8b9   :  { %v11819_v15 = vmul.f32 %v11815_v23, %v11805_v21  ;;  %v11821_v52 = vsel %vm11820_vm6, %v11818_v7, 0.0 }
 0x8bb   :  { %v11822_v5 = vsel %vm11820_vm6, %v11819_v15, 0.0 }
 0x8bc   :  { %v11823_v53 = vadd.f32 %v11822_v5, %v11821_v52 }
 0x8be   :  { %11824 = vadd.xlane.f32.xlu0 %v11823_v53 }
 0x947   :  { %v11825_v43 = vpop.xlane.xlu0 %11824 }
 0x948   :  { %v11833_v61 = vadd.f32 %v13333_v19, %v11825_v43 }
 0x94a   :  { %11836 = vperm.xlu0 %15635, %v11833_v61  }
 0x9c5   :  { %v11837_v16 = vpop.permute.xlu0 %11836 }
 0x9c6   :  { %11839 = vst [vmem:[%s22185_s11] sm:$0x3] %v11837_v16 }

</bundles_post_ra>
